<compile_context>
chip_gen: v7x
topology: tpu7x:2x2x1
jax: 0.10.0
libtpu: 0.0.40
codegen_flags: <defaults>
</compile_context>

<pallas_src>
import jax
import jax.numpy as jnp
import numpy as np
from jax import lax
from jax.experimental import pallas as pl
from jax.experimental.pallas import tpu as pltpu


# ----------------------------------------------------------------------------
# Fused Pallas kernel: conv1 -> pool -> conv2 -> pool -> fc1 -> fc2 -> out
# (B images per grid step; all weights VMEM-resident; no per-row loops)
# ----------------------------------------------------------------------------
def _cnn_kernel(x_ref, w1_ref, b1_ref, w2_ref, b2_ref,
                fc1w_ref, fc1b_ref, fc2w_ref, fc2b_ref, ow_ref, ob_ref,
                o_ref, i2_ref):
    f32, bf16 = jnp.float32, jnp.bfloat16
    B = x_ref.shape[1]                                   # images per grid step

    # ---- conv1 (1->16, 3x3, pad 1) as 3 Toeplitz-along-x MXU matmuls --------
    # x_ref rows = (padded-y, image), lanes = x (28 zero-padded to 32).
    # Output lanes = x_parity*256 + (x_out//2)*16 + cout, so the 2x2 pool's x
    # reduction is a single max of two 128-aligned 256-lane halves.
    xv = x_ref[...]                                       # (30, B, 32) f32
    a = b1_ref[...].astype(f32)                           # (1, 512) bias lanes
    for dy in range(3):
        xs = xv[dy:dy + 28].reshape(28 * B, 32).astype(bf16)
        a = a + jnp.dot(xs, w1_ref[dy], preferred_element_type=f32)
    px = jnp.maximum(a[:, :256], a[:, 256:])              # pool-x  (28B, 256)
    pr = px.reshape(14, 2, B, 256)
    pooled1 = jnp.maximum(jnp.maximum(pr[:, 0], pr[:, 1]), 0.0)   # (14, B, 256)

    # ---- stage pooled conv1 (bf16) into the y-padded conv2 input buffer -----
    i2_ref[0] = jnp.zeros((B, 256), bf16)
    i2_ref[15] = jnp.zeros((B, 256), bf16)
    i2_ref[1:15] = pooled1.astype(bf16)

    # ---- conv2 (16->32, 3x3, pad 1) as 3 Toeplitz-along-x MXU matmuls -------
    # Input lanes = x_in*16 + cin (x padding handled inside the weight);
    # output lanes = x_parity*256 + (x_out//2)*32 + cout.
    d = b2_ref[...].astype(f32)                           # (1, 512)
    for dy in range(3):
        xs = i2_ref[dy:dy + 14].reshape(14 * B, 256)
        d = d + jnp.dot(xs, w2_ref[dy], preferred_element_type=f32)
    qx = jnp.maximum(d[:, :256], d[:, 256:])              # pool-x  (14B, 256)
    qr = qx.reshape(7, 2, B, 256)
    pooled2 = jnp.maximum(jnp.maximum(qr[:, 0], qr[:, 1]), 0.0)   # (7, B, 256)

    # ---- FC head: fc1 as 7 accumulated matmuls over the pooled-y blocks -----
    # (fc1 weight rows were permuted/zero-padded at prep time to match the
    # (yo, xo, cout) lane layout and PyTorch's view(-1, 32*7*7) order.)
    p2 = pooled2.astype(bf16)
    z = fc1b_ref[...].astype(f32)
    for yy in range(7):
        z = z + jnp.dot(p2[yy], fc1w_ref[yy], preferred_element_type=f32)
    z = jnp.maximum(z, 0.0)                               # (B, 512)
    z = jnp.dot(z.astype(bf16), fc2w_ref[...], preferred_element_type=f32)
    z = jnp.maximum(z + fc2b_ref[...], 0.0)               # (B, 256)
    z = jnp.dot(z.astype(bf16), ow_ref[...], preferred_element_type=f32)
    o_ref[...] = (z + ob_ref[...]).astype(o_ref.dtype)    # (B, 128) lane-dense


# ----------------------------------------------------------------------------
# One-time parameter prep: build block-Toeplitz conv weights, lane-layout
# biases, the permuted/zero-padded fc1 weight stack and the padded output head.
# ----------------------------------------------------------------------------
def prep_params(p):
    f32, bf16 = jnp.float32, jnp.bfloat16
    w1 = np.asarray(p["conv1_w"], np.float32)             # (16, 1, 3, 3)
    b1 = np.asarray(p["conv1_b"], np.float32)              # (16,)
    w2 = np.asarray(p["conv2_w"], np.float32)              # (32, 16, 3, 3)
    b2 = np.asarray(p["conv2_b"], np.float32)               # (32,)
    fc1 = np.asarray(p["fc1_w"], np.float32)                # (1568, 512)

    # conv1 Toeplitz (3, 32, 512): rows = x_in (28, padded to 32),
    # cols = parity*256 + (x_out//2)*16 + cout.
    W1 = np.zeros((3, 32, 512), np.float32)
    B1 = np.zeros((1, 512), np.float32)
    for dy in range(3):
        for dx in range(3):
            for xo in range(28):
                xi = xo + dx - 1
                if 0 <= xi < 28:
                    lane = (xo % 2) * 256 + (xo // 2) * 16
                    W1[dy, xi, lane:lane + 16] = w1[:, 0, dy, dx]
    for xo in range(28):
        lane = (xo % 2) * 256 + (xo // 2) * 16
        B1[0, lane:lane + 16] = b1

    # conv2 Toeplitz (3, 256, 512): rows = x_in*16 + cin,
    # cols = parity*256 + (x_out//2)*32 + cout.
    W2 = np.zeros((3, 256, 512), np.float32)
    B2 = np.zeros((1, 512), np.float32)
    for dy in range(3):
        for dx in range(3):
            for xo in range(14):
                xi = xo + dx - 1
                if 0 <= xi < 14:
                    lane = (xo % 2) * 256 + (xo // 2) * 32
                    W2[dy, xi * 16:(xi + 1) * 16, lane:lane + 32] = w2[:, :, dy, dx].T
    for xo in range(14):
        lane = (xo % 2) * 256 + (xo // 2) * 32
        B2[0, lane:lane + 32] = b2

    # fc1 weight stack (7, 256, 512): block Y, row lane xo*32 + cout maps to
    # the PyTorch flat index cout*49 + Y*7 + xo; rows [224:256) stay zero.
    FC1 = np.zeros((7, 256, 512), np.float32)
    for Y in range(7):
        for xo in range(7):
            rows = np.arange(32) * 49 + Y * 7 + xo
            FC1[Y, xo * 32:(xo + 1) * 32, :] = fc1[rows, :]

    # Output head padded to a lane-dense width of 128.
    OW = np.zeros((256, 128), np.float32)
    OW[:, :10] = np.asarray(p["out_w"], np.float32)
    OB = np.zeros((1, 128), np.float32)
    OB[0, :10] = np.asarray(p["out_b"], np.float32)

    return {
        "w1": jnp.asarray(W1, bf16), "b1": jnp.asarray(B1, f32),
        "w2": jnp.asarray(W2, bf16), "b2": jnp.asarray(B2, f32),
        "fc1w": jnp.asarray(FC1, bf16),
        "fc1b": jnp.asarray(p["fc1_b"], f32).reshape(1, 512),
        "fc2w": jnp.asarray(p["fc2_w"], bf16),
        "fc2b": jnp.asarray(p["fc2_b"], f32).reshape(1, 256),
        "ow": jnp.asarray(OW, bf16), "ob": jnp.asarray(OB, f32),
    }


def _prep_input(x_nchw, batch_block):
    """(N,1,28,28) -> (30, N_pad, 32): y padded by 1, x padded 28->32, batch
    padded to a multiple of the per-step batch block."""
    n = x_nchw.shape[0]
    n_pad = -(-n // batch_block) * batch_block
    img = x_nchw[:, 0, :, :]
    img = jnp.pad(img, ((0, n_pad - n), (1, 1), (0, 4)))   # (n_pad, 30, 32)
    return jnp.transpose(img, (1, 0, 2)), n_pad            # (30, n_pad, 32)


def cnn_forward(x_nchw, q, batch_block=16):
    assert batch_block % 8 == 0
    n = x_nchw.shape[0]
    xk, n_pad = _prep_input(x_nchw, batch_block)
    grid = (n_pad // batch_block,)

    def res(shape):  # whole-array, VMEM-resident block (constant index map)
        return pl.BlockSpec(shape, lambda i, _nd=len(shape): (0,) * _nd)

    out = pl.pallas_call(
        _cnn_kernel,
        out_shape=jax.ShapeDtypeStruct((n_pad, 128), jnp.float32),
        grid=grid,
        in_specs=[
            pl.BlockSpec((30, batch_block, 32), lambda i: (0, i, 0)),  # images
            res((3, 32, 512)), res((1, 512)),            # conv1 Toeplitz w, b
            res((3, 256, 512)), res((1, 512)),           # conv2 Toeplitz w, b
            res((7, 256, 512)), res((1, 512)),           # fc1 w-stack, b
            res((512, 256)), res((1, 256)),              # fc2 w, b
            res((256, 128)), res((1, 128)),              # out w, b (padded)
        ],
        out_specs=pl.BlockSpec((batch_block, 128), lambda i: (i, 0)),
        scratch_shapes=[
            pltpu.VMEM((16, batch_block, 256), jnp.bfloat16),  # y-padded conv2 in
        ],
        compiler_params=pltpu.CompilerParams(
            dimension_semantics=("parallel",),
            vmem_limit_bytes=32 * 1024 * 1024),
    )(xk, q["w1"], q["b1"], q["w2"], q["b2"],
      q["fc1w"], q["fc1b"], q["fc2w"], q["fc2b"], q["ow"], q["ob"])
    return out[:n, :10]


# ----------------------------------------------------------------------------
# Pure-JAX reference (same bf16 quantization points as the kernel)
# ----------------------------------------------------------------------------
def cnn_reference(x_nchw, p):
    hi = lax.Precision.HIGHEST
    dn = ("NCHW", "OIHW", "NCHW")

    def bf(t):
        return t.astype(jnp.bfloat16).astype(jnp.float32)

    def conv(x, w, b):
        y = lax.conv_general_dilated(x, w, (1, 1), "SAME",
                                     dimension_numbers=dn, precision=hi)
        return y + b.reshape(1, -1, 1, 1)

    def pool(x):
        return lax.reduce_window(x, -jnp.inf, lax.max,
                                 (1, 1, 2, 2), (1, 1, 2, 2), "VALID")

    y = pool(jnp.maximum(conv(bf(x_nchw), bf(p["conv1_w"]), p["conv1_b"]), 0.0))
    y = pool(jnp.maximum(conv(bf(y), bf(p["conv2_w"]), p["conv2_b"]), 0.0))
    y = y.reshape(y.shape[0], -1)                        # PyTorch (c, h, w) flatten
    y = jnp.maximum(jnp.dot(bf(y), bf(p["fc1_w"]), precision=hi) + p["fc1_b"], 0.0)
    y = jnp.maximum(jnp.dot(bf(y), bf(p["fc2_w"]), precision=hi) + p["fc2_b"], 0.0)
    return jnp.dot(bf(y), bf(p["out_w"]), precision=hi) + p["out_b"]


# ----------------------------------------------------------------------------
def make_params(key):
    ks = jax.random.split(key, 10)

    def w(k, shape, fan_in):
        return jax.random.normal(k, shape, jnp.float32) / jnp.sqrt(fan_in)

    return {
        "conv1_w": w(ks[0], (16, 1, 3, 3), 9.0),
        "conv1_b": w(ks[1], (16,), 9.0),
        "conv2_w": w(ks[2], (32, 16, 3, 3), 144.0),
        "conv2_b": w(ks[3], (32,), 144.0),
        "fc1_w":   w(ks[4], (1568, 512), 1568.0),
        "fc1_b":   w(ks[5], (512,), 1568.0),
        "fc2_w":   w(ks[6], (512, 256), 512.0),
        "fc2_b":   w(ks[7], (256,), 512.0),
        "out_w":   w(ks[8], (256, 10), 256.0),
        "out_b":   w(ks[9], (10,), 256.0),
    }


if __name__ == "__main__":
    key = jax.random.PRNGKey(0)
    k_x, k_p = jax.random.split(key)

    # 24 MNIST-sized images: pads to 32 -> 2 parallel grid steps of 16 images.
    x = jax.random.normal(k_x, (24, 1, 28, 28), jnp.float32)
    params = make_params(k_p)
    prepped = prep_params(params)

    out = jax.block_until_ready(jax.jit(cnn_forward)(x, prepped))
    ref = jax.block_until_ready(cnn_reference(x, params))

    assert out.shape == (24, 10), out.shape
    assert bool(jnp.all(jnp.isfinite(out)))
    max_err = float(jnp.max(jnp.abs(out - ref)))
    assert bool(jnp.allclose(out, ref, rtol=2e-3, atol=2e-3)), max_err

    print("KERNEL_OK")
</pallas_src>

<mosaic_0001>
module attributes {stable_mosaic.version = 11 : i64} {
  func.func @_cnn_kernel(%arg0: i32, %arg1: memref<30x16x32xf32, #tpu.memory_space<vmem>>, %arg2: memref<3x32x512xbf16, #tpu.memory_space<vmem>>, %arg3: memref<1x512xf32, #tpu.memory_space<vmem>>, %arg4: memref<3x256x512xbf16, #tpu.memory_space<vmem>>, %arg5: memref<1x512xf32, #tpu.memory_space<vmem>>, %arg6: memref<7x256x512xbf16, #tpu.memory_space<vmem>>, %arg7: memref<1x512xf32, #tpu.memory_space<vmem>>, %arg8: memref<512x256xbf16, #tpu.memory_space<vmem>>, %arg9: memref<1x256xf32, #tpu.memory_space<vmem>>, %arg10: memref<256x128xbf16, #tpu.memory_space<vmem>>, %arg11: memref<1x128xf32, #tpu.memory_space<vmem>>, %arg12: memref<16x128xf32, #tpu.memory_space<vmem>>, %arg13: memref<16x16x256xbf16, #tpu.memory_space<vmem>>) attributes {dimension_semantics = [#tpu.dimension_semantics<parallel>], iteration_bounds = array<i64: 2>, scalar_prefetch = 0 : i64, scratch_operands = 1 : i64, tpu.core_type = #tpu.core_type<tc>, window_params = [{transform_indices = @transform_0, window_bounds = array<i64: 30, 16, 32>}, {pipeline_mode = #tpu.pipeline_mode<synchronous>, transform_indices = @transform_1, window_bounds = array<i64: 3, 32, 512>}, {pipeline_mode = #tpu.pipeline_mode<synchronous>, transform_indices = @transform_2, window_bounds = array<i64: 1, 512>}, {pipeline_mode = #tpu.pipeline_mode<synchronous>, transform_indices = @transform_3, window_bounds = array<i64: 3, 256, 512>}, {pipeline_mode = #tpu.pipeline_mode<synchronous>, transform_indices = @transform_4, window_bounds = array<i64: 1, 512>}, {pipeline_mode = #tpu.pipeline_mode<synchronous>, transform_indices = @transform_5, window_bounds = array<i64: 7, 256, 512>}, {pipeline_mode = #tpu.pipeline_mode<synchronous>, transform_indices = @transform_6, window_bounds = array<i64: 1, 512>}, {pipeline_mode = #tpu.pipeline_mode<synchronous>, transform_indices = @transform_7, window_bounds = array<i64: 512, 256>}, {pipeline_mode = #tpu.pipeline_mode<synchronous>, transform_indices = @transform_8, window_bounds = array<i64: 1, 256>}, {pipeline_mode = #tpu.pipeline_mode<synchronous>, transform_indices = @transform_9, window_bounds = array<i64: 256, 128>}, {pipeline_mode = #tpu.pipeline_mode<synchronous>, transform_indices = @transform_10, window_bounds = array<i64: 1, 128>}, {transform_indices = @transform_11, window_bounds = array<i64: 16, 128>}]} {
    %c0 = arith.constant 0 : index
    %c0_0 = arith.constant 0 : index
    %c0_1 = arith.constant 0 : index
    %0 = vector.load %arg1[%c0, %c0_0, %c0_1] : memref<30x16x32xf32, #tpu.memory_space<vmem>>, vector<30x16x32xf32>
    %c0_2 = arith.constant 0 : index
    %c0_3 = arith.constant 0 : index
    %1 = vector.load %arg3[%c0_2, %c0_3] : memref<1x512xf32, #tpu.memory_space<vmem>>, vector<1x512xf32>
    %2 = vector.extract_strided_slice %0 {offsets = [0, 0, 0], sizes = [28, 16, 32], strides = [1, 1, 1]} : vector<30x16x32xf32> to vector<28x16x32xf32>
    %3 = vector.shape_cast %2 : vector<28x16x32xf32> to vector<448x32xf32>
    %4 = arith.truncf %3 : vector<448x32xf32> to vector<448x32xbf16>
    %c0_4 = arith.constant 0 : index
    %c0_5 = arith.constant 0 : index
    %c0_6 = arith.constant 0 : index
    %5 = vector.load %arg2[%c0_4, %c0_5, %c0_6] : memref<3x32x512xbf16, #tpu.memory_space<vmem>>, vector<1x32x512xbf16>
    %6 = vector.shape_cast %5 : vector<1x32x512xbf16> to vector<32x512xbf16>
    %cst = arith.constant dense<0.000000e+00> : vector<448x512xf32>
    %7 = tpu.matmul %4, %6, %cst {dimension_numbers = #tpu.dot_dimension_numbers<[1], [0], [0], [1], [0, 0, 1, 1], [], []>} : vector<448x32xbf16>, vector<32x512xbf16>, vector<448x512xf32> -> vector<448x512xf32>
    %8 = vector.broadcast %1 : vector<1x512xf32> to vector<448x512xf32>
    %9 = arith.addf %8, %7 : vector<448x512xf32>
    %10 = vector.extract_strided_slice %0 {offsets = [1, 0, 0], sizes = [28, 16, 32], strides = [1, 1, 1]} : vector<30x16x32xf32> to vector<28x16x32xf32>
    %11 = vector.shape_cast %10 : vector<28x16x32xf32> to vector<448x32xf32>
    %12 = arith.truncf %11 : vector<448x32xf32> to vector<448x32xbf16>
    %c1 = arith.constant 1 : index
    %c0_7 = arith.constant 0 : index
    %c0_8 = arith.constant 0 : index
    %13 = vector.load %arg2[%c1, %c0_7, %c0_8] : memref<3x32x512xbf16, #tpu.memory_space<vmem>>, vector<1x32x512xbf16>
    %14 = vector.shape_cast %13 : vector<1x32x512xbf16> to vector<32x512xbf16>
    %cst_9 = arith.constant dense<0.000000e+00> : vector<448x512xf32>
    %15 = tpu.matmul %12, %14, %cst_9 {dimension_numbers = #tpu.dot_dimension_numbers<[1], [0], [0], [1], [0, 0, 1, 1], [], []>} : vector<448x32xbf16>, vector<32x512xbf16>, vector<448x512xf32> -> vector<448x512xf32>
    %16 = arith.addf %9, %15 : vector<448x512xf32>
    %17 = vector.extract_strided_slice %0 {offsets = [2, 0, 0], sizes = [28, 16, 32], strides = [1, 1, 1]} : vector<30x16x32xf32> to vector<28x16x32xf32>
    %18 = vector.shape_cast %17 : vector<28x16x32xf32> to vector<448x32xf32>
    %19 = arith.truncf %18 : vector<448x32xf32> to vector<448x32xbf16>
    %c2 = arith.constant 2 : index
    %c0_10 = arith.constant 0 : index
    %c0_11 = arith.constant 0 : index
    %20 = vector.load %arg2[%c2, %c0_10, %c0_11] : memref<3x32x512xbf16, #tpu.memory_space<vmem>>, vector<1x32x512xbf16>
    %21 = vector.shape_cast %20 : vector<1x32x512xbf16> to vector<32x512xbf16>
    %cst_12 = arith.constant dense<0.000000e+00> : vector<448x512xf32>
    %22 = tpu.matmul %19, %21, %cst_12 {dimension_numbers = #tpu.dot_dimension_numbers<[1], [0], [0], [1], [0, 0, 1, 1], [], []>} : vector<448x32xbf16>, vector<32x512xbf16>, vector<448x512xf32> -> vector<448x512xf32>
    %23 = arith.addf %16, %22 : vector<448x512xf32>
    %24 = vector.extract_strided_slice %23 {offsets = [0, 0], sizes = [448, 256], strides = [1, 1]} : vector<448x512xf32> to vector<448x256xf32>
    %25 = vector.extract_strided_slice %23 {offsets = [0, 256], sizes = [448, 256], strides = [1, 1]} : vector<448x512xf32> to vector<448x256xf32>
    %26 = arith.maximumf %24, %25 : vector<448x256xf32>
    %27 = vector.shape_cast %26 : vector<448x256xf32> to vector<14x2x16x256xf32>
    %28 = vector.extract_strided_slice %27 {offsets = [0, 0, 0, 0], sizes = [14, 1, 16, 256], strides = [1, 1, 1, 1]} : vector<14x2x16x256xf32> to vector<14x1x16x256xf32>
    %29 = vector.shape_cast %28 : vector<14x1x16x256xf32> to vector<14x16x256xf32>
    %30 = vector.extract_strided_slice %27 {offsets = [0, 1, 0, 0], sizes = [14, 1, 16, 256], strides = [1, 1, 1, 1]} : vector<14x2x16x256xf32> to vector<14x1x16x256xf32>
    %31 = vector.shape_cast %30 : vector<14x1x16x256xf32> to vector<14x16x256xf32>
    %32 = arith.maximumf %29, %31 : vector<14x16x256xf32>
    %cst_13 = arith.constant 0.000000e+00 : f32
    %33 = vector.broadcast %cst_13 : f32 to vector<14x16x256xf32>
    %34 = arith.maximumf %32, %33 : vector<14x16x256xf32>
    %cst_14 = arith.constant 0.000000e+00 : bf16
    %35 = vector.broadcast %cst_14 : bf16 to vector<16x256xbf16>
    %c0_15 = arith.constant 0 : index
    %c0_16 = arith.constant 0 : index
    %c0_17 = arith.constant 0 : index
    %36 = vector.load %arg13[%c0_15, %c0_16, %c0_17] : memref<16x16x256xbf16, #tpu.memory_space<vmem>>, vector<1x16x256xbf16>
    %37 = vector.shape_cast %36 : vector<1x16x256xbf16> to vector<16x256xbf16>
    %38 = vector.shape_cast %35 : vector<16x256xbf16> to vector<1x16x256xbf16>
    tpu.vector_store %arg13[%c0_15, %c0_16, %c0_17], %38 {strides = array<i32>} : memref<16x16x256xbf16, #tpu.memory_space<vmem>>, vector<1x16x256xbf16>,
    %cst_18 = arith.constant 0.000000e+00 : bf16
    %39 = vector.broadcast %cst_18 : bf16 to vector<16x256xbf16>
    %c15 = arith.constant 15 : index
    %c0_19 = arith.constant 0 : index
    %c0_20 = arith.constant 0 : index
    %40 = vector.load %arg13[%c15, %c0_19, %c0_20] : memref<16x16x256xbf16, #tpu.memory_space<vmem>>, vector<1x16x256xbf16>
    %41 = vector.shape_cast %40 : vector<1x16x256xbf16> to vector<16x256xbf16>
    %42 = vector.shape_cast %39 : vector<16x256xbf16> to vector<1x16x256xbf16>
    tpu.vector_store %arg13[%c15, %c0_19, %c0_20], %42 {strides = array<i32>} : memref<16x16x256xbf16, #tpu.memory_space<vmem>>, vector<1x16x256xbf16>,
    %43 = arith.truncf %34 : vector<14x16x256xf32> to vector<14x16x256xbf16>
    %c1_21 = arith.constant 1 : index
    %c0_22 = arith.constant 0 : index
    %c0_23 = arith.constant 0 : index
    %44 = vector.load %arg13[%c1_21, %c0_22, %c0_23] : memref<16x16x256xbf16, #tpu.memory_space<vmem>>, vector<14x16x256xbf16>
    tpu.vector_store %arg13[%c1_21, %c0_22, %c0_23], %43 {strides = array<i32>} : memref<16x16x256xbf16, #tpu.memory_space<vmem>>, vector<14x16x256xbf16>,
    %c0_24 = arith.constant 0 : index
    %c0_25 = arith.constant 0 : index
    %45 = vector.load %arg5[%c0_24, %c0_25] : memref<1x512xf32, #tpu.memory_space<vmem>>, vector<1x512xf32>
    %c0_26 = arith.constant 0 : index
    %c0_27 = arith.constant 0 : index
    %c0_28 = arith.constant 0 : index
    %46 = vector.load %arg13[%c0_26, %c0_27, %c0_28] : memref<16x16x256xbf16, #tpu.memory_space<vmem>>, vector<14x16x256xbf16>
    %47 = vector.shape_cast %46 : vector<14x16x256xbf16> to vector<224x256xbf16>
    %c0_29 = arith.constant 0 : index
    %c0_30 = arith.constant 0 : index
    %c0_31 = arith.constant 0 : index
    %48 = vector.load %arg4[%c0_29, %c0_30, %c0_31] : memref<3x256x512xbf16, #tpu.memory_space<vmem>>, vector<1x256x512xbf16>
    %49 = vector.shape_cast %48 : vector<1x256x512xbf16> to vector<256x512xbf16>
    %cst_32 = arith.constant dense<0.000000e+00> : vector<224x512xf32>
    %50 = tpu.matmul %47, %49, %cst_32 {dimension_numbers = #tpu.dot_dimension_numbers<[1], [0], [0], [1], [0, 0, 1, 1], [], []>} : vector<224x256xbf16>, vector<256x512xbf16>, vector<224x512xf32> -> vector<224x512xf32>
    %51 = vector.broadcast %45 : vector<1x512xf32> to vector<224x512xf32>
    %52 = arith.addf %51, %50 : vector<224x512xf32>
    %c1_33 = arith.constant 1 : index
    %c0_34 = arith.constant 0 : index
    %c0_35 = arith.constant 0 : index
    %53 = vector.load %arg13[%c1_33, %c0_34, %c0_35] : memref<16x16x256xbf16, #tpu.memory_space<vmem>>, vector<14x16x256xbf16>
    %54 = vector.shape_cast %53 : vector<14x16x256xbf16> to vector<224x256xbf16>
    %c1_36 = arith.constant 1 : index
    %c0_37 = arith.constant 0 : index
    %c0_38 = arith.constant 0 : index
    %55 = vector.load %arg4[%c1_36, %c0_37, %c0_38] : memref<3x256x512xbf16, #tpu.memory_space<vmem>>, vector<1x256x512xbf16>
    %56 = vector.shape_cast %55 : vector<1x256x512xbf16> to vector<256x512xbf16>
    %cst_39 = arith.constant dense<0.000000e+00> : vector<224x512xf32>
    %57 = tpu.matmul %54, %56, %cst_39 {dimension_numbers = #tpu.dot_dimension_numbers<[1], [0], [0], [1], [0, 0, 1, 1], [], []>} : vector<224x256xbf16>, vector<256x512xbf16>, vector<224x512xf32> -> vector<224x512xf32>
    %58 = arith.addf %52, %57 : vector<224x512xf32>
    %c2_40 = arith.constant 2 : index
    %c0_41 = arith.constant 0 : index
    %c0_42 = arith.constant 0 : index
    %59 = vector.load %arg13[%c2_40, %c0_41, %c0_42] : memref<16x16x256xbf16, #tpu.memory_space<vmem>>, vector<14x16x256xbf16>
    %60 = vector.shape_cast %59 : vector<14x16x256xbf16> to vector<224x256xbf16>
    %c2_43 = arith.constant 2 : index
    %c0_44 = arith.constant 0 : index
    %c0_45 = arith.constant 0 : index
    %61 = vector.load %arg4[%c2_43, %c0_44, %c0_45] : memref<3x256x512xbf16, #tpu.memory_space<vmem>>, vector<1x256x512xbf16>
    %62 = vector.shape_cast %61 : vector<1x256x512xbf16> to vector<256x512xbf16>
    %cst_46 = arith.constant dense<0.000000e+00> : vector<224x512xf32>
    %63 = tpu.matmul %60, %62, %cst_46 {dimension_numbers = #tpu.dot_dimension_numbers<[1], [0], [0], [1], [0, 0, 1, 1], [], []>} : vector<224x256xbf16>, vector<256x512xbf16>, vector<224x512xf32> -> vector<224x512xf32>
    %64 = arith.addf %58, %63 : vector<224x512xf32>
    %65 = vector.extract_strided_slice %64 {offsets = [0, 0], sizes = [224, 256], strides = [1, 1]} : vector<224x512xf32> to vector<224x256xf32>
    %66 = vector.extract_strided_slice %64 {offsets = [0, 256], sizes = [224, 256], strides = [1, 1]} : vector<224x512xf32> to vector<224x256xf32>
    %67 = arith.maximumf %65, %66 : vector<224x256xf32>
    %68 = vector.shape_cast %67 : vector<224x256xf32> to vector<7x2x16x256xf32>
    %69 = vector.extract_strided_slice %68 {offsets = [0, 0, 0, 0], sizes = [7, 1, 16, 256], strides = [1, 1, 1, 1]} : vector<7x2x16x256xf32> to vector<7x1x16x256xf32>
    %70 = vector.shape_cast %69 : vector<7x1x16x256xf32> to vector<7x16x256xf32>
    %71 = vector.extract_strided_slice %68 {offsets = [0, 1, 0, 0], sizes = [7, 1, 16, 256], strides = [1, 1, 1, 1]} : vector<7x2x16x256xf32> to vector<7x1x16x256xf32>
    %72 = vector.shape_cast %71 : vector<7x1x16x256xf32> to vector<7x16x256xf32>
    %73 = arith.maximumf %70, %72 : vector<7x16x256xf32>
    %cst_47 = arith.constant 0.000000e+00 : f32
    %74 = vector.broadcast %cst_47 : f32 to vector<7x16x256xf32>
    %75 = arith.maximumf %73, %74 : vector<7x16x256xf32>
    %76 = arith.truncf %75 : vector<7x16x256xf32> to vector<7x16x256xbf16>
    %c0_48 = arith.constant 0 : index
    %c0_49 = arith.constant 0 : index
    %77 = vector.load %arg7[%c0_48, %c0_49] : memref<1x512xf32, #tpu.memory_space<vmem>>, vector<1x512xf32>
    %78 = vector.extract_strided_slice %76 {offsets = [0, 0, 0], sizes = [1, 16, 256], strides = [1, 1, 1]} : vector<7x16x256xbf16> to vector<1x16x256xbf16>
    %79 = vector.shape_cast %78 : vector<1x16x256xbf16> to vector<16x256xbf16>
    %c0_50 = arith.constant 0 : index
    %c0_51 = arith.constant 0 : index
    %c0_52 = arith.constant 0 : index
    %80 = vector.load %arg6[%c0_50, %c0_51, %c0_52] : memref<7x256x512xbf16, #tpu.memory_space<vmem>>, vector<1x256x512xbf16>
    %81 = vector.shape_cast %80 : vector<1x256x512xbf16> to vector<256x512xbf16>
    %cst_53 = arith.constant dense<0.000000e+00> : vector<16x512xf32>
    %82 = tpu.matmul %79, %81, %cst_53 {dimension_numbers = #tpu.dot_dimension_numbers<[1], [0], [0], [1], [0, 0, 1, 1], [], []>} : vector<16x256xbf16>, vector<256x512xbf16>, vector<16x512xf32> -> vector<16x512xf32>
    %83 = vector.broadcast %77 : vector<1x512xf32> to vector<16x512xf32>
    %84 = arith.addf %83, %82 : vector<16x512xf32>
    %85 = vector.extract_strided_slice %76 {offsets = [1, 0, 0], sizes = [1, 16, 256], strides = [1, 1, 1]} : vector<7x16x256xbf16> to vector<1x16x256xbf16>
    %86 = vector.shape_cast %85 : vector<1x16x256xbf16> to vector<16x256xbf16>
    %c1_54 = arith.constant 1 : index
    %c0_55 = arith.constant 0 : index
    %c0_56 = arith.constant 0 : index
    %87 = vector.load %arg6[%c1_54, %c0_55, %c0_56] : memref<7x256x512xbf16, #tpu.memory_space<vmem>>, vector<1x256x512xbf16>
    %88 = vector.shape_cast %87 : vector<1x256x512xbf16> to vector<256x512xbf16>
    %cst_57 = arith.constant dense<0.000000e+00> : vector<16x512xf32>
    %89 = tpu.matmul %86, %88, %cst_57 {dimension_numbers = #tpu.dot_dimension_numbers<[1], [0], [0], [1], [0, 0, 1, 1], [], []>} : vector<16x256xbf16>, vector<256x512xbf16>, vector<16x512xf32> -> vector<16x512xf32>
    %90 = arith.addf %84, %89 : vector<16x512xf32>
    %91 = vector.extract_strided_slice %76 {offsets = [2, 0, 0], sizes = [1, 16, 256], strides = [1, 1, 1]} : vector<7x16x256xbf16> to vector<1x16x256xbf16>
    %92 = vector.shape_cast %91 : vector<1x16x256xbf16> to vector<16x256xbf16>
    %c2_58 = arith.constant 2 : index
    %c0_59 = arith.constant 0 : index
    %c0_60 = arith.constant 0 : index
    %93 = vector.load %arg6[%c2_58, %c0_59, %c0_60] : memref<7x256x512xbf16, #tpu.memory_space<vmem>>, vector<1x256x512xbf16>
    %94 = vector.shape_cast %93 : vector<1x256x512xbf16> to vector<256x512xbf16>
    %cst_61 = arith.constant dense<0.000000e+00> : vector<16x512xf32>
    %95 = tpu.matmul %92, %94, %cst_61 {dimension_numbers = #tpu.dot_dimension_numbers<[1], [0], [0], [1], [0, 0, 1, 1], [], []>} : vector<16x256xbf16>, vector<256x512xbf16>, vector<16x512xf32> -> vector<16x512xf32>
    %96 = arith.addf %90, %95 : vector<16x512xf32>
    %97 = vector.extract_strided_slice %76 {offsets = [3, 0, 0], sizes = [1, 16, 256], strides = [1, 1, 1]} : vector<7x16x256xbf16> to vector<1x16x256xbf16>
    %98 = vector.shape_cast %97 : vector<1x16x256xbf16> to vector<16x256xbf16>
    %c3 = arith.constant 3 : index
    %c0_62 = arith.constant 0 : index
    %c0_63 = arith.constant 0 : index
    %99 = vector.load %arg6[%c3, %c0_62, %c0_63] : memref<7x256x512xbf16, #tpu.memory_space<vmem>>, vector<1x256x512xbf16>
    %100 = vector.shape_cast %99 : vector<1x256x512xbf16> to vector<256x512xbf16>
    %cst_64 = arith.constant dense<0.000000e+00> : vector<16x512xf32>
    %101 = tpu.matmul %98, %100, %cst_64 {dimension_numbers = #tpu.dot_dimension_numbers<[1], [0], [0], [1], [0, 0, 1, 1], [], []>} : vector<16x256xbf16>, vector<256x512xbf16>, vector<16x512xf32> -> vector<16x512xf32>
    %102 = arith.addf %96, %101 : vector<16x512xf32>
    %103 = vector.extract_strided_slice %76 {offsets = [4, 0, 0], sizes = [1, 16, 256], strides = [1, 1, 1]} : vector<7x16x256xbf16> to vector<1x16x256xbf16>
    %104 = vector.shape_cast %103 : vector<1x16x256xbf16> to vector<16x256xbf16>
    %c4 = arith.constant 4 : index
    %c0_65 = arith.constant 0 : index
    %c0_66 = arith.constant 0 : index
    %105 = vector.load %arg6[%c4, %c0_65, %c0_66] : memref<7x256x512xbf16, #tpu.memory_space<vmem>>, vector<1x256x512xbf16>
    %106 = vector.shape_cast %105 : vector<1x256x512xbf16> to vector<256x512xbf16>
    %cst_67 = arith.constant dense<0.000000e+00> : vector<16x512xf32>
    %107 = tpu.matmul %104, %106, %cst_67 {dimension_numbers = #tpu.dot_dimension_numbers<[1], [0], [0], [1], [0, 0, 1, 1], [], []>} : vector<16x256xbf16>, vector<256x512xbf16>, vector<16x512xf32> -> vector<16x512xf32>
    %108 = arith.addf %102, %107 : vector<16x512xf32>
    %109 = vector.extract_strided_slice %76 {offsets = [5, 0, 0], sizes = [1, 16, 256], strides = [1, 1, 1]} : vector<7x16x256xbf16> to vector<1x16x256xbf16>
    %110 = vector.shape_cast %109 : vector<1x16x256xbf16> to vector<16x256xbf16>
    %c5 = arith.constant 5 : index
    %c0_68 = arith.constant 0 : index
    %c0_69 = arith.constant 0 : index
    %111 = vector.load %arg6[%c5, %c0_68, %c0_69] : memref<7x256x512xbf16, #tpu.memory_space<vmem>>, vector<1x256x512xbf16>
    %112 = vector.shape_cast %111 : vector<1x256x512xbf16> to vector<256x512xbf16>
    %cst_70 = arith.constant dense<0.000000e+00> : vector<16x512xf32>
    %113 = tpu.matmul %110, %112, %cst_70 {dimension_numbers = #tpu.dot_dimension_numbers<[1], [0], [0], [1], [0, 0, 1, 1], [], []>} : vector<16x256xbf16>, vector<256x512xbf16>, vector<16x512xf32> -> vector<16x512xf32>
    %114 = arith.addf %108, %113 : vector<16x512xf32>
    %115 = vector.extract_strided_slice %76 {offsets = [6, 0, 0], sizes = [1, 16, 256], strides = [1, 1, 1]} : vector<7x16x256xbf16> to vector<1x16x256xbf16>
    %116 = vector.shape_cast %115 : vector<1x16x256xbf16> to vector<16x256xbf16>
    %c6 = arith.constant 6 : index
    %c0_71 = arith.constant 0 : index
    %c0_72 = arith.constant 0 : index
    %117 = vector.load %arg6[%c6, %c0_71, %c0_72] : memref<7x256x512xbf16, #tpu.memory_space<vmem>>, vector<1x256x512xbf16>
    %118 = vector.shape_cast %117 : vector<1x256x512xbf16> to vector<256x512xbf16>
    %cst_73 = arith.constant dense<0.000000e+00> : vector<16x512xf32>
    %119 = tpu.matmul %116, %118, %cst_73 {dimension_numbers = #tpu.dot_dimension_numbers<[1], [0], [0], [1], [0, 0, 1, 1], [], []>} : vector<16x256xbf16>, vector<256x512xbf16>, vector<16x512xf32> -> vector<16x512xf32>
    %120 = arith.addf %114, %119 : vector<16x512xf32>
    %cst_74 = arith.constant 0.000000e+00 : f32
    %121 = vector.broadcast %cst_74 : f32 to vector<16x512xf32>
    %122 = arith.maximumf %120, %121 : vector<16x512xf32>
    %123 = arith.truncf %122 : vector<16x512xf32> to vector<16x512xbf16>
    %c0_75 = arith.constant 0 : index
    %c0_76 = arith.constant 0 : index
    %124 = vector.load %arg8[%c0_75, %c0_76] : memref<512x256xbf16, #tpu.memory_space<vmem>>, vector<512x256xbf16>
    %cst_77 = arith.constant dense<0.000000e+00> : vector<16x256xf32>
    %125 = tpu.matmul %123, %124, %cst_77 {dimension_numbers = #tpu.dot_dimension_numbers<[1], [0], [0], [1], [0, 0, 1, 1], [], []>} : vector<16x512xbf16>, vector<512x256xbf16>, vector<16x256xf32> -> vector<16x256xf32>
    %c0_78 = arith.constant 0 : index
    %c0_79 = arith.constant 0 : index
    %126 = vector.load %arg9[%c0_78, %c0_79] : memref<1x256xf32, #tpu.memory_space<vmem>>, vector<1x256xf32>
    %127 = vector.broadcast %126 : vector<1x256xf32> to vector<16x256xf32>
    %128 = arith.addf %125, %127 : vector<16x256xf32>
    %cst_80 = arith.constant 0.000000e+00 : f32
    %129 = vector.broadcast %cst_80 : f32 to vector<16x256xf32>
    %130 = arith.maximumf %128, %129 : vector<16x256xf32>
    %131 = arith.truncf %130 : vector<16x256xf32> to vector<16x256xbf16>
    %c0_81 = arith.constant 0 : index
    %c0_82 = arith.constant 0 : index
    %132 = vector.load %arg10[%c0_81, %c0_82] : memref<256x128xbf16, #tpu.memory_space<vmem>>, vector<256x128xbf16>
    %cst_83 = arith.constant dense<0.000000e+00> : vector<16x128xf32>
    %133 = tpu.matmul %131, %132, %cst_83 {dimension_numbers = #tpu.dot_dimension_numbers<[1], [0], [0], [1], [0, 0, 1, 1], [], []>} : vector<16x256xbf16>, vector<256x128xbf16>, vector<16x128xf32> -> vector<16x128xf32>
    %c0_84 = arith.constant 0 : index
    %c0_85 = arith.constant 0 : index
    %134 = vector.load %arg11[%c0_84, %c0_85] : memref<1x128xf32, #tpu.memory_space<vmem>>, vector<1x128xf32>
    %135 = vector.broadcast %134 : vector<1x128xf32> to vector<16x128xf32>
    %136 = arith.addf %133, %135 : vector<16x128xf32>
    %c0_86 = arith.constant 0 : index
    %c0_87 = arith.constant 0 : index
    %137 = vector.load %arg12[%c0_86, %c0_87] : memref<16x128xf32, #tpu.memory_space<vmem>>, vector<16x128xf32>
    tpu.vector_store %arg12[%c0_86, %c0_87], %136 {strides = array<i32>} : memref<16x128xf32, #tpu.memory_space<vmem>>, vector<16x128xf32>,
    return
  }
  func.func @transform_0(%arg0: i32) -> (i32, i32, i32) {
    %c0_i32 = arith.constant 0 : i32
    %c0_i32_0 = arith.constant 0 : i32
    %c0_i32_1 = arith.constant 0 : i32
    return %c0_i32, %arg0, %c0_i32_0 : i32, i32, i32
  }
  func.func @transform_1(%arg0: i32) -> (i32, i32, i32) {
    %c0_i32 = arith.constant 0 : i32
    %c0_i32_0 = arith.constant 0 : i32
    %c0_i32_1 = arith.constant 0 : i32
    %c0_i32_2 = arith.constant 0 : i32
    return %c0_i32, %c0_i32_0, %c0_i32_1 : i32, i32, i32
  }
  func.func @transform_2(%arg0: i32) -> (i32, i32) {
    %c0_i32 = arith.constant 0 : i32
    %c0_i32_0 = arith.constant 0 : i32
    %c0_i32_1 = arith.constant 0 : i32
    return %c0_i32, %c0_i32_0 : i32, i32
  }
  func.func @transform_3(%arg0: i32) -> (i32, i32, i32) {
    %c0_i32 = arith.constant 0 : i32
    %c0_i32_0 = arith.constant 0 : i32
    %c0_i32_1 = arith.constant 0 : i32
    %c0_i32_2 = arith.constant 0 : i32
    return %c0_i32, %c0_i32_0, %c0_i32_1 : i32, i32, i32
  }
  func.func @transform_4(%arg0: i32) -> (i32, i32) {
    %c0_i32 = arith.constant 0 : i32
    %c0_i32_0 = arith.constant 0 : i32
    %c0_i32_1 = arith.constant 0 : i32
    return %c0_i32, %c0_i32_0 : i32, i32
  }
  func.func @transform_5(%arg0: i32) -> (i32, i32, i32) {
    %c0_i32 = arith.constant 0 : i32
    %c0_i32_0 = arith.constant 0 : i32
    %c0_i32_1 = arith.constant 0 : i32
    %c0_i32_2 = arith.constant 0 : i32
    return %c0_i32, %c0_i32_0, %c0_i32_1 : i32, i32, i32
  }
  func.func @transform_6(%arg0: i32) -> (i32, i32) {
    %c0_i32 = arith.constant 0 : i32
    %c0_i32_0 = arith.constant 0 : i32
    %c0_i32_1 = arith.constant 0 : i32
    return %c0_i32, %c0_i32_0 : i32, i32
  }
  func.func @transform_7(%arg0: i32) -> (i32, i32) {
    %c0_i32 = arith.constant 0 : i32
    %c0_i32_0 = arith.constant 0 : i32
    %c0_i32_1 = arith.constant 0 : i32
    return %c0_i32, %c0_i32_0 : i32, i32
  }
  func.func @transform_8(%arg0: i32) -> (i32, i32) {
    %c0_i32 = arith.constant 0 : i32
    %c0_i32_0 = arith.constant 0 : i32
    %c0_i32_1 = arith.constant 0 : i32
    return %c0_i32, %c0_i32_0 : i32, i32
  }
  func.func @transform_9(%arg0: i32) -> (i32, i32) {
    %c0_i32 = arith.constant 0 : i32
    %c0_i32_0 = arith.constant 0 : i32
    %c0_i32_1 = arith.constant 0 : i32
    return %c0_i32, %c0_i32_0 : i32, i32
  }
  func.func @transform_10(%arg0: i32) -> (i32, i32) {
    %c0_i32 = arith.constant 0 : i32
    %c0_i32_0 = arith.constant 0 : i32
    %c0_i32_1 = arith.constant 0 : i32
    return %c0_i32, %c0_i32_0 : i32, i32
  }
  func.func @transform_11(%arg0: i32) -> (i32, i32) {
    %c0_i32 = arith.constant 0 : i32
    %c0_i32_0 = arith.constant 0 : i32
    return %arg0, %c0_i32 : i32, i32
  }
}

</mosaic_0001>

<bundles_post_ra>
// kernel: cnn_forward.1
= control target key start
LH: loop header
LB: loop body
LE: loop exit
PB: predicated region body
PF: predicated region fallthrough
CT: control target
= control target key end

     0   :  { %s17474_s0 = inlined_call_operand.vmem [shape: f32[30,32,32], index: 0, kind: input, shape index: {}]   ;;  %s17475_s1 = inlined_call_operand.hbm [shape: bf16[3,32,512], index: 1, kind: input, shape index: {}]   ;;  %s17476_s2 = inlined_call_operand.hbm [shape: f32[1,512], index: 2, kind: input, shape index: {}]   ;;  %s17477_s3 = inlined_call_operand.vmem [shape: bf16[3,256,512], index: 3, kind: input, shape index: {}]   ;;  %s17478_s4 = inlined_call_operand.hbm [shape: f32[1,512], index: 4, kind: input, shape index: {}]   ;;  %s17479_s5 = inlined_call_operand.hbm [shape: bf16[7,256,512], index: 5, kind: input, shape index: {}]   ;;  %s17480_s6 = inlined_call_operand.hbm [shape: f32[1,512], index: 6, kind: input, shape index: {}]   ;;  %s17481_s7 = inlined_call_operand.hbm [shape: bf16[512,256], index: 7, kind: input, shape index: {}]   ;;  %s17482_s8 = inlined_call_operand.hbm [shape: f32[1,256], index: 8, kind: input, shape index: {}]   ;;  %s17483_s9 = inlined_call_operand.hbm [shape: bf16[256,128], index: 9, kind: input, shape index: {}]   ;;  %s17484_s10 = inlined_call_operand.hbm [shape: f32[1,128], index: 10, kind: input, shape index: {}]   ;;  %s17485_s11 = inlined_call_operand.vmem [shape: f32[32,128], index: 11, kind: output, shape index: {}]  }
   0x1   :  { %17533 = sst [smem:[#allocation76_spill]] %s17476_s2 }
   0x2   :  { %17534 = sst [smem:[#allocation77_spill]] %s17479_s5 }
   0x3   :  { %17535 = sst [smem:[#allocation78_spill]] %s17485_s11 }
   0x4   :  { %16 = vsyncpa [#allocation5], 0 }
   0x5   :  { %17 = vsyncpa [#allocation7], 0 }
   0x6   :  { %18 = vsyncpa [#allocation10], 0 }
   0x7   :  { %19 = vsyncpa [#allocation13], 0 }
   0x8   :  { %20 = vsyncpa [#allocation16], 0  ;;  %s14703_s17 = smov 0   ;;  %s14705_s18 = smov 0  }
   0x9   :  { %s14707_s19 = smov 0  }
   0xa LB: > { %s17486_s20 = sadd.s32 4294967295, %s14625_s19   ;;  %s14720_s21 = sadd.s32 1, %s14625_s19   ;;  %s14625_s19 = sphi %s14707_s19, %s17692_s19   ;;  %s14621_s18 = sphi %s14705_s18, %s17695_s18   ;;  %s14617_s17 = sphi %s14703_s17, %s17694_s17  }
   0xb   : > { %17536 = sst [smem:[#allocation23_spill]] %s14720_s21  ;;  %s30_s22 = ssub.s32 %s14625_s19, %s14720_s21 }
   0xc   : > { %s33_s23 = sadd.s32 1, %s14621_s18  ;;  %p31_p0 = scmp.eq.s32.totalorder %s30_s22, 0 }
   0xd   : > { %p40_p1 = scmp.ne.s32.totalorder %s14621_s18, %s14617_s17  ;;  %p41_p2 = scmp.eq.s32.totalorder %s14625_s19, 0 }
   0xe   : > { %p10932_p3 = scmp.ge.s32.totalorder %s14625_s19, 1  ;;  %p293_p5 = scmp.lt.s32.totalorder %s14625_s19, 3 }
   0xf   : > { %s14730_s24 = scalar_select %p31_p0, %s14621_s18, %s33_s23  }
  0x10   : > { %p14732_p4 = por %p41_p2, %p40_p1  ;;  %p14739_p6 = scmp.eq.s32.totalorder %s17486_s20, 0 }
  0x11   : > { %17537 = sst [smem:[#allocation24_spill]] %s14730_s24  ;;  %p14743_p7 = pnand %p10932_p3, %p293_p5 }
  0x12   : > { %s17538_s25 = scalar_select %p14732_p4, 1, 0 }
  0x13   : > { %s17539_s26 = scalar_select %p14739_p6, 1, 0 }
  0x14   : > { %s17540_s27 = scalar_select %p14743_p7, 1, 0 }
  0x15   : > { %s14627_s28 = smov [#allocation6]   ;;  %p13137_p8 = pneg %p14743_p7 }
  0x16   : > { %s319_s29 = sshll.u32 %s14627_s28, 4  ;;  %s14628_s12 = smov [#allocation9]   ;;  %s320_s29 = int_to_ptr.vmem [resolvable:$true] %s319_s29 }
  0x17   : > { %p14751_p9 = pnand %p14739_p6, %p13137_p8  ;;  %s343_s13 = sshll.u32 %s14628_s12, 4  ;;  %s14755_s13 = int_to_ptr.vmem [resolvable:$true] %s343_s13 }
  0x18   : > { %s14629_s14 = smov [#allocation12]   ;;  %s17542_s2 = sld [smem:[#allocation76_spill]] }
  0x19   : > { %s14757_s15 = sshll.u32 %s14629_s14, 4  ;;  %p14767_p11 = pneg %p14751_p9  ;;  %s368_s15 = int_to_ptr.vmem [resolvable:$true] %s14757_s15 }
  0x1e   : > { %s14331_s23 = scalar_lea.hbm %s17542_s2, 64 }
  0x1f   : > { %p14332_p10 = scmp.ne.s32.totalorder %s17542_s2, %s14331_s23  ;;  %p14338_p0 = scmp.lt.u32.totalorder %s14331_s23, %s17542_s2 }
  0x21   : > { %p14334_p12 = pnand %p14767_p11, %p14332_p10 }
  0x23   : > { %p14335_p13 = pneg %p14334_p12 }
  0x25   : > { %p14340_p1 = pnand %p14338_p0, %p14335_p13 }
  0x27   : > { %14343 = shalt.err (!%p14340_p1)
}
  0x28   : > { %s14344_s16 = scalar_lea.vmem %s320_s29, 64  ;;  %p14352_p8 = scmp.lt.s32.totalorder %s320_s29, %s320_s29 }
  0x29   : > { %p14345_p2 = scmp.ne.s32.totalorder %s320_s29, %s14344_s16  ;;  %p14353_p6 = scmp.lt.s32.totalorder %s14344_s16, %s14344_s16 }
  0x2b   : > { %p14347_p3 = pnand %p14345_p2, %p14767_p11  ;;  %p14354_p7 = por %p14353_p6, %p14352_p8 }
  0x2d   : > { %p14348_p5 = pneg %p14347_p3 }
  0x2f   : > { %p14355_p4 = pnand %p14354_p7, %p14348_p5 }
  0x31   : > { %14358 = shalt.err (!%p14355_p4)
}
  0x32   : > { %13143 = dma.hbm_to_vmem [thread:$0]  (!%p14751_p9), %s17542_s2, 64, %s320_s29, [#allocation7]  }
  0x33   : > { %s17544_s5 = sld [smem:[#allocation77_spill]] }
  0x39   : > { %s14359_s12 = scalar_lea.hbm %s17544_s5, 57344 }
  0x3a   : > { %p14360_p10 = scmp.ne.s32.totalorder %s17544_s5, %s14359_s12  ;;  %p14366_p4 = scmp.lt.u32.totalorder %s14359_s12, %s17544_s5 }
  0x3c   : > { %p14362_p12 = pnand %p14360_p10, %p14767_p11 }
  0x3e   : > { %p14363_p6 = pneg %p14362_p12 }
  0x40   : > { %p14368_p7 = pnand %p14366_p4, %p14363_p6 }
  0x42   : > { %14371 = shalt.err (!%p14368_p7)
}
  0x43   : > { %s14372_s29 = scalar_lea.vmem %s14755_s13, 57344  ;;  %p14380_p2 = scmp.lt.s32.totalorder %s14755_s13, %s14755_s13 }
  0x44   : > { %p14373_p13 = scmp.ne.s32.totalorder %s14755_s13, %s14372_s29  ;;  %p14381_p3 = scmp.lt.s32.totalorder %s14372_s29, %s14372_s29 }
  0x46   : > { %p14375_p0 = pnand %p14373_p13, %p14767_p11  ;;  %p14382_p5 = por %p14381_p3, %p14380_p2 }
  0x48   : > { %p14376_p1 = pneg %p14375_p0 }
  0x4a   : > { %p14383_p8 = pnand %p14382_p5, %p14376_p1 }
  0x4c   : > { %14386 = shalt.err (!%p14383_p8)
}
  0x4d   : > { %s17492_s21 = smov 256   ;;  %s17493_s11 = smov 16  }
  0x4e   : > { %13149 = dma.hbm_to_vmem [thread:$0]  (!%p14751_p9), %s17544_s5, 57344, %s14755_s13, [#allocation10], %s17492_s21, %s17492_s21, %s17493_s11  }
  0x4f   : > { %s14387_s12 = scalar_lea.hbm %s17481_s7, 8192 }
  0x50   : > { %p14388_p10 = scmp.ne.s32.totalorder %s17481_s7, %s14387_s12  ;;  %p14394_p4 = scmp.lt.u32.totalorder %s14387_s12, %s17481_s7 }
  0x52   : > { %p14390_p12 = pnand %p14388_p10, %p14767_p11 }
  0x54   : > { %p14391_p6 = pneg %p14390_p12 }
  0x56   : > { %p14396_p7 = pnand %p14394_p4, %p14391_p6 }
  0x58   : > { %14399 = shalt.err (!%p14396_p7)
}
  0x59   : > { %s14400_s20 = scalar_lea.vmem %s368_s15, 8192  ;;  %p14408_p2 = scmp.lt.s32.totalorder %s368_s15, %s368_s15 }
  0x5a   : > { %p14401_p13 = scmp.ne.s32.totalorder %s368_s15, %s14400_s20  ;;  %p14409_p3 = scmp.lt.s32.totalorder %s14400_s20, %s14400_s20 }
  0x5c   : > { %p14403_p0 = pnand %p14401_p13, %p14767_p11  ;;  %p14410_p5 = por %p14409_p3, %p14408_p2 }
  0x5e   : > { %p14404_p1 = pneg %p14403_p0 }
  0x60   : > { %p14411_p8 = pnand %p14410_p5, %p14404_p1 }
  0x62   : > { %14414 = shalt.err (!%p14411_p8)
}
  0x63   : > { %s14632_s13 = smov 128   ;;  %s14633_s22 = smov 8  }
  0x64   : > { %13155 = dma.hbm_to_vmem [thread:$0]  (!%p14751_p9), %s17481_s7, 8192, %s368_s15, [#allocation13], %s14632_s13, %s14632_s13, %s14633_s22  }
  0x65   : > { %s14634_s28 = smov [#allocation15]   ;;  %s14415_s29 = scalar_lea.hbm %s17483_s9, 2048 }
  0x66   : > { %s391_s12 = sshll.u32 %s14634_s28, 4  ;;  %p14416_p10 = scmp.ne.s32.totalorder %s17483_s9, %s14415_s29  ;;  %s392_s12 = int_to_ptr.vmem [resolvable:$true] %s391_s12 }
  0x67   : > { %p14422_p4 = scmp.lt.u32.totalorder %s14415_s29, %s17483_s9 }
  0x68   : > { %p14418_p12 = pnand %p14416_p10, %p14767_p11 }
  0x6a   : > { %p14419_p6 = pneg %p14418_p12 }
  0x6c   : > { %p14424_p7 = pnand %p14422_p4, %p14419_p6 }
  0x6e   : > { %14427 = shalt.err (!%p14424_p7)
}
  0x6f   : > { %s14428_s15 = scalar_lea.vmem %s392_s12, 2048  ;;  %p14436_p2 = scmp.lt.s32.totalorder %s392_s12, %s392_s12 }
  0x70   : > { %p14429_p13 = scmp.ne.s32.totalorder %s392_s12, %s14428_s15  ;;  %p14437_p3 = scmp.lt.s32.totalorder %s14428_s15, %s14428_s15 }
  0x72   : > { %p14431_p0 = pnand %p14429_p13, %p14767_p11  ;;  %p14438_p5 = por %p14437_p3, %p14436_p2 }
  0x74   : > { %p14432_p1 = pneg %p14431_p0 }
  0x76   : > { %p14439_p8 = pnand %p14438_p5, %p14432_p1 }
  0x78   : > { %14442 = shalt.err (!%p14439_p8)
}
  0x79   : > { %s14635_s21 = smov 64   ;;  %s14636_s13 = smov 4  }
  0x7a   : > { %13161 = dma.hbm_to_vmem [thread:$0]  (!%p14751_p9), %s17483_s9, 2048, %s392_s12, [#allocation16], %s14635_s21, %s14635_s21, %s14636_s13  }
  0x7b   : > { %s14637_s22 = smov [#allocation4]   ;;  %s14638_s23 = smov [#allocation8]  }
  0x7c   : > { %s305_s2 = sshll.u32 %s14637_s22, 4  ;;  %s333_s28 = sshll.u32 %s14638_s23, 4  ;;  %s306_s2 = int_to_ptr.vmem [resolvable:$true] %s305_s2  ;;  %s14846_s28 = int_to_ptr.vmem [resolvable:$true] %s333_s28 }
  0x7d   : > { %s14443_s29 = scalar_lea.hbm %s17475_s1, 3072 }
  0x7e   : > { %p14444_p10 = scmp.ne.s32.totalorder %s17475_s1, %s14443_s29  ;;  %p14450_p4 = scmp.lt.u32.totalorder %s14443_s29, %s17475_s1 }
  0x80   : > { %p14446_p12 = pnand %p14444_p10, %p14767_p11 }
  0x82   : > { %p14447_p6 = pneg %p14446_p12 }
  0x84   : > { %p14452_p7 = pnand %p14450_p4, %p14447_p6 }
  0x86   : > { %14455 = shalt.err (!%p14452_p7)
}
  0x87   : > { %s14456_s21 = scalar_lea.vmem %s306_s2, 3072  ;;  %p14464_p2 = scmp.lt.s32.totalorder %s306_s2, %s306_s2 }
  0x88   : > { %p14457_p13 = scmp.ne.s32.totalorder %s306_s2, %s14456_s21  ;;  %p14465_p3 = scmp.lt.s32.totalorder %s14456_s21, %s14456_s21 }
  0x8a   : > { %p14459_p0 = pnand %p14457_p13, %p14767_p11  ;;  %p14466_p5 = por %p14465_p3, %p14464_p2 }
  0x8c   : > { %p14460_p1 = pneg %p14459_p0 }
  0x8e   : > { %p14467_p8 = pnand %p14466_p5, %p14460_p1 }
  0x90   : > { %14470 = shalt.err (!%p14467_p8)
}
  0x91   : > { %s17545_s13 = smov 16   ;;  %s17546_s11 = smov 256  }
  0x92   : > { %13140 = dma.hbm_to_vmem [thread:$0]  (!%p14751_p9), %s17475_s1, 3072, %s306_s2, [#allocation5], %s17546_s11, %s17546_s11, %s17545_s13  }
  0x93   : > { %s14471_s29 = scalar_lea.hbm %s17478_s4, 64 }
  0x94   : > { %p14472_p10 = scmp.ne.s32.totalorder %s17478_s4, %s14471_s29  ;;  %p14478_p4 = scmp.lt.u32.totalorder %s14471_s29, %s17478_s4 }
  0x96   : > { %p14474_p12 = pnand %p14472_p10, %p14767_p11 }
  0x98   : > { %p14475_p6 = pneg %p14474_p12 }
  0x9a   : > { %p14480_p7 = pnand %p14478_p4, %p14475_p6 }
  0x9c   : > { %14483 = shalt.err (!%p14480_p7)
}
  0x9d   : > { %s14484_s2 = scalar_lea.vmem %s14846_s28, 64  ;;  %p14492_p2 = scmp.lt.s32.totalorder %s14846_s28, %s14846_s28 }
  0x9e   : > { %p14485_p13 = scmp.ne.s32.totalorder %s14846_s28, %s14484_s2  ;;  %p14493_p3 = scmp.lt.s32.totalorder %s14484_s2, %s14484_s2 }
  0xa0   : > { %p14487_p0 = pnand %p14485_p13, %p14767_p11  ;;  %p14494_p5 = por %p14493_p3, %p14492_p2 }
  0xa2   : > { %p14488_p1 = pneg %p14487_p0 }
  0xa4   : > { %p14495_p8 = pnand %p14494_p5, %p14488_p1 }
  0xa6   : > { %14498 = shalt.err (!%p14495_p8)
}
  0xa7   : > { %13146 = dma.hbm_to_vmem [thread:$0]  (!%p14751_p9), %s17478_s4, 64, %s14846_s28, [#allocation7]  }
  0xa8   : > { %s14639_s11 = smov [#allocation11]   ;;  %s14640_s23 = smov [#allocation14]  }
  0xa9   : > { %s357_s22 = sshll.u32 %s14639_s11, 4  ;;  %s381_s14 = sshll.u32 %s14640_s23, 4  ;;  %s358_s22 = int_to_ptr.vmem [resolvable:$true] %s357_s22  ;;  %s14892_s14 = int_to_ptr.vmem [resolvable:$true] %s381_s14 }
  0xaa   : > { %s14499_s20 = scalar_lea.hbm %s17480_s6, 64 }
  0xab   : > { %p14500_p10 = scmp.ne.s32.totalorder %s17480_s6, %s14499_s20  ;;  %p14506_p4 = scmp.lt.u32.totalorder %s14499_s20, %s17480_s6 }
  0xad   : > { %p14502_p12 = pnand %p14500_p10, %p14767_p11 }
  0xaf   : > { %p14503_p6 = pneg %p14502_p12 }
  0xb1   : > { %p14508_p7 = pnand %p14506_p4, %p14503_p6 }
  0xb3   : > { %14511 = shalt.err (!%p14508_p7)
}
  0xb4   : > { %s14512_s2 = scalar_lea.vmem %s358_s22, 64  ;;  %p14520_p2 = scmp.lt.s32.totalorder %s358_s22, %s358_s22 }
  0xb5   : > { %p14513_p13 = scmp.ne.s32.totalorder %s358_s22, %s14512_s2  ;;  %p14521_p3 = scmp.lt.s32.totalorder %s14512_s2, %s14512_s2 }
  0xb7   : > { %p14515_p0 = pnand %p14513_p13, %p14767_p11  ;;  %p14522_p5 = por %p14521_p3, %p14520_p2 }
  0xb9   : > { %p14516_p1 = pneg %p14515_p0 }
  0xbb   : > { %p14523_p8 = pnand %p14522_p5, %p14516_p1 }
  0xbd   : > { %14526 = shalt.err (!%p14523_p8)
}
  0xbe   : > { %13152 = dma.hbm_to_vmem [thread:$0]  (!%p14751_p9), %s17480_s6, 64, %s358_s22, [#allocation10]  }
  0xbf   : > { %s14527_s16 = scalar_lea.hbm %s17482_s8, 32 }
  0xc0   : > { %p14528_p10 = scmp.ne.s32.totalorder %s17482_s8, %s14527_s16  ;;  %p14534_p4 = scmp.lt.u32.totalorder %s14527_s16, %s17482_s8 }
  0xc2   : > { %p14530_p12 = pnand %p14528_p10, %p14767_p11 }
  0xc4   : > { %p14531_p6 = pneg %p14530_p12 }
  0xc6   : > { %p14536_p7 = pnand %p14534_p4, %p14531_p6 }
  0xc8   : > { %14539 = shalt.err (!%p14536_p7)
}
  0xc9   : > { %s14540_s22 = scalar_lea.vmem %s14892_s14, 32  ;;  %p14548_p2 = scmp.lt.s32.totalorder %s14892_s14, %s14892_s14 }
  0xca   : > { %p14541_p13 = scmp.ne.s32.totalorder %s14892_s14, %s14540_s22  ;;  %p14549_p3 = scmp.lt.s32.totalorder %s14540_s22, %s14540_s22 }
  0xcc   : > { %p14543_p0 = pnand %p14541_p13, %p14767_p11  ;;  %p14550_p5 = por %p14549_p3, %p14548_p2 }
  0xce   : > { %p14544_p1 = pneg %p14543_p0 }
  0xd0   : > { %p14551_p8 = pnand %p14550_p5, %p14544_p1 }
  0xd2   : > { %14554 = shalt.err (!%p14551_p8)
}
  0xd3   : > { %13158 = dma.hbm_to_vmem [thread:$0]  (!%p14751_p9), %s17482_s8, 32, %s14892_s14, [#allocation13]  }
  0xd4   : > { %s14641_s2 = smov [#allocation17]   ;;  %s14555_s23 = scalar_lea.hbm %s17484_s10, 16 }
  0xd5   : > { %s405_s21 = sshll.u32 %s14641_s2, 4  ;;  %p14556_p10 = scmp.ne.s32.totalorder %s17484_s10, %s14555_s23  ;;  %s406_s21 = int_to_ptr.vmem [resolvable:$true] %s405_s21 }
  0xd6   : > { %p14562_p4 = scmp.lt.u32.totalorder %s14555_s23, %s17484_s10 }
  0xd7   : > { %p14558_p12 = pnand %p14556_p10, %p14767_p11 }
  0xd9   : > { %p14559_p6 = pneg %p14558_p12 }
  0xdb   : > { %p14564_p7 = pnand %p14562_p4, %p14559_p6 }
  0xdd   : > { %14567 = shalt.err (!%p14564_p7)
}
  0xde   : > { %s14568_s14 = scalar_lea.vmem %s406_s21, 16  ;;  %s14575_s5 = scalar_lea.vmem %s406_s21, 32 }
  0xdf   : > { %p14569_p13 = scmp.ne.s32.totalorder %s406_s21, %s14568_s14  ;;  %p14576_p2 = scmp.lt.s32.totalorder %s406_s21, %s406_s21 }
  0xe0   : > { %p14577_p3 = scmp.lt.s32.totalorder %s14575_s5, %s14568_s14 }
  0xe1   : > { %p14571_p0 = pnand %p14569_p13, %p14767_p11 }
  0xe2   : > { %p14578_p5 = por %p14577_p3, %p14576_p2 }
  0xe3   : > { %p14572_p1 = pneg %p14571_p0 }
  0xe5   : > { %p14579_p8 = pnand %p14578_p5, %p14572_p1 }
  0xe7   : > { %14582 = shalt.err (!%p14579_p8)
}
  0xe8   : > { %13164 = dma.hbm_to_vmem [thread:$0]  (!%p14751_p9), %s17484_s10, 16, %s406_s21, [#allocation16]  }
  0xe9   : > { %p10942_p10 = scmp.ge.s32.totalorder %s14625_s19, 2 }
  0xea   : > { %p17547_p12 = scmp.ne.s32.totalorder (!%p10942_p10), %s17538_s25, 0 }
  0xeb   : > { %412 = sbr.rel (%p10942_p10) target bundleno = 276 (0x114), region = 56 }
  0xf2   : > { %415 = sbr.rel (!%p17547_p12) target bundleno = 276 (0x114), region = 60  ;;  %s417_s24 = sand.u32 (%p17547_p12), 1, %s14621_s18  }
  0xf3   : > { %s12000_s28 = sshll.u32 (%p17547_p12), %s14625_s19, 4  ;;  %s13099_s2 = smul.u32 (%p17547_p12), 480, %s417_s24 }
  0xf4   : > { %s14961_s23 = scalar_lea.vmem (%p17547_p12), %s17474_s0, %s12000_s28 }
  0xf5   : > { %v568_v0 = vld [vmem:[%s14961_s23] sm:$0xff] (%p17547_p12)  ;;  %v570_v1 = vld [vmem:[%s14961_s23 + $0x8] sm:$0xff] (%p17547_p12)  ;;  %s14969_s25 = scalar_lea.vmem (%p17547_p12), [#allocation3], %s13099_s2 }
  0xf6   : > { %v572_v2 = vld [vmem:[%s14961_s23 + $0x20] sm:$0xff] (%p17547_p12)  ;;  %v574_v3 = vld [vmem:[%s14961_s23 + $0x28] sm:$0xff] (%p17547_p12)  ;;  %569 = vst [vmem:[%s14969_s25] sm:$0xff] (%p17547_p12), %v568_v0  ;;  %571 = vst [vmem:[%s14969_s25 + $0x8] sm:$0xff] (%p17547_p12), %v570_v1 }
  0xf7   : > { %v576_v4 = vld [vmem:[%s14961_s23 + $0x40] sm:$0xff] (%p17547_p12)  ;;  %v578_v5 = vld [vmem:[%s14961_s23 + $0x48] sm:$0xff] (%p17547_p12)  ;;  %573 = vst [vmem:[%s14969_s25 + $0x10] sm:$0xff] (%p17547_p12), %v572_v2  ;;  %575 = vst [vmem:[%s14969_s25 + $0x18] sm:$0xff] (%p17547_p12), %v574_v3 }
  0xf8   : > { %577 = vst [vmem:[%s14969_s25 + $0x20] sm:$0xff] (%p17547_p12), %v576_v4  ;;  %579 = vst [vmem:[%s14969_s25 + $0x28] sm:$0xff] (%p17547_p12), %v578_v5  ;;  %v580_v6 = vld [vmem:[%s14961_s23 + $0x60] sm:$0xff] (%p17547_p12)  ;;  %v582_v7 = vld [vmem:[%s14961_s23 + $0x68] sm:$0xff] (%p17547_p12) }
  0xf9   : > { %v584_v8 = vld [vmem:[%s14961_s23 + $0x80] sm:$0xff]  ;;  %581 = vst [vmem:[%s14969_s25 + $0x30] sm:$0xff] %v580_v6  ;;  %583 = vst [vmem:[%s14969_s25 + $0x38] sm:$0xff] %v582_v7  ;;  %v586_v9 = vld [vmem:[%s14961_s23 + $0x88] sm:$0xff] }
  0xfa   : > { %585 = vst [vmem:[%s14969_s25 + $0x40] sm:$0xff] %v584_v8  ;;  %v588_v10 = vld [vmem:[%s14961_s23 + $0xa0] sm:$0xff]  ;;  %v590_v11 = vld [vmem:[%s14961_s23 + $0xa8] sm:$0xff]  ;;  %587 = vst [vmem:[%s14969_s25 + $0x48] sm:$0xff] %v586_v9 }
  0xfb   : > { %589 = vst [vmem:[%s14969_s25 + $0x50] sm:$0xff] %v588_v10  ;;  %591 = vst [vmem:[%s14969_s25 + $0x58] sm:$0xff] %v590_v11  ;;  %v592_v12 = vld [vmem:[%s14961_s23 + $0xc0] sm:$0xff]  ;;  %v594_v13 = vld [vmem:[%s14961_s23 + $0xc8] sm:$0xff] }
  0xfc   : > { %v596_v14 = vld [vmem:[%s14961_s23 + $0xe0] sm:$0xff]  ;;  %593 = vst [vmem:[%s14969_s25 + $0x60] sm:$0xff] %v592_v12  ;;  %595 = vst [vmem:[%s14969_s25 + $0x68] sm:$0xff] %v594_v13  ;;  %v598_v15 = vld [vmem:[%s14961_s23 + $0xe8] sm:$0xff] }
  0xfd   : > { %597 = vst [vmem:[%s14969_s25 + $0x70] sm:$0xff] %v596_v14  ;;  %v600_v16 = vld [vmem:[%s14961_s23 + $0x100] sm:$0xff]  ;;  %v602_v17 = vld [vmem:[%s14961_s23 + $0x108] sm:$0xff]  ;;  %599 = vst [vmem:[%s14969_s25 + $0x78] sm:$0xff] %v598_v15 }
  0xfe   : > { %601 = vst [vmem:[%s14969_s25 + $0x80] sm:$0xff] %v600_v16  ;;  %603 = vst [vmem:[%s14969_s25 + $0x88] sm:$0xff] %v602_v17  ;;  %v604_v18 = vld [vmem:[%s14961_s23 + $0x120] sm:$0xff]  ;;  %v606_v19 = vld [vmem:[%s14961_s23 + $0x128] sm:$0xff] }
  0xff   : > { %v608_v20 = vld [vmem:[%s14961_s23 + $0x140] sm:$0xff]  ;;  %605 = vst [vmem:[%s14969_s25 + $0x90] sm:$0xff] %v604_v18  ;;  %607 = vst [vmem:[%s14969_s25 + $0x98] sm:$0xff] %v606_v19  ;;  %v610_v21 = vld [vmem:[%s14961_s23 + $0x148] sm:$0xff] }
 0x100   : > { %609 = vst [vmem:[%s14969_s25 + $0xa0] sm:$0xff] %v608_v20  ;;  %v612_v22 = vld [vmem:[%s14961_s23 + $0x160] sm:$0xff]  ;;  %v614_v23 = vld [vmem:[%s14961_s23 + $0x168] sm:$0xff]  ;;  %611 = vst [vmem:[%s14969_s25 + $0xa8] sm:$0xff] %v610_v21 }
 0x101   : > { %613 = vst [vmem:[%s14969_s25 + $0xb0] sm:$0xff] %v612_v22  ;;  %615 = vst [vmem:[%s14969_s25 + $0xb8] sm:$0xff] %v614_v23  ;;  %v616_v24 = vld [vmem:[%s14961_s23 + $0x180] sm:$0xff]  ;;  %v618_v25 = vld [vmem:[%s14961_s23 + $0x188] sm:$0xff] }
 0x102   : > { %v620_v26 = vld [vmem:[%s14961_s23 + $0x1a0] sm:$0xff]  ;;  %617 = vst [vmem:[%s14969_s25 + $0xc0] sm:$0xff] %v616_v24  ;;  %619 = vst [vmem:[%s14969_s25 + $0xc8] sm:$0xff] %v618_v25  ;;  %v622_v27 = vld [vmem:[%s14961_s23 + $0x1a8] sm:$0xff] }
 0x103   : > { %621 = vst [vmem:[%s14969_s25 + $0xd0] sm:$0xff] %v620_v26  ;;  %v624_v28 = vld [vmem:[%s14961_s23 + $0x1c0] sm:$0xff]  ;;  %v626_v29 = vld [vmem:[%s14961_s23 + $0x1c8] sm:$0xff]  ;;  %623 = vst [vmem:[%s14969_s25 + $0xd8] sm:$0xff] %v622_v27 }
 0x104   : > { %625 = vst [vmem:[%s14969_s25 + $0xe0] sm:$0xff] %v624_v28  ;;  %627 = vst [vmem:[%s14969_s25 + $0xe8] sm:$0xff] %v626_v29  ;;  %v628_v30 = vld [vmem:[%s14961_s23 + $0x1e0] sm:$0xff]  ;;  %v630_v31 = vld [vmem:[%s14961_s23 + $0x1e8] sm:$0xff] }
 0x105   : > { %v632_v32 = vld [vmem:[%s14961_s23 + $0x200] sm:$0xff]  ;;  %629 = vst [vmem:[%s14969_s25 + $0xf0] sm:$0xff] %v628_v30  ;;  %631 = vst [vmem:[%s14969_s25 + $0xf8] sm:$0xff] %v630_v31  ;;  %v634_v33 = vld [vmem:[%s14961_s23 + $0x208] sm:$0xff] }
 0x106   : > { %633 = vst [vmem:[%s14969_s25 + $0x100] sm:$0xff] %v632_v32  ;;  %v636_v34 = vld [vmem:[%s14961_s23 + $0x220] sm:$0xff]  ;;  %v638_v35 = vld [vmem:[%s14961_s23 + $0x228] sm:$0xff]  ;;  %635 = vst [vmem:[%s14969_s25 + $0x108] sm:$0xff] %v634_v33 }
 0x107   : > { %637 = vst [vmem:[%s14969_s25 + $0x110] sm:$0xff] %v636_v34  ;;  %639 = vst [vmem:[%s14969_s25 + $0x118] sm:$0xff] %v638_v35  ;;  %v640_v36 = vld [vmem:[%s14961_s23 + $0x240] sm:$0xff]  ;;  %v642_v37 = vld [vmem:[%s14961_s23 + $0x248] sm:$0xff] }
 0x108   : > { %v644_v38 = vld [vmem:[%s14961_s23 + $0x260] sm:$0xff]  ;;  %641 = vst [vmem:[%s14969_s25 + $0x120] sm:$0xff] %v640_v36  ;;  %643 = vst [vmem:[%s14969_s25 + $0x128] sm:$0xff] %v642_v37  ;;  %v646_v39 = vld [vmem:[%s14961_s23 + $0x268] sm:$0xff] }
 0x109   : > { %645 = vst [vmem:[%s14969_s25 + $0x130] sm:$0xff] %v644_v38  ;;  %v648_v40 = vld [vmem:[%s14961_s23 + $0x280] sm:$0xff]  ;;  %v650_v41 = vld [vmem:[%s14961_s23 + $0x288] sm:$0xff]  ;;  %647 = vst [vmem:[%s14969_s25 + $0x138] sm:$0xff] %v646_v39 }
 0x10a   : > { %649 = vst [vmem:[%s14969_s25 + $0x140] sm:$0xff] %v648_v40  ;;  %651 = vst [vmem:[%s14969_s25 + $0x148] sm:$0xff] %v650_v41  ;;  %v652_v42 = vld [vmem:[%s14961_s23 + $0x2a0] sm:$0xff]  ;;  %v654_v43 = vld [vmem:[%s14961_s23 + $0x2a8] sm:$0xff] }
 0x10b   : > { %v656_v44 = vld [vmem:[%s14961_s23 + $0x2c0] sm:$0xff]  ;;  %653 = vst [vmem:[%s14969_s25 + $0x150] sm:$0xff] %v652_v42  ;;  %655 = vst [vmem:[%s14969_s25 + $0x158] sm:$0xff] %v654_v43  ;;  %v658_v45 = vld [vmem:[%s14961_s23 + $0x2c8] sm:$0xff] }
 0x10c   : > { %657 = vst [vmem:[%s14969_s25 + $0x160] sm:$0xff] %v656_v44  ;;  %v660_v46 = vld [vmem:[%s14961_s23 + $0x2e0] sm:$0xff]  ;;  %v662_v47 = vld [vmem:[%s14961_s23 + $0x2e8] sm:$0xff]  ;;  %659 = vst [vmem:[%s14969_s25 + $0x168] sm:$0xff] %v658_v45 }
 0x10d   : > { %661 = vst [vmem:[%s14969_s25 + $0x170] sm:$0xff] %v660_v46  ;;  %663 = vst [vmem:[%s14969_s25 + $0x178] sm:$0xff] %v662_v47  ;;  %v664_v48 = vld [vmem:[%s14961_s23 + $0x300] sm:$0xff]  ;;  %v666_v49 = vld [vmem:[%s14961_s23 + $0x308] sm:$0xff] }
 0x10e   : > { %v668_v50 = vld [vmem:[%s14961_s23 + $0x320] sm:$0xff]  ;;  %665 = vst [vmem:[%s14969_s25 + $0x180] sm:$0xff] %v664_v48  ;;  %667 = vst [vmem:[%s14969_s25 + $0x188] sm:$0xff] %v666_v49  ;;  %v670_v51 = vld [vmem:[%s14961_s23 + $0x328] sm:$0xff] }
 0x10f   : > { %669 = vst [vmem:[%s14969_s25 + $0x190] sm:$0xff] %v668_v50  ;;  %v672_v52 = vld [vmem:[%s14961_s23 + $0x340] sm:$0xff]  ;;  %v674_v53 = vld [vmem:[%s14961_s23 + $0x348] sm:$0xff]  ;;  %671 = vst [vmem:[%s14969_s25 + $0x198] sm:$0xff] %v670_v51 }
 0x110   : > { %673 = vst [vmem:[%s14969_s25 + $0x1a0] sm:$0xff] %v672_v52  ;;  %675 = vst [vmem:[%s14969_s25 + $0x1a8] sm:$0xff] %v674_v53  ;;  %v676_v54 = vld [vmem:[%s14961_s23 + $0x360] sm:$0xff]  ;;  %v678_v55 = vld [vmem:[%s14961_s23 + $0x368] sm:$0xff] }
 0x111   : > { %v680_v56 = vld [vmem:[%s14961_s23 + $0x380] sm:$0xff]  ;;  %677 = vst [vmem:[%s14969_s25 + $0x1b0] sm:$0xff] %v676_v54  ;;  %679 = vst [vmem:[%s14969_s25 + $0x1b8] sm:$0xff] %v678_v55  ;;  %v682_v57 = vld [vmem:[%s14961_s23 + $0x388] sm:$0xff] }
 0x112   : > { %681 = vst [vmem:[%s14969_s25 + $0x1c0] sm:$0xff] %v680_v56  ;;  %v684_v58 = vld [vmem:[%s14961_s23 + $0x3a0] sm:$0xff]  ;;  %v686_v59 = vld [vmem:[%s14961_s23 + $0x3a8] sm:$0xff]  ;;  %683 = vst [vmem:[%s14969_s25 + $0x1c8] sm:$0xff] %v682_v57 }
 0x113   : > { %685 = vst [vmem:[%s14969_s25 + $0x1d0] sm:$0xff] %v684_v58  ;;  %687 = vst [vmem:[%s14969_s25 + $0x1d8] sm:$0xff] %v686_v59 }
 0x114 PF: > { %p17548_p9 = scmp.ne.s32.totalorder %s17540_s27, 0 }
 0x116   : > { %696 = sbr.rel (%p17548_p9) target bundleno = 2696 (0xa88), region = 98 }
 0x11d   : > { %s699_s30 = sand.u32 1, %s14617_s17   ;;  %p17549_p11 = scmp.ne.s32.totalorder %s17539_s26, 0 }
 0x11e   : > { %s13100_s21 = smul.u32 480, %s699_s30 }
 0x120   : > { %s15088_s16 = scalar_lea.vmem [#allocation3], %s13100_s21 }
 0x121   : > { %14596 = dma.done.wait (%p17549_p11), [#allocation5], 3072  }
 0x122   : > { %14598 = vsyncadd (%p17549_p11), [#allocation5], 4294964224 }
 0x123   : > { %14600 = dma.done.wait (%p17549_p11), [#allocation7], 128  }
 0x124   : > { %14602 = vsyncadd (%p17549_p11), [#allocation7], 4294967168 }
 0x125   : > { %14604 = dma.done.wait (%p17549_p11), [#allocation10], 57408  }
 0x126   : > { %14606 = vsyncadd (%p17549_p11), [#allocation10], 4294909888 }
 0x127   : > { %14608 = dma.done.wait (%p17549_p11), [#allocation13], 8224  }
 0x128   : > { %14610 = vsyncadd (%p17549_p11), [#allocation13], 4294959072 }
 0x129   : > { %14612 = dma.done.wait (%p17549_p11), [#allocation16], 2064  }
 0x12a   : > { %14614 = vsyncadd (%p17549_p11), [#allocation16], 4294965232  ;;  %v17494_v60 = vmov 0   ;;  %v13223_v61 = vld [vmem:[#allocation4 + $0x4] ss:$16 sps:$4 sm:$0xff]   ;;  %v783_v2 = vld [vmem:[%s15088_s16 + $0x8] sm:$0xff] }
 0x12b   : > { %1036 = vmatprep.mubr.bf16.mxu0 %v17494_v60  ;;  %1256 = vmatprep.mubr.bf16.mxu1 %v17494_v60  ;;  %v13225_v62 = vld [vmem:[#allocation4] ss:$16 sps:$4 sm:$0xff]   ;;  %v13226_v63 = vld [vmem:[#allocation4 + $0x24] ss:$16 sps:$4 sm:$0xff]   ;;  %v827_v4 = vld [vmem:[%s15088_s16 + $0x168] sm:$0xff]  ;;  %vm919_vm0 = vcmask 261120  }
 0x12c   : > { %1004 = vmatprep.subr.bf16.mxu0 %v13223_v61  ;;  %12023 = vmatprep.subr.bf16.mxu1 %v13223_v61  ;;  %v13228_v0 = vld [vmem:[#allocation4 + $0x20] ss:$16 sps:$4 sm:$0xff]   ;;  %v13231_v5 = vld [vmem:[#allocation4 + $0xc] ss:$16 sps:$4 sm:$0xff]   ;;  %v13229_v8 = vld [vmem:[#allocation4 + $0x8] ss:$16 sps:$4 sm:$0xff]  }
 0x12d   : > { %v782_v1 = vld [vmem:[%s15088_s16] sm:$0xff]  ;;  %1005 = vmatpush1.bf16.msra.mxu0 %v13225_v62  ;;  %12025 = vmatpush1.bf16.msra.mxu1 %v13225_v62  ;;  %v784_v9 = vld [vmem:[%s15088_s16 + $0x10] sm:$0xff]  ;;  %v785_v10 = vld [vmem:[%s15088_s16 + $0x18] sm:$0xff]  ;;  %s17690_s24 = sadd.s32 4294967295, %s14625_s19   ;;  %s17691_s11 = sld [smem:[#allocation78_spill]] }
 0x12e   : > { %v826_v3 = vld [vmem:[%s15088_s16 + $0x160] sm:$0xff]  ;;  %1006 = vmatprep.subr.bf16.mxu0 %v13226_v63  ;;  %12024 = vmatprep.subr.bf16.mxu1 %v13226_v63  ;;  %v15116_v6 = vpack.c.bf16 %v783_v2, %v782_v1  ;;  %v13234_v11 = vld [vmem:[#allocation4 + $0x2c] ss:$16 sps:$4 sm:$0xff]   ;;  %v828_v12 = vld [vmem:[%s15088_s16 + $0x170] sm:$0xff]  ;;  %v15130_v15 = vpack.c.bf16 %v785_v10, %v784_v9  ;;  %s10955_s28 = sshll.u32 %s17690_s24, 1 }
 0x12f   : > { %v15118_v7 = vpack.c.bf16 %v827_v4, %v826_v3  ;;  %v829_v13 = vld [vmem:[%s15088_s16 + $0x178] sm:$0xff]  ;;  %v786_v18 = vld [vmem:[%s15088_s16 + $0x20] sm:$0xff]  ;;  %v787_v19 = vld [vmem:[%s15088_s16 + $0x28] sm:$0xff]  ;;  %p776_p6 = scmp.lt.s32.totalorder %s10955_s28, 3 }
 0x130   : > { %v13232_v14 = vld [vmem:[#allocation4 + $0x28] ss:$16 sps:$4 sm:$0xff]   ;;  %v15132_v16 = vpack.c.bf16 %v829_v13, %v828_v12  ;;  %v13237_v17 = vld [vmem:[#allocation4 + $0x4c] ss:$16 sps:$4 sm:$0xff]   ;;  %v830_v20 = vld [vmem:[%s15088_s16 + $0x180] sm:$0xff]  ;;  %v15144_v24 = vpack.c.bf16 %v787_v19, %v786_v18 }
 0x131   : > { %1007 = vmatpush1.bf16.msra.mxu0 %v13228_v0  ;;  %12026 = vmatpush1.bf16.msra.mxu1 %v13228_v0  ;;  %v831_v21 = vld [vmem:[%s15088_s16 + $0x188] sm:$0xff]  ;;  %v13238_v22 = vld [vmem:[#allocation4 + $0x40] ss:$16 sps:$4 sm:$0xff]   ;;  %v13240_v23 = vld [vmem:[#allocation4 + $0x44] ss:$16 sps:$4 sm:$0xff]   ;;  %s17697_s28 = smov (!%p776_p6, %s10955_s28), 3 }
 0x132   : > { %1317 = vmatprep.subr.bf16.mxu1 %v13231_v5  ;;  %v15146_v25 = vpack.c.bf16 %v831_v21, %v830_v20  ;;  %1928 = vmatprep.subr.bf16.mxu0 %v13240_v23  ;;  %v788_v26 = vld [vmem:[%s15088_s16 + $0x30] sm:$0xff]  ;;  %v789_v27 = vld [vmem:[%s15088_s16 + $0x38] sm:$0xff]  ;;  %v790_v32 = vld [vmem:[%s15088_s16 + $0x40] sm:$0xff]  ;;  %s10956_s2 = sshll.u32 %s17697_s28, 3 }
 0x133   : > { %v832_v28 = vld [vmem:[%s15088_s16 + $0x190] sm:$0xff]  ;;  %v833_v29 = vld [vmem:[%s15088_s16 + $0x198] sm:$0xff]  ;;  %v15158_v30 = vpack.c.bf16 %v789_v27, %v788_v26  ;;  %v791_v33 = vld [vmem:[%s15088_s16 + $0x48] sm:$0xff]  ;;  %s779_s23 = scalar_lea.vmem %s17691_s11, %s10956_s2 }
 0x134   : > { %10965 = vmatmul.mubr.msk.bf16.vlgmr.msra.gmra.mrb[0].mxu0 %vm919_vm0, %v15116_v6  ;;  %10987 = vmatmul.mubr.msk.bf16.vlgmr.msra.gmra.mrb[0].mxu1 %vm919_vm0, %v15118_v7  ;;  %v15160_v31 = vpack.c.bf16 %v833_v29, %v832_v28  ;;  %v834_v34 = vld [vmem:[%s15088_s16 + $0x1a0] sm:$0xff]  ;;  %v835_v35 = vld [vmem:[%s15088_s16 + $0x1a8] sm:$0xff]  ;;  %v15172_v36 = vpack.c.bf16 %v791_v33, %v790_v32  ;;  %v792_v38 = vld [vmem:[%s15088_s16 + $0x50] sm:$0xff] }
 0x135   : > { %1318 = vmatpush1.bf16.msra.mxu1 %v13229_v8  ;;  %1046 = vmatprep.mubr.bf16.mxu0 %v17494_v60  ;;  %v15174_v37 = vpack.c.bf16 %v835_v35, %v834_v34  ;;  %v793_v39 = vld [vmem:[%s15088_s16 + $0x58] sm:$0xff]  ;;  %v836_v40 = vld [vmem:[%s15088_s16 + $0x1b0] sm:$0xff]  ;;  %v794_v44 = vld [vmem:[%s15088_s16 + $0x60] sm:$0xff] }
 0x136   : > { %1266 = vmatprep.mubr.bf16.mxu1 %v17494_v60  ;;  %1319 = vmatprep.subr.bf16.mxu1 %v13234_v11  ;;  %v837_v41 = vld [vmem:[%s15088_s16 + $0x1b8] sm:$0xff]  ;;  %v15186_v42 = vpack.c.bf16 %v793_v39, %v792_v38  ;;  %v795_v45 = vld [vmem:[%s15088_s16 + $0x68] sm:$0xff]  ;;  %v13244_v46 = vld [vmem:[#allocation4 + $0x60] ss:$16 sps:$4 sm:$0xff]  }
 0x137   : > { %1929 = vmatpush1.bf16.msra.mxu0 %v13238_v22  ;;  %v15188_v43 = vpack.c.bf16 %v837_v41, %v836_v40  ;;  %v13246_v47 = vld [vmem:[#allocation4 + $0x64] ss:$16 sps:$4 sm:$0xff]   ;;  %v13235_v48 = vld [vmem:[#allocation4 + $0x48] ss:$16 sps:$4 sm:$0xff]   ;;  %v15198_v49 = vpack.c.bf16 %v795_v45, %v794_v44  ;;  %v13243_v50 = vld [vmem:[#allocation4 + $0x6c] ss:$16 sps:$4 sm:$0xff]  }
 0x138   : > { %1930 = vmatprep.subr.bf16.mxu0 %v13246_v47  ;;  %v796_v51 = vld [vmem:[%s15088_s16 + $0x70] sm:$0xff]  ;;  %v797_v52 = vld [vmem:[%s15088_s16 + $0x78] sm:$0xff]  ;;  %v798_v55 = vld [vmem:[%s15088_s16 + $0x80] sm:$0xff] }
 0x139   : > { %1320 = vmatpush1.bf16.msra.mxu1 %v13232_v14  ;;  %v13241_v53 = vld [vmem:[#allocation4 + $0x68] ss:$16 sps:$4 sm:$0xff]   ;;  %v15208_v54 = vpack.c.bf16 %v797_v52, %v796_v51  ;;  %v800_v58 = vld [vmem:[%s15088_s16 + $0x90] sm:$0xff]  ;;  %v802_v62 = vld [vmem:[%s15088_s16 + $0xa0] sm:$0xff] }
 0x13a   : > { %2241 = vmatprep.subr.bf16.mxu1 %v13237_v17  ;;  %v799_v56 = vld [vmem:[%s15088_s16 + $0x88] sm:$0xff]  ;;  %v801_v59 = vld [vmem:[%s15088_s16 + $0x98] sm:$0xff]  ;;  %v804_v1 = vld [vmem:[%s15088_s16 + $0xb0] sm:$0xff] }
 0x13b   : > { %1931 = vmatpush1.bf16.msra.mxu0 %v13244_v46  ;;  %v15218_v57 = vpack.c.bf16 %v799_v56, %v798_v55  ;;  %v15228_v61 = vpack.c.bf16 %v801_v59, %v800_v58  ;;  %v803_v63 = vld [vmem:[%s15088_s16 + $0xa8] sm:$0xff]  ;;  %v805_v2 = vld [vmem:[%s15088_s16 + $0xb8] sm:$0xff]  ;;  %v806_v4 = vld [vmem:[%s15088_s16 + $0xc0] sm:$0xff] }
 0x13c   : > { %10966 = vmatmul.mubr.msk.bf16.gmra.mrb[4].mxu0 %vm919_vm0, %v15130_v15  ;;  %10988 = vmatmul.mubr.msk.bf16.gmra.mrb[4].mxu1 %vm919_vm0, %v15132_v16  ;;  %v15238_v0 = vpack.c.bf16 %v803_v63, %v802_v62  ;;  %v15248_v3 = vpack.c.bf16 %v805_v2, %v804_v1  ;;  %v807_v5 = vld [vmem:[%s15088_s16 + $0xc8] sm:$0xff]  ;;  %v808_v8 = vld [vmem:[%s15088_s16 + $0xd0] sm:$0xff]  ;;  %v809_v9 = vld [vmem:[%s15088_s16 + $0xd8] sm:$0xff] }
 0x13d   : > { %1056 = vmatprep.mubr.bf16.mxu0 %v17494_v60  ;;  %1276 = vmatprep.mubr.bf16.mxu1 %v17494_v60  ;;  %v15268_v10 = vpack.c.bf16 %v809_v9, %v808_v8  ;;  %v810_v11 = vld [vmem:[%s15088_s16 + $0xe0] sm:$0xff]  ;;  %v811_v12 = vld [vmem:[%s15088_s16 + $0xe8] sm:$0xff]  ;;  %v812_v14 = vld [vmem:[%s15088_s16 + $0xf0] sm:$0xff] }
 0x13e   : > { %v15278_v13 = vpack.c.bf16 %v811_v12, %v810_v11  ;;  %v813_v17 = vld [vmem:[%s15088_s16 + $0xf8] sm:$0xff]  ;;  %v814_v19 = vld [vmem:[%s15088_s16 + $0x100] sm:$0xff]  ;;  %v815_v20 = vld [vmem:[%s15088_s16 + $0x108] sm:$0xff] }
 0x13f   : > { %v15288_v18 = vpack.c.bf16 %v813_v17, %v812_v14  ;;  %v15298_v21 = vpack.c.bf16 %v815_v20, %v814_v19  ;;  %v816_v22 = vld [vmem:[%s15088_s16 + $0x110] sm:$0xff]  ;;  %v817_v23 = vld [vmem:[%s15088_s16 + $0x118] sm:$0xff]  ;;  %v818_v27 = vld [vmem:[%s15088_s16 + $0x120] sm:$0xff] }
 0x140   : > { %v15308_v26 = vpack.c.bf16 %v817_v23, %v816_v22  ;;  %v819_v28 = vld [vmem:[%s15088_s16 + $0x128] sm:$0xff]  ;;  %v820_v32 = vld [vmem:[%s15088_s16 + $0x130] sm:$0xff]  ;;  %v821_v33 = vld [vmem:[%s15088_s16 + $0x138] sm:$0xff] }
 0x141   : > { %v15318_v29 = vpack.c.bf16 %v819_v28, %v818_v27  ;;  %v13249_v34 = vld [vmem:[#allocation4 + $0x84] ss:$16 sps:$4 sm:$0xff]   ;;  %v13252_v35 = vld [vmem:[#allocation4 + $0x8c] ss:$16 sps:$4 sm:$0xff]   ;;  %v15328_v38 = vpack.c.bf16 %v821_v33, %v820_v32  ;;  %v13247_v47 = vld [vmem:[#allocation4 + $0x80] ss:$16 sps:$4 sm:$0xff]  }
 0x142   : > { %2831 = vmatprep.subr.bf16.mxu0 %v13249_v34  ;;  %v822_v39 = vld [vmem:[%s15088_s16 + $0x140] sm:$0xff]  ;;  %v823_v40 = vld [vmem:[%s15088_s16 + $0x148] sm:$0xff]  ;;  %v824_v44 = vld [vmem:[%s15088_s16 + $0x150] sm:$0xff] }
 0x143   : > { %v15338_v41 = vpack.c.bf16 %v823_v40, %v822_v39  ;;  %v825_v45 = vld [vmem:[%s15088_s16 + $0x158] sm:$0xff]  ;;  %v13253_v23 = vld [vmem:[#allocation4 + $0xa0] ss:$16 sps:$4 sm:$0xff]   ;;  %v13255_v27 = vld [vmem:[#allocation4 + $0xa4] ss:$16 sps:$4 sm:$0xff]  }
 0x144   : > { %10967 = vmatmul.mubr.msk.bf16.gmra.mrb[8].mxu0 %vm919_vm0, %v15144_v24  ;;  %10989 = vmatmul.mubr.msk.bf16.gmra.mrb[8].mxu1 %vm919_vm0, %v15146_v25  ;;  %v15348_v46 = vpack.c.bf16 %v825_v45, %v824_v44  ;;  %v13250_v28 = vld [vmem:[#allocation4 + $0x88] ss:$16 sps:$4 sm:$0xff]   ;;  %v13258_v32 = vld [vmem:[#allocation4 + $0xac] ss:$16 sps:$4 sm:$0xff]   ;;  %v13259_v39 = vld [vmem:[%s17477_s3] ss:$16 sps:$4 sm:$0xff]  }
 0x145   : > { %1066 = vmatprep.mubr.bf16.mxu0 %v17494_v60  ;;  %1286 = vmatprep.mubr.bf16.mxu1 %v17494_v60  ;;  %v13256_v33 = vld [vmem:[#allocation4 + $0xa8] ss:$16 sps:$4 sm:$0xff]   ;;  %v13261_v40 = vld [vmem:[%s17477_s3 + $0x4] ss:$16 sps:$4 sm:$0xff]   ;;  %v13264_v44 = vld [vmem:[%s17477_s3 + $0xc] ss:$16 sps:$4 sm:$0xff]  }
 0x146   : > { %v839_v34 = vld [vmem:[%s15088_s16 + $0x1c8] sm:$0xff]  ;;  %v13265_v45 = vld [vmem:[%s17477_s3 + $0x20] ss:$16 sps:$4 sm:$0xff]  }
 0x14c   : > { %10968 = vmatmul.mubr.msk.bf16.gmra.mrb[12].mxu0 %vm919_vm0, %v15158_v30  ;;  %10990 = vmatmul.mubr.msk.bf16.gmra.mrb[12].mxu1 %vm919_vm0, %v15160_v31 }
 0x14d   : > { %1076 = vmatprep.mubr.bf16.mxu0 %v17494_v60  ;;  %1296 = vmatprep.mubr.bf16.mxu1 %v17494_v60 }
 0x154   : > { %10969 = vmatmul.mubr.msk.bf16.gmra.mrb[16].mxu0 %vm919_vm0, %v15172_v36  ;;  %10991 = vmatmul.mubr.msk.bf16.gmra.mrb[16].mxu1 %vm919_vm0, %v15174_v37 }
 0x155   : > { %1086 = vmatprep.mubr.bf16.mxu0 %v17494_v60  ;;  %1306 = vmatprep.mubr.bf16.mxu1 %v17494_v60 }
 0x15c   : > { %10970 = vmatmul.mubr.msk.bf16.gmra.mrb[20].mxu0 %vm919_vm0, %v15186_v42  ;;  %10992 = vmatmul.mubr.msk.bf16.gmra.mrb[20].mxu1 %vm919_vm0, %v15188_v43 }
 0x15d   : > { %1096 = vmatprep.mubr.bf16.mxu0 %v17494_v60  ;;  %1349 = vmatprep.mubr.bf16.mxu1 %v17494_v60 }
 0x164   : > { %10971 = vmatmul.mubr.msk.bf16.gmra.mrb[24].mxu0 %vm919_vm0, %v15198_v49  ;;  %10993 = vmatmul.mubr.msk.bf16.vlgmr.msra.gmra.mrb[24].mxu1 %vm919_vm0, %v15116_v6  ;;  %v15258_v6 = vpack.c.bf16 %v807_v5, %v806_v4 }
 0x165   : > { %2242 = vmatpush1.bf16.msra.mxu1 %v13235_v48  ;;  %1106 = vmatprep.mubr.bf16.mxu0 %v17494_v60 }
 0x166   : > { %1359 = vmatprep.mubr.bf16.mxu1 %v17494_v60  ;;  %2243 = vmatprep.subr.bf16.mxu1 %v13243_v50 }
 0x169   : > { %2244 = vmatpush1.bf16.msra.mxu1 %v13241_v53 }
 0x16a   : > { %3144 = vmatprep.subr.bf16.mxu1 %v13252_v35 }
 0x16c   : > { %10972 = vmatmul.mubr.msk.bf16.gmra.mrb[28].mxu0 %vm919_vm0, %v15208_v54  ;;  %10994 = vmatmul.mubr.msk.bf16.gmra.mrb[28].mxu1 %vm919_vm0, %v15130_v15 }
 0x16d   : > { %1116 = vmatprep.mubr.bf16.mxu0 %v17494_v60  ;;  %1369 = vmatprep.mubr.bf16.mxu1 %v17494_v60 }
 0x174   : > { %10973 = vmatmul.mubr.msk.bf16.gmra.mrb[32].mxu0 %vm919_vm0, %v15218_v57  ;;  %10995 = vmatmul.mubr.msk.bf16.gmra.mrb[32].mxu1 %vm919_vm0, %v15144_v24 }
 0x175   : > { %1126 = vmatprep.mubr.bf16.mxu0 %v17494_v60  ;;  %1379 = vmatprep.mubr.bf16.mxu1 %v17494_v60 }
 0x17c   : > { %10974 = vmatmul.mubr.msk.bf16.gmra.mrb[36].mxu0 %vm919_vm0, %v15228_v61  ;;  %10996 = vmatmul.mubr.msk.bf16.gmra.mrb[36].mxu1 %vm919_vm0, %v15158_v30 }
 0x17d   : > { %1136 = vmatprep.mubr.bf16.mxu0 %v17494_v60  ;;  %1389 = vmatprep.mubr.bf16.mxu1 %v17494_v60 }
 0x184   : > { %10975 = vmatmul.mubr.msk.bf16.gmra.mrb[40].mxu0 %vm919_vm0, %v15238_v0  ;;  %10997 = vmatmul.mubr.msk.bf16.gmra.mrb[40].mxu1 %vm919_vm0, %v15172_v36 }
 0x185   : > { %1146 = vmatprep.mubr.bf16.mxu0 %v17494_v60  ;;  %1399 = vmatprep.mubr.bf16.mxu1 %v17494_v60 }
 0x18c   : > { %10976 = vmatmul.mubr.msk.bf16.gmra.mrb[44].mxu0 %vm919_vm0, %v15248_v3  ;;  %10998 = vmatmul.mubr.msk.bf16.gmra.mrb[44].mxu1 %vm919_vm0, %v15186_v42 }
 0x18d   : > { %1156 = vmatprep.mubr.bf16.mxu0 %v17494_v60  ;;  %1409 = vmatprep.mubr.bf16.mxu1 %v17494_v60 }
 0x194   : > { %10977 = vmatmul.mubr.msk.bf16.gmra.mrb[48].mxu0 %vm919_vm0, %v15258_v6  ;;  %10999 = vmatmul.mubr.msk.bf16.gmra.mrb[48].mxu1 %vm919_vm0, %v15198_v49 }
 0x195   : > { %1166 = vmatprep.mubr.bf16.mxu0 %v17494_v60  ;;  %1419 = vmatprep.mubr.bf16.mxu1 %v17494_v60 }
 0x19c   : > { %10978 = vmatmul.mubr.msk.bf16.gmra.mrb[52].mxu0 %vm919_vm0, %v15268_v10  ;;  %11000 = vmatmul.mubr.msk.bf16.gmra.mrb[52].mxu1 %vm919_vm0, %v15208_v54 }
 0x19d   : > { %1176 = vmatprep.mubr.bf16.mxu0 %v17494_v60  ;;  %1429 = vmatprep.mubr.bf16.mxu1 %v17494_v60 }
 0x1a4   : > { %10979 = vmatmul.mubr.msk.bf16.gmra.mrb[56].mxu0 %vm919_vm0, %v15278_v13  ;;  %11001 = vmatmul.mubr.msk.bf16.gmra.mrb[56].mxu1 %vm919_vm0, %v15218_v57 }
 0x1a5   : > { %1186 = vmatprep.mubr.bf16.mxu0 %v17494_v60  ;;  %1439 = vmatprep.mubr.bf16.mxu1 %v17494_v60 }
 0x1ac   : > { %10980 = vmatmul.mubr.msk.bf16.gmra.mrb[60].mxu0 %vm919_vm0, %v15288_v18  ;;  %11002 = vmatmul.mubr.msk.bf16.gmra.mrb[60].mxu1 %vm919_vm0, %v15228_v61 }
 0x1ad   : > { %1196 = vmatprep.mubr.bf16.mxu0 %v17494_v60  ;;  %1449 = vmatprep.mubr.bf16.mxu1 %v17494_v60 }
 0x1b4   : > { %10981 = vmatmul.mubr.msk.bf16.gmra.mrb[64].mxu0 %vm919_vm0, %v15298_v21  ;;  %11003 = vmatmul.mubr.msk.bf16.gmra.mrb[64].mxu1 %vm919_vm0, %v15238_v0 }
 0x1b5   : > { %1206 = vmatprep.mubr.bf16.mxu0 %v17494_v60  ;;  %1459 = vmatprep.mubr.bf16.mxu1 %v17494_v60 }
 0x1bc   : > { %10982 = vmatmul.mubr.msk.bf16.gmra.mrb[68].mxu0 %vm919_vm0, %v15308_v26  ;;  %11004 = vmatmul.mubr.msk.bf16.gmra.mrb[68].mxu1 %vm919_vm0, %v15248_v3 }
 0x1bd   : > { %1216 = vmatprep.mubr.bf16.mxu0 %v17494_v60  ;;  %1469 = vmatprep.mubr.bf16.mxu1 %v17494_v60 }
 0x1c4   : > { %10983 = vmatmul.mubr.msk.bf16.gmra.mrb[72].mxu0 %vm919_vm0, %v15318_v29  ;;  %11005 = vmatmul.mubr.msk.bf16.gmra.mrb[72].mxu1 %vm919_vm0, %v15258_v6 }
 0x1c5   : > { %1226 = vmatprep.mubr.bf16.mxu0 %v17494_v60  ;;  %1479 = vmatprep.mubr.bf16.mxu1 %v17494_v60 }
 0x1cc   : > { %10984 = vmatmul.mubr.msk.bf16.gmra.mrb[76].mxu0 %vm919_vm0, %v15328_v38  ;;  %11006 = vmatmul.mubr.msk.bf16.gmra.mrb[76].mxu1 %vm919_vm0, %v15268_v10 }
 0x1cd   : > { %1236 = vmatprep.mubr.bf16.mxu0 %v17494_v60  ;;  %1489 = vmatprep.mubr.bf16.mxu1 %v17494_v60 }
 0x1d4   : > { %10985 = vmatmul.mubr.msk.bf16.gmra.mrb[80].mxu0 %vm919_vm0, %v15338_v41  ;;  %11007 = vmatmul.mubr.msk.bf16.gmra.mrb[80].mxu1 %vm919_vm0, %v15278_v13 }
 0x1d5   : > { %1246 = vmatprep.mubr.bf16.mxu0 %v17494_v60  ;;  %1499 = vmatprep.mubr.bf16.mxu1 %v17494_v60 }
 0x1dc   : > { %10986 = vmatmul.mubr.msk.bf16.gmra.mrb[84].mxu0 %vm919_vm0, %v15348_v46  ;;  %11008 = vmatmul.mubr.msk.bf16.gmra.mrb[84].mxu1 %vm919_vm0, %v15288_v18 }
 0x1dd   : > { %1509 = vmatprep.mubr.bf16.mxu1 %v17494_v60  ;;  %1960 = vmatprep.mubr.bf16.mxu0 %v17494_v60 }
 0x1e4   : > { %11009 = vmatmul.mubr.msk.bf16.gmra.mrb[88].mxu1 %vm919_vm0, %v15298_v21  ;;  %11029 = vmatmul.mubr.msk.bf16.vlgmr.msra.gmra.mrb[0].mxu0 %vm919_vm0, %v15130_v15 }
 0x1e5   : > { %1519 = vmatprep.mubr.bf16.mxu1 %v17494_v60  ;;  %1970 = vmatprep.mubr.bf16.mxu0 %v17494_v60 }
 0x1e6   : > { %2832 = vmatpush1.bf16.msra.mxu0 %v13247_v47  ;;  %v13267_v47 = vld [vmem:[%s17477_s3 + $0x24] ss:$16 sps:$4 sm:$0xff]  }
 0x1e7   : > { %2833 = vmatprep.subr.bf16.mxu0 %v13255_v27  ;;  %v13270_v27 = vld [vmem:[%s17477_s3 + $0x2c] ss:$16 sps:$4 sm:$0xff]  }
 0x1ea   : > { %2834 = vmatpush1.bf16.msra.mxu0 %v13253_v23  ;;  %v13262_v23 = vld [vmem:[%s17477_s3 + $0x8] ss:$16 sps:$4 sm:$0xff]  }
 0x1eb   : > { %4380 = vmatprep.subr.bf16.mxu0 %v13261_v40  ;;  %v13282_v40 = vld [vmem:[%s17477_s3 + $0x6c] ss:$16 sps:$4 sm:$0xff]  }
 0x1ec   : > { %11010 = vmatmul.mubr.msk.bf16.gmra.mrb[92].mxu1 %vm919_vm0, %v15308_v26  ;;  %11030 = vmatmul.mubr.msk.bf16.gmra.mrb[4].mxu0 %vm919_vm0, %v15144_v24 }
 0x1ed   : > { %1529 = vmatprep.mubr.bf16.mxu1 %v17494_v60  ;;  %1980 = vmatprep.mubr.bf16.mxu0 %v17494_v60 }
 0x1f4   : > { %11011 = vmatmul.mubr.msk.bf16.gmra.mrb[96].mxu1 %vm919_vm0, %v15318_v29  ;;  %11031 = vmatmul.mubr.msk.bf16.gmra.mrb[8].mxu0 %vm919_vm0, %v15158_v30 }
 0x1f5   : > { %1539 = vmatprep.mubr.bf16.mxu1 %v17494_v60  ;;  %1990 = vmatprep.mubr.bf16.mxu0 %v17494_v60 }
 0x1fc   : > { %11012 = vmatmul.mubr.msk.bf16.gmra.mrb[100].mxu1 %vm919_vm0, %v15328_v38  ;;  %11032 = vmatmul.mubr.msk.bf16.gmra.mrb[12].mxu0 %vm919_vm0, %v15172_v36 }
 0x1fd   : > { %1549 = vmatprep.mubr.bf16.mxu1 %v17494_v60  ;;  %2000 = vmatprep.mubr.bf16.mxu0 %v17494_v60 }
 0x204   : > { %11013 = vmatmul.mubr.msk.bf16.gmra.mrb[104].mxu1 %vm919_vm0, %v15338_v41  ;;  %11033 = vmatmul.mubr.msk.bf16.gmra.mrb[16].mxu0 %vm919_vm0, %v15186_v42 }
 0x205   : > { %1559 = vmatprep.mubr.bf16.mxu1 %v17494_v60  ;;  %2010 = vmatprep.mubr.bf16.mxu0 %v17494_v60 }
 0x207   : > { %v15386_v48 = vpop.f32.mrb[0].mxu1 }
 0x208   : > { %v15388_v50 = vpop.f32.mrb[1].mxu1 }
 0x209   : > { %v15390_v51 = vpop.f32.mrb[2].mxu1 }
 0x20a   : > { %v15392_v52 = vpop.f32.mrb[3].mxu1 }
 0x20b   : > { %17550 = vst [vmem:[#allocation25_spill] sm:$0xff] %v15392_v52 }
 0x20c   : > { %11014 = vmatmul.mubr.msk.bf16.gmra.mrb[108].mxu1 %vm919_vm0, %v15348_v46  ;;  %11034 = vmatmul.mubr.msk.bf16.gmra.mrb[20].mxu0 %vm919_vm0, %v15198_v49 }
 0x20d   : > { %1569 = vmatprep.mubr.bf16.mxu1 %v17494_v60  ;;  %2020 = vmatprep.mubr.bf16.mxu0 %v17494_v60 }
 0x20f   : > { %v15400_v53 = vpop.f32.mrb[4].mxu1 }
 0x210   : > { %17551 = vst [vmem:[#allocation26_spill] sm:$0xff] %v15400_v53  ;;  %v15402_v55 = vpop.f32.mrb[5].mxu1 }
 0x211   : > { %17552 = vst [vmem:[#allocation27_spill] sm:$0xff] %v15402_v55  ;;  %v15404_v56 = vpop.f32.mrb[6].mxu1 }
 0x212   : > { %17553 = vst [vmem:[#allocation28_spill] sm:$0xff] %v15404_v56  ;;  %v15406_v58 = vpop.f32.mrb[7].mxu1 }
 0x213   : > { %17554 = vst [vmem:[#allocation29_spill] sm:$0xff] %v15406_v58 }
 0x214   : > { %11015 = vmatmul.mubr.msk.bf16.gmra.mrb[112].mxu1 %vm919_vm0, %v15118_v7  ;;  %11035 = vmatmul.mubr.msk.bf16.gmra.mrb[24].mxu0 %vm919_vm0, %v15208_v54 }
 0x215   : > { %1579 = vmatprep.mubr.bf16.mxu1 %v17494_v60  ;;  %2030 = vmatprep.mubr.bf16.mxu0 %v17494_v60 }
 0x217   : > { %v15414_v59 = vpop.f32.mrb[8].mxu1 }
 0x218   : > { %17555 = vst [vmem:[#allocation30_spill] sm:$0xff] %v15414_v59  ;;  %v15416_v62 = vpop.f32.mrb[9].mxu1 }
 0x219   : > { %17556 = vst [vmem:[#allocation31_spill] sm:$0xff] %v15416_v62  ;;  %v15418_v63 = vpop.f32.mrb[10].mxu1  ;;  %v13361_v62 = vld [vmem:[%s17477_s3 + $0x220] ss:$16 sps:$4 sm:$0xff]  }
 0x21a   : > { %17557 = vst [vmem:[#allocation32_spill] sm:$0xff] %v15418_v63  ;;  %v15420_v1 = vpop.f32.mrb[11].mxu1 }
 0x21b   : > { %17558 = vst [vmem:[#allocation33_spill] sm:$0xff] %v15420_v1  ;;  %v13363_v1 = vld [vmem:[%s17477_s3 + $0x224] ss:$16 sps:$4 sm:$0xff]  }
 0x21c   : > { %11016 = vmatmul.mubr.msk.bf16.gmra.mrb[116].mxu1 %vm919_vm0, %v15132_v16  ;;  %11036 = vmatmul.mubr.msk.bf16.gmra.mrb[28].mxu0 %vm919_vm0, %v15218_v57 }
 0x21d   : > { %1589 = vmatprep.mubr.bf16.mxu1 %v17494_v60  ;;  %2040 = vmatprep.mubr.bf16.mxu0 %v17494_v60 }
 0x21f   : > { %v15428_v2 = vpop.f32.mrb[12].mxu1 }
 0x220   : > { %17559 = vst [vmem:[#allocation34_spill] sm:$0xff] %v15428_v2  ;;  %v15430_v4 = vpop.f32.mrb[13].mxu1  ;;  %v13357_v2 = vld [vmem:[%s17477_s3 + $0x204] ss:$16 sps:$4 sm:$0xff]  }
 0x221   : > { %17560 = vst [vmem:[#allocation35_spill] sm:$0xff] %v15430_v4  ;;  %v15432_v5 = vpop.f32.mrb[14].mxu1  ;;  %v13355_v4 = vld [vmem:[%s17477_s3 + $0x200] ss:$16 sps:$4 sm:$0xff]  }
 0x222   : > { %17561 = vst [vmem:[#allocation36_spill] sm:$0xff] %v15432_v5  ;;  %v15434_v8 = vpop.f32.mrb[15].mxu1 }
 0x223   : > { %17562 = vst [vmem:[#allocation37_spill] sm:$0xff] %v15434_v8  ;;  %v1631_v8 = vlaneseq }
 0x224   : > { %11017 = vmatmul.mubr.msk.bf16.gmra.mrb[120].mxu1 %vm919_vm0, %v15146_v25  ;;  %11037 = vmatmul.mubr.msk.bf16.gmra.mrb[32].mxu0 %vm919_vm0, %v15228_v61 }
 0x225   : > { %1599 = vmatprep.mubr.bf16.mxu1 %v17494_v60  ;;  %2050 = vmatprep.mubr.bf16.mxu0 %v17494_v60  ;;  %v1632_v63 = vshrl.u32 %v1631_v8, 7 }
 0x227   : > { %v15442_v9 = vpop.f32.mrb[16].mxu1  ;;  %v16078_v58 = vsub.s32 2, %v1632_v63  ;;  %v16084_v56 = vsub.s32 0, %v1632_v63 }
 0x228   : > { %17563 = vst [vmem:[#allocation38_spill] sm:$0xff] %v15442_v9  ;;  %v15444_v11 = vpop.f32.mrb[17].mxu1 }
 0x229   : > { %17564 = vst [vmem:[#allocation39_spill] sm:$0xff] %v15444_v11  ;;  %v15446_v12 = vpop.f32.mrb[18].mxu1  ;;  %17577 = vst [vmem:[#allocation52_spill] sm:$0xff] %v16078_v58 }
 0x22a   : > { %17565 = vst [vmem:[#allocation40_spill] sm:$0xff] %v15446_v12  ;;  %v15448_v14 = vpop.f32.mrb[19].mxu1  ;;  %17580 = vst [vmem:[#allocation55_spill] sm:$0xff] %v16084_v56 }
 0x22b   : > { %17566 = vst [vmem:[#allocation41_spill] sm:$0xff] %v15448_v14 }
 0x22c   : > { %11018 = vmatmul.mubr.msk.bf16.gmra.mrb[124].mxu1 %vm919_vm0, %v15160_v31  ;;  %11038 = vmatmul.mubr.msk.bf16.gmra.mrb[36].mxu0 %vm919_vm0, %v15238_v0 }
 0x22d   : > { %1609 = vmatprep.mubr.bf16.mxu1 %v17494_v60  ;;  %2060 = vmatprep.mubr.bf16.mxu0 %v17494_v60 }
 0x22f   : > { %v15456_v17 = vpop.f32.mrb[20].mxu1 }
 0x230   : > { %17567 = vst [vmem:[#allocation42_spill] sm:$0xff] %v15456_v17  ;;  %v15458_v19 = vpop.f32.mrb[21].mxu1 }
 0x231   : > { %17568 = vst [vmem:[#allocation43_spill] sm:$0xff] %v15458_v19  ;;  %v15460_v20 = vpop.f32.mrb[22].mxu1 }
 0x232   : > { %17569 = vst [vmem:[#allocation44_spill] sm:$0xff] %v15460_v20  ;;  %v15462_v22 = vpop.f32.mrb[23].mxu1 }
 0x233   : > { %17570 = vst [vmem:[#allocation45_spill] sm:$0xff] %v15462_v22 }
 0x234   : > { %11019 = vmatmul.mubr.msk.bf16.gmra.mrb[128].mxu1 %vm919_vm0, %v15174_v37  ;;  %11039 = vmatmul.mubr.msk.bf16.gmra.mrb[40].mxu0 %vm919_vm0, %v15248_v3 }
 0x235   : > { %1619 = vmatprep.mubr.bf16.mxu1 %v17494_v60  ;;  %2070 = vmatprep.mubr.bf16.mxu0 %v17494_v60 }
 0x23c   : > { %11020 = vmatmul.mubr.msk.bf16.gmra.mrb[132].mxu1 %vm919_vm0, %v15188_v43  ;;  %11040 = vmatmul.mubr.msk.bf16.gmra.mrb[44].mxu0 %vm919_vm0, %v15258_v6 }
 0x23d   : > { %2080 = vmatprep.mubr.bf16.mxu0 %v17494_v60  ;;  %2273 = vmatprep.mubr.bf16.mxu1 %v17494_v60 }
 0x244   : > { %11041 = vmatmul.mubr.msk.bf16.gmra.mrb[48].mxu0 %vm919_vm0, %v15268_v10  ;;  %11057 = vmatmul.mubr.msk.bf16.vlgmr.msra.gmra.mrb[24].mxu1 %vm919_vm0, %v15130_v15  ;;  %v838_v15 = vld [vmem:[%s15088_s16 + $0x1c0] sm:$0xff] }
 0x245   : > { %3145 = vmatpush1.bf16.msra.mxu1 %v13250_v28  ;;  %2090 = vmatprep.mubr.bf16.mxu0 %v17494_v60  ;;  %v15568_v35 = vpack.c.bf16 %v839_v34, %v838_v15  ;;  %v13271_v28 = vld [vmem:[%s17477_s3 + $0x40] ss:$16 sps:$4 sm:$0xff]   ;;  %v13276_v15 = vld [vmem:[%s17477_s3 + $0x4c] ss:$16 sps:$4 sm:$0xff]   ;;  %v13279_v34 = vld [vmem:[%s17477_s3 + $0x64] ss:$16 sps:$4 sm:$0xff]  }
 0x246   : > { %2283 = vmatprep.mubr.bf16.mxu1 %v17494_v60  ;;  %3146 = vmatprep.subr.bf16.mxu1 %v13258_v32  ;;  %v13273_v32 = vld [vmem:[%s17477_s3 + $0x44] ss:$16 sps:$4 sm:$0xff]  }
 0x249   : > { %3147 = vmatpush1.bf16.msra.mxu1 %v13256_v33  ;;  %v13268_v33 = vld [vmem:[%s17477_s3 + $0x28] ss:$16 sps:$4 sm:$0xff]  }
 0x24a   : > { %4553 = vmatprep.subr.bf16.mxu1 %v13264_v44  ;;  %v13283_v44 = vld [vmem:[%s17477_s3 + $0x80] ss:$16 sps:$4 sm:$0xff]  }
 0x24c   : > { %11042 = vmatmul.mubr.msk.bf16.gmra.mrb[52].mxu0 %vm919_vm0, %v15278_v13  ;;  %11058 = vmatmul.mubr.msk.bf16.gmra.mrb[28].mxu1 %vm919_vm0, %v15144_v24 }
 0x24d   : > { %2100 = vmatprep.mubr.bf16.mxu0 %v17494_v60  ;;  %2293 = vmatprep.mubr.bf16.mxu1 %v17494_v60 }
 0x254   : > { %11043 = vmatmul.mubr.msk.bf16.gmra.mrb[56].mxu0 %vm919_vm0, %v15288_v18  ;;  %11059 = vmatmul.mubr.msk.bf16.gmra.mrb[32].mxu1 %vm919_vm0, %v15158_v30 }
 0x255   : > { %2110 = vmatprep.mubr.bf16.mxu0 %v17494_v60  ;;  %2303 = vmatprep.mubr.bf16.mxu1 %v17494_v60 }
 0x25c   : > { %11044 = vmatmul.mubr.msk.bf16.gmra.mrb[60].mxu0 %vm919_vm0, %v15298_v21  ;;  %11060 = vmatmul.mubr.msk.bf16.gmra.mrb[36].mxu1 %vm919_vm0, %v15172_v36 }
 0x25d   : > { %2120 = vmatprep.mubr.bf16.mxu0 %v17494_v60  ;;  %2313 = vmatprep.mubr.bf16.mxu1 %v17494_v60 }
 0x264   : > { %11045 = vmatmul.mubr.msk.bf16.gmra.mrb[64].mxu0 %vm919_vm0, %v15308_v26  ;;  %11061 = vmatmul.mubr.msk.bf16.gmra.mrb[40].mxu1 %vm919_vm0, %v15186_v42 }
 0x265   : > { %2130 = vmatprep.mubr.bf16.mxu0 %v17494_v60  ;;  %2323 = vmatprep.mubr.bf16.mxu1 %v17494_v60 }
 0x26c   : > { %11046 = vmatmul.mubr.msk.bf16.gmra.mrb[68].mxu0 %vm919_vm0, %v15318_v29  ;;  %11062 = vmatmul.mubr.msk.bf16.gmra.mrb[44].mxu1 %vm919_vm0, %v15198_v49 }
 0x26d   : > { %2140 = vmatprep.mubr.bf16.mxu0 %v17494_v60  ;;  %2333 = vmatprep.mubr.bf16.mxu1 %v17494_v60 }
 0x274   : > { %11047 = vmatmul.mubr.msk.bf16.gmra.mrb[72].mxu0 %vm919_vm0, %v15328_v38  ;;  %11063 = vmatmul.mubr.msk.bf16.gmra.mrb[48].mxu1 %vm919_vm0, %v15208_v54 }
 0x275   : > { %2150 = vmatprep.mubr.bf16.mxu0 %v17494_v60  ;;  %2343 = vmatprep.mubr.bf16.mxu1 %v17494_v60 }
 0x27c   : > { %11048 = vmatmul.mubr.msk.bf16.gmra.mrb[76].mxu0 %vm919_vm0, %v15338_v41  ;;  %11064 = vmatmul.mubr.msk.bf16.gmra.mrb[52].mxu1 %vm919_vm0, %v15218_v57 }
 0x27d   : > { %2160 = vmatprep.mubr.bf16.mxu0 %v17494_v60  ;;  %2353 = vmatprep.mubr.bf16.mxu1 %v17494_v60 }
 0x284   : > { %11049 = vmatmul.mubr.msk.bf16.gmra.mrb[80].mxu0 %vm919_vm0, %v15348_v46  ;;  %11065 = vmatmul.mubr.msk.bf16.gmra.mrb[56].mxu1 %vm919_vm0, %v15228_v61 }
 0x285   : > { %2170 = vmatprep.mubr.bf16.mxu0 %v17494_v60  ;;  %2363 = vmatprep.mubr.bf16.mxu1 %v17494_v60 }
 0x28c   : > { %11050 = vmatmul.mubr.msk.bf16.gmra.mrb[84].mxu0 %vm919_vm0, %v15118_v7  ;;  %11066 = vmatmul.mubr.msk.bf16.gmra.mrb[60].mxu1 %vm919_vm0, %v15238_v0 }
 0x28d   : > { %2180 = vmatprep.mubr.bf16.mxu0 %v17494_v60  ;;  %2373 = vmatprep.mubr.bf16.mxu1 %v17494_v60 }
 0x294   : > { %11051 = vmatmul.mubr.msk.bf16.gmra.mrb[88].mxu0 %vm919_vm0, %v15132_v16  ;;  %11067 = vmatmul.mubr.msk.bf16.gmra.mrb[64].mxu1 %vm919_vm0, %v15248_v3 }
 0x295   : > { %2190 = vmatprep.mubr.bf16.mxu0 %v17494_v60  ;;  %2383 = vmatprep.mubr.bf16.mxu1 %v17494_v60 }
 0x29c   : > { %11052 = vmatmul.mubr.msk.bf16.gmra.mrb[92].mxu0 %vm919_vm0, %v15146_v25  ;;  %11068 = vmatmul.mubr.msk.bf16.gmra.mrb[68].mxu1 %vm919_vm0, %v15258_v6 }
 0x29d   : > { %2200 = vmatprep.mubr.bf16.mxu0 %v17494_v60  ;;  %2393 = vmatprep.mubr.bf16.mxu1 %v17494_v60 }
 0x2a4   : > { %11053 = vmatmul.mubr.msk.bf16.gmra.mrb[96].mxu0 %vm919_vm0, %v15160_v31  ;;  %11069 = vmatmul.mubr.msk.bf16.gmra.mrb[72].mxu1 %vm919_vm0, %v15268_v10 }
 0x2a5   : > { %2210 = vmatprep.mubr.bf16.mxu0 %v17494_v60  ;;  %2403 = vmatprep.mubr.bf16.mxu1 %v17494_v60 }
 0x2ac   : > { %11054 = vmatmul.mubr.msk.bf16.gmra.mrb[100].mxu0 %vm919_vm0, %v15174_v37  ;;  %11070 = vmatmul.mubr.msk.bf16.gmra.mrb[76].mxu1 %vm919_vm0, %v15278_v13 }
 0x2ad   : > { %2220 = vmatprep.mubr.bf16.mxu0 %v17494_v60  ;;  %2413 = vmatprep.mubr.bf16.mxu1 %v17494_v60 }
 0x2b4   : > { %11055 = vmatmul.mubr.msk.bf16.gmra.mrb[104].mxu0 %vm919_vm0, %v15188_v43  ;;  %11071 = vmatmul.mubr.msk.bf16.gmra.mrb[80].mxu1 %vm919_vm0, %v15288_v18 }
 0x2b5   : > { %2230 = vmatprep.mubr.bf16.mxu0 %v17494_v60  ;;  %2423 = vmatprep.mubr.bf16.mxu1 %v17494_v60 }
 0x2bc   : > { %11056 = vmatmul.mubr.msk.bf16.gmra.mrb[108].mxu0 %vm919_vm0, %v15568_v35  ;;  %11072 = vmatmul.mubr.msk.bf16.gmra.mrb[84].mxu1 %vm919_vm0, %v15298_v21 }
 0x2bd   : > { %2433 = vmatprep.mubr.bf16.mxu1 %v17494_v60  ;;  %2863 = vmatprep.mubr.bf16.mxu0 %v17494_v60 }
 0x2c4   : > { %11073 = vmatmul.mubr.msk.bf16.gmra.mrb[88].mxu1 %vm919_vm0, %v15308_v26  ;;  %11093 = vmatmul.mubr.msk.bf16.vlgmr.msra.gmra.mrb[0].mxu0 %vm919_vm0, %v15144_v24 }
 0x2c5   : > { %2443 = vmatprep.mubr.bf16.mxu1 %v17494_v60  ;;  %2873 = vmatprep.mubr.bf16.mxu0 %v17494_v60 }
 0x2c6   : > { %4381 = vmatpush1.bf16.msra.mxu0 %v13259_v39  ;;  %v13277_v39 = vld [vmem:[%s17477_s3 + $0x60] ss:$16 sps:$4 sm:$0xff]  }
 0x2c7   : > { %4382 = vmatprep.subr.bf16.mxu0 %v13267_v47  ;;  %v13289_v47 = vld [vmem:[%s17477_s3 + $0xa0] ss:$16 sps:$4 sm:$0xff]  }
 0x2ca   : > { %4383 = vmatpush1.bf16.msra.mxu0 %v13265_v45  ;;  %v13286_v45 = vld [vmem:[%s17477_s3 + $0x88] ss:$16 sps:$4 sm:$0xff]  }
 0x2cb   : > { %4384 = vmatprep.subr.bf16.mxu0 %v13273_v32  ;;  %v13298_v32 = vld [vmem:[%s17477_s3 + $0xc8] ss:$16 sps:$4 sm:$0xff]  }
 0x2cc   : > { %11074 = vmatmul.mubr.msk.bf16.gmra.mrb[92].mxu1 %vm919_vm0, %v15318_v29  ;;  %11094 = vmatmul.mubr.msk.bf16.gmra.mrb[4].mxu0 %vm919_vm0, %v15158_v30 }
 0x2cd   : > { %2453 = vmatprep.mubr.bf16.mxu1 %v17494_v60  ;;  %2883 = vmatprep.mubr.bf16.mxu0 %v17494_v60 }
 0x2ce   : > { %4385 = vmatpush1.bf16.msra.mxu0 %v13271_v28  ;;  %v13297_v28 = vld [vmem:[%s17477_s3 + $0xc4] ss:$16 sps:$4 sm:$0xff]  }
 0x2cf   : > { %4386 = vmatprep.subr.bf16.mxu0 %v13279_v34  ;;  %v13307_v34 = vld [vmem:[%s17477_s3 + $0x100] ss:$16 sps:$4 sm:$0xff]  }
 0x2d2   : > { %4387 = vmatpush1.bf16.msra.mxu0 %v13277_v39  ;;  %v13309_v39 = vld [vmem:[%s17477_s3 + $0x104] ss:$16 sps:$4 sm:$0xff]  }
 0x2d4   : > { %11075 = vmatmul.mubr.msk.bf16.gmra.mrb[96].mxu1 %vm919_vm0, %v15328_v38  ;;  %11095 = vmatmul.mubr.msk.bf16.gmra.mrb[8].mxu0 %vm919_vm0, %v15172_v36 }
 0x2d5   : > { %2463 = vmatprep.mubr.bf16.mxu1 %v17494_v60  ;;  %2893 = vmatprep.mubr.bf16.mxu0 %v17494_v60 }
 0x2dc   : > { %11076 = vmatmul.mubr.msk.bf16.gmra.mrb[100].mxu1 %vm919_vm0, %v15338_v41  ;;  %11096 = vmatmul.mubr.msk.bf16.gmra.mrb[12].mxu0 %vm919_vm0, %v15186_v42 }
 0x2dd   : > { %2473 = vmatprep.mubr.bf16.mxu1 %v17494_v60  ;;  %2903 = vmatprep.mubr.bf16.mxu0 %v17494_v60 }
 0x2e4   : > { %11077 = vmatmul.mubr.msk.bf16.gmra.mrb[104].mxu1 %vm919_vm0, %v15348_v46  ;;  %11097 = vmatmul.mubr.msk.bf16.gmra.mrb[16].mxu0 %vm919_vm0, %v15198_v49 }
 0x2e5   : > { %2483 = vmatprep.mubr.bf16.mxu1 %v17494_v60  ;;  %2913 = vmatprep.mubr.bf16.mxu0 %v17494_v60 }
 0x2ec   : > { %11078 = vmatmul.mubr.msk.bf16.gmra.mrb[108].mxu1 %vm919_vm0, %v15118_v7  ;;  %11098 = vmatmul.mubr.msk.bf16.gmra.mrb[20].mxu0 %vm919_vm0, %v15208_v54 }
 0x2ed   : > { %2493 = vmatprep.mubr.bf16.mxu1 %v17494_v60  ;;  %2923 = vmatprep.mubr.bf16.mxu0 %v17494_v60 }
 0x2f4   : > { %11079 = vmatmul.mubr.msk.bf16.gmra.mrb[112].mxu1 %vm919_vm0, %v15132_v16  ;;  %11099 = vmatmul.mubr.msk.bf16.gmra.mrb[24].mxu0 %vm919_vm0, %v15218_v57 }
 0x2f5   : > { %2503 = vmatprep.mubr.bf16.mxu1 %v17494_v60  ;;  %2933 = vmatprep.mubr.bf16.mxu0 %v17494_v60 }
 0x2fc   : > { %11080 = vmatmul.mubr.msk.bf16.gmra.mrb[116].mxu1 %vm919_vm0, %v15146_v25  ;;  %11100 = vmatmul.mubr.msk.bf16.gmra.mrb[28].mxu0 %vm919_vm0, %v15228_v61 }
 0x2fd   : > { %2513 = vmatprep.mubr.bf16.mxu1 %v17494_v60  ;;  %2943 = vmatprep.mubr.bf16.mxu0 %v17494_v60 }
 0x304   : > { %11081 = vmatmul.mubr.msk.bf16.gmra.mrb[120].mxu1 %vm919_vm0, %v15160_v31  ;;  %11101 = vmatmul.mubr.msk.bf16.gmra.mrb[32].mxu0 %vm919_vm0, %v15238_v0 }
 0x305   : > { %2523 = vmatprep.mubr.bf16.mxu1 %v17494_v60  ;;  %2953 = vmatprep.mubr.bf16.mxu0 %v17494_v60 }
 0x30c   : > { %11082 = vmatmul.mubr.msk.bf16.gmra.mrb[124].mxu1 %vm919_vm0, %v15174_v37  ;;  %11102 = vmatmul.mubr.msk.bf16.gmra.mrb[36].mxu0 %vm919_vm0, %v15248_v3 }
 0x30d   : > { %2533 = vmatprep.mubr.bf16.mxu1 %v17494_v60  ;;  %2963 = vmatprep.mubr.bf16.mxu0 %v17494_v60 }
 0x314   : > { %11083 = vmatmul.mubr.msk.bf16.gmra.mrb[128].mxu1 %vm919_vm0, %v15188_v43  ;;  %11103 = vmatmul.mubr.msk.bf16.gmra.mrb[40].mxu0 %vm919_vm0, %v15258_v6 }
 0x315   : > { %2543 = vmatprep.mubr.bf16.mxu1 %v17494_v60  ;;  %2973 = vmatprep.mubr.bf16.mxu0 %v17494_v60 }
 0x31c   : > { %11084 = vmatmul.mubr.msk.bf16.gmra.mrb[132].mxu1 %vm919_vm0, %v15568_v35  ;;  %11104 = vmatmul.mubr.msk.bf16.gmra.mrb[44].mxu0 %vm919_vm0, %v15268_v10 }
 0x31d   : > { %2983 = vmatprep.mubr.bf16.mxu0 %v17494_v60  ;;  %3176 = vmatprep.mubr.bf16.mxu1 %v17494_v60 }
 0x324   : > { %11105 = vmatmul.mubr.msk.bf16.gmra.mrb[48].mxu0 %vm919_vm0, %v15278_v13  ;;  %11121 = vmatmul.mubr.msk.bf16.vlgmr.msra.gmra.mrb[24].mxu1 %vm919_vm0, %v15144_v24  ;;  %v13274_v24 = vld [vmem:[%s17477_s3 + $0x48] ss:$16 sps:$4 sm:$0xff]  }
 0x325   : > { %2993 = vmatprep.mubr.bf16.mxu0 %v17494_v60  ;;  %3186 = vmatprep.mubr.bf16.mxu1 %v17494_v60 }
 0x326   : > { %4554 = vmatpush1.bf16.msra.mxu1 %v13262_v23  ;;  %v13291_v23 = vld [vmem:[%s17477_s3 + $0xa4] ss:$16 sps:$4 sm:$0xff]  }
 0x327   : > { %4555 = vmatprep.subr.bf16.mxu1 %v13270_v27  ;;  %v13295_v27 = vld [vmem:[%s17477_s3 + $0xc0] ss:$16 sps:$4 sm:$0xff]  }
 0x32a   : > { %4556 = vmatpush1.bf16.msra.mxu1 %v13268_v33  ;;  %v13303_v33 = vld [vmem:[%s17477_s3 + $0xe4] ss:$16 sps:$4 sm:$0xff]  }
 0x32b   : > { %4557 = vmatprep.subr.bf16.mxu1 %v13276_v15  ;;  %v13301_v15 = vld [vmem:[%s17477_s3 + $0xe0] ss:$16 sps:$4 sm:$0xff]  }
 0x32c   : > { %11106 = vmatmul.mubr.msk.bf16.gmra.mrb[52].mxu0 %vm919_vm0, %v15288_v18  ;;  %11122 = vmatmul.mubr.msk.bf16.gmra.mrb[28].mxu1 %vm919_vm0, %v15158_v30  ;;  %v13280_v30 = vld [vmem:[%s17477_s3 + $0x68] ss:$16 sps:$4 sm:$0xff]  }
 0x32d   : > { %3003 = vmatprep.mubr.bf16.mxu0 %v17494_v60  ;;  %3196 = vmatprep.mubr.bf16.mxu1 %v17494_v60 }
 0x32e   : > { %4558 = vmatpush1.bf16.msra.mxu1 %v13274_v24  ;;  %v13304_v24 = vld [vmem:[%s17477_s3 + $0xe8] ss:$16 sps:$4 sm:$0xff]  }
 0x32f   : > { %4559 = vmatprep.subr.bf16.mxu1 %v13282_v40  ;;  %v13310_v40 = vld [vmem:[%s17477_s3 + $0x108] ss:$16 sps:$4 sm:$0xff]  }
 0x332   : > { %4560 = vmatpush1.bf16.msra.mxu1 %v13280_v30  ;;  %v13315_v30 = vld [vmem:[%s17477_s3 + $0x124] ss:$16 sps:$4 sm:$0xff]  }
 0x334   : > { %11107 = vmatmul.mubr.msk.bf16.gmra.mrb[56].mxu0 %vm919_vm0, %v15298_v21  ;;  %11123 = vmatmul.mubr.msk.bf16.gmra.mrb[32].mxu1 %vm919_vm0, %v15172_v36  ;;  %v13285_v36 = vld [vmem:[%s17477_s3 + $0x84] ss:$16 sps:$4 sm:$0xff]  }
 0x335   : > { %3013 = vmatprep.mubr.bf16.mxu0 %v17494_v60  ;;  %3206 = vmatprep.mubr.bf16.mxu1 %v17494_v60 }
 0x336   : > { %4388 = vmatprep.subr.bf16.mxu0 %v13285_v36  ;;  %v13313_v36 = vld [vmem:[%s17477_s3 + $0x120] ss:$16 sps:$4 sm:$0xff]  }
 0x337   : > { %4389 = vmatpush1.bf16.msra.mxu0 %v13283_v44  ;;  %v13318_v44 = vld [vmem:[%s17477_s3 + $0x12c] ss:$16 sps:$4 sm:$0xff]  }
 0x338   : > { %4390 = vmatprep.subr.bf16.mxu0 %v13291_v23  ;;  %v13324_v23 = vld [vmem:[%s17477_s3 + $0x14c] ss:$16 sps:$4 sm:$0xff]  }
 0x33b   : > { %4391 = vmatpush1.bf16.msra.mxu0 %v13289_v47  ;;  %v13321_v47 = vld [vmem:[%s17477_s3 + $0x144] ss:$16 sps:$4 sm:$0xff]  }
 0x33c   : > { %11108 = vmatmul.mubr.msk.bf16.gmra.mrb[60].mxu0 %vm919_vm0, %v15308_v26  ;;  %11124 = vmatmul.mubr.msk.bf16.gmra.mrb[36].mxu1 %vm919_vm0, %v15186_v42  ;;  %v13288_v42 = vld [vmem:[%s17477_s3 + $0x8c] ss:$16 sps:$4 sm:$0xff]  }
 0x33d   : > { %3023 = vmatprep.mubr.bf16.mxu0 %v17494_v60  ;;  %3216 = vmatprep.mubr.bf16.mxu1 %v17494_v60 }
 0x33e   : > { %4561 = vmatprep.subr.bf16.mxu1 %v13288_v42  ;;  %4392 = vmatprep.subr.bf16.mxu0 %v13297_v28  ;;  %v13319_v42 = vld [vmem:[%s17477_s3 + $0x140] ss:$16 sps:$4 sm:$0xff]   ;;  %v13328_v28 = vld [vmem:[%s17477_s3 + $0x168] ss:$16 sps:$4 sm:$0xff]  }
 0x33f   : > { %4562 = vmatpush1.bf16.msra.mxu1 %v13286_v45  ;;  %4393 = vmatpush1.bf16.msra.mxu0 %v13295_v27  ;;  %v13316_v45 = vld [vmem:[%s17477_s3 + $0x128] ss:$16 sps:$4 sm:$0xff]   ;;  %v13325_v27 = vld [vmem:[%s17477_s3 + $0x160] ss:$16 sps:$4 sm:$0xff]  }
 0x340   : > { %4394 = vmatprep.subr.bf16.mxu0 %v13303_v33  ;;  %v13336_v33 = vld [vmem:[%s17477_s3 + $0x18c] ss:$16 sps:$4 sm:$0xff]  }
 0x343   : > { %4395 = vmatpush1.bf16.msra.mxu0 %v13301_v15  ;;  %v13342_v15 = vld [vmem:[%s17477_s3 + $0x1ac] ss:$16 sps:$4 sm:$0xff]  }
 0x344   : > { %11109 = vmatmul.mubr.msk.bf16.gmra.mrb[64].mxu0 %vm919_vm0, %v15318_v29  ;;  %11125 = vmatmul.mubr.msk.bf16.gmra.mrb[40].mxu1 %vm919_vm0, %v15198_v49  ;;  %v13292_v49 = vld [vmem:[%s17477_s3 + $0xa8] ss:$16 sps:$4 sm:$0xff]  }
 0x345   : > { %3033 = vmatprep.mubr.bf16.mxu0 %v17494_v60  ;;  %3226 = vmatprep.mubr.bf16.mxu1 %v17494_v60 }
 0x346   : > { %4396 = vmatprep.subr.bf16.mxu0 %v13309_v39  ;;  %v13345_v39 = vld [vmem:[%s17477_s3 + $0x1c4] ss:$16 sps:$4 sm:$0xff]  }
 0x347   : > { %4397 = vmatpush1.bf16.msra.mxu0 %v13307_v34  ;;  %v13340_v34 = vld [vmem:[%s17477_s3 + $0x1a8] ss:$16 sps:$4 sm:$0xff]  }
 0x348   : > { %4398 = vmatprep.subr.bf16.mxu0 %v13315_v30  ;;  %v13351_v30 = vld [vmem:[%s17477_s3 + $0x1e4] ss:$16 sps:$4 sm:$0xff]  }
 0x34b   : > { %4399 = vmatpush1.bf16.msra.mxu0 %v13313_v36  ;;  %v13349_v36 = vld [vmem:[%s17477_s3 + $0x1e0] ss:$16 sps:$4 sm:$0xff]  }
 0x34c   : > { %11110 = vmatmul.mubr.msk.bf16.gmra.mrb[68].mxu0 %vm919_vm0, %v15328_v38  ;;  %11126 = vmatmul.mubr.msk.bf16.gmra.mrb[44].mxu1 %vm919_vm0, %v15208_v54  ;;  %v13294_v54 = vld [vmem:[%s17477_s3 + $0xac] ss:$16 sps:$4 sm:$0xff]  }
 0x34d   : > { %3043 = vmatprep.mubr.bf16.mxu0 %v17494_v60  ;;  %3236 = vmatprep.mubr.bf16.mxu1 %v17494_v60 }
 0x34e   : > { %4563 = vmatprep.subr.bf16.mxu1 %v13294_v54  ;;  %4400 = vmatprep.subr.bf16.mxu0 %v13321_v47  ;;  %v13330_v54 = vld [vmem:[%s17477_s3 + $0x16c] ss:$16 sps:$4 sm:$0xff]  }
 0x34f   : > { %4564 = vmatpush1.bf16.msra.mxu1 %v13292_v49  ;;  %4401 = vmatpush1.bf16.msra.mxu0 %v13319_v42  ;;  %v13327_v49 = vld [vmem:[%s17477_s3 + $0x164] ss:$16 sps:$4 sm:$0xff]   ;;  %v841_v42 = vld [vmem:[%s15088_s16 + $0x1d8] sm:$0xff] }
 0x350   : > { %4402 = vmatprep.subr.bf16.mxu0 %v13327_v49 }
 0x353   : > { %4403 = vmatpush1.bf16.msra.mxu0 %v13325_v27 }
 0x354   : > { %11111 = vmatmul.mubr.msk.bf16.gmra.mrb[72].mxu0 %vm919_vm0, %v15338_v41  ;;  %11127 = vmatmul.mubr.msk.bf16.gmra.mrb[48].mxu1 %vm919_vm0, %v15218_v57  ;;  %v13300_v57 = vld [vmem:[%s17477_s3 + $0xcc] ss:$16 sps:$4 sm:$0xff]  }
 0x355   : > { %3053 = vmatprep.mubr.bf16.mxu0 %v17494_v60  ;;  %3246 = vmatprep.mubr.bf16.mxu1 %v17494_v60 }
 0x356   : > { %4565 = vmatprep.subr.bf16.mxu1 %v13300_v57  ;;  %v13333_v57 = vld [vmem:[%s17477_s3 + $0x184] ss:$16 sps:$4 sm:$0xff]  }
 0x357   : > { %4566 = vmatpush1.bf16.msra.mxu1 %v13298_v32  ;;  %v13331_v32 = vld [vmem:[%s17477_s3 + $0x180] ss:$16 sps:$4 sm:$0xff]   ;;  %4404 = vmatprep.subr.bf16.mxu0 %v13333_v57 }
 0x358   : > { %4405 = vmatpush1.bf16.msra.mxu0 %v13331_v32 }
 0x35c   : > { %11112 = vmatmul.mubr.msk.bf16.gmra.mrb[76].mxu0 %vm919_vm0, %v15348_v46  ;;  %11128 = vmatmul.mubr.msk.bf16.gmra.mrb[52].mxu1 %vm919_vm0, %v15228_v61  ;;  %v13306_v61 = vld [vmem:[%s17477_s3 + $0xec] ss:$16 sps:$4 sm:$0xff]  }
 0x35d   : > { %3063 = vmatprep.mubr.bf16.mxu0 %v17494_v60  ;;  %3256 = vmatprep.mubr.bf16.mxu1 %v17494_v60 }
 0x35e   : > { %4567 = vmatprep.subr.bf16.mxu1 %v13306_v61  ;;  %v13339_v61 = vld [vmem:[%s17477_s3 + $0x1a4] ss:$16 sps:$4 sm:$0xff]  }
 0x35f   : > { %4568 = vmatpush1.bf16.msra.mxu1 %v13304_v24  ;;  %v13337_v24 = vld [vmem:[%s17477_s3 + $0x1a0] ss:$16 sps:$4 sm:$0xff]   ;;  %4406 = vmatprep.subr.bf16.mxu0 %v13339_v61 }
 0x360   : > { %4407 = vmatpush1.bf16.msra.mxu0 %v13337_v24 }
 0x361   : > { %4408 = vmatprep.subr.bf16.mxu0 %v13345_v39 }
 0x364   : > { %11113 = vmatmul.mubr.msk.bf16.gmra.mrb[80].mxu0 %vm919_vm0, %v15118_v7  ;;  %11129 = vmatmul.mubr.msk.bf16.gmra.mrb[56].mxu1 %vm919_vm0, %v15238_v0  ;;  %v13312_v0 = vld [vmem:[%s17477_s3 + $0x10c] ss:$16 sps:$4 sm:$0xff]  }
 0x365   : > { %3073 = vmatprep.mubr.bf16.mxu0 %v17494_v60  ;;  %3266 = vmatprep.mubr.bf16.mxu1 %v17494_v60 }
 0x366   : > { %4569 = vmatprep.subr.bf16.mxu1 %v13312_v0  ;;  %v13343_v0 = vld [vmem:[%s17477_s3 + $0x1c0] ss:$16 sps:$4 sm:$0xff]  }
 0x367   : > { %4570 = vmatpush1.bf16.msra.mxu1 %v13310_v40  ;;  %v13348_v40 = vld [vmem:[%s17477_s3 + $0x1cc] ss:$16 sps:$4 sm:$0xff]   ;;  %4409 = vmatpush1.bf16.msra.mxu0 %v13343_v0 }
 0x368   : > { %4571 = vmatprep.subr.bf16.mxu1 %v13318_v44  ;;  %v13354_v44 = vld [vmem:[%s17477_s3 + $0x1ec] ss:$16 sps:$4 sm:$0xff]   ;;  %4410 = vmatprep.subr.bf16.mxu0 %v13351_v30 }
 0x36b   : > { %4572 = vmatpush1.bf16.msra.mxu1 %v13316_v45  ;;  %v13352_v45 = vld [vmem:[%s17477_s3 + $0x1e8] ss:$16 sps:$4 sm:$0xff]   ;;  %4411 = vmatpush1.bf16.msra.mxu0 %v13349_v36 }
 0x36c   : > { %11114 = vmatmul.mubr.msk.bf16.gmra.mrb[84].mxu0 %vm919_vm0, %v15132_v16  ;;  %11130 = vmatmul.mubr.msk.bf16.gmra.mrb[60].mxu1 %vm919_vm0, %v15248_v3  ;;  %v13322_v3 = vld [vmem:[%s17477_s3 + $0x148] ss:$16 sps:$4 sm:$0xff]  }
 0x36d   : > { %3083 = vmatprep.mubr.bf16.mxu0 %v17494_v60  ;;  %3276 = vmatprep.mubr.bf16.mxu1 %v17494_v60 }
 0x36e   : > { %4573 = vmatprep.subr.bf16.mxu1 %v13324_v23  ;;  %5272 = vmatprep.subr.bf16.mxu0 %v13357_v2  ;;  %v16082_v2 = vsub.s32 3, %v1632_v63 }
 0x36f   : > { %4574 = vmatpush1.bf16.msra.mxu1 %v13322_v3 }
 0x370   : > { %4575 = vmatprep.subr.bf16.mxu1 %v13330_v54  ;;  %17579 = vst [vmem:[#allocation54_spill] sm:$0xff] %v16082_v2 }
 0x373   : > { %4576 = vmatpush1.bf16.msra.mxu1 %v13328_v28 }
 0x374   : > { %11115 = vmatmul.mubr.msk.bf16.gmra.mrb[88].mxu0 %vm919_vm0, %v15146_v25  ;;  %11131 = vmatmul.mubr.msk.bf16.gmra.mrb[64].mxu1 %vm919_vm0, %v15258_v6  ;;  %v13334_v6 = vld [vmem:[%s17477_s3 + $0x188] ss:$16 sps:$4 sm:$0xff]  }
 0x375   : > { %3093 = vmatprep.mubr.bf16.mxu0 %v17494_v60  ;;  %3286 = vmatprep.mubr.bf16.mxu1 %v17494_v60 }
 0x376   : > { %4577 = vmatprep.subr.bf16.mxu1 %v13336_v33 }
 0x377   : > { %4578 = vmatpush1.bf16.msra.mxu1 %v13334_v6 }
 0x378   : > { %4579 = vmatprep.subr.bf16.mxu1 %v13342_v15 }
 0x37b   : > { %4580 = vmatpush1.bf16.msra.mxu1 %v13340_v34 }
 0x37c   : > { %11116 = vmatmul.mubr.msk.bf16.gmra.mrb[92].mxu0 %vm919_vm0, %v15160_v31  ;;  %11132 = vmatmul.mubr.msk.bf16.gmra.mrb[68].mxu1 %vm919_vm0, %v15268_v10  ;;  %v13346_v10 = vld [vmem:[%s17477_s3 + $0x1c8] ss:$16 sps:$4 sm:$0xff]  }
 0x37d   : > { %3103 = vmatprep.mubr.bf16.mxu0 %v17494_v60  ;;  %3296 = vmatprep.mubr.bf16.mxu1 %v17494_v60 }
 0x37e   : > { %4581 = vmatprep.subr.bf16.mxu1 %v13348_v40 }
 0x37f   : > { %4582 = vmatpush1.bf16.msra.mxu1 %v13346_v10 }
 0x380   : > { %4583 = vmatprep.subr.bf16.mxu1 %v13354_v44 }
 0x383   : > { %4584 = vmatpush1.bf16.msra.mxu1 %v13352_v45 }
 0x384   : > { %11117 = vmatmul.mubr.msk.bf16.gmra.mrb[96].mxu0 %vm919_vm0, %v15174_v37  ;;  %11133 = vmatmul.mubr.msk.bf16.gmra.mrb[72].mxu1 %vm919_vm0, %v15278_v13  ;;  %v840_v13 = vld [vmem:[%s15088_s16 + $0x1d0] sm:$0xff] }
 0x385   : > { %3113 = vmatprep.mubr.bf16.mxu0 %v17494_v60  ;;  %3306 = vmatprep.mubr.bf16.mxu1 %v17494_v60 }
 0x38c   : > { %11118 = vmatmul.mubr.msk.bf16.gmra.mrb[100].mxu0 %vm919_vm0, %v15188_v43  ;;  %11134 = vmatmul.mubr.msk.bf16.gmra.mrb[76].mxu1 %vm919_vm0, %v15288_v18  ;;  %v15936_v18 = vpack.c.bf16 %v841_v42, %v840_v13 }
 0x38d   : > { %3123 = vmatprep.mubr.bf16.mxu0 %v17494_v60  ;;  %3316 = vmatprep.mubr.bf16.mxu1 %v17494_v60 }
 0x394   : > { %11119 = vmatmul.mubr.msk.bf16.gmra.mrb[104].mxu0 %vm919_vm0, %v15568_v35  ;;  %11135 = vmatmul.mubr.msk.bf16.gmra.mrb[80].mxu1 %vm919_vm0, %v15298_v21 }
 0x395   : > { %3133 = vmatprep.mubr.bf16.mxu0 %v17494_v60  ;;  %3326 = vmatprep.mubr.bf16.mxu1 %v17494_v60 }
 0x397   : > { %v15932_v47 = vpop.f32.mrb[0].mxu0 }
 0x398   : > { %v15934_v23 = vpop.f32.mrb[1].mxu0 }
 0x399   : > { %v15938_v3 = vpop.f32.mrb[2].mxu0 }
 0x39a   : > { %v15940_v49 = vpop.f32.mrb[3].mxu0 }
 0x39c   : > { %11120 = vmatmul.mubr.msk.bf16.gmra.mrb[108].mxu0 %vm919_vm0, %v15936_v18  ;;  %11136 = vmatmul.mubr.msk.bf16.gmra.mrb[84].mxu1 %vm919_vm0, %v15308_v26 }
 0x39d   : > { %3336 = vmatprep.mubr.bf16.mxu1 %v17494_v60  ;;  %4412 = vmatprep.mubr.bf16.mxu0 %v17494_v60 }
 0x39f   : > { %v15948_v21 = vpop.f32.mrb[4].mxu0 }
 0x3a0   : > { %v15950_v54 = vpop.f32.mrb[5].mxu0 }
 0x3a1   : > { %v15952_v27 = vpop.f32.mrb[6].mxu0 }
 0x3a2   : > { %v15954_v28 = vpop.f32.mrb[7].mxu0 }
 0x3a4   : > { %11137 = vmatmul.mubr.msk.bf16.gmra.mrb[88].mxu1 %vm919_vm0, %v15318_v29  ;;  %4413 = vmatmul.mubr.bf16.vlgmr.msra.gmra.mrb[112].mxu0 %v17494_v60 }
 0x3a5   : > { %3346 = vmatprep.mubr.bf16.mxu1 %v17494_v60  ;;  %5273 = vmatpush1.bf16.msra.mxu0 %v13355_v4  ;;  %v842_v4 = vld [vmem:[#allocation6] sm:$0xf] }
 0x3a6   : > { %5274 = vmatprep.subr.bf16.mxu0 %v13363_v1  ;;  %v16093_v1 = vrot.slane %v842_v4, %v16078_v58 }
 0x3a7   : > { %v15960_v26 = vpop.f32.mrb[8].mxu0 }
 0x3a8   : > { %v15962_v32 = vpop.f32.mrb[9].mxu0 }
 0x3a9   : > { %v15964_v57 = vpop.f32.mrb[10].mxu0  ;;  %5275 = vmatpush1.bf16.msra.mxu0 %v13361_v62 }
 0x3aa   : > { %v15966_v33 = vpop.f32.mrb[11].mxu0 }
 0x3ac   : > { %11138 = vmatmul.mubr.msk.bf16.gmra.mrb[92].mxu1 %vm919_vm0, %v15328_v38 }
 0x3ad   : > { %3356 = vmatprep.mubr.bf16.mxu1 %v17494_v60 }
 0x3af   : > { %v15971_v6 = vpop.f32.mrb[12].mxu0 }
 0x3b0   : > { %v15973_v29 = vpop.f32.mrb[13].mxu0 }
 0x3b1   : > { %v15975_v61 = vpop.f32.mrb[14].mxu0 }
 0x3b2   : > { %v15977_v15 = vpop.f32.mrb[15].mxu0 }
 0x3b4   : > { %11139 = vmatmul.mubr.msk.bf16.gmra.mrb[96].mxu1 %vm919_vm0, %v15338_v41 }
 0x3b5   : > { %3366 = vmatprep.mubr.bf16.mxu1 %v17494_v60 }
 0x3b7   : > { %v15982_v24 = vpop.f32.mrb[16].mxu0 }
 0x3b8   : > { %v15984_v34 = vpop.f32.mrb[17].mxu0 }
 0x3b9   : > { %v15986_v38 = vpop.f32.mrb[18].mxu0 }
 0x3ba   : > { %v15988_v39 = vpop.f32.mrb[19].mxu0 }
 0x3bc   : > { %11140 = vmatmul.mubr.msk.bf16.gmra.mrb[100].mxu1 %vm919_vm0, %v15348_v46 }
 0x3bd   : > { %3376 = vmatprep.mubr.bf16.mxu1 %v17494_v60 }
 0x3bf   : > { %v15993_v40 = vpop.f32.mrb[20].mxu0 }
 0x3c0   : > { %v15995_v0 = vpop.f32.mrb[21].mxu0 }
 0x3c1   : > { %v15997_v41 = vpop.f32.mrb[22].mxu0 }
 0x3c2   : > { %v15999_v10 = vpop.f32.mrb[23].mxu0 }
 0x3c4   : > { %11141 = vmatmul.mubr.msk.bf16.gmra.mrb[104].mxu1 %vm919_vm0, %v15118_v7 }
 0x3c5   : > { %3386 = vmatprep.mubr.bf16.mxu1 %v17494_v60 }
 0x3c7   : > { %v16004_v30 = vpop.f32.mrb[24].mxu0 }
 0x3c8   : > { %v16006_v44 = vpop.f32.mrb[25].mxu0 }
 0x3c9   : > { %v16008_v46 = vpop.f32.mrb[26].mxu0 }
 0x3ca   : > { %v16010_v36 = vpop.f32.mrb[27].mxu0 }
 0x3cc   : > { %11142 = vmatmul.mubr.msk.bf16.gmra.mrb[108].mxu1 %vm919_vm0, %v15132_v16 }
 0x3cd   : > { %3396 = vmatprep.mubr.bf16.mxu1 %v17494_v60 }
 0x3cf   : > { %v16015_v45 = vpop.f32.mrb[28].mxu0 }
 0x3d0   : > { %v16017_v13 = vpop.f32.mrb[29].mxu0 }
 0x3d1   : > { %v16019_v7 = vpop.f32.mrb[30].mxu0 }
 0x3d2   : > { %v16021_v42 = vpop.f32.mrb[31].mxu0 }
 0x3d4   : > { %11143 = vmatmul.mubr.msk.bf16.gmra.mrb[112].mxu1 %vm919_vm0, %v15146_v25 }
 0x3d5   : > { %3406 = vmatprep.mubr.bf16.mxu1 %v17494_v60 }
 0x3d7   : > { %v16026_v22 = vpop.f32.mrb[32].mxu0 }
 0x3d8   : > { %v16028_v20 = vpop.f32.mrb[33].mxu0 }
 0x3d9   : > { %v16030_v16 = vpop.f32.mrb[34].mxu0 }
 0x3da   : > { %v16032_v19 = vpop.f32.mrb[35].mxu0 }
 0x3dc   : > { %11144 = vmatmul.mubr.msk.bf16.gmra.mrb[116].mxu1 %vm919_vm0, %v15160_v31 }
 0x3dd   : > { %3416 = vmatprep.mubr.bf16.mxu1 %v17494_v60 }
 0x3df   : > { %v16037_v17 = vpop.f32.mrb[36].mxu0 }
 0x3e0   : > { %v16039_v14 = vpop.f32.mrb[37].mxu0 }
 0x3e1   : > { %v16041_v25 = vpop.f32.mrb[38].mxu0 }
 0x3e2   : > { %v16043_v12 = vpop.f32.mrb[39].mxu0 }
 0x3e4   : > { %11145 = vmatmul.mubr.msk.bf16.gmra.mrb[120].mxu1 %vm919_vm0, %v15174_v37  ;;  %v13360_v37 = vld [vmem:[%s17477_s3 + $0x20c] ss:$16 sps:$4 sm:$0xff]  }
 0x3e5   : > { %3426 = vmatprep.mubr.bf16.mxu1 %v17494_v60  ;;  %5445 = vmatprep.subr.bf16.mxu1 %v13360_v37  ;;  %v16088_v37 = vsub.s32 1, %v1632_v63 }
 0x3e7   : > { %v16048_v11 = vpop.f32.mrb[40].mxu0  ;;  %17582 = vst [vmem:[#allocation57_spill] sm:$0xff] %v16088_v37 }
 0x3e8   : > { %17571 = vst [vmem:[#allocation46_spill] sm:$0xff] %v16048_v11  ;;  %v16050_v9 = vpop.f32.mrb[41].mxu0 }
 0x3e9   : > { %17572 = vst [vmem:[#allocation47_spill] sm:$0xff] %v16050_v9  ;;  %v16052_v31 = vpop.f32.mrb[42].mxu0 }
 0x3ea   : > { %17573 = vst [vmem:[#allocation48_spill] sm:$0xff] %v16052_v31  ;;  %v16054_v5 = vpop.f32.mrb[43].mxu0 }
 0x3eb   : > { %17574 = vst [vmem:[#allocation49_spill] sm:$0xff] %v16054_v5 }
 0x3ec   : > { %11146 = vmatmul.mubr.msk.bf16.gmra.mrb[124].mxu1 %vm919_vm0, %v15188_v43 }
 0x3ed   : > { %3436 = vmatprep.mubr.bf16.mxu1 %v17494_v60 }
 0x3ef   : > { %v16074_v59 = vpop.f32.mrb[44].mxu0 }
 0x3f0   : > { %17575 = vst [vmem:[#allocation50_spill] sm:$0xff] %v16074_v59  ;;  %v16076_v43 = vpop.f32.mrb[45].mxu0  ;;  %v16100_v59 = vrot.slane %v842_v4, %v16084_v56 }
 0x3f1   : > { %17576 = vst [vmem:[#allocation51_spill] sm:$0xff] %v16076_v43  ;;  %v16080_v60 = vpop.f32.mrb[46].mxu0  ;;  %v16096_v43 = vrot.slane %v842_v4, %v16082_v2 }
 0x3f2   : > { %17578 = vst [vmem:[#allocation53_spill] sm:$0xff] %v16080_v60  ;;  %v16086_v8 = vpop.f32.mrb[47].mxu0  ;;  %v17583_v60 = vmov 0  }
 0x3f3   : > { %17581 = vst [vmem:[#allocation56_spill] sm:$0xff] %v16086_v8  ;;  %v16103_v8 = vrot.slane %v842_v4, %v16088_v37  ;;  %v12029_v37 = vadd.f32 %v15938_v3, %v16100_v59  ;;  %v13369_v3 = vld [vmem:[%s17477_s3 + $0x244] ss:$16 sps:$4 sm:$0xff]  }
 0x3f4   : > { %11147 = vmatmul.mubr.msk.bf16.gmra.mrb[128].mxu1 %vm919_vm0, %v15568_v35  ;;  %v12027_v35 = vadd.f32 %v15932_v47, %v16100_v59  ;;  %5276 = vmatprep.subr.bf16.mxu0 %v13369_v3 }
 0x3f5   : > { %3446 = vmatprep.mubr.bf16.mxu1 %v17583_v60  ;;  %v12028_v53 = vadd.f32 %v15934_v23, %v16103_v8 }
 0x3f7   : > { %v16105_v62 = vpop.f32.mrb[48].mxu0  ;;  %v3178_v63 = vpop.f32.mrb[24].mxu1 }
 0x3f8   : > { %17584 = vst [vmem:[#allocation58_spill] sm:$0xff] %v16105_v62  ;;  %v12163_v58 = vadd.f32 %v3178_v63, %v16093_v1  ;;  %v16110_v55 = vpop.f32.mrb[49].mxu0  ;;  %v3180_v2 = vpop.f32.mrb[25].mxu1 }
 0x3f9   : > { %17585 = vst [vmem:[#allocation59_spill] sm:$0xff] %v16110_v55  ;;  %v12164_v56 = vadd.f32 %v3180_v2, %v16096_v43  ;;  %v16115_v5 = vpop.f32.mrb[50].mxu0  ;;  %v3182_v4 = vpop.f32.mrb[26].mxu1  ;;  %v12030_v55 = vadd.f32 %v15940_v49, %v16103_v8  ;;  %v13367_v2 = vld [vmem:[%s17477_s3 + $0x240] ss:$16 sps:$4 sm:$0xff]  }
 0x3fa   : > { %17586 = vst [vmem:[#allocation60_spill] sm:$0xff] %v16115_v5  ;;  %v3681_v62 = vmax.f32 %v12027_v35, %v12163_v58  ;;  %v12165_v31 = vadd.f32 %v3182_v4, %v16093_v1  ;;  %v16120_v47 = vpop.f32.mrb[51].mxu0  ;;  %v3184_v63 = vpop.f32.mrb[27].mxu1  ;;  %5277 = vmatpush1.bf16.msra.mxu0 %v13367_v2 }
 0x3fb   : > { %17587 = vst [vmem:[#allocation61_spill] sm:$0xff] %v16120_v47  ;;  %v3682_v9 = vmax.f32 %v12028_v53, %v12164_v56  ;;  %v12166_v23 = vadd.f32 %v3184_v63, %v16096_v43  ;;  %v13375_v53 = vld [vmem:[%s17477_s3 + $0x264] ss:$16 sps:$4 sm:$0xff]   ;;  %v13373_v56 = vld [vmem:[%s17477_s3 + $0x260] ss:$16 sps:$4 sm:$0xff]   ;;  %v12032_v63 = vadd.f32 %v15950_v54, %v16103_v8 }
 0x3fc   : > { %v3683_v58 = vmax.f32 %v12029_v37, %v12165_v31  ;;  %11148 = vmatmul.mubr.msk.bf16.gmra.mrb[132].mxu1 %vm919_vm0, %v15936_v18  ;;  %5278 = vmatprep.subr.bf16.mxu0 %v13375_v53  ;;  %v12031_v18 = vadd.f32 %v15948_v21, %v16100_v59  ;;  %v13358_v53 = vld [vmem:[%s17477_s3 + $0x208] ss:$16 sps:$4 sm:$0xff]   ;;  %v12033_v21 = vadd.f32 %v15952_v27, %v16100_v59  ;;  %v13366_v54 = vld [vmem:[%s17477_s3 + $0x22c] ss:$16 sps:$4 sm:$0xff]  }
 0x3fd   : > { %v3684_v35 = vmax.f32 %v12030_v55, %v12166_v23  ;;  %4585 = vmatprep.mubr.bf16.mxu1 %v17583_v60 }
 0x3fe   : > { %5279 = vmatpush1.bf16.msra.mxu0 %v13373_v56 }
 0x3ff   : > { %v16140_v49 = vpop.f32.mrb[52].mxu0  ;;  %v3188_v4 = vpop.f32.mrb[28].mxu1 }
 0x400   : > { %17588 = vst [vmem:[#allocation62_spill] sm:$0xff] %v16140_v49  ;;  %v12167_v55 = vadd.f32 %v3188_v4, %v16093_v1  ;;  %v16145_v31 = vpop.f32.mrb[53].mxu0  ;;  %v3190_v37 = vpop.f32.mrb[29].mxu1 }
 0x401   : > { %17589 = vst [vmem:[#allocation63_spill] sm:$0xff] %v16145_v31  ;;  %v12168_v23 = vadd.f32 %v3190_v37, %v16096_v43  ;;  %v16150_v2 = vpop.f32.mrb[54].mxu0  ;;  %v3192_v3 = vpop.f32.mrb[30].mxu1  ;;  %v12034_v37 = vadd.f32 %v15954_v28, %v16103_v8  ;;  %v13372_v28 = vld [vmem:[%s17477_s3 + $0x24c] ss:$16 sps:$4 sm:$0xff]  }
 0x402   : > { %17590 = vst [vmem:[#allocation64_spill] sm:$0xff] %v16150_v2  ;;  %v3685_v49 = vmax.f32 %v12031_v18, %v12167_v55  ;;  %v12169_v4 = vadd.f32 %v3192_v3, %v16093_v1  ;;  %v16158_v31 = vpop.f32.mrb[55].mxu0  ;;  %v3194_v47 = vpop.f32.mrb[31].mxu1  ;;  %v13364_v55 = vld [vmem:[%s17477_s3 + $0x228] ss:$16 sps:$4 sm:$0xff]  }
 0x403   : > { %v3686_v2 = vmax.f32 %v12032_v63, %v12168_v23  ;;  %v12170_v5 = vadd.f32 %v3194_v47, %v16096_v43  ;;  %v16177_v47 = vadd.f32 %v15960_v26, %v16100_v59 }
 0x404   : > { %v3793_v11 = vmax.f32 %v3681_v62, %v3685_v49  ;;  %v3687_v52 = vmax.f32 %v12033_v21, %v12169_v4  ;;  %4586 = vmatmul.mubr.bf16.vlgmr.msra.gmra.mrb[136].mxu1 %v17583_v60  ;;  %v12042_v60 = vadd.f32 %v15977_v15, %v16103_v8 }
 0x405   : > { %v3794_v27 = vmax.f32 %v3682_v9, %v3686_v2  ;;  %v3688_v18 = vmax.f32 %v12034_v37, %v12170_v5  ;;  %5446 = vmatpush1.bf16.msra.mxu1 %v13358_v53 }
 0x406   : > { %v3795_v3 = vmax.f32 %v3683_v58, %v3687_v52  ;;  %5447 = vmatprep.subr.bf16.mxu1 %v13366_v54  ;;  %v3849_v5 = vmax.f32 %v3793_v11, 0.0  ;;  %v16184_v58 = vadd.f32 %v15962_v32, %v16103_v8  ;;  %v12037_v11 = vadd.f32 %v15964_v57, %v16100_v59  ;;  %v13370_v57 = vld [vmem:[%s17477_s3 + $0x248] ss:$16 sps:$4 sm:$0xff]  }
 0x407   : > { %v3796_v56 = vmax.f32 %v3684_v35, %v3688_v18  ;;  %v16173_v63 = vpop.f32.mrb[56].mxu0  ;;  %v3198_v62 = vpop.f32.mrb[32].mxu1  ;;  %v3850_v2 = vmax.f32 %v3794_v27, 0.0  ;;  %v12038_v27 = vadd.f32 %v15966_v33, %v16103_v8  ;;  %v13379_v33 = vld [vmem:[%s17477_s3 + $0x280] ss:$16 sps:$4 sm:$0xff]  }
 0x408   : > { %v3851_v9 = vmax.f32 %v3795_v3, 0.0  ;;  %v12171_v49 = vadd.f32 %v3198_v62, %v16093_v1  ;;  %v16180_v23 = vpop.f32.mrb[57].mxu0  ;;  %v3200_v52 = vpop.f32.mrb[33].mxu1  ;;  %v13381_v62 = vld [vmem:[%s17477_s3 + $0x284] ss:$16 sps:$4 sm:$0xff]  }
 0x409   : > { %v3852_v35 = vmax.f32 %v3796_v56, 0.0  ;;  %v12172_v53 = vadd.f32 %v3200_v52, %v16096_v43  ;;  %v16187_v21 = vpop.f32.mrb[58].mxu0  ;;  %v3202_v4 = vpop.f32.mrb[34].mxu1  ;;  %5448 = vmatpush1.bf16.msra.mxu1 %v13364_v55  ;;  %5280 = vmatprep.subr.bf16.mxu0 %v13381_v62 }
 0x40a   : > { %v16191_v26 = vpack.c.bf16 %v3851_v9, %v3849_v5  ;;  %v3689_v54 = vmax.f32 %v16177_v47, %v12171_v49  ;;  %v12173_v37 = vadd.f32 %v3202_v4, %v16093_v1  ;;  %v16195_v18 = vpop.f32.mrb[59].mxu0  ;;  %v3204_v32 = vpop.f32.mrb[35].mxu1  ;;  %5449 = vmatprep.subr.bf16.mxu1 %v13372_v28  ;;  %v13378_v28 = vld [vmem:[%s17477_s3 + $0x26c] ss:$16 sps:$4 sm:$0xff]   ;;  %v13387_v9 = vld [vmem:[%s17477_s3 + $0x2a4] ss:$16 sps:$4 sm:$0xff]   ;;  %5281 = vmatpush1.bf16.msra.mxu0 %v13379_v33 }
 0x40b   : > { %v16199_v3 = vpack.c.bf16 %v3852_v35, %v3850_v2  ;;  %v3690_v55 = vmax.f32 %v16184_v58, %v12172_v53  ;;  %v12174_v56 = vadd.f32 %v3204_v32, %v16096_v43  ;;  %v13376_v58 = vld [vmem:[%s17477_s3 + $0x268] ss:$16 sps:$4 sm:$0xff]   ;;  %v12039_v2 = vadd.f32 %v15971_v6, %v16100_v59  ;;  %5282 = vmatprep.subr.bf16.mxu0 %v13387_v9 }
 0x40c   : > { %17591 = vst [vmem:[#allocation65_spill] sm:$0xff] %v16191_v26  ;;  %v3691_v47 = vmax.f32 %v12037_v11, %v12173_v37  ;;  %v13384_v11 = vld [vmem:[%s17477_s3 + $0x28c] ss:$16 sps:$4 sm:$0xff]   ;;  %v13385_v37 = vld [vmem:[%s17477_s3 + $0x2a0] ss:$16 sps:$4 sm:$0xff]   ;;  %v12040_v32 = vadd.f32 %v15973_v29, %v16103_v8 }
 0x40d   : > { %17592 = vst [vmem:[#allocation66_spill] sm:$0xff] %v16199_v3  ;;  %v3692_v5 = vmax.f32 %v12038_v27, %v12174_v56  ;;  %4422 = vmatprep.mubr.bf16.mxu0 %v16199_v3  ;;  %4595 = vmatprep.mubr.bf16.mxu1 %v16199_v3  ;;  %v13382_v9 = vld [vmem:[%s17477_s3 + $0x288] ss:$16 sps:$4 sm:$0xff]  }
 0x40e   : > { %4423 = vmatmul.mubr.bf16.gmra.mrb[116].mxu0 %v16191_v26  ;;  %4596 = vmatmul.mubr.bf16.gmra.mrb[140].mxu1 %v16191_v26 }
 0x40f   : > { %v16222_v49 = vpop.f32.mrb[60].mxu0  ;;  %v3208_v52 = vpop.f32.mrb[36].mxu1  ;;  %5450 = vmatpush1.bf16.msra.mxu1 %v13370_v57  ;;  %v12041_v57 = vadd.f32 %v15975_v61, %v16100_v59  ;;  %v13390_v61 = vld [vmem:[%s17477_s3 + $0x2ac] ss:$16 sps:$4 sm:$0xff]   ;;  %5283 = vmatpush1.bf16.msra.mxu0 %v13385_v37  ;;  %v16279_v37 = vadd.f32 %v15984_v34, %v16103_v8 }
 0x410   : > { %v12175_v35 = vadd.f32 %v3208_v52, %v16093_v1  ;;  %v16230_v53 = vpop.f32.mrb[61].mxu0  ;;  %v3210_v4 = vpop.f32.mrb[37].mxu1  ;;  %5451 = vmatprep.subr.bf16.mxu1 %v13378_v28 }
 0x411   : > { %v12176_v6 = vadd.f32 %v3210_v4, %v16096_v43  ;;  %v16241_v27 = vpop.f32.mrb[62].mxu0  ;;  %v3212_v56 = vpop.f32.mrb[38].mxu1 }
 0x412   : > { %v3693_v62 = vmax.f32 %v12039_v2, %v12175_v35  ;;  %v12177_v28 = vadd.f32 %v3212_v56, %v16093_v1  ;;  %v16246_v33 = vpop.f32.mrb[63].mxu0  ;;  %v3214_v52 = vpop.f32.mrb[39].mxu1 }
 0x413   : > { %v3694_v26 = vmax.f32 %v12040_v32, %v12176_v6  ;;  %v12178_v29 = vadd.f32 %v3214_v52, %v16096_v43  ;;  %5452 = vmatpush1.bf16.msra.mxu1 %v13376_v58  ;;  %v13388_v58 = vld [vmem:[%s17477_s3 + $0x2a8] ss:$16 sps:$4 sm:$0xff]  }
 0x414   : > { %v3797_v4 = vmax.f32 %v3689_v54, %v3693_v62  ;;  %v3695_v3 = vmax.f32 %v12041_v57, %v12177_v28  ;;  %5453 = vmatprep.subr.bf16.mxu1 %v13384_v11  ;;  %v13391_v54 = vld [vmem:[%s17477_s3 + $0x2c0] ss:$16 sps:$4 sm:$0xff]   ;;  %v16267_v11 = vadd.f32 %v15982_v24, %v16100_v59 }
 0x415   : > { %v3798_v2 = vmax.f32 %v3690_v55, %v3694_v26  ;;  %v3696_v35 = vmax.f32 %v12042_v60, %v12178_v29  ;;  %v12045_v29 = vadd.f32 %v15986_v38, %v16100_v59 }
 0x416   : > { %v3799_v56 = vmax.f32 %v3691_v47, %v3695_v3  ;;  %v3853_v26 = vmax.f32 %v3797_v4, 0.0 }
 0x417   : > { %v3800_v15 = vmax.f32 %v3692_v5, %v3696_v35  ;;  %v16257_v32 = vpop.f32.mrb[64].mxu0  ;;  %v3218_v6 = vpop.f32.mrb[40].mxu1  ;;  %5454 = vmatpush1.bf16.msra.mxu1 %v13382_v9  ;;  %v13393_v5 = vld [vmem:[%s17477_s3 + $0x2c4] ss:$16 sps:$4 sm:$0xff]   ;;  %v3854_v57 = vmax.f32 %v3798_v2, 0.0 }
 0x418   : > { %v3855_v60 = vmax.f32 %v3799_v56, 0.0  ;;  %v16270_v3 = vadd.f32 %v3218_v6, %v16093_v1  ;;  %v16272_v55 = vpop.f32.mrb[65].mxu0  ;;  %v3220_v47 = vpop.f32.mrb[41].mxu1  ;;  %5455 = vmatprep.subr.bf16.mxu1 %v13390_v61  ;;  %5284 = vmatprep.subr.bf16.mxu0 %v13393_v5  ;;  %v13396_v2 = vld [vmem:[%s17477_s3 + $0x2cc] ss:$16 sps:$4 sm:$0xff]   ;;  %v12046_v56 = vadd.f32 %v15988_v39, %v16103_v8 }
 0x419   : > { %v3856_v24 = vmax.f32 %v3800_v15, 0.0  ;;  %v12180_v62 = vadd.f32 %v3220_v47, %v16096_v43  ;;  %v16282_v28 = vpop.f32.mrb[66].mxu0  ;;  %v3222_v52 = vpop.f32.mrb[42].mxu1  ;;  %5285 = vmatpush1.bf16.msra.mxu0 %v13391_v54  ;;  %v13397_v39 = vld [vmem:[%s17477_s3 + $0x2e0] ss:$16 sps:$4 sm:$0xff]  }
 0x41a   : > { %v16286_v9 = vpack.c.bf16 %v3855_v60, %v3853_v26  ;;  %v3697_v4 = vmax.f32 %v16267_v11, %v16270_v3  ;;  %v12181_v61 = vadd.f32 %v3222_v52, %v16093_v1  ;;  %v16291_v35 = vpop.f32.mrb[67].mxu0  ;;  %v3224_v34 = vpop.f32.mrb[43].mxu1  ;;  %v13394_v11 = vld [vmem:[%s17477_s3 + $0x2c8] ss:$16 sps:$4 sm:$0xff]   ;;  %v13399_v26 = vld [vmem:[%s17477_s3 + $0x2e4] ss:$16 sps:$4 sm:$0xff]  }
 0x41b   : > { %v16298_v15 = vpack.c.bf16 %v3856_v24, %v3854_v57  ;;  %v3698_v38 = vmax.f32 %v16279_v37, %v12180_v62  ;;  %v12182_v6 = vadd.f32 %v3224_v34, %v16096_v43  ;;  %5456 = vmatpush1.bf16.msra.mxu1 %v13388_v58  ;;  %v13402_v3 = vld [vmem:[%s17477_s3 + $0x2ec] ss:$16 sps:$4 sm:$0xff]   ;;  %v13405_v54 = vld [vmem:[%s17477_s3 + $0x304] ss:$16 sps:$4 sm:$0xff]   ;;  %5286 = vmatprep.subr.bf16.mxu0 %v13399_v26  ;;  %v13400_v37 = vld [vmem:[%s17477_s3 + $0x2e8] ss:$16 sps:$4 sm:$0xff]  }
 0x41c   : > { %17593 = vst [vmem:[#allocation67_spill] sm:$0xff] %v16286_v9  ;;  %v3699_v60 = vmax.f32 %v12045_v29, %v12181_v61  ;;  %5457 = vmatprep.subr.bf16.mxu1 %v13396_v2  ;;  %v12047_v57 = vadd.f32 %v15993_v40, %v16100_v59  ;;  %v13403_v29 = vld [vmem:[%s17477_s3 + $0x300] ss:$16 sps:$4 sm:$0xff]   ;;  %v13408_v61 = vld [vmem:[%s17477_s3 + $0x30c] ss:$16 sps:$4 sm:$0xff]   ;;  %v12048_v34 = vadd.f32 %v15995_v0, %v16103_v8 }
 0x41d   : > { %17594 = vst [vmem:[#allocation68_spill] sm:$0xff] %v16298_v15  ;;  %v3700_v58 = vmax.f32 %v12046_v56, %v12182_v6  ;;  %4432 = vmatprep.mubr.bf16.mxu0 %v16298_v15  ;;  %4605 = vmatprep.mubr.bf16.mxu1 %v16298_v15  ;;  %v12049_v6 = vadd.f32 %v15997_v41, %v16100_v59 }
 0x41e   : > { %4433 = vmatmul.mubr.bf16.gmra.mrb[120].mxu0 %v16286_v9  ;;  %4606 = vmatmul.mubr.bf16.gmra.mrb[144].mxu1 %v16286_v9 }
 0x41f   : > { %v16321_v47 = vpop.f32.mrb[68].mxu0  ;;  %v3228_v5 = vpop.f32.mrb[44].mxu1  ;;  %5458 = vmatpush1.bf16.msra.mxu1 %v13394_v11  ;;  %5287 = vmatpush1.bf16.msra.mxu0 %v13397_v39 }
 0x420   : > { %v12183_v24 = vadd.f32 %v3228_v5, %v16093_v1  ;;  %v16329_v62 = vpop.f32.mrb[69].mxu0  ;;  %v3230_v52 = vpop.f32.mrb[45].mxu1  ;;  %5459 = vmatprep.subr.bf16.mxu1 %v13402_v3  ;;  %5288 = vmatprep.subr.bf16.mxu0 %v13405_v54  ;;  %v12050_v5 = vadd.f32 %v15999_v10, %v16103_v8  ;;  %v13406_v54 = vld [vmem:[%s17477_s3 + $0x308] ss:$16 sps:$4 sm:$0xff]   ;;  %v12051_v10 = vadd.f32 %v16004_v30, %v16100_v59 }
 0x421   : > { %v12184_v40 = vadd.f32 %v3230_v52, %v16096_v43  ;;  %v16340_v2 = vpop.f32.mrb[70].mxu0  ;;  %v3232_v56 = vpop.f32.mrb[46].mxu1  ;;  %v12053_v30 = vadd.f32 %v16008_v46, %v16100_v59  ;;  %v13411_v46 = vld [vmem:[%s17477_s3 + $0x324] ss:$16 sps:$4 sm:$0xff]  }
 0x422   : > { %17595 = vst [vmem:[#allocation69_spill] sm:$0xff] %v16340_v2  ;;  %v3701_v11 = vmax.f32 %v12047_v57, %v12183_v24  ;;  %v12185_v26 = vadd.f32 %v3232_v56, %v16093_v1  ;;  %v16345_v39 = vpop.f32.mrb[71].mxu0  ;;  %v3234_v3 = vpop.f32.mrb[47].mxu1 }
 0x423   : > { %17596 = vst [vmem:[#allocation70_spill] sm:$0xff] %v16345_v39  ;;  %v3702_v9 = vmax.f32 %v12048_v34, %v12184_v40  ;;  %v12186_v0 = vadd.f32 %v3234_v3, %v16096_v43  ;;  %5460 = vmatpush1.bf16.msra.mxu1 %v13400_v37  ;;  %5289 = vmatpush1.bf16.msra.mxu0 %v13403_v29 }
 0x424   : > { %v3801_v52 = vmax.f32 %v3697_v4, %v3701_v11  ;;  %v3703_v15 = vmax.f32 %v12049_v6, %v12185_v26  ;;  %5461 = vmatprep.subr.bf16.mxu1 %v13408_v61  ;;  %5290 = vmatprep.subr.bf16.mxu0 %v13411_v46 }
 0x425   : > { %v3802_v41 = vmax.f32 %v3698_v38, %v3702_v9  ;;  %v3704_v57 = vmax.f32 %v12050_v5, %v12186_v0  ;;  %v12052_v9 = vadd.f32 %v16006_v44, %v16103_v8  ;;  %v12054_v44 = vadd.f32 %v16010_v36, %v16103_v8  ;;  %v13414_v36 = vld [vmem:[%s17477_s3 + $0x32c] ss:$16 sps:$4 sm:$0xff]  }
 0x426   : > { %v3803_v24 = vmax.f32 %v3699_v60, %v3703_v15  ;;  %v3857_v37 = vmax.f32 %v3801_v52, 0.0 }
 0x427   : > { %v3804_v56 = vmax.f32 %v3700_v58, %v3704_v57  ;;  %v16353_v39 = vpop.f32.mrb[72].mxu0  ;;  %v3238_v2 = vpop.f32.mrb[48].mxu1  ;;  %5462 = vmatpush1.bf16.msra.mxu1 %v13406_v54  ;;  %v3858_v38 = vmax.f32 %v3802_v41, 0.0  ;;  %v13409_v41 = vld [vmem:[%s17477_s3 + $0x320] ss:$16 sps:$4 sm:$0xff]  }
 0x428   : > { %v3859_v34 = vmax.f32 %v3803_v24, 0.0  ;;  %v12187_v40 = vadd.f32 %v3238_v2, %v16093_v1  ;;  %v16358_v3 = vpop.f32.mrb[73].mxu0  ;;  %v3240_v4 = vpop.f32.mrb[49].mxu1  ;;  %v13412_v57 = vld [vmem:[%s17477_s3 + $0x328] ss:$16 sps:$4 sm:$0xff]   ;;  %5463 = vmatprep.subr.bf16.mxu1 %v13414_v36  ;;  %5291 = vmatpush1.bf16.msra.mxu0 %v13409_v41 }
 0x429   : > { %v3860_v15 = vmax.f32 %v3804_v56, 0.0  ;;  %v12188_v60 = vadd.f32 %v3240_v4, %v16096_v43  ;;  %v16363_v58 = vpop.f32.mrb[74].mxu0  ;;  %v3242_v29 = vpop.f32.mrb[50].mxu1  ;;  %v13417_v56 = vld [vmem:[%s17477_s3 + $0x344] ss:$16 sps:$4 sm:$0xff]  }
 0x42a   : > { %v16367_v61 = vpack.c.bf16 %v3859_v34, %v3857_v37  ;;  %v3705_v6 = vmax.f32 %v12051_v10, %v12187_v40  ;;  %v12189_v2 = vadd.f32 %v3242_v29, %v16093_v1  ;;  %v16370_v11 = vpop.f32.mrb[75].mxu0  ;;  %v3244_v26 = vpop.f32.mrb[51].mxu1  ;;  %v13420_v10 = vld [vmem:[%s17477_s3 + $0x34c] ss:$16 sps:$4 sm:$0xff]   ;;  %v12055_v40 = vadd.f32 %v16015_v45, %v16100_v59  ;;  %5292 = vmatprep.subr.bf16.mxu0 %v13417_v56 }
 0x42b   : > { %v16374_v5 = vpack.c.bf16 %v3860_v15, %v3858_v38  ;;  %v3706_v0 = vmax.f32 %v12052_v9, %v12188_v60  ;;  %v12190_v54 = vadd.f32 %v3244_v26, %v16096_v43  ;;  %5464 = vmatpush1.bf16.msra.mxu1 %v13412_v57  ;;  %v13415_v15 = vld [vmem:[%s17477_s3 + $0x340] ss:$16 sps:$4 sm:$0xff]   ;;  %v13418_v60 = vld [vmem:[%s17477_s3 + $0x348] ss:$16 sps:$4 sm:$0xff]   ;;  %v12056_v29 = vadd.f32 %v16017_v13, %v16103_v8 }
 0x42c   : > { %17597 = vst [vmem:[#allocation71_spill] sm:$0xff] %v16367_v61  ;;  %v3707_v52 = vmax.f32 %v12053_v30, %v12189_v2  ;;  %5465 = vmatprep.subr.bf16.mxu1 %v13420_v10  ;;  %v12057_v26 = vadd.f32 %v16019_v7, %v16100_v59  ;;  %v12058_v57 = vadd.f32 %v16021_v42, %v16103_v8 }
 0x42d   : > { %17598 = vst [vmem:[#allocation72_spill] sm:$0xff] %v16374_v5  ;;  %v3708_v24 = vmax.f32 %v12054_v44, %v12190_v54  ;;  %4442 = vmatprep.mubr.bf16.mxu0 %v16374_v5  ;;  %4615 = vmatprep.mubr.bf16.mxu1 %v16374_v5 }
 0x42e   : > { %4443 = vmatmul.mubr.bf16.gmra.mrb[124].mxu0 %v16367_v61  ;;  %4616 = vmatmul.mubr.bf16.gmra.mrb[148].mxu1 %v16367_v61 }
 0x42f   : > { %v16399_v37 = vpop.f32.mrb[76].mxu0  ;;  %v3248_v34 = vpop.f32.mrb[52].mxu1  ;;  %5293 = vmatpush1.bf16.msra.mxu0 %v13415_v15  ;;  %5466 = vmatpush1.bf16.msra.mxu1 %v13418_v60  ;;  %v12060_v15 = vadd.f32 %v16028_v20, %v16103_v8  ;;  %v12062_v20 = vadd.f32 %v16032_v19, %v16103_v8  ;;  %v13426_v19 = vld [vmem:[%s17477_s3 + $0x36c] ss:$16 sps:$4 sm:$0xff]  }
 0x430   : > { %v12191_v4 = vadd.f32 %v3248_v34, %v16093_v1  ;;  %v16404_v9 = vpop.f32.mrb[77].mxu0  ;;  %v3250_v38 = vpop.f32.mrb[53].mxu1  ;;  %5467 = vmatprep.subr.bf16.mxu1 %v13426_v19 }
 0x431   : > { %v12192_v45 = vadd.f32 %v3250_v38, %v16096_v43  ;;  %v16415_v30 = vpop.f32.mrb[78].mxu0  ;;  %v3252_v2 = vpop.f32.mrb[54].mxu1 }
 0x432   : > { %v3709_v44 = vmax.f32 %v12055_v40, %v12191_v4  ;;  %v12193_v54 = vadd.f32 %v3252_v2, %v16093_v1  ;;  %v16420_v46 = vpop.f32.mrb[79].mxu0  ;;  %v3254_v41 = vpop.f32.mrb[55].mxu1  ;;  %v12059_v2 = vadd.f32 %v16026_v22, %v16100_v59  ;;  %v12061_v22 = vadd.f32 %v16030_v16, %v16100_v59  ;;  %v13423_v16 = vld [vmem:[%s17477_s3 + $0x364] ss:$16 sps:$4 sm:$0xff]  }
 0x433   : > { %17599 = vst [vmem:[#allocation73_spill] sm:$0xff] %v16420_v46  ;;  %v3710_v13 = vmax.f32 %v12056_v29, %v12192_v45  ;;  %v12194_v36 = vadd.f32 %v3254_v41, %v16096_v43  ;;  %5294 = vmatprep.subr.bf16.mxu0 %v13423_v16 }
 0x434   : > { %v3805_v34 = vmax.f32 %v3705_v6, %v3709_v44  ;;  %v3711_v38 = vmax.f32 %v12057_v26, %v12193_v54 }
 0x435   : > { %v3806_v56 = vmax.f32 %v3706_v0, %v3710_v13  ;;  %v3712_v10 = vmax.f32 %v12058_v57, %v12194_v36 }
 0x436   : > { %v3807_v61 = vmax.f32 %v3707_v52, %v3711_v38  ;;  %v3861_v5 = vmax.f32 %v3805_v34, 0.0  ;;  %v13424_v34 = vld [vmem:[%s17477_s3 + $0x368] ss:$16 sps:$4 sm:$0xff]  }
 0x437   : > { %v3808_v7 = vmax.f32 %v3708_v24, %v3712_v10  ;;  %v16425_v40 = vpop.f32.mrb[80].mxu0  ;;  %v3258_v4 = vpop.f32.mrb[56].mxu1  ;;  %v3862_v0 = vmax.f32 %v3806_v56, 0.0  ;;  %v13429_v56 = vld [vmem:[%s17477_s3 + $0x384] ss:$16 sps:$4 sm:$0xff]   ;;  %5468 = vmatpush1.bf16.msra.mxu1 %v13424_v34 }
 0x438   : > { %v3863_v46 = vmax.f32 %v3807_v61, 0.0  ;;  %v12195_v42 = vadd.f32 %v3258_v4, %v16093_v1  ;;  %v16430_v29 = vpop.f32.mrb[81].mxu0  ;;  %v3260_v6 = vpop.f32.mrb[57].mxu1  ;;  %v13432_v10 = vld [vmem:[%s17477_s3 + $0x38c] ss:$16 sps:$4 sm:$0xff]  }
 0x439   : > { %v3864_v60 = vmax.f32 %v3808_v7, 0.0  ;;  %v12196_v52 = vadd.f32 %v3260_v6, %v16096_v43  ;;  %v16435_v24 = vpop.f32.mrb[82].mxu0  ;;  %v3262_v45 = vpop.f32.mrb[58].mxu1  ;;  %5469 = vmatprep.subr.bf16.mxu1 %v13432_v10 }
 0x43a   : > { %v16439_v26 = vpack.c.bf16 %v3863_v46, %v3861_v5  ;;  %v3713_v61 = vmax.f32 %v12059_v2, %v12195_v42  ;;  %v12197_v44 = vadd.f32 %v3262_v45, %v16093_v1  ;;  %v16442_v54 = vpop.f32.mrb[83].mxu0  ;;  %v3264_v41 = vpop.f32.mrb[59].mxu1  ;;  %v13421_v46 = vld [vmem:[%s17477_s3 + $0x360] ss:$16 sps:$4 sm:$0xff]   ;;  %v12063_v2 = vadd.f32 %v16037_v17, %v16100_v59 }
 0x43b   : > { %v16446_v57 = vpack.c.bf16 %v3864_v60, %v3862_v0  ;;  %v3714_v13 = vmax.f32 %v12060_v15, %v12196_v52  ;;  %v12198_v36 = vadd.f32 %v3264_v41, %v16096_v43  ;;  %5295 = vmatpush1.bf16.msra.mxu0 %v13421_v46  ;;  %v13427_v0 = vld [vmem:[%s17477_s3 + $0x380] ss:$16 sps:$4 sm:$0xff]   ;;  %v13430_v60 = vld [vmem:[%s17477_s3 + $0x388] ss:$16 sps:$4 sm:$0xff]   ;;  %v12064_v52 = vadd.f32 %v16039_v14, %v16103_v8 }
 0x43c   : > { %17600 = vst [vmem:[#allocation74_spill] sm:$0xff] %v16439_v26  ;;  %v3715_v5 = vmax.f32 %v12061_v22, %v12197_v44  ;;  %5296 = vmatprep.subr.bf16.mxu0 %v13429_v56  ;;  %v12065_v44 = vadd.f32 %v16041_v25, %v16100_v59  ;;  %v12066_v46 = vadd.f32 %v16043_v12, %v16103_v8 }
 0x43d   : > { %17601 = vst [vmem:[#allocation75_spill] sm:$0xff] %v16446_v57  ;;  %v3716_v38 = vmax.f32 %v12062_v20, %v12198_v36  ;;  %4452 = vmatprep.mubr.bf16.mxu0 %v16446_v57  ;;  %4625 = vmatprep.mubr.bf16.mxu1 %v16446_v57  ;;  %v1827_v56 = vadd.f32 %v16100_v59, %v15386_v48  ;;  %v17605_v48 = vld [vmem:[#allocation48_spill] sm:$0xff] }
 0x43e   : > { %4453 = vmatmul.mubr.bf16.gmra.mrb[128].mxu0 %v16439_v26  ;;  %4626 = vmatmul.mubr.bf16.gmra.mrb[152].mxu1 %v16439_v26  ;;  %v1828_v25 = vadd.f32 %v16103_v8, %v15388_v50  ;;  %v16515_v50 = vadd.f32 %v17605_v48, %v16100_v59 }
 0x43f   : > { %v16471_v7 = vpop.f32.mrb[84].mxu0  ;;  %v3268_v4 = vpop.f32.mrb[60].mxu1  ;;  %5297 = vmatpush1.bf16.msra.mxu0 %v13427_v0  ;;  %5470 = vmatpush1.bf16.msra.mxu1 %v13430_v60  ;;  %v17604_v60 = vld [vmem:[#allocation47_spill] sm:$0xff] }
 0x440   : > { %v12199_v42 = vadd.f32 %v3268_v4, %v16093_v1  ;;  %v16476_v6 = vpop.f32.mrb[85].mxu0  ;;  %v3270_v15 = vpop.f32.mrb[61].mxu1 }
 0x441   : > { %v12200_v17 = vadd.f32 %v3270_v15, %v16096_v43  ;;  %v16487_v45 = vpop.f32.mrb[86].mxu0  ;;  %v3272_v22 = vpop.f32.mrb[62].mxu1  ;;  %v17602_v15 = vld [vmem:[#allocation25_spill] sm:$0xff] }
 0x442   : > { %v3717_v41 = vmax.f32 %v12063_v2, %v12199_v42  ;;  %v12201_v20 = vadd.f32 %v3272_v22, %v16093_v1  ;;  %v16492_v36 = vpop.f32.mrb[87].mxu0  ;;  %v3274_v16 = vpop.f32.mrb[63].mxu1  ;;  %v1831_v42 = vadd.f32 %v16100_v59, %v15390_v51  ;;  %v1832_v12 = vadd.f32 %v16103_v8, %v17602_v15 }
 0x443   : > { %v3718_v14 = vmax.f32 %v12064_v52, %v12200_v17  ;;  %v12202_v34 = vadd.f32 %v3274_v16, %v16096_v43  ;;  %v17603_v52 = vld [vmem:[#allocation46_spill] sm:$0xff]  ;;  %v16511_v17 = vadd.f32 %v17604_v60, %v16103_v8 }
 0x444   : > { %v3809_v19 = vmax.f32 %v3713_v61, %v3717_v41  ;;  %v3719_v4 = vmax.f32 %v12065_v44, %v12201_v20  ;;  %v16507_v61 = vadd.f32 %v17603_v52, %v16100_v59 }
 0x445   : > { %v3810_v10 = vmax.f32 %v3714_v13, %v3718_v14  ;;  %v3720_v2 = vmax.f32 %v12066_v46, %v12202_v34  ;;  %v17606_v13 = vld [vmem:[#allocation49_spill] sm:$0xff] }
 0x446   : > { %v3811_v0 = vmax.f32 %v3715_v5, %v3719_v4  ;;  %v16519_v22 = vadd.f32 %v17606_v13, %v16103_v8  ;;  %v3865_v20 = vmax.f32 %v3809_v19, 0.0  ;;  %v13435_v4 = vld [vmem:[%s17477_s3 + $0x3a4] ss:$16 sps:$4 sm:$0xff]  }
 0x447   : > { %v3812_v51 = vmax.f32 %v3716_v38, %v3720_v2  ;;  %v3085_v44 = vpop.f32.mrb[88].mxu0  ;;  %v3278_v41 = vpop.f32.mrb[64].mxu1  ;;  %v3866_v15 = vmax.f32 %v3810_v10, 0.0  ;;  %5298 = vmatprep.subr.bf16.mxu0 %v13435_v4  ;;  %v17612_v4 = vld [vmem:[#allocation26_spill] sm:$0xff] }
 0x448   : > { %v3867_v16 = vmax.f32 %v3811_v0, 0.0  ;;  %v16521_v46 = vadd.f32 %v3085_v44, %v1827_v56  ;;  %v16524_v5 = vadd.f32 %v3278_v41, %v16093_v1  ;;  %v3087_v14 = vpop.f32.mrb[89].mxu0  ;;  %v3280_v34 = vpop.f32.mrb[65].mxu1  ;;  %v13433_v56 = vld [vmem:[%s17477_s3 + $0x3a0] ss:$16 sps:$4 sm:$0xff]  }
 0x449   : > { %v3868_v52 = vmax.f32 %v3812_v51, 0.0  ;;  %v16529_v60 = vadd.f32 %v3087_v14, %v1828_v25  ;;  %v16532_v38 = vadd.f32 %v3280_v34, %v16096_v43  ;;  %v3089_v19 = vpop.f32.mrb[90].mxu0  ;;  %v3282_v2 = vpop.f32.mrb[66].mxu1  ;;  %v13438_v44 = vld [vmem:[%s17477_s3 + $0x3ac] ss:$16 sps:$4 sm:$0xff]   ;;  %5299 = vmatpush1.bf16.msra.mxu0 %v13433_v56 }
 0x44a   : > { %v16537_v0 = vpack.c.bf16 %v3867_v16, %v3865_v20  ;;  %v3721_v48 = vmax.f32 %v16507_v61, %v16524_v5  ;;  %v16541_v13 = vadd.f32 %v3089_v19, %v1831_v42  ;;  %v16544_v10 = vadd.f32 %v3282_v2, %v16093_v1  ;;  %v3091_v25 = vpop.f32.mrb[91].mxu0  ;;  %v3284_v51 = vpop.f32.mrb[67].mxu1  ;;  %v13436_v61 = vld [vmem:[%s17477_s3 + $0x3a8] ss:$16 sps:$4 sm:$0xff]   ;;  %v13441_v5 = vld [vmem:[%s17477_s3 + $0x3c4] ss:$16 sps:$4 sm:$0xff]   ;;  %5471 = vmatprep.subr.bf16.mxu1 %v13438_v44 }
 0x44b   : > { %17607 = vst [vmem:[#allocation25_spill] sm:$0xff] %v16529_v60  ;;  %v16549_v41 = vpack.c.bf16 %v3868_v52, %v3866_v15  ;;  %v3722_v20 = vmax.f32 %v16511_v17, %v16532_v38  ;;  %v16553_v16 = vadd.f32 %v3091_v25, %v1832_v12  ;;  %v16556_v42 = vadd.f32 %v3284_v51, %v16096_v43  ;;  %v13439_v12 = vld [vmem:[%s17477_s3 + $0x3c0] ss:$16 sps:$4 sm:$0xff]   ;;  %v13444_v17 = vld [vmem:[%s17477_s3 + $0x3cc] ss:$16 sps:$4 sm:$0xff]  }
 0x44c   : > { %17608 = vst [vmem:[#allocation46_spill] sm:$0xff] %v16537_v0  ;;  %17609 = vst [vmem:[#allocation47_spill] sm:$0xff] %v16541_v13  ;;  %v3723_v14 = vmax.f32 %v16515_v50, %v16544_v10  ;;  %v1835_v15 = vadd.f32 %v16100_v59, %v17612_v4  ;;  %v17613_v50 = vld [vmem:[#allocation27_spill] sm:$0xff]  ;;  %v17614_v38 = vld [vmem:[#allocation28_spill] sm:$0xff]  ;;  %5472 = vmatpush1.bf16.msra.mxu1 %v13436_v61  ;;  %5300 = vmatprep.subr.bf16.mxu0 %v13441_v5 }
 0x44d   : > { %17610 = vst [vmem:[#allocation48_spill] sm:$0xff] %v16549_v41  ;;  %17611 = vst [vmem:[#allocation49_spill] sm:$0xff] %v16553_v16  ;;  %v3724_v34 = vmax.f32 %v16519_v22, %v16556_v42  ;;  %4462 = vmatprep.mubr.bf16.mxu0 %v16549_v41  ;;  %4635 = vmatprep.mubr.bf16.mxu1 %v16549_v41  ;;  %v1836_v52 = vadd.f32 %v16103_v8, %v17613_v50  ;;  %v13442_v22 = vld [vmem:[%s17477_s3 + $0x3c8] ss:$16 sps:$4 sm:$0xff]   ;;  %v13447_v61 = vld [vmem:[%s17477_s3 + $0x3e4] ss:$16 sps:$4 sm:$0xff]  }
 0x44e   : > { %4463 = vmatmul.mubr.bf16.gmra.mrb[132].mxu0 %v16537_v0  ;;  %4636 = vmatmul.mubr.bf16.gmra.mrb[156].mxu1 %v16537_v0  ;;  %v1839_v19 = vadd.f32 %v16100_v59, %v17614_v38  ;;  %v17615_v10 = vld [vmem:[#allocation50_spill] sm:$0xff]  ;;  %v17617_v50 = vld [vmem:[#allocation29_spill] sm:$0xff] }
 0x44f   : > { %v3095_v2 = vpop.f32.mrb[92].mxu0  ;;  %v3288_v56 = vpop.f32.mrb[68].mxu1  ;;  %v12071_v25 = vadd.f32 %v17615_v10, %v16100_v59  ;;  %5473 = vmatprep.subr.bf16.mxu1 %v13444_v17  ;;  %5301 = vmatpush1.bf16.msra.mxu0 %v13439_v12  ;;  %v13450_v5 = vld [vmem:[%s17477_s3 + $0x3ec] ss:$16 sps:$4 sm:$0xff]   ;;  %v1840_v38 = vadd.f32 %v16103_v8, %v17617_v50  ;;  %v13445_v0 = vld [vmem:[%s17477_s3 + $0x3e0] ss:$16 sps:$4 sm:$0xff]  }
 0x450   : > { %v16589_v51 = vadd.f32 %v3095_v2, %v1835_v15  ;;  %v12207_v44 = vadd.f32 %v3288_v56, %v16093_v1  ;;  %v3097_v42 = vpop.f32.mrb[93].mxu0  ;;  %v3290_v4 = vpop.f32.mrb[69].mxu1  ;;  %v17618_v15 = vld [vmem:[#allocation51_spill] sm:$0xff]  ;;  %v17620_v41 = vld [vmem:[#allocation53_spill] sm:$0xff]  ;;  %5302 = vmatprep.subr.bf16.mxu0 %v13447_v61  ;;  %5474 = vmatpush1.bf16.msra.mxu1 %v13442_v22 }
 0x451   : > { %v12072_v2 = vadd.f32 %v17618_v15, %v16103_v8  ;;  %v16602_v10 = vadd.f32 %v3097_v42, %v1836_v52  ;;  %v12208_v56 = vadd.f32 %v3290_v4, %v16096_v43  ;;  %v3099_v17 = vpop.f32.mrb[94].mxu0  ;;  %v3292_v12 = vpop.f32.mrb[70].mxu1  ;;  %v12073_v26 = vadd.f32 %v17620_v41, %v16100_v59  ;;  %v17622_v52 = vld [vmem:[#allocation56_spill] sm:$0xff]  ;;  %5475 = vmatprep.subr.bf16.mxu1 %v13450_v5  ;;  %v17627_v22 = vld [vmem:[#allocation33_spill] sm:$0xff] }
 0x452   : > { %17616 = vst [vmem:[#allocation26_spill] sm:$0xff] %v16589_v51  ;;  %v3725_v57 = vmax.f32 %v12071_v25, %v12207_v44  ;;  %v16610_v51 = vadd.f32 %v3099_v17, %v1839_v19  ;;  %v12209_v50 = vadd.f32 %v3292_v12, %v16093_v1  ;;  %v3101_v16 = vpop.f32.mrb[95].mxu0  ;;  %v3294_v15 = vpop.f32.mrb[71].mxu1  ;;  %v12074_v42 = vadd.f32 %v17622_v52, %v16103_v8  ;;  %v13448_v41 = vld [vmem:[%s17477_s3 + $0x3e8] ss:$16 sps:$4 sm:$0xff]   ;;  %v17625_v17 = vld [vmem:[#allocation31_spill] sm:$0xff] }
 0x453   : > { %17619 = vst [vmem:[#allocation27_spill] sm:$0xff] %v16602_v10  ;;  %v3726_v4 = vmax.f32 %v12072_v2, %v12208_v56  ;;  %v16615_v10 = vadd.f32 %v3101_v16, %v1840_v38  ;;  %v12210_v13 = vadd.f32 %v3294_v15, %v16096_v43  ;;  %5303 = vmatpush1.bf16.msra.mxu0 %v13445_v0  ;;  %v17624_v44 = vld [vmem:[#allocation30_spill] sm:$0xff]  ;;  %v17626_v38 = vld [vmem:[#allocation32_spill] sm:$0xff]  ;;  %v17629_v0 = vld [vmem:[#allocation59_spill] sm:$0xff] }
 0x454   : > { %17621 = vst [vmem:[#allocation28_spill] sm:$0xff] %v16610_v51  ;;  %v3813_v19 = vmax.f32 %v3721_v48, %v3725_v57  ;;  %v3727_v25 = vmax.f32 %v12073_v26, %v12209_v50  ;;  %v1843_v61 = vadd.f32 %v16100_v59, %v17624_v44  ;;  %v1844_v12 = vadd.f32 %v16103_v8, %v17625_v17  ;;  %v17628_v52 = vld [vmem:[#allocation58_spill] sm:$0xff]  ;;  %v17630_v5 = vld [vmem:[#allocation60_spill] sm:$0xff] }
 0x455   : > { %17623 = vst [vmem:[#allocation50_spill] sm:$0xff] %v16615_v10  ;;  %v3814_v2 = vmax.f32 %v3722_v20, %v3726_v4  ;;  %v3728_v16 = vmax.f32 %v12074_v42, %v12210_v13  ;;  %v1847_v56 = vadd.f32 %v16100_v59, %v17626_v38  ;;  %v1848_v15 = vadd.f32 %v16103_v8, %v17627_v22  ;;  %v17631_v13 = vld [vmem:[#allocation61_spill] sm:$0xff] }
 0x456   : > { %v16631_v57 = vadd.f32 %v17628_v52, %v16100_v59  ;;  %v3815_v26 = vmax.f32 %v3723_v14, %v3727_v25  ;;  %v16635_v48 = vadd.f32 %v17629_v0, %v16103_v8  ;;  %v16639_v50 = vadd.f32 %v17630_v5, %v16100_v59  ;;  %5476 = vmatpush1.bf16.msra.mxu1 %v13448_v41 }
 0x457   : > { %v16643_v20 = vadd.f32 %v17631_v13, %v16103_v8  ;;  %v3816_v42 = vmax.f32 %v3724_v34, %v3728_v16  ;;  %v3105_v4 = vpop.f32.mrb[96].mxu0  ;;  %v3298_v44 = vpop.f32.mrb[72].mxu1  ;;  %v3869_v17 = vmax.f32 %v3813_v19, 0.0  ;;  %v3870_v0 = vmax.f32 %v3814_v2, 0.0 }
 0x458   : > { %v3871_v38 = vmax.f32 %v3815_v26, 0.0  ;;  %v16645_v22 = vadd.f32 %v3105_v4, %v1843_v61  ;;  %v12211_v14 = vadd.f32 %v3298_v44, %v16093_v1  ;;  %v3107_v25 = vpop.f32.mrb[97].mxu0  ;;  %v3300_v52 = vpop.f32.mrb[73].mxu1  ;;  %v13453_v44 = vld [vmem:[%s17477_s3 + $0x404] ss:$16 sps:$4 sm:$0xff]  }
 0x459   : > { %v3872_v10 = vmax.f32 %v3816_v42, 0.0  ;;  %v16648_v5 = vadd.f32 %v3107_v25, %v1844_v12  ;;  %v12212_v51 = vadd.f32 %v3300_v52, %v16096_v43  ;;  %v3109_v13 = vpop.f32.mrb[98].mxu0  ;;  %v3302_v60 = vpop.f32.mrb[74].mxu1  ;;  %6144 = vmatprep.subr.bf16.mxu0 %v13453_v44 }
 0x45a   : > { %v16651_v34 = vpack.c.bf16 %v3871_v38, %v3869_v17  ;;  %v3729_v41 = vmax.f32 %v16631_v57, %v12211_v14  ;;  %v16654_v19 = vadd.f32 %v3109_v13, %v1847_v56  ;;  %v12213_v61 = vadd.f32 %v3302_v60, %v16093_v1  ;;  %v3111_v16 = vpop.f32.mrb[99].mxu0  ;;  %v3304_v26 = vpop.f32.mrb[75].mxu1  ;;  %v13456_v60 = vld [vmem:[%s17477_s3 + $0x40c] ss:$16 sps:$4 sm:$0xff]  }
 0x45b   : > { %v16657_v4 = vpack.c.bf16 %v3872_v10, %v3870_v0  ;;  %v3730_v2 = vmax.f32 %v16635_v48, %v12212_v51  ;;  %v16660_v12 = vadd.f32 %v3111_v16, %v1848_v15  ;;  %v12214_v42 = vadd.f32 %v3304_v26, %v16096_v43  ;;  %v17636_v51 = vld [vmem:[#allocation34_spill] sm:$0xff]  ;;  %v17637_v15 = vld [vmem:[#allocation35_spill] sm:$0xff]  ;;  %6317 = vmatprep.subr.bf16.mxu1 %v13456_v60  ;;  %v17638_v38 = vld [vmem:[#allocation36_spill] sm:$0xff] }
 0x45c   : > { %17632 = vst [vmem:[#allocation29_spill] sm:$0xff] %v16651_v34  ;;  %17633 = vst [vmem:[#allocation51_spill] sm:$0xff] %v16654_v19  ;;  %v3731_v57 = vmax.f32 %v16639_v50, %v12213_v61  ;;  %v1851_v10 = vadd.f32 %v16100_v59, %v17636_v51  ;;  %v1852_v48 = vadd.f32 %v16103_v8, %v17637_v15  ;;  %v17639_v14 = vld [vmem:[#allocation62_spill] sm:$0xff]  ;;  %v17641_v16 = vld [vmem:[#allocation37_spill] sm:$0xff] }
 0x45d   : > { %17634 = vst [vmem:[#allocation53_spill] sm:$0xff] %v16657_v4  ;;  %17635 = vst [vmem:[#allocation56_spill] sm:$0xff] %v16660_v12  ;;  %v3732_v56 = vmax.f32 %v16643_v20, %v12214_v42  ;;  %4472 = vmatprep.mubr.bf16.mxu0 %v16657_v4  ;;  %4645 = vmatprep.mubr.bf16.mxu1 %v16657_v4  ;;  %v1855_v20 = vadd.f32 %v16100_v59, %v17638_v38  ;;  %v17642_v42 = vld [vmem:[#allocation63_spill] sm:$0xff]  ;;  %v17646_v12 = vld [vmem:[#allocation38_spill] sm:$0xff] }
 0x45e   : > { %4473 = vmatmul.mubr.bf16.gmra.mrb[136].mxu0 %v16651_v34  ;;  %4646 = vmatmul.mubr.bf16.gmra.mrb[160].mxu1 %v16651_v34  ;;  %v12079_v25 = vadd.f32 %v17639_v14, %v16100_v59  ;;  %v1856_v26 = vadd.f32 %v16103_v8, %v17641_v16  ;;  %v12080_v51 = vadd.f32 %v17642_v42, %v16103_v8  ;;  %v17644_v14 = vld [vmem:[#allocation64_spill] sm:$0xff]  ;;  %v17649_v19 = vld [vmem:[#allocation41_spill] sm:$0xff] }
 0x45f   : > { %v3115_v50 = vpop.f32.mrb[100].mxu0  ;;  %v3308_v17 = vpop.f32.mrb[76].mxu1  ;;  %v12082_v16 = vadd.f32 %v16158_v31, %v16103_v8  ;;  %v1864_v31 = vadd.f32 %v16103_v8, %v17649_v19 }
 0x460   : > { %v16683_v52 = vadd.f32 %v3115_v50, %v1851_v10  ;;  %v12215_v0 = vadd.f32 %v3308_v17, %v16093_v1  ;;  %v3117_v13 = vpop.f32.mrb[101].mxu0  ;;  %v3310_v61 = vpop.f32.mrb[77].mxu1  ;;  %v12081_v10 = vadd.f32 %v17644_v14, %v16100_v59  ;;  %v1859_v14 = vadd.f32 %v16100_v59, %v17646_v12 }
 0x461   : > { %v16690_v44 = vadd.f32 %v3117_v13, %v1852_v48  ;;  %v12216_v60 = vadd.f32 %v3310_v61, %v16096_v43  ;;  %v3119_v15 = vpop.f32.mrb[102].mxu0  ;;  %v3312_v38 = vpop.f32.mrb[78].mxu1  ;;  %v16721_v12 = vadd.f32 %v16187_v21, %v16100_v59 }
 0x462   : > { %17640 = vst [vmem:[#allocation30_spill] sm:$0xff] %v16683_v52  ;;  %v3733_v50 = vmax.f32 %v12079_v25, %v12215_v0  ;;  %v16695_v34 = vadd.f32 %v3119_v15, %v1855_v20  ;;  %v12217_v17 = vadd.f32 %v3312_v38, %v16093_v1  ;;  %v3121_v4 = vpop.f32.mrb[103].mxu0  ;;  %v3314_v52 = vpop.f32.mrb[79].mxu1  ;;  %v17647_v25 = vld [vmem:[#allocation39_spill] sm:$0xff]  ;;  %v17648_v38 = vld [vmem:[#allocation40_spill] sm:$0xff] }
 0x463   : > { %17643 = vst [vmem:[#allocation31_spill] sm:$0xff] %v16690_v44  ;;  %v3734_v42 = vmax.f32 %v12080_v51, %v12216_v60  ;;  %v16700_v48 = vadd.f32 %v3121_v4, %v1856_v26  ;;  %v12218_v13 = vadd.f32 %v3314_v52, %v16096_v43  ;;  %v1860_v20 = vadd.f32 %v16103_v8, %v17647_v25 }
 0x464   : > { %17645 = vst [vmem:[#allocation32_spill] sm:$0xff] %v16695_v34  ;;  %v3817_v61 = vmax.f32 %v3729_v41, %v3733_v50  ;;  %v3735_v44 = vmax.f32 %v12081_v10, %v12217_v17  ;;  %v1863_v34 = vadd.f32 %v16100_v59, %v17648_v38  ;;  %v16713_v4 = vadd.f32 %v16173_v63, %v16100_v59 }
 0x465   : > { %v3818_v0 = vmax.f32 %v3730_v2, %v3734_v42  ;;  %v3736_v15 = vmax.f32 %v12082_v16, %v12218_v13  ;;  %v16717_v52 = vadd.f32 %v16180_v23, %v16103_v8  ;;  %v16725_v2 = vadd.f32 %v16195_v18, %v16103_v8 }
 0x466   : > { %v3819_v41 = vmax.f32 %v3731_v57, %v3735_v44  ;;  %v3873_v60 = vmax.f32 %v3817_v61, 0.0 }
 0x467   : > { %v3820_v26 = vmax.f32 %v3732_v56, %v3736_v15  ;;  %v3125_v51 = vpop.f32.mrb[104].mxu0  ;;  %v3318_v19 = vpop.f32.mrb[80].mxu1  ;;  %v3874_v50 = vmax.f32 %v3818_v0, 0.0 }
 0x468   : > { %v3875_v10 = vmax.f32 %v3819_v41, 0.0  ;;  %v16727_v63 = vadd.f32 %v3125_v51, %v1859_v14  ;;  %v12219_v57 = vadd.f32 %v3318_v19, %v16093_v1  ;;  %v3127_v44 = vpop.f32.mrb[105].mxu0  ;;  %v3320_v23 = vpop.f32.mrb[81].mxu1 }
 0x469   : > { %v3876_v17 = vmax.f32 %v3820_v26, 0.0  ;;  %v16730_v16 = vadd.f32 %v3127_v44, %v1860_v20  ;;  %v12220_v21 = vadd.f32 %v3320_v23, %v16096_v43  ;;  %v3129_v42 = vpop.f32.mrb[106].mxu0  ;;  %v3322_v18 = vpop.f32.mrb[82].mxu1 }
 0x46a   : > { %v16733_v13 = vpack.c.bf16 %v3875_v10, %v3873_v60  ;;  %v3737_v56 = vmax.f32 %v16713_v4, %v12219_v57  ;;  %v16736_v61 = vadd.f32 %v3129_v42, %v1863_v34  ;;  %v12221_v14 = vadd.f32 %v3322_v18, %v16093_v1  ;;  %v3131_v25 = vpop.f32.mrb[107].mxu0  ;;  %v3324_v15 = vpop.f32.mrb[83].mxu1  ;;  %v17652_v34 = vld [vmem:[#allocation42_spill] sm:$0xff]  ;;  %v17654_v10 = vld [vmem:[#allocation44_spill] sm:$0xff] }
 0x46b   : > { %v16739_v38 = vpack.c.bf16 %v3876_v17, %v3874_v50  ;;  %v3738_v0 = vmax.f32 %v16717_v52, %v12220_v21  ;;  %v16742_v20 = vadd.f32 %v3131_v25, %v1864_v31  ;;  %v12222_v41 = vadd.f32 %v3324_v15, %v16096_v43  ;;  %v17653_v52 = vld [vmem:[#allocation43_spill] sm:$0xff]  ;;  %v17655_v17 = vld [vmem:[#allocation45_spill] sm:$0xff] }
 0x46c   : > { %17650 = vst [vmem:[#allocation33_spill] sm:$0xff] %v16733_v13  ;;  %v3739_v26 = vmax.f32 %v16721_v12, %v12221_v14  ;;  %v1867_v4 = vadd.f32 %v16100_v59, %v17652_v34  ;;  %v1868_v31 = vadd.f32 %v16103_v8, %v17653_v52  ;;  %v1871_v12 = vadd.f32 %v16100_v59, %v17654_v10 }
 0x46d   : > { %17651 = vst [vmem:[#allocation58_spill] sm:$0xff] %v16739_v38  ;;  %v3740_v51 = vmax.f32 %v16725_v2, %v12222_v41  ;;  %4482 = vmatprep.mubr.bf16.mxu0 %v16739_v38  ;;  %4655 = vmatprep.mubr.bf16.mxu1 %v16739_v38  ;;  %v12087_v2 = vadd.f32 %v16222_v49, %v16100_v59 }
 0x46e   : > { %4483 = vmatmul.mubr.bf16.gmra.mrb[140].mxu0 %v16733_v13  ;;  %4656 = vmatmul.mubr.bf16.gmra.mrb[164].mxu1 %v16733_v13  ;;  %v1872_v21 = vadd.f32 %v16103_v8, %v17655_v17  ;;  %v12088_v42 = vadd.f32 %v16230_v53, %v16103_v8  ;;  %v12089_v49 = vadd.f32 %v16241_v27, %v16100_v59 }
 0x46f   : > { %v3135_v19 = vpop.f32.mrb[108].mxu0  ;;  %v3328_v60 = vpop.f32.mrb[84].mxu1 }
 0x470   : > { %v16759_v57 = vadd.f32 %v3135_v19, %v1867_v4  ;;  %v12223_v44 = vadd.f32 %v3328_v60, %v16093_v1  ;;  %v3137_v23 = vpop.f32.mrb[109].mxu0  ;;  %v3330_v50 = vpop.f32.mrb[85].mxu1  ;;  %v12090_v60 = vadd.f32 %v16246_v33, %v16103_v8 }
 0x471   : > { %v16766_v18 = vadd.f32 %v3137_v23, %v1868_v31  ;;  %v12224_v14 = vadd.f32 %v3330_v50, %v16096_v43  ;;  %v3139_v25 = vpop.f32.mrb[110].mxu0  ;;  %v3332_v15 = vpop.f32.mrb[86].mxu1 }
 0x472   : > { %v3741_v41 = vmax.f32 %v12087_v2, %v12223_v44  ;;  %v16771_v34 = vadd.f32 %v3139_v25, %v1871_v12  ;;  %v12225_v4 = vadd.f32 %v3332_v15, %v16093_v1  ;;  %v3141_v52 = vpop.f32.mrb[111].mxu0  ;;  %v3334_v19 = vpop.f32.mrb[87].mxu1  ;;  %v12091_v44 = vadd.f32 %v16257_v32, %v16100_v59 }
 0x473   : > { %v3742_v53 = vmax.f32 %v12088_v42, %v12224_v14  ;;  %v16776_v31 = vadd.f32 %v3141_v52, %v1872_v21  ;;  %v12226_v10 = vadd.f32 %v3334_v19, %v16096_v43  ;;  %v12092_v21 = vadd.f32 %v16272_v55, %v16103_v8 }
 0x474   : > { %v3821_v23 = vmax.f32 %v3737_v56, %v3741_v41  ;;  %v3743_v50 = vmax.f32 %v12089_v49, %v12225_v4  ;;  %v12094_v41 = vadd.f32 %v16291_v35, %v16103_v8 }
 0x475   : > { %v3822_v17 = vmax.f32 %v3738_v0, %v3742_v53  ;;  %v3744_v13 = vmax.f32 %v12090_v60, %v12226_v10  ;;  %v12096_v10 = vadd.f32 %v16329_v62, %v16103_v8 }
 0x476   : > { %v3823_v27 = vmax.f32 %v3739_v26, %v3743_v50  ;;  %v3877_v25 = vmax.f32 %v3821_v23, 0.0 }
 0x477   : > { %v3824_v2 = vmax.f32 %v3740_v51, %v3744_v13  ;;  %v3338_v12 = vpop.f32.mrb[88].mxu1  ;;  %v3878_v42 = vmax.f32 %v3822_v17, 0.0  ;;  %v12093_v13 = vadd.f32 %v16282_v28, %v16100_v59  ;;  %v17656_v17 = vld [vmem:[#allocation69_spill] sm:$0xff] }
 0x478   : > { %v3879_v15 = vmax.f32 %v3823_v27, 0.0  ;;  %v12227_v38 = vadd.f32 %v3338_v12, %v16093_v1  ;;  %v3340_v33 = vpop.f32.mrb[89].mxu1  ;;  %v12097_v27 = vadd.f32 %v17656_v17, %v16100_v59 }
 0x479   : > { %v3880_v14 = vmax.f32 %v3824_v2, 0.0  ;;  %v12228_v56 = vadd.f32 %v3340_v33, %v16096_v43  ;;  %v3342_v0 = vpop.f32.mrb[90].mxu1 }
 0x47a   : > { %v16787_v26 = vpack.c.bf16 %v3879_v15, %v3877_v25  ;;  %v3745_v51 = vmax.f32 %v12091_v44, %v12227_v38  ;;  %v12229_v32 = vadd.f32 %v3342_v0, %v16093_v1  ;;  %v3344_v49 = vpop.f32.mrb[91].mxu1  ;;  %v12095_v38 = vadd.f32 %v16321_v47, %v16100_v59  ;;  %v17657_v25 = vld [vmem:[#allocation70_spill] sm:$0xff] }
 0x47b   : > { %v16792_v4 = vpack.c.bf16 %v3880_v14, %v3878_v42  ;;  %v3746_v55 = vmax.f32 %v12092_v21, %v12228_v56  ;;  %v12230_v52 = vadd.f32 %v3344_v49, %v16096_v43  ;;  %v12098_v15 = vadd.f32 %v17657_v25, %v16103_v8 }
 0x47c   : > { %v3747_v19 = vmax.f32 %v12093_v13, %v12229_v32  ;;  %v12099_v32 = vadd.f32 %v16353_v39, %v16100_v59 }
 0x47d   : > { %v3748_v60 = vmax.f32 %v12094_v41, %v12230_v52  ;;  %4492 = vmatprep.mubr.bf16.mxu0 %v16792_v4  ;;  %4665 = vmatprep.mubr.bf16.mxu1 %v16792_v4 }
 0x47e   : > { %4493 = vmatmul.mubr.bf16.gmra.mrb[144].mxu0 %v16787_v26  ;;  %4666 = vmatmul.mubr.bf16.gmra.mrb[168].mxu1 %v16787_v26 }
 0x47f   : > { %v3348_v28 = vpop.f32.mrb[92].mxu1 }
 0x480   : > { %v12231_v35 = vadd.f32 %v3348_v28, %v16093_v1  ;;  %v3350_v53 = vpop.f32.mrb[93].mxu1 }
 0x481   : > { %v12232_v23 = vadd.f32 %v3350_v53, %v16096_v43  ;;  %v3352_v50 = vpop.f32.mrb[94].mxu1 }
 0x482   : > { %v3749_v2 = vmax.f32 %v12095_v38, %v12231_v35  ;;  %v12233_v12 = vadd.f32 %v3352_v50, %v16093_v1  ;;  %v3354_v44 = vpop.f32.mrb[95].mxu1  ;;  %v12100_v38 = vadd.f32 %v16358_v3, %v16103_v8  ;;  %v12102_v50 = vadd.f32 %v16370_v11, %v16103_v8 }
 0x483   : > { %v3750_v47 = vmax.f32 %v12096_v10, %v12232_v23  ;;  %v12234_v33 = vadd.f32 %v3354_v44, %v16096_v43  ;;  %v12103_v44 = vadd.f32 %v16399_v37, %v16100_v59 }
 0x484   : > { %v3825_v21 = vmax.f32 %v3745_v51, %v3749_v2  ;;  %v3751_v42 = vmax.f32 %v12097_v27, %v12233_v12 }
 0x485   : > { %v3826_v14 = vmax.f32 %v3746_v55, %v3750_v47  ;;  %v3752_v62 = vmax.f32 %v12098_v15, %v12234_v33  ;;  %v12104_v15 = vadd.f32 %v16404_v9, %v16103_v8 }
 0x486   : > { %v3827_v56 = vmax.f32 %v3747_v19, %v3751_v42  ;;  %v3881_v49 = vmax.f32 %v3825_v21, 0.0  ;;  %v12101_v19 = vadd.f32 %v16363_v58, %v16100_v59  ;;  %v12105_v21 = vadd.f32 %v16415_v30, %v16100_v59 }
 0x487   : > { %v3828_v0 = vmax.f32 %v3748_v60, %v3752_v62  ;;  %v3358_v13 = vpop.f32.mrb[96].mxu1  ;;  %v3882_v35 = vmax.f32 %v3826_v14, 0.0  ;;  %v12107_v30 = vadd.f32 %v16425_v40, %v16100_v59 }
 0x488   : > { %v3883_v41 = vmax.f32 %v3827_v56, 0.0  ;;  %v12235_v52 = vadd.f32 %v3358_v13, %v16093_v1  ;;  %v3360_v28 = vpop.f32.mrb[97].mxu1  ;;  %v17658_v56 = vld [vmem:[#allocation73_spill] sm:$0xff] }
 0x489   : > { %v3884_v53 = vmax.f32 %v3828_v0, 0.0  ;;  %v12236_v51 = vadd.f32 %v3360_v28, %v16096_v43  ;;  %v3362_v55 = vpop.f32.mrb[98].mxu1  ;;  %v12106_v0 = vadd.f32 %v17658_v56, %v16103_v8 }
 0x48a   : > { %v16819_v60 = vpack.c.bf16 %v3883_v41, %v3881_v49  ;;  %v3753_v10 = vmax.f32 %v12099_v32, %v12235_v52  ;;  %v12237_v39 = vadd.f32 %v3362_v55, %v16093_v1  ;;  %v3364_v23 = vpop.f32.mrb[99].mxu1 }
 0x48b   : > { %v16824_v17 = vpack.c.bf16 %v3884_v53, %v3882_v35  ;;  %v3754_v3 = vmax.f32 %v12100_v38, %v12236_v51  ;;  %v12238_v27 = vadd.f32 %v3364_v23, %v16096_v43 }
 0x48c   : > { %v3755_v2 = vmax.f32 %v12101_v19, %v12237_v39  ;;  %v12108_v19 = vadd.f32 %v16430_v29, %v16103_v8 }
 0x48d   : > { %v3756_v12 = vmax.f32 %v12102_v50, %v12238_v27  ;;  %4502 = vmatprep.mubr.bf16.mxu0 %v16824_v17  ;;  %4675 = vmatprep.mubr.bf16.mxu1 %v16824_v17 }
 0x48e   : > { %4503 = vmatmul.mubr.bf16.gmra.mrb[148].mxu0 %v16819_v60  ;;  %4676 = vmatmul.mubr.bf16.gmra.mrb[172].mxu1 %v16819_v60 }
 0x48f   : > { %v3368_v58 = vpop.f32.mrb[100].mxu1 }
 0x490   : > { %v12239_v11 = vadd.f32 %v3368_v58, %v16093_v1  ;;  %v3370_v25 = vpop.f32.mrb[101].mxu1  ;;  %v12110_v58 = vadd.f32 %v16442_v54, %v16103_v8 }
 0x491   : > { %v12240_v47 = vadd.f32 %v3370_v25, %v16096_v43  ;;  %v3372_v33 = vpop.f32.mrb[102].mxu1 }
 0x492   : > { %v3757_v42 = vmax.f32 %v12103_v44, %v12239_v11  ;;  %v12241_v14 = vadd.f32 %v3372_v33, %v16093_v1  ;;  %v3374_v62 = vpop.f32.mrb[103].mxu1 }
 0x493   : > { %v3758_v37 = vmax.f32 %v12104_v15, %v12240_v47  ;;  %v12242_v13 = vadd.f32 %v3374_v62, %v16096_v43  ;;  %v12111_v47 = vadd.f32 %v16471_v7, %v16100_v59  ;;  %v12113_v62 = vadd.f32 %v16487_v45, %v16100_v59 }
 0x494   : > { %v3829_v32 = vmax.f32 %v3753_v10, %v3757_v42  ;;  %v3759_v49 = vmax.f32 %v12105_v21, %v12241_v14  ;;  %v12112_v21 = vadd.f32 %v16476_v6, %v16103_v8 }
 0x495   : > { %v3830_v41 = vmax.f32 %v3754_v3, %v3758_v37  ;;  %v3760_v9 = vmax.f32 %v12106_v0, %v12242_v13  ;;  %v12109_v3 = vadd.f32 %v16435_v24, %v16100_v59  ;;  %v12114_v13 = vadd.f32 %v16492_v36, %v16103_v8 }
 0x496   : > { %v3831_v52 = vmax.f32 %v3755_v2, %v3759_v49  ;;  %v3885_v35 = vmax.f32 %v3829_v32, 0.0 }
 0x497   : > { %v3832_v28 = vmax.f32 %v3756_v12, %v3760_v9  ;;  %v3378_v38 = vpop.f32.mrb[104].mxu1  ;;  %v3886_v39 = vmax.f32 %v3830_v41, 0.0 }
 0x498   : > { %v3887_v53 = vmax.f32 %v3831_v52, 0.0  ;;  %v12243_v51 = vadd.f32 %v3378_v38, %v16093_v1  ;;  %v3380_v55 = vpop.f32.mrb[105].mxu1 }
 0x499   : > { %v3888_v23 = vmax.f32 %v3832_v28, 0.0  ;;  %v12244_v10 = vadd.f32 %v3380_v55, %v16096_v43  ;;  %v3382_v50 = vpop.f32.mrb[106].mxu1 }
 0x49a   : > { %v16851_v27 = vpack.c.bf16 %v3887_v53, %v3885_v35  ;;  %v3761_v2 = vmax.f32 %v12107_v30, %v12243_v51  ;;  %v12245_v40 = vadd.f32 %v3382_v50, %v16093_v1  ;;  %v3384_v12 = vpop.f32.mrb[107].mxu1  ;;  %v17659_v50 = vld [vmem:[#allocation25_spill] sm:$0xff] }
 0x49b   : > { %v16856_v44 = vpack.c.bf16 %v3888_v23, %v3886_v39  ;;  %v3762_v29 = vmax.f32 %v12108_v19, %v12244_v10  ;;  %v12246_v11 = vadd.f32 %v3384_v12, %v16096_v43 }
 0x49c   : > { %v3763_v25 = vmax.f32 %v12109_v3, %v12245_v40  ;;  %v17660_v40 = vld [vmem:[#allocation47_spill] sm:$0xff] }
 0x49d   : > { %v3764_v15 = vmax.f32 %v12110_v58, %v12246_v11  ;;  %4512 = vmatprep.mubr.bf16.mxu0 %v16856_v44  ;;  %4685 = vmatprep.mubr.bf16.mxu1 %v16856_v44  ;;  %v17661_v58 = vld [vmem:[#allocation49_spill] sm:$0xff] }
 0x49e   : > { %4513 = vmatmul.mubr.bf16.gmra.mrb[152].mxu0 %v16851_v27  ;;  %4686 = vmatmul.mubr.bf16.gmra.mrb[176].mxu1 %v16851_v27 }
 0x49f   : > { %v3388_v24 = vpop.f32.mrb[108].mxu1 }
 0x4a0   : > { %v12247_v54 = vadd.f32 %v3388_v24, %v16093_v1  ;;  %v3390_v33 = vpop.f32.mrb[109].mxu1 }
 0x4a1   : > { %v12248_v42 = vadd.f32 %v3390_v33, %v16096_v43  ;;  %v3392_v14 = vpop.f32.mrb[110].mxu1 }
 0x4a2   : > { %v3765_v56 = vmax.f32 %v12111_v47, %v12247_v54  ;;  %v12249_v0 = vadd.f32 %v3392_v14, %v16093_v1  ;;  %v3394_v37 = vpop.f32.mrb[111].mxu1  ;;  %v17662_v47 = vld [vmem:[#allocation26_spill] sm:$0xff] }
 0x4a3   : > { %v3766_v7 = vmax.f32 %v12112_v21, %v12248_v42  ;;  %v12250_v32 = vadd.f32 %v3394_v37, %v16096_v43  ;;  %v17663_v42 = vld [vmem:[#allocation27_spill] sm:$0xff] }
 0x4a4   : > { %v3833_v49 = vmax.f32 %v3761_v2, %v3765_v56  ;;  %v3767_v41 = vmax.f32 %v12113_v62, %v12249_v0  ;;  %v17664_v0 = vld [vmem:[#allocation28_spill] sm:$0xff] }
 0x4a5   : > { %v3834_v9 = vmax.f32 %v3762_v29, %v3766_v7  ;;  %v3768_v6 = vmax.f32 %v12114_v13, %v12250_v32  ;;  %v17665_v7 = vld [vmem:[#allocation50_spill] sm:$0xff] }
 0x4a6   : > { %v3835_v52 = vmax.f32 %v3763_v25, %v3767_v41  ;;  %v3889_v30 = vmax.f32 %v3833_v49, 0.0 }
 0x4a7   : > { %v3836_v28 = vmax.f32 %v3764_v15, %v3768_v6  ;;  %v3398_v38 = vpop.f32.mrb[112].mxu1  ;;  %v3890_v53 = vmax.f32 %v3834_v9, 0.0 }
 0x4a8   : > { %v3891_v35 = vmax.f32 %v3835_v52, 0.0  ;;  %v12251_v59 = vadd.f32 %v3398_v38, %v16093_v1  ;;  %v3400_v45 = vpop.f32.mrb[113].mxu1 }
 0x4a9   : > { %v3892_v51 = vmax.f32 %v3836_v28, 0.0  ;;  %v12252_v55 = vadd.f32 %v3400_v45, %v16096_v43  ;;  %v3402_v8 = vpop.f32.mrb[114].mxu1 }
 0x4aa   : > { %v16877_v36 = vpack.c.bf16 %v3891_v35, %v3889_v30  ;;  %v3769_v19 = vmax.f32 %v16521_v46, %v12251_v59  ;;  %v12253_v39 = vadd.f32 %v3402_v8, %v16093_v1  ;;  %v3404_v23 = vpop.f32.mrb[115].mxu1 }
 0x4ab   : > { %v16881_v10 = vpack.c.bf16 %v3892_v51, %v3890_v53  ;;  %v3770_v3 = vmax.f32 %v17659_v50, %v12252_v55  ;;  %v12254_v2 = vadd.f32 %v3404_v23, %v16096_v43  ;;  %v17666_v50 = vld [vmem:[#allocation51_spill] sm:$0xff] }
 0x4ac   : > { %v3771_v12 = vmax.f32 %v17660_v40, %v12253_v39 }
 0x4ad   : > { %v3772_v29 = vmax.f32 %v17661_v58, %v12254_v2  ;;  %4522 = vmatprep.mubr.bf16.mxu0 %v16881_v10  ;;  %4695 = vmatprep.mubr.bf16.mxu1 %v16881_v10  ;;  %v17667_v2 = vld [vmem:[#allocation56_spill] sm:$0xff] }
 0x4ae   : > { %4523 = vmatmul.mubr.bf16.gmra.mrb[156].mxu0 %v16877_v36  ;;  %4696 = vmatmul.mubr.bf16.gmra.mrb[180].mxu1 %v16877_v36 }
 0x4af   : > { %v3408_v46 = vpop.f32.mrb[116].mxu1 }
 0x4b0   : > { %v12255_v11 = vadd.f32 %v3408_v46, %v16093_v1  ;;  %v3410_v25 = vpop.f32.mrb[117].mxu1  ;;  %v17668_v46 = vld [vmem:[#allocation30_spill] sm:$0xff] }
 0x4b1   : > { %v12256_v15 = vadd.f32 %v3410_v25, %v16096_v43  ;;  %v3412_v24 = vpop.f32.mrb[118].mxu1 }
 0x4b2   : > { %v3773_v54 = vmax.f32 %v17662_v47, %v12255_v11  ;;  %v12257_v33 = vadd.f32 %v3412_v24, %v16093_v1  ;;  %v3414_v21 = vpop.f32.mrb[119].mxu1  ;;  %v17669_v24 = vld [vmem:[#allocation31_spill] sm:$0xff] }
 0x4b3   : > { %v3774_v14 = vmax.f32 %v17663_v42, %v12256_v15  ;;  %v12258_v62 = vadd.f32 %v3414_v21, %v16096_v43  ;;  %v17670_v21 = vld [vmem:[#allocation32_spill] sm:$0xff] }
 0x4b4   : > { %v3837_v56 = vmax.f32 %v3769_v19, %v3773_v54  ;;  %v3775_v37 = vmax.f32 %v17664_v0, %v12257_v33 }
 0x4b5   : > { %v3838_v13 = vmax.f32 %v3770_v3, %v3774_v14  ;;  %v3776_v32 = vmax.f32 %v17665_v7, %v12258_v62 }
 0x4b6   : > { %v3839_v49 = vmax.f32 %v3771_v12, %v3775_v37  ;;  %v3893_v6 = vmax.f32 %v3837_v56, 0.0 }
 0x4b7   : > { %v3840_v41 = vmax.f32 %v3772_v29, %v3776_v32  ;;  %v3418_v9 = vpop.f32.mrb[120].mxu1  ;;  %v3894_v30 = vmax.f32 %v3838_v13, 0.0 }
 0x4b8   : > { %v3895_v52 = vmax.f32 %v3839_v49, 0.0  ;;  %v12259_v28 = vadd.f32 %v3418_v9, %v16093_v1  ;;  %v3420_v38 = vpop.f32.mrb[121].mxu1 }
 0x4b9   : > { %v3896_v35 = vmax.f32 %v3840_v41, 0.0  ;;  %v12260_v59 = vadd.f32 %v3420_v38, %v16096_v43  ;;  %v3422_v45 = vpop.f32.mrb[122].mxu1 }
 0x4ba   : > { %v16901_v53 = vpack.c.bf16 %v3895_v52, %v3893_v6  ;;  %v3777_v51 = vmax.f32 %v16645_v22, %v12259_v28  ;;  %v12261_v55 = vadd.f32 %v3422_v45, %v16093_v1  ;;  %v3424_v8 = vpop.f32.mrb[123].mxu1 }
 0x4bb   : > { %v16905_v19 = vpack.c.bf16 %v3896_v35, %v3894_v30  ;;  %v3778_v39 = vmax.f32 %v16648_v5, %v12260_v59  ;;  %v12262_v23 = vadd.f32 %v3424_v8, %v16096_v43  ;;  %v17671_v8 = vld [vmem:[#allocation66_spill] sm:$0xff] }
 0x4bc   : > { %v3779_v3 = vmax.f32 %v17666_v50, %v12261_v55 }
 0x4bd   : > { %v3780_v40 = vmax.f32 %v17667_v2, %v12262_v23  ;;  %4532 = vmatprep.mubr.bf16.mxu0 %v16905_v19  ;;  %4705 = vmatprep.mubr.bf16.mxu1 %v16905_v19 }
 0x4be   : > { %4533 = vmatmul.mubr.bf16.gmra.mrb[160].mxu0 %v16901_v53  ;;  %4706 = vmatmul.mubr.bf16.gmra.mrb[184].mxu1 %v16901_v53 }
 0x4bf   : > { %v3428_v22 = vpop.f32.mrb[124].mxu1 }
 0x4c0   : > { %v12263_v12 = vadd.f32 %v3428_v22, %v16093_v1  ;;  %v3430_v58 = vpop.f32.mrb[125].mxu1 }
 0x4c1   : > { %v12264_v5 = vadd.f32 %v3430_v58, %v16096_v43  ;;  %v3432_v29 = vpop.f32.mrb[126].mxu1  ;;  %v13451_v58 = vld [vmem:[%s17477_s3 + $0x400] ss:$16 sps:$4 sm:$0xff]  }
 0x4c2   : > { %v3781_v11 = vmax.f32 %v17668_v46, %v12263_v12  ;;  %v12265_v25 = vadd.f32 %v3432_v29, %v16093_v1  ;;  %v3434_v15 = vpop.f32.mrb[127].mxu1 }
 0x4c3   : > { %v3782_v47 = vmax.f32 %v17669_v24, %v12264_v5  ;;  %v12266_v54 = vadd.f32 %v3434_v15, %v16096_v43  ;;  %v13454_v5 = vld [vmem:[%s17477_s3 + $0x408] ss:$16 sps:$4 sm:$0xff]   ;;  %v13457_v15 = vld [vmem:[%s17477_s3 + $0x420] ss:$16 sps:$4 sm:$0xff]  }
 0x4c4   : > { %v3841_v33 = vmax.f32 %v3777_v51, %v3781_v11  ;;  %v3783_v42 = vmax.f32 %v17670_v21, %v12265_v25  ;;  %v17673_v11 = vld [vmem:[#allocation68_spill] sm:$0xff] }
 0x4c5   : > { %v3842_v14 = vmax.f32 %v3778_v39, %v3782_v47  ;;  %v3784_v62 = vmax.f32 %v16700_v48, %v12266_v54  ;;  %v13460_v24 = vld [vmem:[%s17477_s3 + $0x428] ss:$16 sps:$4 sm:$0xff]   ;;  %v13468_v21 = vld [vmem:[%s17477_s3 + $0x44c] ss:$16 sps:$4 sm:$0xff]  }
 0x4c6   : > { %v3843_v56 = vmax.f32 %v3779_v3, %v3783_v42  ;;  %v3897_v13 = vmax.f32 %v3841_v33, 0.0  ;;  %v13465_v33 = vld [vmem:[%s17477_s3 + $0x444] ss:$16 sps:$4 sm:$0xff]  }
 0x4c7   : > { %v3844_v0 = vmax.f32 %v3780_v40, %v3784_v62  ;;  %v3438_v37 = vpop.f32.mrb[128].mxu1  ;;  %v3898_v41 = vmax.f32 %v3842_v14, 0.0  ;;  %v13463_v62 = vld [vmem:[%s17477_s3 + $0x440] ss:$16 sps:$4 sm:$0xff]  }
 0x4c8   : > { %v3899_v7 = vmax.f32 %v3843_v56, 0.0  ;;  %v12267_v32 = vadd.f32 %v3438_v37, %v16093_v1  ;;  %v3440_v49 = vpop.f32.mrb[129].mxu1  ;;  %v13466_v56 = vld [vmem:[%s17477_s3 + $0x448] ss:$16 sps:$4 sm:$0xff]   ;;  %v13474_v37 = vld [vmem:[%s17477_s3 + $0x46c] ss:$16 sps:$4 sm:$0xff]  }
 0x4c9   : > { %v3900_v9 = vmax.f32 %v3844_v0, 0.0  ;;  %v12268_v6 = vadd.f32 %v3440_v49, %v16096_v43  ;;  %v3442_v52 = vpop.f32.mrb[130].mxu1  ;;  %v13471_v0 = vld [vmem:[%s17477_s3 + $0x464] ss:$16 sps:$4 sm:$0xff]   ;;  %v13472_v49 = vld [vmem:[%s17477_s3 + $0x468] ss:$16 sps:$4 sm:$0xff]  }
 0x4ca   : > { %v16925_v28 = vpack.c.bf16 %v3899_v7, %v3897_v13  ;;  %v3785_v38 = vmax.f32 %v16727_v63, %v12267_v32  ;;  %v12269_v30 = vadd.f32 %v3442_v52, %v16093_v1  ;;  %v3444_v48 = vpop.f32.mrb[131].mxu1  ;;  %v17674_v13 = vld [vmem:[#allocation67_spill] sm:$0xff]  ;;  %v17675_v7 = vld [vmem:[#allocation72_spill] sm:$0xff] }
 0x4cb   : > { %v16929_v35 = vpack.c.bf16 %v3900_v9, %v3898_v41  ;;  %v3786_v59 = vmax.f32 %v16730_v16, %v12268_v6  ;;  %v12270_v45 = vadd.f32 %v3444_v48, %v16096_v43  ;;  %v13469_v32 = vld [vmem:[%s17477_s3 + $0x460] ss:$16 sps:$4 sm:$0xff]   ;;  %v13477_v41 = vld [vmem:[%s17477_s3 + $0x484] ss:$16 sps:$4 sm:$0xff]   ;;  %v13480_v9 = vld [vmem:[%s17477_s3 + $0x48c] ss:$16 sps:$4 sm:$0xff]  }
 0x4cc   : > { %v3787_v51 = vmax.f32 %v16736_v61, %v12269_v30  ;;  %v13475_v6 = vld [vmem:[%s17477_s3 + $0x480] ss:$16 sps:$4 sm:$0xff]   ;;  %v13478_v52 = vld [vmem:[%s17477_s3 + $0x488] ss:$16 sps:$4 sm:$0xff]   ;;  %v13486_v30 = vld [vmem:[%s17477_s3 + $0x4ac] ss:$16 sps:$4 sm:$0xff]  }
 0x4cd   : > { %v3788_v55 = vmax.f32 %v16742_v20, %v12270_v45  ;;  %4542 = vmatprep.mubr.bf16.mxu0 %v16929_v35  ;;  %4715 = vmatprep.mubr.bf16.mxu1 %v16929_v35  ;;  %v17676_v48 = vld [vmem:[#allocation71_spill] sm:$0xff] }
 0x4ce   : > { %4543 = vmatmul.mubr.bf16.gmra.mrb[164].mxu0 %v16925_v28  ;;  %4716 = vmatmul.mubr.bf16.gmra.mrb[188].mxu1 %v16925_v28  ;;  %v13481_v45 = vld [vmem:[%s17477_s3 + $0x4a0] ss:$16 sps:$4 sm:$0xff]  }
 0x4cf   : > { %v3448_v63 = vpop.f32.mrb[132].mxu1  ;;  %5304 = vmatprep.mubr.bf16.mxu0 %v17671_v8  ;;  %5477 = vmatprep.mubr.bf16.mxu1 %v17671_v8  ;;  %v13487_v8 = vld [vmem:[%s17477_s3 + $0x4c0] ss:$16 sps:$4 sm:$0xff]  }
 0x4d0   : > { %v12271_v16 = vadd.f32 %v3448_v63, %v16093_v1  ;;  %v3450_v39 = vpop.f32.mrb[133].mxu1  ;;  %v13492_v63 = vld [vmem:[%s17477_s3 + $0x4cc] ss:$16 sps:$4 sm:$0xff]  }
 0x4d1   : > { %v12272_v61 = vadd.f32 %v3450_v39, %v16096_v43  ;;  %v3452_v23 = vpop.f32.mrb[134].mxu1  ;;  %v13495_v39 = vld [vmem:[%s17477_s3 + $0x4e4] ss:$16 sps:$4 sm:$0xff]  }
 0x4d2   : > { %v3789_v20 = vmax.f32 %v16759_v57, %v12271_v16  ;;  %v12273_v50 = vadd.f32 %v3452_v23, %v16093_v1  ;;  %v3454_v3 = vpop.f32.mrb[135].mxu1  ;;  %v13459_v1 = vld [vmem:[%s17477_s3 + $0x424] ss:$16 sps:$4 sm:$0xff]   ;;  %v13490_v16 = vld [vmem:[%s17477_s3 + $0x4c8] ss:$16 sps:$4 sm:$0xff]  }
 0x4d3   : > { %v3790_v2 = vmax.f32 %v16766_v18, %v12272_v61  ;;  %v12274_v40 = vadd.f32 %v3454_v3, %v16096_v43  ;;  %v13462_v43 = vld [vmem:[%s17477_s3 + $0x42c] ss:$16 sps:$4 sm:$0xff]   ;;  %v13496_v3 = vld [vmem:[%s17477_s3 + $0x4e8] ss:$16 sps:$4 sm:$0xff]  }
 0x4d4   : > { %v3845_v22 = vmax.f32 %v3785_v38, %v3789_v20  ;;  %v3791_v12 = vmax.f32 %v16771_v34, %v12273_v50  ;;  %v17672_v34 = vld [vmem:[#allocation65_spill] sm:$0xff]  ;;  %v13498_v61 = vld [vmem:[%s17477_s3 + $0x4ec] ss:$16 sps:$4 sm:$0xff]  }
 0x4d5   : > { %v3846_v29 = vmax.f32 %v3786_v59, %v3790_v2  ;;  %v3792_v57 = vmax.f32 %v16776_v31, %v12274_v40  ;;  %v13483_v38 = vld [vmem:[%s17477_s3 + $0x4a4] ss:$16 sps:$4 sm:$0xff]   ;;  %v17678_v23 = vld [vmem:[#allocation74_spill] sm:$0xff]  ;;  %v17679_v20 = vld [vmem:[#allocation48_spill] sm:$0xff] }
 0x4d6   : > { %v3847_v18 = vmax.f32 %v3787_v51, %v3791_v12  ;;  %5305 = vmatmul.mubr.bf16.vlgmr.msra.gmra.mrb[112].mxu0 %v17672_v34  ;;  %5478 = vmatmul.mubr.bf16.vlgmr.msra.gmra.mrb[136].mxu1 %v17672_v34  ;;  %v3901_v25 = vmax.f32 %v3845_v22, 0.0  ;;  %v17677_v59 = vld [vmem:[#allocation75_spill] sm:$0xff]  ;;  %v13484_v51 = vld [vmem:[%s17477_s3 + $0x4a8] ss:$16 sps:$4 sm:$0xff]   ;;  %v13504_v40 = vld [vmem:[%s17477_s3 + $0x50c] ss:$16 sps:$4 sm:$0xff]  }
 0x4d7   : > { %v3848_v46 = vmax.f32 %v3788_v55, %v3792_v57  ;;  %5314 = vmatprep.mubr.bf16.mxu0 %v17673_v11  ;;  %5487 = vmatprep.mubr.bf16.mxu1 %v17673_v11  ;;  %v3902_v47 = vmax.f32 %v3846_v29, 0.0  ;;  %v13489_v55 = vld [vmem:[%s17477_s3 + $0x4c4] ss:$16 sps:$4 sm:$0xff]   ;;  %v13493_v50 = vld [vmem:[%s17477_s3 + $0x4e0] ss:$16 sps:$4 sm:$0xff]   ;;  %v17680_v29 = vld [vmem:[#allocation46_spill] sm:$0xff] }
 0x4d8   : > { %v3903_v31 = vmax.f32 %v3847_v18, 0.0  ;;  %6145 = vmatpush1.bf16.msra.mxu0 %v13451_v58  ;;  %6318 = vmatpush1.bf16.msra.mxu1 %v13454_v5  ;;  %v13501_v2 = vld [vmem:[%s17477_s3 + $0x504] ss:$16 sps:$4 sm:$0xff]   ;;  %v13499_v22 = vld [vmem:[%s17477_s3 + $0x500] ss:$16 sps:$4 sm:$0xff]  }
 0x4d9   : > { %v3904_v54 = vmax.f32 %v3848_v46, 0.0  ;;  %6146 = vmatprep.subr.bf16.mxu0 %v13459_v1  ;;  %6319 = vmatprep.subr.bf16.mxu1 %v13462_v43  ;;  %v13502_v12 = vld [vmem:[%s17477_s3 + $0x508] ss:$16 sps:$4 sm:$0xff]   ;;  %v13507_v58 = vld [vmem:[%s17477_s3 + $0x524] ss:$16 sps:$4 sm:$0xff]  }
 0x4da   : > { %v16977_v42 = vpack.c.bf16 %v3903_v31, %v3901_v25  ;;  %v13510_v5 = vld [vmem:[%s17477_s3 + $0x52c] ss:$16 sps:$4 sm:$0xff]   ;;  %v17681_v57 = vld [vmem:[#allocation53_spill] sm:$0xff]  ;;  %v13508_v43 = vld [vmem:[%s17477_s3 + $0x528] ss:$16 sps:$4 sm:$0xff]  }
 0x4db   : > { %v16979_v14 = vpack.c.bf16 %v3904_v54, %v3902_v47  ;;  %v13505_v1 = vld [vmem:[%s17477_s3 + $0x520] ss:$16 sps:$4 sm:$0xff]   ;;  %v13513_v18 = vld [vmem:[%s17477_s3 + $0x544] ss:$16 sps:$4 sm:$0xff]   ;;  %v13516_v34 = vld [vmem:[%s17477_s3 + $0x54c] ss:$16 sps:$4 sm:$0xff]  }
 0x4dc   : > { %6147 = vmatpush1.bf16.msra.mxu0 %v13457_v15  ;;  %6320 = vmatpush1.bf16.msra.mxu1 %v13460_v24  ;;  %v13511_v46 = vld [vmem:[%s17477_s3 + $0x540] ss:$16 sps:$4 sm:$0xff]   ;;  %v13514_v25 = vld [vmem:[%s17477_s3 + $0x548] ss:$16 sps:$4 sm:$0xff]   ;;  %v13519_v31 = vld [vmem:[%s17477_s3 + $0x564] ss:$16 sps:$4 sm:$0xff]  }
 0x4dd   : > { %6148 = vmatprep.subr.bf16.mxu0 %v13465_v33  ;;  %6321 = vmatprep.subr.bf16.mxu1 %v13468_v21  ;;  %v13522_v15 = vld [vmem:[%s17477_s3 + $0x56c] ss:$16 sps:$4 sm:$0xff]   ;;  %v17682_v24 = vld [vmem:[#allocation29_spill] sm:$0xff]  ;;  %v13520_v33 = vld [vmem:[%s17477_s3 + $0x568] ss:$16 sps:$4 sm:$0xff]  }
 0x4de   : > { %5315 = vmatmul.mubr.bf16.gmra.mrb[116].mxu0 %v17674_v13  ;;  %5488 = vmatmul.mubr.bf16.gmra.mrb[140].mxu1 %v17674_v13  ;;  %v17683_v47 = vld [vmem:[#allocation58_spill] sm:$0xff]  ;;  %v13517_v54 = vld [vmem:[%s17477_s3 + $0x560] ss:$16 sps:$4 sm:$0xff]   ;;  %v13525_v21 = vld [vmem:[%s17477_s3 + $0x584] ss:$16 sps:$4 sm:$0xff]  }
 0x4df   : > { %5324 = vmatprep.mubr.bf16.mxu0 %v17675_v7  ;;  %5497 = vmatprep.mubr.bf16.mxu1 %v17675_v7 }
 0x4e0   : > { %6149 = vmatpush1.bf16.msra.mxu0 %v13463_v62  ;;  %6322 = vmatpush1.bf16.msra.mxu1 %v13466_v56  ;;  %v13528_v62 = vld [vmem:[%s17477_s3 + $0x58c] ss:$16 sps:$4 sm:$0xff]   ;;  %v13523_v56 = vld [vmem:[%s17477_s3 + $0x580] ss:$16 sps:$4 sm:$0xff]  }
 0x4e1   : > { %6150 = vmatprep.subr.bf16.mxu0 %v13471_v0  ;;  %6323 = vmatprep.subr.bf16.mxu1 %v13474_v37  ;;  %v13526_v0 = vld [vmem:[%s17477_s3 + $0x588] ss:$16 sps:$4 sm:$0xff]   ;;  %v13531_v37 = vld [vmem:[%s17477_s3 + $0x5a4] ss:$16 sps:$4 sm:$0xff]  }
 0x4e4   : > { %6151 = vmatpush1.bf16.msra.mxu0 %v13469_v32  ;;  %6324 = vmatpush1.bf16.msra.mxu1 %v13472_v49  ;;  %v13534_v32 = vld [vmem:[%s17477_s3 + $0x5ac] ss:$16 sps:$4 sm:$0xff]   ;;  %v17684_v49 = vld [vmem:[#allocation33_spill] sm:$0xff] }
 0x4e5   : > { %6152 = vmatprep.subr.bf16.mxu0 %v13477_v41  ;;  %6325 = vmatprep.subr.bf16.mxu1 %v13480_v9  ;;  %v13529_v41 = vld [vmem:[%s17477_s3 + $0x5a0] ss:$16 sps:$4 sm:$0xff]   ;;  %v13532_v9 = vld [vmem:[%s17477_s3 + $0x5a8] ss:$16 sps:$4 sm:$0xff]  }
 0x4e6   : > { %5325 = vmatmul.mubr.bf16.gmra.mrb[120].mxu0 %v17676_v48  ;;  %5498 = vmatmul.mubr.bf16.gmra.mrb[144].mxu1 %v17676_v48 }
 0x4e7   : > { %5334 = vmatprep.mubr.bf16.mxu0 %v17677_v59  ;;  %5507 = vmatprep.mubr.bf16.mxu1 %v17677_v59 }
 0x4e8   : > { %6153 = vmatpush1.bf16.msra.mxu0 %v13475_v6  ;;  %6326 = vmatpush1.bf16.msra.mxu1 %v13478_v52  ;;  %v13537_v6 = vld [vmem:[%s17477_s3 + $0x5c4] ss:$16 sps:$4 sm:$0xff]   ;;  %v13540_v52 = vld [vmem:[%s17477_s3 + $0x5cc] ss:$16 sps:$4 sm:$0xff]  }
 0x4e9   : > { %6154 = vmatprep.subr.bf16.mxu0 %v13483_v38  ;;  %6327 = vmatprep.subr.bf16.mxu1 %v13486_v30  ;;  %v13535_v38 = vld [vmem:[%s17477_s3 + $0x5c0] ss:$16 sps:$4 sm:$0xff]   ;;  %v13538_v30 = vld [vmem:[%s17477_s3 + $0x5c8] ss:$16 sps:$4 sm:$0xff]  }
 0x4ec   : > { %6155 = vmatpush1.bf16.msra.mxu0 %v13481_v45  ;;  %6328 = vmatpush1.bf16.msra.mxu1 %v13484_v51  ;;  %v13543_v45 = vld [vmem:[%s17477_s3 + $0x5e4] ss:$16 sps:$4 sm:$0xff]   ;;  %v13546_v51 = vld [vmem:[%s17477_s3 + $0x5ec] ss:$16 sps:$4 sm:$0xff]  }
 0x4ed   : > { %6156 = vmatprep.subr.bf16.mxu0 %v13489_v55  ;;  %6329 = vmatprep.subr.bf16.mxu1 %v13492_v63  ;;  %v13541_v55 = vld [vmem:[%s17477_s3 + $0x5e0] ss:$16 sps:$4 sm:$0xff]   ;;  %v13544_v63 = vld [vmem:[%s17477_s3 + $0x5e8] ss:$16 sps:$4 sm:$0xff]  }
 0x4ee   : > { %5335 = vmatmul.mubr.bf16.gmra.mrb[124].mxu0 %v17678_v23  ;;  %5508 = vmatmul.mubr.bf16.gmra.mrb[148].mxu1 %v17678_v23 }
 0x4ef   : > { %5344 = vmatprep.mubr.bf16.mxu0 %v17679_v20  ;;  %5517 = vmatprep.mubr.bf16.mxu1 %v17679_v20 }
 0x4f0   : > { %6157 = vmatpush1.bf16.msra.mxu0 %v13487_v8  ;;  %6330 = vmatpush1.bf16.msra.mxu1 %v13490_v16  ;;  %v13549_v8 = vld [vmem:[#allocation9 + $0x4] ss:$16 sps:$4 sm:$0xff]   ;;  %v13570_v16 = vld [vmem:[#allocation9 + $0xc] ss:$16 sps:$4 sm:$0xff]  }
 0x4f1   : > { %6158 = vmatprep.subr.bf16.mxu0 %v13495_v39  ;;  %6331 = vmatprep.subr.bf16.mxu1 %v13498_v61  ;;  %v13547_v39 = vld [vmem:[#allocation9] ss:$16 sps:$4 sm:$0xff]   ;;  %v13568_v61 = vld [vmem:[#allocation9 + $0x8] ss:$16 sps:$4 sm:$0xff]  }
 0x4f4   : > { %6159 = vmatpush1.bf16.msra.mxu0 %v13493_v50  ;;  %6332 = vmatpush1.bf16.msra.mxu1 %v13496_v3  ;;  %v13552_v50 = vld [vmem:[#allocation9 + $0x24] ss:$16 sps:$4 sm:$0xff]   ;;  %v13576_v3 = vld [vmem:[#allocation9 + $0x2c] ss:$16 sps:$4 sm:$0xff]  }
 0x4f5   : > { %6160 = vmatprep.subr.bf16.mxu0 %v13501_v2  ;;  %6333 = vmatprep.subr.bf16.mxu1 %v13504_v40  ;;  %v13550_v2 = vld [vmem:[#allocation9 + $0x20] ss:$16 sps:$4 sm:$0xff]   ;;  %v13574_v40 = vld [vmem:[#allocation9 + $0x28] ss:$16 sps:$4 sm:$0xff]  }
 0x4f6   : > { %5345 = vmatmul.mubr.bf16.gmra.mrb[128].mxu0 %v17680_v29  ;;  %5518 = vmatmul.mubr.bf16.gmra.mrb[152].mxu1 %v17680_v29 }
 0x4f7   : > { %5354 = vmatprep.mubr.bf16.mxu0 %v17681_v57  ;;  %5527 = vmatprep.mubr.bf16.mxu1 %v17681_v57 }
 0x4f8   : > { %6161 = vmatpush1.bf16.msra.mxu0 %v13499_v22  ;;  %6334 = vmatpush1.bf16.msra.mxu1 %v13502_v12  ;;  %v13555_v22 = vld [vmem:[#allocation9 + $0x44] ss:$16 sps:$4 sm:$0xff]   ;;  %v13553_v12 = vld [vmem:[#allocation9 + $0x40] ss:$16 sps:$4 sm:$0xff]  }
 0x4f9   : > { %6162 = vmatprep.subr.bf16.mxu0 %v13507_v58  ;;  %6335 = vmatprep.subr.bf16.mxu1 %v13510_v5  ;;  %v13577_v58 = vld [vmem:[#allocation9 + $0x48] ss:$16 sps:$4 sm:$0xff]   ;;  %v13558_v5 = vld [vmem:[#allocation9 + $0x64] ss:$16 sps:$4 sm:$0xff]  }
 0x4fc   : > { %6163 = vmatpush1.bf16.msra.mxu0 %v13505_v1  ;;  %6336 = vmatpush1.bf16.msra.mxu1 %v13508_v43  ;;  %v13583_v1 = vld [vmem:[#allocation9 + $0x68] ss:$16 sps:$4 sm:$0xff]   ;;  %v13561_v43 = vld [vmem:[#allocation9 + $0x84] ss:$16 sps:$4 sm:$0xff]  }
 0x4fd   : > { %6164 = vmatprep.subr.bf16.mxu0 %v13513_v18  ;;  %6337 = vmatprep.subr.bf16.mxu1 %v13516_v34  ;;  %v13591_v18 = vld [vmem:[#allocation9 + $0x8c] ss:$16 sps:$4 sm:$0xff]   ;;  %v13559_v34 = vld [vmem:[#allocation9 + $0x80] ss:$16 sps:$4 sm:$0xff]  }
 0x4fe   : > { %5355 = vmatmul.mubr.bf16.gmra.mrb[132].mxu0 %v17682_v24  ;;  %5528 = vmatmul.mubr.bf16.gmra.mrb[156].mxu1 %v17682_v24 }
 0x4ff   : > { %5364 = vmatprep.mubr.bf16.mxu0 %v17683_v47  ;;  %5537 = vmatprep.mubr.bf16.mxu1 %v17683_v47 }
 0x500   : > { %6165 = vmatpush1.bf16.msra.mxu0 %v13511_v46  ;;  %6338 = vmatpush1.bf16.msra.mxu1 %v13514_v25  ;;  %v13589_v46 = vld [vmem:[#allocation9 + $0x88] ss:$16 sps:$4 sm:$0xff]   ;;  %v13564_v25 = vld [vmem:[#allocation9 + $0xa4] ss:$16 sps:$4 sm:$0xff]  }
 0x501   : > { %6166 = vmatprep.subr.bf16.mxu0 %v13519_v31  ;;  %6339 = vmatprep.subr.bf16.mxu1 %v13522_v15  ;;  %v13592_v31 = vld [vmem:[#allocation9 + $0xa8] ss:$16 sps:$4 sm:$0xff]   ;;  %v13567_v15 = vld [vmem:[#allocation9 + $0xc4] ss:$16 sps:$4 sm:$0xff]  }
 0x504   : > { %6167 = vmatpush1.bf16.msra.mxu0 %v13517_v54  ;;  %6340 = vmatpush1.bf16.msra.mxu1 %v13520_v33  ;;  %v13600_v54 = vld [vmem:[#allocation9 + $0xcc] ss:$16 sps:$4 sm:$0xff]   ;;  %v13565_v33 = vld [vmem:[#allocation9 + $0xc0] ss:$16 sps:$4 sm:$0xff]  }
 0x505   : > { %6168 = vmatprep.subr.bf16.mxu0 %v13525_v21  ;;  %6341 = vmatprep.subr.bf16.mxu1 %v13528_v62  ;;  %v13598_v21 = vld [vmem:[#allocation9 + $0xc8] ss:$16 sps:$4 sm:$0xff]   ;;  %v13573_v62 = vld [vmem:[#allocation9 + $0xe4] ss:$16 sps:$4 sm:$0xff]  }
 0x506   : > { %5365 = vmatmul.mubr.bf16.gmra.mrb[136].mxu0 %v17684_v49  ;;  %5538 = vmatmul.mubr.bf16.gmra.mrb[160].mxu1 %v17684_v49 }
 0x507   : > { %5374 = vmatprep.mubr.bf16.mxu0 %v16792_v4  ;;  %5547 = vmatprep.mubr.bf16.mxu1 %v16792_v4 }
 0x508   : > { %6169 = vmatpush1.bf16.msra.mxu0 %v13523_v56  ;;  %6342 = vmatpush1.bf16.msra.mxu1 %v13526_v0  ;;  %v13601_v56 = vld [vmem:[#allocation9 + $0xe8] ss:$16 sps:$4 sm:$0xff]   ;;  %v13582_v0 = vld [vmem:[#allocation9 + $0x104] ss:$16 sps:$4 sm:$0xff]  }
 0x509   : > { %6170 = vmatprep.subr.bf16.mxu0 %v13531_v37  ;;  %6343 = vmatprep.subr.bf16.mxu1 %v13534_v32  ;;  %v13609_v37 = vld [vmem:[#allocation9 + $0x10c] ss:$16 sps:$4 sm:$0xff]   ;;  %v13580_v32 = vld [vmem:[#allocation9 + $0x100] ss:$16 sps:$4 sm:$0xff]  }
 0x50c   : > { %6171 = vmatpush1.bf16.msra.mxu0 %v13529_v41  ;;  %6344 = vmatpush1.bf16.msra.mxu1 %v13532_v9  ;;  %v13607_v41 = vld [vmem:[#allocation9 + $0x108] ss:$16 sps:$4 sm:$0xff]   ;;  %v13588_v9 = vld [vmem:[#allocation9 + $0x124] ss:$16 sps:$4 sm:$0xff]  }
 0x50d   : > { %6172 = vmatprep.subr.bf16.mxu0 %v13537_v6  ;;  %6345 = vmatprep.subr.bf16.mxu1 %v13540_v52  ;;  %v13610_v6 = vld [vmem:[#allocation9 + $0x128] ss:$16 sps:$4 sm:$0xff]   ;;  %v13597_v52 = vld [vmem:[#allocation9 + $0x144] ss:$16 sps:$4 sm:$0xff]  }
 0x50e   : > { %5375 = vmatmul.mubr.bf16.gmra.mrb[140].mxu0 %v16787_v26  ;;  %5548 = vmatmul.mubr.bf16.gmra.mrb[164].mxu1 %v16787_v26 }
 0x50f   : > { %5384 = vmatprep.mubr.bf16.mxu0 %v16824_v17  ;;  %5557 = vmatprep.mubr.bf16.mxu1 %v16824_v17 }
 0x510   : > { %6173 = vmatpush1.bf16.msra.mxu0 %v13535_v38  ;;  %6346 = vmatpush1.bf16.msra.mxu1 %v13538_v30  ;;  %v13618_v38 = vld [vmem:[#allocation9 + $0x14c] ss:$16 sps:$4 sm:$0xff]   ;;  %v13595_v30 = vld [vmem:[#allocation9 + $0x140] ss:$16 sps:$4 sm:$0xff]  }
 0x511   : > { %6174 = vmatprep.subr.bf16.mxu0 %v13543_v45  ;;  %6347 = vmatprep.subr.bf16.mxu1 %v13546_v51  ;;  %v13616_v45 = vld [vmem:[#allocation9 + $0x148] ss:$16 sps:$4 sm:$0xff]   ;;  %v13606_v51 = vld [vmem:[#allocation9 + $0x164] ss:$16 sps:$4 sm:$0xff]  }
 0x514   : > { %6175 = vmatpush1.bf16.msra.mxu0 %v13541_v55  ;;  %6348 = vmatpush1.bf16.msra.mxu1 %v13544_v63  ;;  %v13613_v55 = vld [vmem:[#allocation9 + $0x180] ss:$16 sps:$4 sm:$0xff]   ;;  %v13642_v63 = vld [vmem:[#allocation9 + $0x1ec] ss:$16 sps:$4 sm:$0xff]  }
 0x515   : > { %7113 = vmatprep.subr.bf16.mxu0 %v13549_v8  ;;  %7156 = vmatprep.subr.bf16.mxu1 %v13570_v16  ;;  %v13637_v8 = vld [vmem:[#allocation9 + $0x1e0] ss:$16 sps:$4 sm:$0xff]   ;;  %v13640_v16 = vld [vmem:[#allocation9 + $0x1e8] ss:$16 sps:$4 sm:$0xff]  }
 0x516   : > { %5385 = vmatmul.mubr.bf16.gmra.mrb[144].mxu0 %v16819_v60  ;;  %5558 = vmatmul.mubr.bf16.gmra.mrb[168].mxu1 %v16819_v60 }
 0x517   : > { %5394 = vmatprep.mubr.bf16.mxu0 %v16856_v44  ;;  %5567 = vmatprep.mubr.bf16.mxu1 %v16856_v44 }
 0x51e   : > { %5395 = vmatmul.mubr.bf16.gmra.mrb[148].mxu0 %v16851_v27  ;;  %5568 = vmatmul.mubr.bf16.gmra.mrb[172].mxu1 %v16851_v27 }
 0x51f   : > { %5404 = vmatprep.mubr.bf16.mxu0 %v16881_v10  ;;  %5577 = vmatprep.mubr.bf16.mxu1 %v16881_v10 }
 0x526   : > { %5405 = vmatmul.mubr.bf16.gmra.mrb[152].mxu0 %v16877_v36  ;;  %5578 = vmatmul.mubr.bf16.gmra.mrb[176].mxu1 %v16877_v36 }
 0x527   : > { %5414 = vmatprep.mubr.bf16.mxu0 %v16905_v19  ;;  %5587 = vmatprep.mubr.bf16.mxu1 %v16905_v19 }
 0x52e   : > { %5415 = vmatmul.mubr.bf16.gmra.mrb[156].mxu0 %v16901_v53  ;;  %5588 = vmatmul.mubr.bf16.gmra.mrb[180].mxu1 %v16901_v53 }
 0x52f   : > { %5424 = vmatprep.mubr.bf16.mxu0 %v16929_v35  ;;  %5597 = vmatprep.mubr.bf16.mxu1 %v16929_v35 }
 0x536   : > { %5425 = vmatmul.mubr.bf16.gmra.mrb[160].mxu0 %v16925_v28  ;;  %5598 = vmatmul.mubr.bf16.gmra.mrb[184].mxu1 %v16925_v28 }
 0x537   : > { %5434 = vmatprep.mubr.bf16.mxu0 %v16979_v14  ;;  %5607 = vmatprep.mubr.bf16.mxu1 %v16979_v14 }
 0x53e   : > { %5435 = vmatmul.mubr.bf16.gmra.mrb[164].mxu0 %v16977_v42  ;;  %5608 = vmatmul.mubr.bf16.gmra.mrb[188].mxu1 %v16977_v42 }
 0x53f   : > { %6176 = vmatprep.mubr.bf16.mxu0 %v17673_v11  ;;  %6349 = vmatprep.mubr.bf16.mxu1 %v17673_v11  ;;  %v13579_v11 = vld [vmem:[#allocation9 + $0x4c] ss:$16 sps:$4 sm:$0xff]  }
 0x546   : > { %6177 = vmatmul.mubr.bf16.vlgmr.msra.gmra.mrb[112].mxu0 %v17674_v13  ;;  %6350 = vmatmul.mubr.bf16.vlgmr.msra.gmra.mrb[136].mxu1 %v17674_v13  ;;  %v13585_v13 = vld [vmem:[#allocation9 + $0x6c] ss:$16 sps:$4 sm:$0xff]  }
 0x547   : > { %6186 = vmatprep.mubr.bf16.mxu0 %v17675_v7  ;;  %6359 = vmatprep.mubr.bf16.mxu1 %v17675_v7  ;;  %v13556_v7 = vld [vmem:[#allocation9 + $0x60] ss:$16 sps:$4 sm:$0xff]  }
 0x548   : > { %7114 = vmatpush1.bf16.msra.mxu0 %v13547_v39  ;;  %7157 = vmatpush1.bf16.msra.mxu1 %v13568_v61  ;;  %v13645_v39 = vld [vmem:[#allocation9 + $0x204] ss:$16 sps:$4 sm:$0xff]   ;;  %v3967_v61 = vld [vmem:[#allocation8] sm:$0xf] }
 0x549   : > { %7115 = vmatprep.subr.bf16.mxu0 %v13552_v50  ;;  %7158 = vmatprep.subr.bf16.mxu1 %v13576_v3  ;;  %v17686_v50 = vld [vmem:[#allocation55_spill] sm:$0xff] }
 0x54a   : > { %v17250_v3 = vrot.slane %v3967_v61, %v17686_v50 }
 0x54c   : > { %7116 = vmatpush1.bf16.msra.mxu0 %v13550_v2  ;;  %7159 = vmatpush1.bf16.msra.mxu1 %v13574_v40  ;;  %v17687_v2 = vld [vmem:[#allocation52_spill] sm:$0xff] }
 0x54d   : > { %7117 = vmatprep.subr.bf16.mxu0 %v13555_v22  ;;  %7160 = vmatprep.subr.bf16.mxu1 %v13579_v11  ;;  %v17253_v40 = vrot.slane %v3967_v61, %v17687_v2  ;;  %v17688_v22 = vld [vmem:[#allocation57_spill] sm:$0xff] }
 0x54e   : > { %6187 = vmatmul.mubr.bf16.gmra.mrb[116].mxu0 %v17676_v48  ;;  %6360 = vmatmul.mubr.bf16.gmra.mrb[140].mxu1 %v17676_v48  ;;  %v13594_v48 = vld [vmem:[#allocation9 + $0xac] ss:$16 sps:$4 sm:$0xff]   ;;  %v17256_v11 = vrot.slane %v3967_v61, %v17688_v22 }
 0x54f   : > { %6196 = vmatprep.mubr.bf16.mxu0 %v17677_v59  ;;  %6369 = vmatprep.mubr.bf16.mxu1 %v17677_v59  ;;  %v13562_v59 = vld [vmem:[#allocation9 + $0xa0] ss:$16 sps:$4 sm:$0xff]  }
 0x550   : > { %7118 = vmatpush1.bf16.msra.mxu0 %v13553_v12  ;;  %7161 = vmatpush1.bf16.msra.mxu1 %v13577_v58  ;;  %v17689_v12 = vld [vmem:[#allocation54_spill] sm:$0xff] }
 0x551   : > { %7119 = vmatprep.subr.bf16.mxu0 %v13558_v5  ;;  %7162 = vmatprep.subr.bf16.mxu1 %v13585_v13  ;;  %v17259_v58 = vrot.slane %v3967_v61, %v17689_v12 }
 0x554   : > { %7120 = vmatpush1.bf16.msra.mxu0 %v13556_v7  ;;  %7163 = vmatpush1.bf16.msra.mxu1 %v13583_v1 }
 0x555   : > { %7121 = vmatprep.subr.bf16.mxu0 %v13561_v43  ;;  %7164 = vmatprep.subr.bf16.mxu1 %v13591_v18 }
 0x556   : > { %6197 = vmatmul.mubr.bf16.gmra.mrb[120].mxu0 %v17678_v23  ;;  %6370 = vmatmul.mubr.bf16.gmra.mrb[144].mxu1 %v17678_v23  ;;  %v13603_v23 = vld [vmem:[#allocation9 + $0xec] ss:$16 sps:$4 sm:$0xff]  }
 0x557   : > { %6206 = vmatprep.mubr.bf16.mxu0 %v17679_v20  ;;  %6379 = vmatprep.mubr.bf16.mxu1 %v17679_v20  ;;  %v13571_v20 = vld [vmem:[#allocation9 + $0xe0] ss:$16 sps:$4 sm:$0xff]  }
 0x558   : > { %7122 = vmatpush1.bf16.msra.mxu0 %v13559_v34  ;;  %7165 = vmatpush1.bf16.msra.mxu1 %v13589_v46 }
 0x559   : > { %7123 = vmatprep.subr.bf16.mxu0 %v13564_v25  ;;  %7166 = vmatprep.subr.bf16.mxu1 %v13594_v48 }
 0x55c   : > { %7124 = vmatpush1.bf16.msra.mxu0 %v13562_v59  ;;  %7167 = vmatpush1.bf16.msra.mxu1 %v13592_v31 }
 0x55d   : > { %7125 = vmatprep.subr.bf16.mxu0 %v13567_v15  ;;  %7168 = vmatprep.subr.bf16.mxu1 %v13600_v54 }
 0x55e   : > { %6207 = vmatmul.mubr.bf16.gmra.mrb[124].mxu0 %v17680_v29  ;;  %6380 = vmatmul.mubr.bf16.gmra.mrb[148].mxu1 %v17680_v29  ;;  %v13612_v29 = vld [vmem:[#allocation9 + $0x12c] ss:$16 sps:$4 sm:$0xff]  }
 0x55f   : > { %6216 = vmatprep.mubr.bf16.mxu0 %v17681_v57  ;;  %6389 = vmatprep.mubr.bf16.mxu1 %v17681_v57  ;;  %v13586_v57 = vld [vmem:[#allocation9 + $0x120] ss:$16 sps:$4 sm:$0xff]  }
 0x560   : > { %7126 = vmatpush1.bf16.msra.mxu0 %v13565_v33  ;;  %7169 = vmatpush1.bf16.msra.mxu1 %v13598_v21 }
 0x561   : > { %7127 = vmatprep.subr.bf16.mxu0 %v13573_v62  ;;  %7170 = vmatprep.subr.bf16.mxu1 %v13603_v23 }
 0x564   : > { %7128 = vmatpush1.bf16.msra.mxu0 %v13571_v20  ;;  %7171 = vmatpush1.bf16.msra.mxu1 %v13601_v56 }
 0x565   : > { %7129 = vmatprep.subr.bf16.mxu0 %v13582_v0  ;;  %7172 = vmatprep.subr.bf16.mxu1 %v13609_v37 }
 0x566   : > { %6217 = vmatmul.mubr.bf16.gmra.mrb[128].mxu0 %v17682_v24  ;;  %6390 = vmatmul.mubr.bf16.gmra.mrb[152].mxu1 %v17682_v24  ;;  %v13604_v24 = vld [vmem:[#allocation9 + $0x160] ss:$16 sps:$4 sm:$0xff]  }
 0x567   : > { %6226 = vmatprep.mubr.bf16.mxu0 %v17683_v47  ;;  %6399 = vmatprep.mubr.bf16.mxu1 %v17683_v47  ;;  %v13615_v47 = vld [vmem:[#allocation9 + $0x184] ss:$16 sps:$4 sm:$0xff]  }
 0x568   : > { %7130 = vmatpush1.bf16.msra.mxu0 %v13580_v32  ;;  %7173 = vmatpush1.bf16.msra.mxu1 %v13607_v41 }
 0x569   : > { %7131 = vmatprep.subr.bf16.mxu0 %v13588_v9  ;;  %7174 = vmatprep.subr.bf16.mxu1 %v13612_v29 }
 0x56c   : > { %7132 = vmatpush1.bf16.msra.mxu0 %v13586_v57  ;;  %7175 = vmatpush1.bf16.msra.mxu1 %v13610_v6 }
 0x56d   : > { %7133 = vmatprep.subr.bf16.mxu0 %v13597_v52  ;;  %7176 = vmatprep.subr.bf16.mxu1 %v13618_v38 }
 0x56e   : > { %6227 = vmatmul.mubr.bf16.gmra.mrb[132].mxu0 %v17684_v49  ;;  %6400 = vmatmul.mubr.bf16.gmra.mrb[156].mxu1 %v17684_v49  ;;  %v17685_v49 = vmov 0  }
 0x56f   : > { %6236 = vmatprep.mubr.bf16.mxu0 %v16792_v4  ;;  %6409 = vmatprep.mubr.bf16.mxu1 %v16792_v4  ;;  %v13622_v4 = vld [vmem:[#allocation9 + $0x168] ss:$16 sps:$4 sm:$0xff]  }
 0x570   : > { %7134 = vmatpush1.bf16.msra.mxu0 %v13595_v30  ;;  %7177 = vmatpush1.bf16.msra.mxu1 %v13616_v45 }
 0x571   : > { %7135 = vmatprep.subr.bf16.mxu0 %v13606_v51 }
 0x574   : > { %7136 = vmatpush1.bf16.msra.mxu0 %v13604_v24 }
 0x575   : > { %7137 = vmatprep.subr.bf16.mxu0 %v13615_v47 }
 0x576   : > { %6237 = vmatmul.mubr.bf16.gmra.mrb[136].mxu0 %v16787_v26  ;;  %6410 = vmatmul.mubr.bf16.gmra.mrb[160].mxu1 %v16787_v26  ;;  %v13624_v26 = vld [vmem:[#allocation9 + $0x16c] ss:$16 sps:$4 sm:$0xff]  }
 0x577   : > { %6246 = vmatprep.mubr.bf16.mxu0 %v16824_v17  ;;  %6419 = vmatprep.mubr.bf16.mxu1 %v16824_v17  ;;  %v13619_v17 = vld [vmem:[#allocation9 + $0x1a0] ss:$16 sps:$4 sm:$0xff]  }
 0x578   : > { %7138 = vmatpush1.bf16.msra.mxu0 %v13613_v55  ;;  %7178 = vmatprep.subr.bf16.mxu1 %v13624_v26 }
 0x579   : > { %7179 = vmatpush1.bf16.msra.mxu1 %v13622_v4 }
 0x57e   : > { %6247 = vmatmul.mubr.bf16.gmra.mrb[140].mxu0 %v16819_v60  ;;  %6420 = vmatmul.mubr.bf16.gmra.mrb[164].mxu1 %v16819_v60  ;;  %v13627_v60 = vld [vmem:[#allocation9 + $0x18c] ss:$16 sps:$4 sm:$0xff]  }
 0x57f   : > { %6256 = vmatprep.mubr.bf16.mxu0 %v16856_v44  ;;  %6429 = vmatprep.mubr.bf16.mxu1 %v16856_v44  ;;  %v13625_v44 = vld [vmem:[#allocation9 + $0x188] ss:$16 sps:$4 sm:$0xff]  }
 0x580   : > { %7180 = vmatprep.subr.bf16.mxu1 %v13627_v60 }
 0x581   : > { %7181 = vmatpush1.bf16.msra.mxu1 %v13625_v44 }
 0x586   : > { %6257 = vmatmul.mubr.bf16.gmra.mrb[144].mxu0 %v16851_v27  ;;  %6430 = vmatmul.mubr.bf16.gmra.mrb[168].mxu1 %v16851_v27  ;;  %v13621_v27 = vld [vmem:[#allocation9 + $0x1a4] ss:$16 sps:$4 sm:$0xff]  }
 0x587   : > { %6266 = vmatprep.mubr.bf16.mxu0 %v16881_v10  ;;  %6439 = vmatprep.mubr.bf16.mxu1 %v16881_v10  ;;  %v13631_v10 = vld [vmem:[#allocation9 + $0x1a8] ss:$16 sps:$4 sm:$0xff]  }
 0x588   : > { %7139 = vmatprep.subr.bf16.mxu0 %v13621_v27 }
 0x589   : > { %7140 = vmatpush1.bf16.msra.mxu0 %v13619_v17 }
 0x58e   : > { %6267 = vmatmul.mubr.bf16.gmra.mrb[148].mxu0 %v16877_v36  ;;  %6440 = vmatmul.mubr.bf16.gmra.mrb[172].mxu1 %v16877_v36  ;;  %v13633_v36 = vld [vmem:[#allocation9 + $0x1ac] ss:$16 sps:$4 sm:$0xff]  }
 0x58f   : > { %6276 = vmatprep.mubr.bf16.mxu0 %v16905_v19  ;;  %6449 = vmatprep.mubr.bf16.mxu1 %v16905_v19  ;;  %v13636_v19 = vld [vmem:[#allocation9 + $0x1cc] ss:$16 sps:$4 sm:$0xff]  }
 0x590   : > { %7182 = vmatprep.subr.bf16.mxu1 %v13633_v36 }
 0x591   : > { %7183 = vmatpush1.bf16.msra.mxu1 %v13631_v10 }
 0x592   : > { %7184 = vmatprep.subr.bf16.mxu1 %v13636_v19 }
 0x596   : > { %6277 = vmatmul.mubr.bf16.gmra.mrb[152].mxu0 %v16901_v53  ;;  %6450 = vmatmul.mubr.bf16.gmra.mrb[176].mxu1 %v16901_v53  ;;  %v13630_v53 = vld [vmem:[#allocation9 + $0x1c4] ss:$16 sps:$4 sm:$0xff]  }
 0x597   : > { %6286 = vmatprep.mubr.bf16.mxu0 %v16929_v35  ;;  %6459 = vmatprep.mubr.bf16.mxu1 %v16929_v35  ;;  %v13634_v35 = vld [vmem:[#allocation9 + $0x1c8] ss:$16 sps:$4 sm:$0xff]  }
 0x598   : > { %7141 = vmatprep.subr.bf16.mxu0 %v13630_v53  ;;  %7185 = vmatpush1.bf16.msra.mxu1 %v13634_v35 }
 0x599   : > { %7186 = vmatprep.subr.bf16.mxu1 %v13642_v63 }
 0x59c   : > { %7187 = vmatpush1.bf16.msra.mxu1 %v13640_v16 }
 0x59e   : > { %6287 = vmatmul.mubr.bf16.gmra.mrb[156].mxu0 %v16925_v28  ;;  %6460 = vmatmul.mubr.bf16.gmra.mrb[180].mxu1 %v16925_v28  ;;  %v13628_v28 = vld [vmem:[#allocation9 + $0x1c0] ss:$16 sps:$4 sm:$0xff]  }
 0x59f   : > { %6296 = vmatprep.mubr.bf16.mxu0 %v16979_v14  ;;  %6469 = vmatprep.mubr.bf16.mxu1 %v16979_v14  ;;  %v13639_v14 = vld [vmem:[#allocation9 + $0x1e4] ss:$16 sps:$4 sm:$0xff]  }
 0x5a0   : > { %7142 = vmatpush1.bf16.msra.mxu0 %v13628_v28 }
 0x5a1   : > { %7143 = vmatprep.subr.bf16.mxu0 %v13639_v14 }
 0x5a4   : > { %7144 = vmatpush1.bf16.msra.mxu0 %v13637_v8 }
 0x5a5   : > { %7613 = vmatprep.subr.bf16.mxu0 %v13645_v39 }
 0x5a6   : > { %6297 = vmatmul.mubr.bf16.gmra.mrb[160].mxu0 %v16977_v42  ;;  %6470 = vmatmul.mubr.bf16.gmra.mrb[184].mxu1 %v16977_v42  ;;  %v13648_v42 = vld [vmem:[#allocation9 + $0x20c] ss:$16 sps:$4 sm:$0xff]  }
 0x5a7   : > { %6306 = vmatprep.mubr.bf16.mxu0 %v17685_v49  ;;  %6479 = vmatprep.mubr.bf16.mxu1 %v17685_v49 }
 0x5a8   : > { %7656 = vmatprep.subr.bf16.mxu1 %v13648_v42 }
 0x5ae   : > { %6307 = vmatmul.mubr.bf16.gmra.mrb[164].mxu0 %v17685_v49  ;;  %6480 = vmatmul.mubr.bf16.gmra.mrb[188].mxu1 %v17685_v49 }
 0x619   : > { %v6178_v5 = vpop.f32.mrb[112].mxu0  ;;  %v6351_v13 = vpop.f32.mrb[136].mxu1 }
 0x61a   : > { %v12275_v7 = vadd.f32 %v6178_v5, %v17250_v3  ;;  %v12331_v1 = vadd.f32 %v6351_v13, %v17253_v40  ;;  %v6180_v43 = vpop.f32.mrb[113].mxu0  ;;  %v6353_v18 = vpop.f32.mrb[137].mxu1 }
 0x61b   : > { %v12276_v34 = vadd.f32 %v6180_v43, %v17256_v11  ;;  %v12332_v46 = vadd.f32 %v6353_v18, %v17259_v58  ;;  %v6182_v25 = vpop.f32.mrb[114].mxu0  ;;  %v6355_v48 = vpop.f32.mrb[138].mxu1 }
 0x61c   : > { %v6602_v59 = vmax.f32 %v12275_v7, %v12331_v1  ;;  %v12277_v31 = vadd.f32 %v6182_v25, %v17250_v3  ;;  %v12333_v15 = vadd.f32 %v6355_v48, %v17253_v40  ;;  %v6184_v54 = vpop.f32.mrb[115].mxu0  ;;  %v6357_v33 = vpop.f32.mrb[139].mxu1 }
 0x61d   : > { %v6603_v21 = vmax.f32 %v12276_v34, %v12332_v46  ;;  %v12278_v62 = vadd.f32 %v6184_v54, %v17256_v11  ;;  %v12334_v23 = vadd.f32 %v6357_v33, %v17259_v58  ;;  %v13646_v54 = vld [vmem:[#allocation9 + $0x208] ss:$16 sps:$4 sm:$0xff]  }
 0x61e   : > { %v6604_v20 = vmax.f32 %v12277_v31, %v12333_v15  ;;  %v13643_v15 = vld [vmem:[#allocation9 + $0x200] ss:$16 sps:$4 sm:$0xff]  }
 0x61f   : > { %v6605_v56 = vmax.f32 %v12278_v62, %v12334_v23  ;;  %v13654_v62 = vld [vmem:[#allocation9 + $0x22c] ss:$16 sps:$4 sm:$0xff]  }
 0x621   : > { %v6188_v0 = vpop.f32.mrb[116].mxu0  ;;  %v6361_v37 = vpop.f32.mrb[140].mxu1 }
 0x622   : > { %v12279_v32 = vadd.f32 %v6188_v0, %v17250_v3  ;;  %v12335_v41 = vadd.f32 %v6361_v37, %v17253_v40  ;;  %v6190_v9 = vpop.f32.mrb[117].mxu0  ;;  %v6363_v29 = vpop.f32.mrb[141].mxu1  ;;  %v13649_v0 = vld [vmem:[#allocation9 + $0x220] ss:$16 sps:$4 sm:$0xff]   ;;  %v13652_v37 = vld [vmem:[#allocation9 + $0x228] ss:$16 sps:$4 sm:$0xff]  }
 0x623   : > { %v12280_v57 = vadd.f32 %v6190_v9, %v17256_v11  ;;  %v12336_v6 = vadd.f32 %v6363_v29, %v17259_v58  ;;  %v6192_v52 = vpop.f32.mrb[118].mxu0  ;;  %v6365_v38 = vpop.f32.mrb[142].mxu1 }
 0x624   : > { %v6606_v30 = vmax.f32 %v12279_v32, %v12335_v41  ;;  %v12281_v45 = vadd.f32 %v6192_v52, %v17250_v3  ;;  %v12337_v51 = vadd.f32 %v6365_v38, %v17253_v40  ;;  %v6194_v24 = vpop.f32.mrb[119].mxu0  ;;  %v6367_v47 = vpop.f32.mrb[143].mxu1 }
 0x625   : > { %v6607_v55 = vmax.f32 %v12280_v57, %v12336_v6  ;;  %v12282_v26 = vadd.f32 %v6194_v24, %v17256_v11  ;;  %v12338_v4 = vadd.f32 %v6367_v47, %v17259_v58  ;;  %v13657_v57 = vld [vmem:[#allocation9 + $0x244] ss:$16 sps:$4 sm:$0xff]   ;;  %v13660_v6 = vld [vmem:[#allocation9 + $0x24c] ss:$16 sps:$4 sm:$0xff]  }
 0x626   : > { %v6658_v60 = vmax.f32 %v6602_v59, %v6606_v30  ;;  %v6608_v17 = vmax.f32 %v12281_v45, %v12337_v51 }
 0x627   : > { %v6659_v27 = vmax.f32 %v6603_v21, %v6607_v55  ;;  %v6609_v44 = vmax.f32 %v12282_v26, %v12338_v4  ;;  %v13651_v21 = vld [vmem:[#allocation9 + $0x224] ss:$16 sps:$4 sm:$0xff]  }
 0x628   : > { %v6660_v36 = vmax.f32 %v6604_v20, %v6608_v17  ;;  %v6686_v28 = vmax.f32 %v6658_v60, 0.0 }
 0x629   : > { %v6661_v10 = vmax.f32 %v6605_v56, %v6609_v44  ;;  %v6198_v53 = vpop.f32.mrb[120].mxu0  ;;  %v6371_v19 = vpop.f32.mrb[144].mxu1  ;;  %v6687_v16 = vmax.f32 %v6659_v27, 0.0  ;;  %v13655_v27 = vld [vmem:[#allocation9 + $0x240] ss:$16 sps:$4 sm:$0xff]  }
 0x62a   : > { %v6688_v35 = vmax.f32 %v6660_v36, 0.0  ;;  %v12283_v49 = vadd.f32 %v6198_v53, %v17250_v3  ;;  %v12339_v14 = vadd.f32 %v6371_v19, %v17253_v40  ;;  %v6200_v63 = vpop.f32.mrb[121].mxu0  ;;  %v6373_v8 = vpop.f32.mrb[145].mxu1  ;;  %v13658_v44 = vld [vmem:[#allocation9 + $0x248] ss:$16 sps:$4 sm:$0xff]  }
 0x62b   : > { %v6689_v39 = vmax.f32 %v6661_v10, 0.0  ;;  %v12284_v42 = vadd.f32 %v6200_v63, %v17256_v11  ;;  %v12340_v61 = vadd.f32 %v6373_v8, %v17259_v58  ;;  %v6202_v5 = vpop.f32.mrb[122].mxu0  ;;  %v6375_v13 = vpop.f32.mrb[146].mxu1  ;;  %v13663_v53 = vld [vmem:[#allocation9 + $0x264] ss:$16 sps:$4 sm:$0xff]  }
 0x62c   : > { %v6714_v7 = vpack.c.bf16 %v6688_v35, %v6686_v28  ;;  %v6610_v1 = vmax.f32 %v12283_v49, %v12339_v14  ;;  %v12285_v43 = vadd.f32 %v6202_v5, %v17250_v3  ;;  %v12341_v18 = vadd.f32 %v6375_v13, %v17253_v40  ;;  %v6204_v34 = vpop.f32.mrb[123].mxu0  ;;  %v6377_v46 = vpop.f32.mrb[147].mxu1  ;;  %v13666_v19 = vld [vmem:[#allocation9 + $0x26c] ss:$16 sps:$4 sm:$0xff]   ;;  %v13661_v14 = vld [vmem:[#allocation9 + $0x260] ss:$16 sps:$4 sm:$0xff]  }
 0x62d   : > { %v6611_v25 = vmax.f32 %v12284_v42, %v12340_v61  ;;  %v12286_v48 = vadd.f32 %v6204_v34, %v17256_v11  ;;  %v12342_v59 = vadd.f32 %v6377_v46, %v17259_v58  ;;  %v6715_v31 = vpack.c.bf16 %v6689_v39, %v6687_v16  ;;  %v13664_v39 = vld [vmem:[#allocation9 + $0x268] ss:$16 sps:$4 sm:$0xff]   ;;  %v13669_v42 = vld [vmem:[#allocation9 + $0x284] ss:$16 sps:$4 sm:$0xff]  }
 0x62e   : > { %v6612_v33 = vmax.f32 %v12285_v43, %v12341_v18  ;;  %v13672_v18 = vld [vmem:[#allocation9 + $0x28c] ss:$16 sps:$4 sm:$0xff]  }
 0x62f   : > { %v6613_v23 = vmax.f32 %v12286_v48, %v12342_v59  ;;  %7145 = vmatprep.mubr.bf16.mxu0 %v6715_v31  ;;  %7188 = vmatprep.mubr.bf16.mxu1 %v6715_v31 }
 0x630   : > { %7146 = vmatmul.mubr.bf16.vlgmr.msra.gmra.mrb[168].mxu0 %v6714_v7  ;;  %7189 = vmatmul.mubr.bf16.vlgmr.msra.gmra.mrb[192].mxu1 %v6714_v7 }
 0x631   : > { %7614 = vmatpush1.bf16.msra.mxu0 %v13643_v15  ;;  %7657 = vmatpush1.bf16.msra.mxu1 %v13646_v54  ;;  %v6208_v20 = vpop.f32.mrb[124].mxu0  ;;  %v6381_v56 = vpop.f32.mrb[148].mxu1 }
 0x632   : > { %v12287_v32 = vadd.f32 %v6208_v20, %v17250_v3  ;;  %v12343_v41 = vadd.f32 %v6381_v56, %v17253_v40  ;;  %v6210_v9 = vpop.f32.mrb[125].mxu0  ;;  %v6383_v29 = vpop.f32.mrb[149].mxu1  ;;  %7615 = vmatprep.subr.bf16.mxu0 %v13651_v21  ;;  %7658 = vmatprep.subr.bf16.mxu1 %v13654_v62 }
 0x633   : > { %v12288_v52 = vadd.f32 %v6210_v9, %v17256_v11  ;;  %v12344_v38 = vadd.f32 %v6383_v29, %v17259_v58  ;;  %v6212_v30 = vpop.f32.mrb[126].mxu0  ;;  %v6385_v45 = vpop.f32.mrb[150].mxu1  ;;  %v13675_v29 = vld [vmem:[#allocation9 + $0x2a4] ss:$16 sps:$4 sm:$0xff]  }
 0x634   : > { %v6614_v51 = vmax.f32 %v12287_v32, %v12343_v41  ;;  %v12289_v24 = vadd.f32 %v6212_v30, %v17250_v3  ;;  %v12345_v47 = vadd.f32 %v6385_v45, %v17253_v40  ;;  %v6214_v55 = vpop.f32.mrb[127].mxu0  ;;  %v6387_v26 = vpop.f32.mrb[151].mxu1  ;;  %v13670_v32 = vld [vmem:[#allocation9 + $0x288] ss:$16 sps:$4 sm:$0xff]   ;;  %v13673_v30 = vld [vmem:[#allocation9 + $0x2a0] ss:$16 sps:$4 sm:$0xff]  }
 0x635   : > { %v6615_v4 = vmax.f32 %v12288_v52, %v12344_v38  ;;  %v12290_v60 = vadd.f32 %v6214_v55, %v17256_v11  ;;  %v12346_v17 = vadd.f32 %v6387_v26, %v17259_v58  ;;  %7616 = vmatpush1.bf16.msra.mxu0 %v13649_v0  ;;  %7659 = vmatpush1.bf16.msra.mxu1 %v13652_v37  ;;  %v13667_v37 = vld [vmem:[#allocation9 + $0x280] ss:$16 sps:$4 sm:$0xff]   ;;  %v13676_v45 = vld [vmem:[#allocation9 + $0x2a8] ss:$16 sps:$4 sm:$0xff]   ;;  %v13681_v26 = vld [vmem:[#allocation9 + $0x2c4] ss:$16 sps:$4 sm:$0xff]  }
 0x636   : > { %v6662_v36 = vmax.f32 %v6610_v1, %v6614_v51  ;;  %v6616_v10 = vmax.f32 %v12289_v24, %v12345_v47  ;;  %7617 = vmatprep.subr.bf16.mxu0 %v13657_v57  ;;  %7660 = vmatprep.subr.bf16.mxu1 %v13660_v6  ;;  %v13678_v57 = vld [vmem:[#allocation9 + $0x2ac] ss:$16 sps:$4 sm:$0xff]  }
 0x637   : > { %v6663_v28 = vmax.f32 %v6611_v25, %v6615_v4  ;;  %v6617_v35 = vmax.f32 %v12290_v60, %v12346_v17  ;;  %v13684_v4 = vld [vmem:[#allocation9 + $0x2cc] ss:$16 sps:$4 sm:$0xff]  }
 0x638   : > { %v6664_v49 = vmax.f32 %v6612_v33, %v6616_v10  ;;  %v6690_v61 = vmax.f32 %v6662_v36, 0.0 }
 0x639   : > { %v6665_v63 = vmax.f32 %v6613_v23, %v6617_v35  ;;  %7618 = vmatpush1.bf16.msra.mxu0 %v13655_v27  ;;  %7661 = vmatpush1.bf16.msra.mxu1 %v13658_v44  ;;  %v6218_v8 = vpop.f32.mrb[128].mxu0  ;;  %v6391_v16 = vpop.f32.mrb[152].mxu1  ;;  %v6691_v34 = vmax.f32 %v6663_v28, 0.0 }
 0x63a   : > { %v6692_v5 = vmax.f32 %v6664_v49, 0.0  ;;  %v17294_v13 = vadd.f32 %v6218_v8, %v17250_v3  ;;  %v17297_v7 = vadd.f32 %v6391_v16, %v17253_v40  ;;  %v6220_v1 = vpop.f32.mrb[129].mxu0  ;;  %v6393_v43 = vpop.f32.mrb[153].mxu1  ;;  %7619 = vmatprep.subr.bf16.mxu0 %v13663_v53  ;;  %7662 = vmatprep.subr.bf16.mxu1 %v13666_v19  ;;  %v13682_v8 = vld [vmem:[#allocation9 + $0x2c8] ss:$16 sps:$4 sm:$0xff]  }
 0x63b   : > { %v6693_v46 = vmax.f32 %v6665_v63, 0.0  ;;  %v17300_v25 = vadd.f32 %v6220_v1, %v17256_v11  ;;  %v12348_v48 = vadd.f32 %v6393_v43, %v17259_v58  ;;  %v6222_v59 = vpop.f32.mrb[130].mxu0  ;;  %v6395_v31 = vpop.f32.mrb[154].mxu1  ;;  %v13679_v63 = vld [vmem:[#allocation9 + $0x2c0] ss:$16 sps:$4 sm:$0xff]  }
 0x63c   : > { %v17303_v15 = vpack.c.bf16 %v6692_v5, %v6690_v61  ;;  %v6618_v54 = vmax.f32 %v17294_v13, %v17297_v7  ;;  %v12293_v33 = vadd.f32 %v6222_v59, %v17250_v3  ;;  %v12349_v21 = vadd.f32 %v6395_v31, %v17253_v40  ;;  %v6224_v62 = vpop.f32.mrb[131].mxu0  ;;  %v6397_v23 = vpop.f32.mrb[155].mxu1  ;;  %v13690_v61 = vld [vmem:[#allocation9 + $0x2ec] ss:$16 sps:$4 sm:$0xff]   ;;  %v13685_v1 = vld [vmem:[#allocation9 + $0x2e0] ss:$16 sps:$4 sm:$0xff]  }
 0x63d   : > { %v6619_v20 = vmax.f32 %v17300_v25, %v12348_v48  ;;  %v12294_v56 = vadd.f32 %v6224_v62, %v17256_v11  ;;  %v12350_v0 = vadd.f32 %v6397_v23, %v17259_v58  ;;  %7620 = vmatpush1.bf16.msra.mxu0 %v13661_v14  ;;  %7663 = vmatpush1.bf16.msra.mxu1 %v13664_v39  ;;  %v13693_v25 = vld [vmem:[#allocation9 + $0x304] ss:$16 sps:$4 sm:$0xff]   ;;  %v13696_v62 = vld [vmem:[#allocation9 + $0x30c] ss:$16 sps:$4 sm:$0xff]  }
 0x63e   : > { %v6620_v41 = vmax.f32 %v12293_v33, %v12349_v21  ;;  %7621 = vmatprep.subr.bf16.mxu0 %v13669_v42  ;;  %v6717_v9 = vpack.c.bf16 %v6693_v46, %v6691_v34  ;;  %7664 = vmatprep.subr.bf16.mxu1 %v13672_v18  ;;  %v13687_v42 = vld [vmem:[#allocation9 + $0x2e4] ss:$16 sps:$4 sm:$0xff]   ;;  %v13688_v46 = vld [vmem:[#allocation9 + $0x2e8] ss:$16 sps:$4 sm:$0xff]  }
 0x63f   : > { %v6621_v6 = vmax.f32 %v12294_v56, %v12350_v0 }
 0x640   : > { %7645 = vmatprep.mubr.bf16.mxu0 %v6717_v9  ;;  %7688 = vmatprep.mubr.bf16.mxu1 %v6717_v9 }
 0x641   : > { %7622 = vmatpush1.bf16.msra.mxu0 %v13667_v37  ;;  %7665 = vmatpush1.bf16.msra.mxu1 %v13670_v32  ;;  %v6228_v52 = vpop.f32.mrb[132].mxu0  ;;  %v6401_v38 = vpop.f32.mrb[156].mxu1 }
 0x642   : > { %v12295_v51 = vadd.f32 %v6228_v52, %v17250_v3  ;;  %v12351_v24 = vadd.f32 %v6401_v38, %v17253_v40  ;;  %v6230_v47 = vpop.f32.mrb[133].mxu0  ;;  %v6403_v55 = vpop.f32.mrb[157].mxu1  ;;  %7623 = vmatprep.subr.bf16.mxu0 %v13675_v29  ;;  %7666 = vmatprep.subr.bf16.mxu1 %v13678_v57 }
 0x643   : > { %v12296_v60 = vadd.f32 %v6230_v47, %v17256_v11  ;;  %v12352_v17 = vadd.f32 %v6403_v55, %v17259_v58  ;;  %v6232_v27 = vpop.f32.mrb[134].mxu0  ;;  %v6405_v44 = vpop.f32.mrb[158].mxu1  ;;  %v13699_v55 = vld [vmem:[#allocation9 + $0x324] ss:$16 sps:$4 sm:$0xff]  }
 0x644   : > { %v6622_v36 = vmax.f32 %v12295_v51, %v12351_v24  ;;  %v12297_v10 = vadd.f32 %v6232_v27, %v17250_v3  ;;  %v12353_v53 = vadd.f32 %v6405_v44, %v17253_v40  ;;  %v6234_v19 = vpop.f32.mrb[135].mxu0  ;;  %v6407_v28 = vpop.f32.mrb[159].mxu1  ;;  %v13691_v51 = vld [vmem:[#allocation9 + $0x300] ss:$16 sps:$4 sm:$0xff]   ;;  %v13694_v24 = vld [vmem:[#allocation9 + $0x308] ss:$16 sps:$4 sm:$0xff]  }
 0x645   : > { %v6623_v35 = vmax.f32 %v12296_v60, %v12352_v17  ;;  %v12298_v49 = vadd.f32 %v6234_v19, %v17256_v11  ;;  %v12354_v14 = vadd.f32 %v6407_v28, %v17259_v58  ;;  %7624 = vmatpush1.bf16.msra.mxu0 %v13673_v30  ;;  %7667 = vmatpush1.bf16.msra.mxu1 %v13676_v45  ;;  %v13697_v44 = vld [vmem:[#allocation9 + $0x320] ss:$16 sps:$4 sm:$0xff]  }
 0x646   : > { %v6666_v16 = vmax.f32 %v6618_v54, %v6622_v36  ;;  %v6624_v39 = vmax.f32 %v12297_v10, %v12353_v53  ;;  %7625 = vmatprep.subr.bf16.mxu0 %v13681_v26  ;;  %7668 = vmatprep.subr.bf16.mxu1 %v13684_v4  ;;  %v13702_v26 = vld [vmem:[#allocation9 + $0x32c] ss:$16 sps:$4 sm:$0xff]   ;;  %v13700_v36 = vld [vmem:[#allocation9 + $0x328] ss:$16 sps:$4 sm:$0xff]  }
 0x647   : > { %v6667_v5 = vmax.f32 %v6619_v20, %v6623_v35  ;;  %v6625_v13 = vmax.f32 %v12298_v49, %v12354_v14  ;;  %v13705_v35 = vld [vmem:[#allocation9 + $0x344] ss:$16 sps:$4 sm:$0xff]   ;;  %v13708_v49 = vld [vmem:[#allocation9 + $0x34c] ss:$16 sps:$4 sm:$0xff]  }
 0x648   : > { %v6668_v7 = vmax.f32 %v6620_v41, %v6624_v39  ;;  %v6694_v48 = vmax.f32 %v6666_v16, 0.0 }
 0x649   : > { %v6669_v43 = vmax.f32 %v6621_v6, %v6625_v13  ;;  %7626 = vmatpush1.bf16.msra.mxu0 %v13679_v63  ;;  %7669 = vmatpush1.bf16.msra.mxu1 %v13682_v8  ;;  %v6238_v18 = vpop.f32.mrb[136].mxu0  ;;  %v6411_v34 = vpop.f32.mrb[160].mxu1  ;;  %v6695_v23 = vmax.f32 %v6667_v5, 0.0 }
 0x64a   : > { %v6696_v59 = vmax.f32 %v6668_v7, 0.0  ;;  %v17321_v31 = vadd.f32 %v6238_v18, %v17250_v3  ;;  %v17324_v54 = vadd.f32 %v6411_v34, %v17253_v40  ;;  %v6240_v33 = vpop.f32.mrb[137].mxu0  ;;  %v6413_v21 = vpop.f32.mrb[161].mxu1  ;;  %7627 = vmatprep.subr.bf16.mxu0 %v13687_v42  ;;  %7670 = vmatprep.subr.bf16.mxu1 %v13690_v61  ;;  %v13703_v18 = vld [vmem:[#allocation9 + $0x340] ss:$16 sps:$4 sm:$0xff]  }
 0x64b   : > { %v6697_v20 = vmax.f32 %v6669_v43, 0.0  ;;  %v12300_v56 = vadd.f32 %v6240_v33, %v17256_v11  ;;  %v12356_v0 = vadd.f32 %v6413_v21, %v17259_v58  ;;  %v6242_v37 = vpop.f32.mrb[138].mxu0  ;;  %v6415_v32 = vpop.f32.mrb[162].mxu1  ;;  %v13706_v34 = vld [vmem:[#allocation9 + $0x348] ss:$16 sps:$4 sm:$0xff]  }
 0x64c   : > { %v17328_v41 = vpack.c.bf16 %v6696_v59, %v6694_v48  ;;  %v6626_v9 = vmax.f32 %v17321_v31, %v17324_v54  ;;  %v12301_v29 = vadd.f32 %v6242_v37, %v17250_v3  ;;  %v12357_v57 = vadd.f32 %v6415_v32, %v17253_v40  ;;  %v6244_v6 = vpop.f32.mrb[139].mxu0  ;;  %v6417_v52 = vpop.f32.mrb[163].mxu1  ;;  %v13711_v48 = vld [vmem:[#allocation9 + $0x364] ss:$16 sps:$4 sm:$0xff]   ;;  %v13714_v59 = vld [vmem:[#allocation9 + $0x36c] ss:$16 sps:$4 sm:$0xff]  }
 0x64d   : > { %v6627_v38 = vmax.f32 %v12300_v56, %v12356_v0  ;;  %v12302_v30 = vadd.f32 %v6244_v6, %v17256_v11  ;;  %v12358_v45 = vadd.f32 %v6417_v52, %v17259_v58  ;;  %7628 = vmatpush1.bf16.msra.mxu0 %v13685_v1  ;;  %7671 = vmatpush1.bf16.msra.mxu1 %v13688_v46  ;;  %v13709_v21 = vld [vmem:[#allocation9 + $0x360] ss:$16 sps:$4 sm:$0xff]   ;;  %v13712_v56 = vld [vmem:[#allocation9 + $0x368] ss:$16 sps:$4 sm:$0xff]   ;;  %v13717_v0 = vld [vmem:[#allocation9 + $0x384] ss:$16 sps:$4 sm:$0xff]  }
 0x64e   : > { %v6628_v47 = vmax.f32 %v12301_v29, %v12357_v57  ;;  %7629 = vmatprep.subr.bf16.mxu0 %v13693_v25  ;;  %7672 = vmatprep.subr.bf16.mxu1 %v13696_v62  ;;  %v17336_v4 = vpack.c.bf16 %v6697_v20, %v6695_v23  ;;  %v13720_v52 = vld [vmem:[#allocation9 + $0x38c] ss:$16 sps:$4 sm:$0xff]  }
 0x64f   : > { %v6629_v60 = vmax.f32 %v12302_v30, %v12358_v45 }
 0x651   : > { %7630 = vmatpush1.bf16.msra.mxu0 %v13691_v51  ;;  %7673 = vmatpush1.bf16.msra.mxu1 %v13694_v24  ;;  %v6248_v17 = vpop.f32.mrb[140].mxu0  ;;  %v6421_v27 = vpop.f32.mrb[164].mxu1 }
 0x652   : > { %v12303_v10 = vadd.f32 %v6248_v17, %v17250_v3  ;;  %v12359_v53 = vadd.f32 %v6421_v27, %v17253_v40  ;;  %v6250_v19 = vpop.f32.mrb[141].mxu0  ;;  %v6423_v28 = vpop.f32.mrb[165].mxu1  ;;  %7631 = vmatprep.subr.bf16.mxu0 %v13699_v55  ;;  %7674 = vmatprep.subr.bf16.mxu1 %v13702_v26 }
 0x653   : > { %v12304_v14 = vadd.f32 %v6250_v19, %v17256_v11  ;;  %v12360_v63 = vadd.f32 %v6423_v28, %v17259_v58  ;;  %v6252_v8 = vpop.f32.mrb[142].mxu0  ;;  %v6425_v16 = vpop.f32.mrb[166].mxu1  ;;  %v13715_v19 = vld [vmem:[#allocation9 + $0x380] ss:$16 sps:$4 sm:$0xff]   ;;  %v13718_v28 = vld [vmem:[#allocation9 + $0x388] ss:$16 sps:$4 sm:$0xff]  }
 0x654   : > { %v6630_v39 = vmax.f32 %v12303_v10, %v12359_v53  ;;  %v12305_v42 = vadd.f32 %v6252_v8, %v17250_v3  ;;  %v12361_v61 = vadd.f32 %v6425_v16, %v17253_v40  ;;  %v6254_v5 = vpop.f32.mrb[143].mxu0  ;;  %v6427_v13 = vpop.f32.mrb[167].mxu1 }
 0x655   : > { %v6631_v7 = vmax.f32 %v12304_v14, %v12360_v63  ;;  %v12306_v1 = vadd.f32 %v6254_v5, %v17256_v11  ;;  %v12362_v43 = vadd.f32 %v6427_v13, %v17259_v58  ;;  %7632 = vmatpush1.bf16.msra.mxu0 %v13697_v44  ;;  %7675 = vmatpush1.bf16.msra.mxu1 %v13700_v36  ;;  %v13726_v14 = vld [vmem:[#allocation9 + $0x3ac] ss:$16 sps:$4 sm:$0xff]  }
 0x656   : > { %v6670_v46 = vmax.f32 %v6626_v9, %v6630_v39  ;;  %v6632_v25 = vmax.f32 %v12305_v42, %v12361_v61  ;;  %7633 = vmatprep.subr.bf16.mxu0 %v13705_v35  ;;  %7676 = vmatprep.subr.bf16.mxu1 %v13708_v49  ;;  %v13723_v49 = vld [vmem:[#allocation9 + $0x3a4] ss:$16 sps:$4 sm:$0xff]   ;;  %v13721_v42 = vld [vmem:[#allocation9 + $0x3a0] ss:$16 sps:$4 sm:$0xff]   ;;  %v13724_v61 = vld [vmem:[#allocation9 + $0x3a8] ss:$16 sps:$4 sm:$0xff]  }
 0x657   : > { %v6671_v31 = vmax.f32 %v6627_v38, %v6631_v7  ;;  %v6633_v54 = vmax.f32 %v12306_v1, %v12362_v43  ;;  %v13729_v43 = vld [vmem:[#allocation9 + $0x3c4] ss:$16 sps:$4 sm:$0xff]  }
 0x658   : > { %v6672_v33 = vmax.f32 %v6628_v47, %v6632_v25  ;;  %v6698_v37 = vmax.f32 %v6670_v46, 0.0 }
 0x659   : > { %v6673_v62 = vmax.f32 %v6629_v60, %v6633_v54  ;;  %7634 = vmatpush1.bf16.msra.mxu0 %v13703_v18  ;;  %7677 = vmatpush1.bf16.msra.mxu1 %v13706_v34  ;;  %v6258_v23 = vpop.f32.mrb[144].mxu0  ;;  %v6431_v20 = vpop.f32.mrb[168].mxu1  ;;  %v6699_v38 = vmax.f32 %v6671_v31, 0.0  ;;  %v13732_v18 = vld [vmem:[#allocation9 + $0x3cc] ss:$16 sps:$4 sm:$0xff]  }
 0x65a   : > { %v6700_v32 = vmax.f32 %v6672_v33, 0.0  ;;  %v17347_v9 = vadd.f32 %v6258_v23, %v17250_v3  ;;  %v17350_v29 = vadd.f32 %v6431_v20, %v17253_v40  ;;  %v6260_v57 = vpop.f32.mrb[145].mxu0  ;;  %v6433_v6 = vpop.f32.mrb[169].mxu1  ;;  %7635 = vmatprep.subr.bf16.mxu0 %v13711_v48  ;;  %7678 = vmatprep.subr.bf16.mxu1 %v13714_v59 }
 0x65b   : > { %v6701_v30 = vmax.f32 %v6673_v62, 0.0  ;;  %v12308_v45 = vadd.f32 %v6260_v57, %v17256_v11  ;;  %v12364_v51 = vadd.f32 %v6433_v6, %v17259_v58  ;;  %v6262_v24 = vpop.f32.mrb[146].mxu0  ;;  %v6435_v47 = vpop.f32.mrb[170].mxu1 }
 0x65c   : > { %v17354_v55 = vpack.c.bf16 %v6700_v32, %v6698_v37  ;;  %v6634_v26 = vmax.f32 %v17347_v9, %v17350_v29  ;;  %v12309_v60 = vadd.f32 %v6262_v24, %v17250_v3  ;;  %v12365_v17 = vadd.f32 %v6435_v47, %v17253_v40  ;;  %v6264_v27 = vpop.f32.mrb[147].mxu0  ;;  %v6437_v44 = vpop.f32.mrb[171].mxu1  ;;  %v13735_v9 = vld [vmem:[#allocation9 + $0x3e4] ss:$16 sps:$4 sm:$0xff]   ;;  %v13738_v29 = vld [vmem:[#allocation9 + $0x3ec] ss:$16 sps:$4 sm:$0xff]  }
 0x65d   : > { %v6635_v36 = vmax.f32 %v12308_v45, %v12364_v51  ;;  %v12310_v10 = vadd.f32 %v6264_v27, %v17256_v11  ;;  %v12366_v53 = vadd.f32 %v6437_v44, %v17259_v58  ;;  %7636 = vmatpush1.bf16.msra.mxu0 %v13709_v21  ;;  %7679 = vmatpush1.bf16.msra.mxu1 %v13712_v56  ;;  %v13727_v56 = vld [vmem:[#allocation9 + $0x3c0] ss:$16 sps:$4 sm:$0xff]   ;;  %v13736_v24 = vld [vmem:[#allocation9 + $0x3e8] ss:$16 sps:$4 sm:$0xff]   ;;  %v13741_v47 = vld [vmem:[#allocation9 + $0x404] ss:$16 sps:$4 sm:$0xff]  }
 0x65e   : > { %v6636_v35 = vmax.f32 %v12309_v60, %v12365_v17  ;;  %7637 = vmatprep.subr.bf16.mxu0 %v13717_v0  ;;  %7680 = vmatprep.subr.bf16.mxu1 %v13720_v52  ;;  %v17362_v63 = vpack.c.bf16 %v6701_v30, %v6699_v38  ;;  %v13730_v0 = vld [vmem:[#allocation9 + $0x3c8] ss:$16 sps:$4 sm:$0xff]   ;;  %v13733_v38 = vld [vmem:[#allocation9 + $0x3e0] ss:$16 sps:$4 sm:$0xff]  }
 0x65f   : > { %v6637_v8 = vmax.f32 %v12310_v10, %v12366_v53  ;;  %v13744_v10 = vld [vmem:[#allocation9 + $0x40c] ss:$16 sps:$4 sm:$0xff]  }
 0x661   : > { %7638 = vmatpush1.bf16.msra.mxu0 %v13715_v19  ;;  %7681 = vmatpush1.bf16.msra.mxu1 %v13718_v28  ;;  %v6268_v16 = vpop.f32.mrb[148].mxu0  ;;  %v6441_v39 = vpop.f32.mrb[172].mxu1 }
 0x662   : > { %v12311_v5 = vadd.f32 %v6268_v16, %v17250_v3  ;;  %v12367_v13 = vadd.f32 %v6441_v39, %v17253_v40  ;;  %v6270_v7 = vpop.f32.mrb[149].mxu0  ;;  %v6443_v1 = vpop.f32.mrb[173].mxu1  ;;  %7639 = vmatprep.subr.bf16.mxu0 %v13723_v49  ;;  %7682 = vmatprep.subr.bf16.mxu1 %v13726_v14 }
 0x663   : > { %v12312_v34 = vadd.f32 %v6270_v7, %v17256_v11  ;;  %v12368_v46 = vadd.f32 %v6443_v1, %v17259_v58  ;;  %v6272_v25 = vpop.f32.mrb[150].mxu0  ;;  %v6445_v48 = vpop.f32.mrb[174].mxu1 }
 0x664   : > { %v6638_v59 = vmax.f32 %v12311_v5, %v12367_v13  ;;  %v12313_v31 = vadd.f32 %v6272_v25, %v17250_v3  ;;  %v12369_v54 = vadd.f32 %v6445_v48, %v17253_v40  ;;  %v6274_v33 = vpop.f32.mrb[151].mxu0  ;;  %v6447_v21 = vpop.f32.mrb[175].mxu1  ;;  %v13747_v48 = vld [vmem:[#allocation9 + $0x424] ss:$16 sps:$4 sm:$0xff]  }
 0x665   : > { %v6639_v62 = vmax.f32 %v12312_v34, %v12368_v46  ;;  %v12314_v23 = vadd.f32 %v6274_v33, %v17256_v11  ;;  %v12370_v20 = vadd.f32 %v6447_v21, %v17259_v58  ;;  %7640 = vmatpush1.bf16.msra.mxu0 %v13721_v42  ;;  %7683 = vmatpush1.bf16.msra.mxu1 %v13724_v61  ;;  %v13742_v34 = vld [vmem:[#allocation9 + $0x408] ss:$16 sps:$4 sm:$0xff]   ;;  %v13745_v33 = vld [vmem:[#allocation9 + $0x420] ss:$16 sps:$4 sm:$0xff]  }
 0x666   : > { %v6674_v37 = vmax.f32 %v6634_v26, %v6638_v59  ;;  %v6640_v32 = vmax.f32 %v12313_v31, %v12369_v54  ;;  %7641 = vmatprep.subr.bf16.mxu0 %v13729_v43  ;;  %7684 = vmatprep.subr.bf16.mxu1 %v13732_v18  ;;  %v13739_v43 = vld [vmem:[#allocation9 + $0x400] ss:$16 sps:$4 sm:$0xff]   ;;  %v13750_v59 = vld [vmem:[#allocation9 + $0x42c] ss:$16 sps:$4 sm:$0xff]  }
 0x667   : > { %v6675_v57 = vmax.f32 %v6635_v36, %v6639_v62  ;;  %v6641_v6 = vmax.f32 %v12314_v23, %v12370_v20 }
 0x668   : > { %v6676_v52 = vmax.f32 %v6636_v35, %v6640_v32  ;;  %v6702_v60 = vmax.f32 %v6674_v37, 0.0 }
 0x669   : > { %v6677_v30 = vmax.f32 %v6637_v8, %v6641_v6  ;;  %7642 = vmatpush1.bf16.msra.mxu0 %v13727_v56  ;;  %7685 = vmatpush1.bf16.msra.mxu1 %v13730_v0  ;;  %v6278_v45 = vpop.f32.mrb[152].mxu0  ;;  %v6451_v51 = vpop.f32.mrb[176].mxu1  ;;  %v6703_v53 = vmax.f32 %v6675_v57, 0.0  ;;  %v13748_v56 = vld [vmem:[#allocation9 + $0x428] ss:$16 sps:$4 sm:$0xff]  }
 0x66a   : > { %v6704_v17 = vmax.f32 %v6676_v52, 0.0  ;;  %v17373_v26 = vadd.f32 %v6278_v45, %v17250_v3  ;;  %v17376_v27 = vadd.f32 %v6451_v51, %v17253_v40  ;;  %v6280_v44 = vpop.f32.mrb[153].mxu0  ;;  %v6453_v36 = vpop.f32.mrb[177].mxu1  ;;  %7643 = vmatprep.subr.bf16.mxu0 %v13735_v9  ;;  %7686 = vmatprep.subr.bf16.mxu1 %v13738_v29  ;;  %v13753_v0 = vld [vmem:[#allocation9 + $0x444] ss:$16 sps:$4 sm:$0xff]  }
 0x66b   : > { %v6705_v19 = vmax.f32 %v6677_v30, 0.0  ;;  %v17379_v28 = vadd.f32 %v6280_v44, %v17256_v11  ;;  %v12372_v35 = vadd.f32 %v6453_v36, %v17259_v58  ;;  %v6282_v49 = vpop.f32.mrb[154].mxu0  ;;  %v6455_v14 = vpop.f32.mrb[178].mxu1  ;;  %v13756_v29 = vld [vmem:[#allocation9 + $0x44c] ss:$16 sps:$4 sm:$0xff]  }
 0x66c   : > { %v17382_v8 = vpack.c.bf16 %v6704_v17, %v6702_v60  ;;  %v6642_v16 = vmax.f32 %v17373_v26, %v17376_v27  ;;  %v12317_v39 = vadd.f32 %v6282_v49, %v17250_v3  ;;  %v12373_v42 = vadd.f32 %v6455_v14, %v17253_v40  ;;  %v6284_v61 = vpop.f32.mrb[155].mxu0  ;;  %v6457_v5 = vpop.f32.mrb[179].mxu1  ;;  %v13754_v17 = vld [vmem:[#allocation9 + $0x448] ss:$16 sps:$4 sm:$0xff]   ;;  %v13759_v26 = vld [vmem:[#allocation9 + $0x464] ss:$16 sps:$4 sm:$0xff]  }
 0x66d   : > { %v6643_v13 = vmax.f32 %v17379_v28, %v12372_v35  ;;  %v12318_v7 = vadd.f32 %v6284_v61, %v17256_v11  ;;  %v12374_v1 = vadd.f32 %v6457_v5, %v17259_v58  ;;  %7644 = vmatpush1.bf16.msra.mxu0 %v13733_v38  ;;  %7687 = vmatpush1.bf16.msra.mxu1 %v13736_v24  ;;  %v13751_v24 = vld [vmem:[#allocation9 + $0x440] ss:$16 sps:$4 sm:$0xff]   ;;  %v13762_v36 = vld [vmem:[#allocation9 + $0x46c] ss:$16 sps:$4 sm:$0xff]   ;;  %v13760_v49 = vld [vmem:[#allocation9 + $0x468] ss:$16 sps:$4 sm:$0xff]  }
 0x66e   : > { %v6644_v18 = vmax.f32 %v12317_v39, %v12373_v42  ;;  %8092 = vmatprep.subr.bf16.mxu0 %v13741_v47  ;;  %8135 = vmatprep.subr.bf16.mxu1 %v13744_v10  ;;  %v17391_v46 = vpack.c.bf16 %v6705_v19, %v6703_v53  ;;  %v13757_v35 = vld [vmem:[#allocation9 + $0x460] ss:$16 sps:$4 sm:$0xff]  }
 0x66f   : > { %v6645_v25 = vmax.f32 %v12318_v7, %v12374_v1 }
 0x670   : > { %7646 = vmatmul.mubr.bf16.vlgmr.msra.gmra.mrb[168].mxu0 %v17303_v15  ;;  %7689 = vmatmul.mubr.bf16.vlgmr.msra.gmra.mrb[192].mxu1 %v17303_v15 }
 0x671   : > { %8093 = vmatpush1.bf16.msra.mxu0 %v13739_v43  ;;  %8124 = vmatprep.mubr.bf16.mxu0 %v17336_v4  ;;  %v6288_v31 = vpop.f32.mrb[156].mxu0  ;;  %v6461_v54 = vpop.f32.mrb[180].mxu1 }
 0x672   : > { %8136 = vmatpush1.bf16.msra.mxu1 %v13742_v34  ;;  %8167 = vmatprep.mubr.bf16.mxu1 %v17336_v4  ;;  %v12319_v21 = vadd.f32 %v6288_v31, %v17250_v3  ;;  %v12375_v62 = vadd.f32 %v6461_v54, %v17253_v40  ;;  %v6290_v23 = vpop.f32.mrb[157].mxu0  ;;  %v6463_v20 = vpop.f32.mrb[181].mxu1 }
 0x673   : > { %v12320_v37 = vadd.f32 %v6290_v23, %v17256_v11  ;;  %v12376_v15 = vadd.f32 %v6463_v20, %v17259_v58  ;;  %v6292_v32 = vpop.f32.mrb[158].mxu0  ;;  %v6465_v9 = vpop.f32.mrb[182].mxu1  ;;  %8094 = vmatprep.subr.bf16.mxu0 %v13747_v48  ;;  %8137 = vmatprep.subr.bf16.mxu1 %v13750_v59  ;;  %v13768_v48 = vld [vmem:[#allocation9 + $0x48c] ss:$16 sps:$4 sm:$0xff]  }
 0x674   : > { %v6646_v57 = vmax.f32 %v12319_v21, %v12375_v62  ;;  %v12321_v4 = vadd.f32 %v6292_v32, %v17250_v3  ;;  %v12377_v6 = vadd.f32 %v6465_v9, %v17253_v40  ;;  %v6294_v52 = vpop.f32.mrb[159].mxu0  ;;  %v6467_v38 = vpop.f32.mrb[183].mxu1  ;;  %v13766_v32 = vld [vmem:[#allocation9 + $0x488] ss:$16 sps:$4 sm:$0xff]   ;;  %v13771_v9 = vld [vmem:[#allocation9 + $0x4a4] ss:$16 sps:$4 sm:$0xff]  }
 0x675   : > { %v6647_v30 = vmax.f32 %v12320_v37, %v12376_v15  ;;  %v12322_v45 = vadd.f32 %v6294_v52, %v17256_v11  ;;  %v12378_v51 = vadd.f32 %v6467_v38, %v17259_v58  ;;  %8095 = vmatpush1.bf16.msra.mxu0 %v13745_v33  ;;  %v13769_v52 = vld [vmem:[#allocation9 + $0x4a0] ss:$16 sps:$4 sm:$0xff]  }
 0x676   : > { %v6678_v47 = vmax.f32 %v6642_v16, %v6646_v57  ;;  %v6648_v60 = vmax.f32 %v12321_v4, %v12377_v6  ;;  %8138 = vmatpush1.bf16.msra.mxu1 %v13748_v56  ;;  %8096 = vmatprep.subr.bf16.mxu0 %v13753_v0  ;;  %v13763_v0 = vld [vmem:[#allocation9 + $0x480] ss:$16 sps:$4 sm:$0xff]   ;;  %v13774_v57 = vld [vmem:[#allocation9 + $0x4ac] ss:$16 sps:$4 sm:$0xff]  }
 0x677   : > { %v6679_v27 = vmax.f32 %v6643_v13, %v6647_v30  ;;  %v6649_v44 = vmax.f32 %v12322_v45, %v12378_v51  ;;  %8139 = vmatprep.subr.bf16.mxu1 %v13756_v29  ;;  %v13765_v13 = vld [vmem:[#allocation9 + $0x484] ss:$16 sps:$4 sm:$0xff]  }
 0x678   : > { %v6680_v10 = vmax.f32 %v6644_v18, %v6648_v60  ;;  %v6706_v14 = vmax.f32 %v6678_v47, 0.0  ;;  %v13777_v47 = vld [vmem:[#allocation9 + $0x4c4] ss:$16 sps:$4 sm:$0xff]  }
 0x679   : > { %v6681_v53 = vmax.f32 %v6645_v25, %v6649_v44  ;;  %8097 = vmatpush1.bf16.msra.mxu0 %v13751_v24  ;;  %v6298_v19 = vpop.f32.mrb[160].mxu0  ;;  %v6471_v28 = vpop.f32.mrb[184].mxu1  ;;  %v6707_v7 = vmax.f32 %v6679_v27, 0.0  ;;  %v13772_v24 = vld [vmem:[#allocation9 + $0x4a8] ss:$16 sps:$4 sm:$0xff]  }
 0x67a   : > { %v6708_v39 = vmax.f32 %v6680_v10, 0.0  ;;  %8140 = vmatpush1.bf16.msra.mxu1 %v13754_v17  ;;  %v17406_v16 = vadd.f32 %v6298_v19, %v17250_v3  ;;  %v12379_v42 = vadd.f32 %v6471_v28, %v17253_v40  ;;  %v6300_v61 = vpop.f32.mrb[161].mxu0  ;;  %v6473_v5 = vpop.f32.mrb[185].mxu1  ;;  %8098 = vmatprep.subr.bf16.mxu0 %v13759_v26  ;;  %v13780_v44 = vld [vmem:[#allocation9 + $0x4cc] ss:$16 sps:$4 sm:$0xff]  }
 0x67b   : > { %v6709_v1 = vmax.f32 %v6681_v53, 0.0  ;;  %v12324_v43 = vadd.f32 %v6300_v61, %v17256_v11  ;;  %v12380_v18 = vadd.f32 %v6473_v5, %v17259_v58  ;;  %v6302_v34 = vpop.f32.mrb[162].mxu0  ;;  %v6475_v25 = vpop.f32.mrb[186].mxu1  ;;  %8141 = vmatprep.subr.bf16.mxu1 %v13762_v36  ;;  %v13778_v61 = vld [vmem:[#allocation9 + $0x4c8] ss:$16 sps:$4 sm:$0xff]  }
 0x67c   : > { %v17411_v59 = vpack.c.bf16 %v6708_v39, %v6706_v14  ;;  %v6650_v31 = vmax.f32 %v17406_v16, %v12379_v42  ;;  %v12325_v54 = vadd.f32 %v6302_v34, %v17250_v3  ;;  %v12381_v33 = vadd.f32 %v6475_v25, %v17253_v40  ;;  %v6304_v21 = vpop.f32.mrb[163].mxu0  ;;  %v6477_v62 = vpop.f32.mrb[187].mxu1  ;;  %v13775_v39 = vld [vmem:[#allocation9 + $0x4c0] ss:$16 sps:$4 sm:$0xff]   ;;  %v13783_v5 = vld [vmem:[#allocation9 + $0x4e4] ss:$16 sps:$4 sm:$0xff]  }
 0x67d   : > { %v6651_v23 = vmax.f32 %v12324_v43, %v12380_v18  ;;  %v12326_v20 = vadd.f32 %v6304_v21, %v17256_v11  ;;  %v12382_v56 = vadd.f32 %v6477_v62, %v17259_v58  ;;  %8099 = vmatpush1.bf16.msra.mxu0 %v13757_v35  ;;  %v17418_v37 = vpack.c.bf16 %v6709_v1, %v6707_v7  ;;  %v13781_v43 = vld [vmem:[#allocation9 + $0x4e0] ss:$16 sps:$4 sm:$0xff]   ;;  %v13789_v34 = vld [vmem:[#allocation9 + $0x504] ss:$16 sps:$4 sm:$0xff]   ;;  %v13790_v62 = vld [vmem:[#allocation9 + $0x508] ss:$16 sps:$4 sm:$0xff]  }
 0x67e   : > { %v6652_v15 = vmax.f32 %v12325_v54, %v12381_v33  ;;  %8142 = vmatpush1.bf16.msra.mxu1 %v13760_v49  ;;  %8100 = vmatprep.subr.bf16.mxu0 %v13765_v13  ;;  %v13787_v33 = vld [vmem:[#allocation9 + $0x500] ss:$16 sps:$4 sm:$0xff]  }
 0x67f   : > { %v6653_v29 = vmax.f32 %v12326_v20, %v12382_v56  ;;  %8143 = vmatprep.subr.bf16.mxu1 %v13768_v48  ;;  %v13798_v20 = vld [vmem:[#allocation9 + $0x52c] ss:$16 sps:$4 sm:$0xff]   ;;  %v13793_v56 = vld [vmem:[#allocation9 + $0x520] ss:$16 sps:$4 sm:$0xff]  }
 0x681   : > { %8101 = vmatpush1.bf16.msra.mxu0 %v13763_v0  ;;  %v6308_v4 = vpop.f32.mrb[164].mxu0  ;;  %v6481_v6 = vpop.f32.mrb[188].mxu1  ;;  %v13796_v0 = vld [vmem:[#allocation9 + $0x528] ss:$16 sps:$4 sm:$0xff]  }
 0x682   : > { %8144 = vmatpush1.bf16.msra.mxu1 %v13766_v32  ;;  %v12327_v38 = vadd.f32 %v6308_v4, %v17250_v3  ;;  %v12383_v30 = vadd.f32 %v6481_v6, %v17253_v40  ;;  %v6310_v45 = vpop.f32.mrb[165].mxu0  ;;  %v6483_v51 = vpop.f32.mrb[189].mxu1  ;;  %8102 = vmatprep.subr.bf16.mxu0 %v13771_v9  ;;  %v13804_v32 = vld [vmem:[#allocation9 + $0x54c] ss:$16 sps:$4 sm:$0xff]   ;;  %v13799_v9 = vld [vmem:[#allocation9 + $0x540] ss:$16 sps:$4 sm:$0xff]  }
 0x683   : > { %v12328_v60 = vadd.f32 %v6310_v45, %v17256_v11  ;;  %v12384_v17 = vadd.f32 %v6483_v51, %v17259_v58  ;;  %v6312_v26 = vpop.f32.mrb[166].mxu0  ;;  %v6485_v27 = vpop.f32.mrb[190].mxu1  ;;  %8145 = vmatprep.subr.bf16.mxu1 %v13774_v57  ;;  %v13807_v57 = vld [vmem:[#allocation9 + $0x564] ss:$16 sps:$4 sm:$0xff]   ;;  %v13810_v4 = vld [vmem:[#allocation9 + $0x56c] ss:$16 sps:$4 sm:$0xff]  }
 0x684   : > { %v6654_v36 = vmax.f32 %v12327_v38, %v12383_v30  ;;  %v12329_v10 = vadd.f32 %v6312_v26, %v17250_v3  ;;  %v12385_v53 = vadd.f32 %v6485_v27, %v17253_v40  ;;  %v6314_v19 = vpop.f32.mrb[167].mxu0  ;;  %v6487_v28 = vpop.f32.mrb[191].mxu1  ;;  %v13786_v3 = vld [vmem:[#allocation9 + $0x4ec] ss:$16 sps:$4 sm:$0xff]   ;;  %v13805_v6 = vld [vmem:[#allocation9 + $0x560] ss:$16 sps:$4 sm:$0xff]  }
 0x685   : > { %v6655_v35 = vmax.f32 %v12328_v60, %v12384_v17  ;;  %v12330_v49 = vadd.f32 %v6314_v19, %v17256_v11  ;;  %v12386_v14 = vadd.f32 %v6487_v28, %v17259_v58  ;;  %8103 = vmatpush1.bf16.msra.mxu0 %v13769_v52  ;;  %v13784_v58 = vld [vmem:[#allocation9 + $0x4e8] ss:$16 sps:$4 sm:$0xff]   ;;  %v13813_v38 = vld [vmem:[#allocation9 + $0x584] ss:$16 sps:$4 sm:$0xff]   ;;  %v13816_v30 = vld [vmem:[#allocation9 + $0x58c] ss:$16 sps:$4 sm:$0xff]  }
 0x686   : > { %v6682_v16 = vmax.f32 %v6650_v31, %v6654_v36  ;;  %v6656_v42 = vmax.f32 %v12329_v10, %v12385_v53  ;;  %8146 = vmatpush1.bf16.msra.mxu1 %v13772_v24  ;;  %8104 = vmatprep.subr.bf16.mxu0 %v13777_v47  ;;  %v13792_v31 = vld [vmem:[#allocation9 + $0x50c] ss:$16 sps:$4 sm:$0xff]   ;;  %v13808_v52 = vld [vmem:[#allocation9 + $0x568] ss:$16 sps:$4 sm:$0xff]   ;;  %v13811_v45 = vld [vmem:[#allocation9 + $0x580] ss:$16 sps:$4 sm:$0xff]  }
 0x687   : > { %v6683_v13 = vmax.f32 %v6651_v23, %v6655_v35  ;;  %v6657_v7 = vmax.f32 %v12330_v49, %v12386_v14  ;;  %8147 = vmatprep.subr.bf16.mxu1 %v13780_v44  ;;  %v13795_v23 = vld [vmem:[#allocation9 + $0x524] ss:$16 sps:$4 sm:$0xff]   ;;  %v13814_v51 = vld [vmem:[#allocation9 + $0x588] ss:$16 sps:$4 sm:$0xff]   ;;  %v13822_v47 = vld [vmem:[#allocation9 + $0x5ac] ss:$16 sps:$4 sm:$0xff]  }
 0x688   : > { %v6684_v40 = vmax.f32 %v6652_v15, %v6656_v42  ;;  %v6710_v18 = vmax.f32 %v6682_v16, 0.0  ;;  %v13801_v15 = vld [vmem:[#allocation9 + $0x544] ss:$16 sps:$4 sm:$0xff]   ;;  %v13817_v60 = vld [vmem:[#allocation9 + $0x5a0] ss:$16 sps:$4 sm:$0xff]  }
 0x689   : > { %v6685_v1 = vmax.f32 %v6653_v29, %v6657_v7  ;;  %8105 = vmatpush1.bf16.msra.mxu0 %v13775_v39  ;;  %v6711_v25 = vmax.f32 %v6683_v13, 0.0  ;;  %v13802_v29 = vld [vmem:[#allocation9 + $0x548] ss:$16 sps:$4 sm:$0xff]   ;;  %v13819_v24 = vld [vmem:[#allocation9 + $0x5a4] ss:$16 sps:$4 sm:$0xff]  }
 0x68a   : > { %v6712_v11 = vmax.f32 %v6684_v40, 0.0  ;;  %8148 = vmatpush1.bf16.msra.mxu1 %v13778_v61  ;;  %8106 = vmatprep.subr.bf16.mxu0 %v13783_v5  ;;  %v13820_v17 = vld [vmem:[#allocation9 + $0x5a8] ss:$16 sps:$4 sm:$0xff]   ;;  %v13825_v26 = vld [vmem:[#allocation9 + $0x5c4] ss:$16 sps:$4 sm:$0xff]  }
 0x68b   : > { %v6713_v48 = vmax.f32 %v6685_v1, 0.0  ;;  %8149 = vmatprep.subr.bf16.mxu1 %v13786_v3  ;;  %v13828_v27 = vld [vmem:[#allocation9 + $0x5cc] ss:$16 sps:$4 sm:$0xff]   ;;  %v13823_v44 = vld [vmem:[#allocation9 + $0x5c0] ss:$16 sps:$4 sm:$0xff]  }
 0x68c   : > { %v17428_v54 = vpack.c.bf16 %v6712_v11, %v6710_v18  ;;  %v13826_v36 = vld [vmem:[#allocation9 + $0x5c8] ss:$16 sps:$4 sm:$0xff]   ;;  %v13831_v10 = vld [vmem:[#allocation9 + $0x5e4] ss:$16 sps:$4 sm:$0xff]   ;;  %v13834_v53 = vld [vmem:[#allocation9 + $0x5ec] ss:$16 sps:$4 sm:$0xff]  }
 0x68d   : > { %8107 = vmatpush1.bf16.msra.mxu0 %v13781_v43  ;;  %v17430_v21 = vpack.c.bf16 %v6713_v48, %v6711_v25  ;;  %v13829_v19 = vld [vmem:[#allocation9 + $0x5e0] ss:$16 sps:$4 sm:$0xff]   ;;  %v13832_v28 = vld [vmem:[#allocation9 + $0x5e8] ss:$16 sps:$4 sm:$0xff]   ;;  %v13837_v35 = vld [vmem:[#allocation9 + $0x604] ss:$16 sps:$4 sm:$0xff]  }
 0x68e   : > { %8150 = vmatpush1.bf16.msra.mxu1 %v13784_v58  ;;  %8108 = vmatprep.subr.bf16.mxu0 %v13789_v34  ;;  %v13840_v49 = vld [vmem:[#allocation9 + $0x60c] ss:$16 sps:$4 sm:$0xff]   ;;  %v13835_v14 = vld [vmem:[#allocation9 + $0x600] ss:$16 sps:$4 sm:$0xff]   ;;  %v13838_v39 = vld [vmem:[#allocation9 + $0x608] ss:$16 sps:$4 sm:$0xff]  }
 0x68f   : > { %8151 = vmatprep.subr.bf16.mxu1 %v13792_v31  ;;  %v13843_v16 = vld [vmem:[#allocation9 + $0x624] ss:$16 sps:$4 sm:$0xff]   ;;  %v13846_v42 = vld [vmem:[#allocation9 + $0x62c] ss:$16 sps:$4 sm:$0xff]   ;;  %v13841_v61 = vld [vmem:[#allocation9 + $0x620] ss:$16 sps:$4 sm:$0xff]  }
 0x690   : > { %v13844_v5 = vld [vmem:[#allocation9 + $0x628] ss:$16 sps:$4 sm:$0xff]   ;;  %v13849_v13 = vld [vmem:[#allocation9 + $0x644] ss:$16 sps:$4 sm:$0xff]   ;;  %v13852_v7 = vld [vmem:[#allocation9 + $0x64c] ss:$16 sps:$4 sm:$0xff]  }
 0x691   : > { %8109 = vmatpush1.bf16.msra.mxu0 %v13787_v33  ;;  %v13847_v3 = vld [vmem:[#allocation9 + $0x640] ss:$16 sps:$4 sm:$0xff]   ;;  %v13850_v40 = vld [vmem:[#allocation9 + $0x648] ss:$16 sps:$4 sm:$0xff]   ;;  %v13855_v1 = vld [vmem:[#allocation9 + $0x664] ss:$16 sps:$4 sm:$0xff]  }
 0x692   : > { %8152 = vmatpush1.bf16.msra.mxu1 %v13790_v62  ;;  %8110 = vmatprep.subr.bf16.mxu0 %v13795_v23  ;;  %v13853_v43 = vld [vmem:[#allocation9 + $0x660] ss:$16 sps:$4 sm:$0xff]   ;;  %v13856_v18 = vld [vmem:[#allocation9 + $0x668] ss:$16 sps:$4 sm:$0xff]   ;;  %v13861_v11 = vld [vmem:[#allocation9 + $0x684] ss:$16 sps:$4 sm:$0xff]  }
 0x693   : > { %8153 = vmatprep.subr.bf16.mxu1 %v13798_v20  ;;  %v13864_v58 = vld [vmem:[#allocation9 + $0x68c] ss:$16 sps:$4 sm:$0xff]   ;;  %v13862_v34 = vld [vmem:[#allocation9 + $0x688] ss:$16 sps:$4 sm:$0xff]   ;;  %v13867_v25 = vld [vmem:[#allocation9 + $0x6a4] ss:$16 sps:$4 sm:$0xff]  }
 0x694   : > { %v13870_v48 = vld [vmem:[#allocation9 + $0x6ac] ss:$16 sps:$4 sm:$0xff]   ;;  %v13865_v31 = vld [vmem:[#allocation9 + $0x6a0] ss:$16 sps:$4 sm:$0xff]   ;;  %v13868_v33 = vld [vmem:[#allocation9 + $0x6a8] ss:$16 sps:$4 sm:$0xff]  }
 0x695   : > { %8111 = vmatpush1.bf16.msra.mxu0 %v13793_v56  ;;  %v13873_v62 = vld [vmem:[#allocation9 + $0x6c4] ss:$16 sps:$4 sm:$0xff]   ;;  %v13876_v23 = vld [vmem:[#allocation9 + $0x6cc] ss:$16 sps:$4 sm:$0xff]   ;;  %v13871_v20 = vld [vmem:[#allocation9 + $0x6c0] ss:$16 sps:$4 sm:$0xff]  }
 0x696   : > { %8154 = vmatpush1.bf16.msra.mxu1 %v13796_v0  ;;  %8112 = vmatprep.subr.bf16.mxu0 %v13801_v15  ;;  %v13874_v56 = vld [vmem:[#allocation9 + $0x6c8] ss:$16 sps:$4 sm:$0xff]   ;;  %v13879_v0 = vld [vmem:[#allocation9 + $0x6e4] ss:$16 sps:$4 sm:$0xff]   ;;  %v13882_v15 = vld [vmem:[#allocation9 + $0x6ec] ss:$16 sps:$4 sm:$0xff]  }
 0x697   : > { %8155 = vmatprep.subr.bf16.mxu1 %v13804_v32  ;;  %v13877_v32 = vld [vmem:[#allocation9 + $0x6e0] ss:$16 sps:$4 sm:$0xff]  }
 0x699   : > { %8113 = vmatpush1.bf16.msra.mxu0 %v13799_v9  ;;  %v13880_v9 = vld [vmem:[#allocation9 + $0x6e8] ss:$16 sps:$4 sm:$0xff]  }
 0x69a   : > { %8156 = vmatpush1.bf16.msra.mxu1 %v13802_v29  ;;  %8114 = vmatprep.subr.bf16.mxu0 %v13807_v57  ;;  %v13885_v29 = vld [vmem:[#allocation9 + $0x704] ss:$16 sps:$4 sm:$0xff]   ;;  %v13888_v57 = vld [vmem:[#allocation9 + $0x70c] ss:$16 sps:$4 sm:$0xff]  }
 0x69b   : > { %8157 = vmatprep.subr.bf16.mxu1 %v13810_v4  ;;  %v13883_v4 = vld [vmem:[#allocation9 + $0x700] ss:$16 sps:$4 sm:$0xff]  }
 0x69d   : > { %8115 = vmatpush1.bf16.msra.mxu0 %v13805_v6  ;;  %v13886_v6 = vld [vmem:[#allocation9 + $0x708] ss:$16 sps:$4 sm:$0xff]  }
 0x69e   : > { %8158 = vmatpush1.bf16.msra.mxu1 %v13808_v52  ;;  %8116 = vmatprep.subr.bf16.mxu0 %v13813_v38  ;;  %v13891_v52 = vld [vmem:[#allocation9 + $0x724] ss:$16 sps:$4 sm:$0xff]   ;;  %v13894_v38 = vld [vmem:[#allocation9 + $0x72c] ss:$16 sps:$4 sm:$0xff]  }
 0x69f   : > { %8159 = vmatprep.subr.bf16.mxu1 %v13816_v30  ;;  %v13889_v30 = vld [vmem:[#allocation9 + $0x720] ss:$16 sps:$4 sm:$0xff]  }
 0x6a1   : > { %8117 = vmatpush1.bf16.msra.mxu0 %v13811_v45  ;;  %v13892_v45 = vld [vmem:[#allocation9 + $0x728] ss:$16 sps:$4 sm:$0xff]  }
 0x6a2   : > { %8160 = vmatpush1.bf16.msra.mxu1 %v13814_v51  ;;  %8118 = vmatprep.subr.bf16.mxu0 %v13819_v24  ;;  %v13897_v51 = vld [vmem:[#allocation9 + $0x744] ss:$16 sps:$4 sm:$0xff]   ;;  %v13900_v24 = vld [vmem:[#allocation9 + $0x74c] ss:$16 sps:$4 sm:$0xff]  }
 0x6a3   : > { %8161 = vmatprep.subr.bf16.mxu1 %v13822_v47  ;;  %v13895_v47 = vld [vmem:[#allocation9 + $0x740] ss:$16 sps:$4 sm:$0xff]  }
 0x6a5   : > { %8119 = vmatpush1.bf16.msra.mxu0 %v13817_v60  ;;  %v13898_v60 = vld [vmem:[#allocation9 + $0x748] ss:$16 sps:$4 sm:$0xff]  }
 0x6a6   : > { %8162 = vmatpush1.bf16.msra.mxu1 %v13820_v17  ;;  %8120 = vmatprep.subr.bf16.mxu0 %v13825_v26  ;;  %v13903_v17 = vld [vmem:[#allocation9 + $0x764] ss:$16 sps:$4 sm:$0xff]   ;;  %v13906_v26 = vld [vmem:[#allocation9 + $0x76c] ss:$16 sps:$4 sm:$0xff]  }
 0x6a7   : > { %8163 = vmatprep.subr.bf16.mxu1 %v13828_v27  ;;  %v13901_v27 = vld [vmem:[#allocation9 + $0x760] ss:$16 sps:$4 sm:$0xff]  }
 0x6a9   : > { %8121 = vmatpush1.bf16.msra.mxu0 %v13823_v44  ;;  %v13904_v44 = vld [vmem:[#allocation9 + $0x768] ss:$16 sps:$4 sm:$0xff]  }
 0x6aa   : > { %8164 = vmatpush1.bf16.msra.mxu1 %v13826_v36  ;;  %8122 = vmatprep.subr.bf16.mxu0 %v13831_v10  ;;  %v13909_v36 = vld [vmem:[#allocation9 + $0x784] ss:$16 sps:$4 sm:$0xff]   ;;  %v13912_v10 = vld [vmem:[#allocation9 + $0x78c] ss:$16 sps:$4 sm:$0xff]  }
 0x6ab   : > { %8165 = vmatprep.subr.bf16.mxu1 %v13834_v53  ;;  %v13907_v53 = vld [vmem:[#allocation9 + $0x780] ss:$16 sps:$4 sm:$0xff]  }
 0x6ad   : > { %8123 = vmatpush1.bf16.msra.mxu0 %v13829_v19  ;;  %v13910_v19 = vld [vmem:[#allocation9 + $0x788] ss:$16 sps:$4 sm:$0xff]  }
 0x6ae   : > { %8166 = vmatpush1.bf16.msra.mxu1 %v13832_v28  ;;  %8571 = vmatprep.subr.bf16.mxu0 %v13837_v35  ;;  %v13915_v28 = vld [vmem:[#allocation9 + $0x7a4] ss:$16 sps:$4 sm:$0xff]   ;;  %v13918_v35 = vld [vmem:[#allocation9 + $0x7ac] ss:$16 sps:$4 sm:$0xff]  }
 0x6af   : > { %8614 = vmatprep.subr.bf16.mxu1 %v13840_v49  ;;  %v13913_v49 = vld [vmem:[#allocation9 + $0x7a0] ss:$16 sps:$4 sm:$0xff]  }
 0x6b0   : > { %8125 = vmatmul.mubr.bf16.vlgmr.msra.gmra.mrb[168].mxu0 %v17328_v41 }
 0x6b1   : > { %8168 = vmatmul.mubr.bf16.vlgmr.msra.gmra.mrb[192].mxu1 %v17328_v41  ;;  %8572 = vmatpush1.bf16.msra.mxu0 %v13835_v14  ;;  %v13858_v41 = vld [vmem:[#allocation9 + $0x66c] ss:$16 sps:$4 sm:$0xff]   ;;  %v13916_v14 = vld [vmem:[#allocation9 + $0x7a8] ss:$16 sps:$4 sm:$0xff]  }
 0x6b2   : > { %8603 = vmatprep.mubr.bf16.mxu0 %v17362_v63  ;;  %8615 = vmatpush1.bf16.msra.mxu1 %v13838_v39  ;;  %v13921_v39 = vld [vmem:[#allocation9 + $0x7c4] ss:$16 sps:$4 sm:$0xff]  }
 0x6b3   : > { %8646 = vmatprep.mubr.bf16.mxu1 %v17362_v63  ;;  %8573 = vmatprep.subr.bf16.mxu0 %v13843_v16  ;;  %v13859_v63 = vld [vmem:[#allocation9 + $0x680] ss:$16 sps:$4 sm:$0xff]   ;;  %v13924_v16 = vld [vmem:[#allocation9 + $0x7cc] ss:$16 sps:$4 sm:$0xff]  }
 0x6b4   : > { %8616 = vmatprep.subr.bf16.mxu1 %v13846_v42  ;;  %v13919_v42 = vld [vmem:[#allocation9 + $0x7c0] ss:$16 sps:$4 sm:$0xff]  }
 0x6b5   : > { %8574 = vmatpush1.bf16.msra.mxu0 %v13841_v61  ;;  %v13922_v61 = vld [vmem:[#allocation9 + $0x7c8] ss:$16 sps:$4 sm:$0xff]  }
 0x6b6   : > { %8617 = vmatpush1.bf16.msra.mxu1 %v13844_v5  ;;  %8575 = vmatprep.subr.bf16.mxu0 %v13849_v13  ;;  %v13927_v5 = vld [vmem:[#allocation9 + $0x7e4] ss:$16 sps:$4 sm:$0xff]   ;;  %v13930_v13 = vld [vmem:[#allocation9 + $0x7ec] ss:$16 sps:$4 sm:$0xff]  }
 0x6b7   : > { %8618 = vmatprep.subr.bf16.mxu1 %v13852_v7  ;;  %v13925_v7 = vld [vmem:[#allocation9 + $0x7e0] ss:$16 sps:$4 sm:$0xff]  }
 0x6b9   : > { %8576 = vmatpush1.bf16.msra.mxu0 %v13847_v3  ;;  %v13928_v3 = vld [vmem:[#allocation9 + $0x7e8] ss:$16 sps:$4 sm:$0xff]  }
 0x6ba   : > { %8619 = vmatpush1.bf16.msra.mxu1 %v13850_v40  ;;  %8577 = vmatprep.subr.bf16.mxu0 %v13855_v1  ;;  %v13933_v40 = vld [vmem:[#allocation9 + $0x804] ss:$16 sps:$4 sm:$0xff]   ;;  %v13936_v1 = vld [vmem:[#allocation9 + $0x80c] ss:$16 sps:$4 sm:$0xff]  }
 0x6bb   : > { %8620 = vmatprep.subr.bf16.mxu1 %v13858_v41  ;;  %v13931_v41 = vld [vmem:[#allocation9 + $0x800] ss:$16 sps:$4 sm:$0xff]  }
 0x6bd   : > { %8578 = vmatpush1.bf16.msra.mxu0 %v13853_v43  ;;  %v13934_v43 = vld [vmem:[#allocation9 + $0x808] ss:$16 sps:$4 sm:$0xff]  }
 0x6be   : > { %8621 = vmatpush1.bf16.msra.mxu1 %v13856_v18  ;;  %8579 = vmatprep.subr.bf16.mxu0 %v13861_v11  ;;  %v13939_v18 = vld [vmem:[#allocation9 + $0x824] ss:$16 sps:$4 sm:$0xff]   ;;  %v13942_v11 = vld [vmem:[#allocation9 + $0x82c] ss:$16 sps:$4 sm:$0xff]  }
 0x6bf   : > { %8622 = vmatprep.subr.bf16.mxu1 %v13864_v58  ;;  %v13937_v58 = vld [vmem:[#allocation9 + $0x820] ss:$16 sps:$4 sm:$0xff]  }
 0x6c1   : > { %8580 = vmatpush1.bf16.msra.mxu0 %v13859_v63  ;;  %v13940_v63 = vld [vmem:[#allocation9 + $0x828] ss:$16 sps:$4 sm:$0xff]  }
 0x6c2   : > { %8623 = vmatpush1.bf16.msra.mxu1 %v13862_v34  ;;  %8581 = vmatprep.subr.bf16.mxu0 %v13867_v25  ;;  %v13945_v34 = vld [vmem:[#allocation9 + $0x844] ss:$16 sps:$4 sm:$0xff]   ;;  %v13948_v25 = vld [vmem:[#allocation9 + $0x84c] ss:$16 sps:$4 sm:$0xff]  }
 0x6c3   : > { %8624 = vmatprep.subr.bf16.mxu1 %v13870_v48  ;;  %v13943_v48 = vld [vmem:[#allocation9 + $0x840] ss:$16 sps:$4 sm:$0xff]  }
 0x6c5   : > { %8582 = vmatpush1.bf16.msra.mxu0 %v13865_v31  ;;  %v13946_v31 = vld [vmem:[#allocation9 + $0x848] ss:$16 sps:$4 sm:$0xff]  }
 0x6c6   : > { %8625 = vmatpush1.bf16.msra.mxu1 %v13868_v33  ;;  %8583 = vmatprep.subr.bf16.mxu0 %v13873_v62  ;;  %v13951_v33 = vld [vmem:[#allocation9 + $0x864] ss:$16 sps:$4 sm:$0xff]   ;;  %v13949_v62 = vld [vmem:[#allocation9 + $0x860] ss:$16 sps:$4 sm:$0xff]  }
 0x6c7   : > { %8626 = vmatprep.subr.bf16.mxu1 %v13876_v23  ;;  %v13952_v23 = vld [vmem:[#allocation9 + $0x868] ss:$16 sps:$4 sm:$0xff]  }
 0x6c9   : > { %8584 = vmatpush1.bf16.msra.mxu0 %v13871_v20  ;;  %v13957_v20 = vld [vmem:[#allocation9 + $0x884] ss:$16 sps:$4 sm:$0xff]  }
 0x6ca   : > { %8627 = vmatpush1.bf16.msra.mxu1 %v13874_v56  ;;  %8585 = vmatprep.subr.bf16.mxu0 %v13879_v0  ;;  %v13960_v56 = vld [vmem:[#allocation9 + $0x88c] ss:$16 sps:$4 sm:$0xff]   ;;  %v13958_v0 = vld [vmem:[#allocation9 + $0x888] ss:$16 sps:$4 sm:$0xff]  }
 0x6cb   : > { %8628 = vmatprep.subr.bf16.mxu1 %v13882_v15  ;;  %v13963_v15 = vld [vmem:[#allocation9 + $0x8a4] ss:$16 sps:$4 sm:$0xff]  }
 0x6cd   : > { %8586 = vmatpush1.bf16.msra.mxu0 %v13877_v32  ;;  %v13966_v32 = vld [vmem:[#allocation9 + $0x8ac] ss:$16 sps:$4 sm:$0xff]  }
 0x6ce   : > { %8629 = vmatpush1.bf16.msra.mxu1 %v13880_v9  ;;  %8587 = vmatprep.subr.bf16.mxu0 %v13885_v29  ;;  %v13961_v9 = vld [vmem:[#allocation9 + $0x8a0] ss:$16 sps:$4 sm:$0xff]   ;;  %v13964_v29 = vld [vmem:[#allocation9 + $0x8a8] ss:$16 sps:$4 sm:$0xff]  }
 0x6cf   : > { %8630 = vmatprep.subr.bf16.mxu1 %v13888_v57  ;;  %v13969_v57 = vld [vmem:[#allocation9 + $0x8c4] ss:$16 sps:$4 sm:$0xff]  }
 0x6d1   : > { %8588 = vmatpush1.bf16.msra.mxu0 %v13883_v4  ;;  %v13972_v4 = vld [vmem:[#allocation9 + $0x8cc] ss:$16 sps:$4 sm:$0xff]  }
 0x6d2   : > { %8631 = vmatpush1.bf16.msra.mxu1 %v13886_v6  ;;  %8589 = vmatprep.subr.bf16.mxu0 %v13891_v52  ;;  %v13967_v6 = vld [vmem:[#allocation9 + $0x8c0] ss:$16 sps:$4 sm:$0xff]   ;;  %v13970_v52 = vld [vmem:[#allocation9 + $0x8c8] ss:$16 sps:$4 sm:$0xff]  }
 0x6d3   : > { %8632 = vmatprep.subr.bf16.mxu1 %v13894_v38  ;;  %v13975_v38 = vld [vmem:[#allocation9 + $0x8e4] ss:$16 sps:$4 sm:$0xff]  }
 0x6d5   : > { %8590 = vmatpush1.bf16.msra.mxu0 %v13889_v30  ;;  %v13978_v30 = vld [vmem:[#allocation9 + $0x8ec] ss:$16 sps:$4 sm:$0xff]  }
 0x6d6   : > { %8633 = vmatpush1.bf16.msra.mxu1 %v13892_v45  ;;  %8591 = vmatprep.subr.bf16.mxu0 %v13897_v51  ;;  %v13973_v45 = vld [vmem:[#allocation9 + $0x8e0] ss:$16 sps:$4 sm:$0xff]   ;;  %v13976_v51 = vld [vmem:[#allocation9 + $0x8e8] ss:$16 sps:$4 sm:$0xff]  }
 0x6d7   : > { %8634 = vmatprep.subr.bf16.mxu1 %v13900_v24  ;;  %v13981_v24 = vld [vmem:[#allocation9 + $0x904] ss:$16 sps:$4 sm:$0xff]  }
 0x6d9   : > { %8592 = vmatpush1.bf16.msra.mxu0 %v13895_v47  ;;  %v13984_v47 = vld [vmem:[#allocation9 + $0x90c] ss:$16 sps:$4 sm:$0xff]  }
 0x6da   : > { %8635 = vmatpush1.bf16.msra.mxu1 %v13898_v60  ;;  %8593 = vmatprep.subr.bf16.mxu0 %v13903_v17  ;;  %v13979_v60 = vld [vmem:[#allocation9 + $0x900] ss:$16 sps:$4 sm:$0xff]   ;;  %v13982_v17 = vld [vmem:[#allocation9 + $0x908] ss:$16 sps:$4 sm:$0xff]  }
 0x6db   : > { %8636 = vmatprep.subr.bf16.mxu1 %v13906_v26  ;;  %v13987_v26 = vld [vmem:[#allocation9 + $0x924] ss:$16 sps:$4 sm:$0xff]  }
 0x6dd   : > { %8594 = vmatpush1.bf16.msra.mxu0 %v13901_v27  ;;  %v13990_v27 = vld [vmem:[#allocation9 + $0x92c] ss:$16 sps:$4 sm:$0xff]  }
 0x6de   : > { %8637 = vmatpush1.bf16.msra.mxu1 %v13904_v44  ;;  %8595 = vmatprep.subr.bf16.mxu0 %v13909_v36  ;;  %v13985_v44 = vld [vmem:[#allocation9 + $0x920] ss:$16 sps:$4 sm:$0xff]   ;;  %v13988_v36 = vld [vmem:[#allocation9 + $0x928] ss:$16 sps:$4 sm:$0xff]  }
 0x6df   : > { %8638 = vmatprep.subr.bf16.mxu1 %v13912_v10  ;;  %v13993_v10 = vld [vmem:[#allocation9 + $0x944] ss:$16 sps:$4 sm:$0xff]  }
 0x6e1   : > { %8596 = vmatpush1.bf16.msra.mxu0 %v13907_v53  ;;  %v13996_v53 = vld [vmem:[#allocation9 + $0x94c] ss:$16 sps:$4 sm:$0xff]  }
 0x6e2   : > { %8639 = vmatpush1.bf16.msra.mxu1 %v13910_v19  ;;  %8597 = vmatprep.subr.bf16.mxu0 %v13915_v28  ;;  %v13991_v19 = vld [vmem:[#allocation9 + $0x940] ss:$16 sps:$4 sm:$0xff]   ;;  %v13994_v28 = vld [vmem:[#allocation9 + $0x948] ss:$16 sps:$4 sm:$0xff]  }
 0x6e3   : > { %8640 = vmatprep.subr.bf16.mxu1 %v13918_v35  ;;  %v13999_v35 = vld [vmem:[#allocation9 + $0x964] ss:$16 sps:$4 sm:$0xff]  }
 0x6e5   : > { %8598 = vmatpush1.bf16.msra.mxu0 %v13913_v49  ;;  %v14002_v49 = vld [vmem:[#allocation9 + $0x96c] ss:$16 sps:$4 sm:$0xff]  }
 0x6e6   : > { %8641 = vmatpush1.bf16.msra.mxu1 %v13916_v14  ;;  %8599 = vmatprep.subr.bf16.mxu0 %v13921_v39  ;;  %v13997_v14 = vld [vmem:[#allocation9 + $0x960] ss:$16 sps:$4 sm:$0xff]   ;;  %v14000_v39 = vld [vmem:[#allocation9 + $0x968] ss:$16 sps:$4 sm:$0xff]  }
 0x6e7   : > { %8642 = vmatprep.subr.bf16.mxu1 %v13924_v16  ;;  %v14005_v16 = vld [vmem:[#allocation9 + $0x984] ss:$16 sps:$4 sm:$0xff]  }
 0x6e9   : > { %8600 = vmatpush1.bf16.msra.mxu0 %v13919_v42  ;;  %v14008_v42 = vld [vmem:[#allocation9 + $0x98c] ss:$16 sps:$4 sm:$0xff]  }
 0x6ea   : > { %8643 = vmatpush1.bf16.msra.mxu1 %v13922_v61  ;;  %8601 = vmatprep.subr.bf16.mxu0 %v13927_v5  ;;  %v14003_v61 = vld [vmem:[#allocation9 + $0x980] ss:$16 sps:$4 sm:$0xff]   ;;  %v14006_v5 = vld [vmem:[#allocation9 + $0x988] ss:$16 sps:$4 sm:$0xff]  }
 0x6eb   : > { %8644 = vmatprep.subr.bf16.mxu1 %v13930_v13  ;;  %v14011_v13 = vld [vmem:[#allocation9 + $0x9a4] ss:$16 sps:$4 sm:$0xff]  }
 0x6ed   : > { %8602 = vmatpush1.bf16.msra.mxu0 %v13925_v7  ;;  %v14014_v7 = vld [vmem:[#allocation9 + $0x9ac] ss:$16 sps:$4 sm:$0xff]  }
 0x6ee   : > { %8645 = vmatpush1.bf16.msra.mxu1 %v13928_v3  ;;  %9050 = vmatprep.subr.bf16.mxu0 %v13933_v40  ;;  %v14009_v3 = vld [vmem:[#allocation9 + $0x9a0] ss:$16 sps:$4 sm:$0xff]   ;;  %v14012_v40 = vld [vmem:[#allocation9 + $0x9a8] ss:$16 sps:$4 sm:$0xff]  }
 0x6ef   : > { %9093 = vmatprep.subr.bf16.mxu1 %v13936_v1  ;;  %v14017_v1 = vld [vmem:[#allocation9 + $0x9c4] ss:$16 sps:$4 sm:$0xff]  }
 0x6f0   : > { %8604 = vmatmul.mubr.bf16.vlgmr.msra.gmra.mrb[168].mxu0 %v17354_v55 }
 0x6f1   : > { %8647 = vmatmul.mubr.bf16.vlgmr.msra.gmra.mrb[192].mxu1 %v17354_v55  ;;  %9051 = vmatpush1.bf16.msra.mxu0 %v13931_v41  ;;  %v13954_v55 = vld [vmem:[#allocation9 + $0x86c] ss:$16 sps:$4 sm:$0xff]  }
 0x6f2   : > { %9082 = vmatprep.mubr.bf16.mxu0 %v17391_v46  ;;  %9094 = vmatpush1.bf16.msra.mxu1 %v13934_v43  ;;  %v14020_v41 = vld [vmem:[#allocation9 + $0x9cc] ss:$16 sps:$4 sm:$0xff]   ;;  %v14015_v43 = vld [vmem:[#allocation9 + $0x9c0] ss:$16 sps:$4 sm:$0xff]  }
 0x6f3   : > { %9125 = vmatprep.mubr.bf16.mxu1 %v17391_v46  ;;  %9052 = vmatprep.subr.bf16.mxu0 %v13939_v18  ;;  %v13955_v46 = vld [vmem:[#allocation9 + $0x880] ss:$16 sps:$4 sm:$0xff]   ;;  %v14018_v18 = vld [vmem:[#allocation9 + $0x9c8] ss:$16 sps:$4 sm:$0xff]  }
 0x6f4   : > { %9095 = vmatprep.subr.bf16.mxu1 %v13942_v11  ;;  %v14023_v11 = vld [vmem:[#allocation9 + $0x9e4] ss:$16 sps:$4 sm:$0xff]  }
 0x6f5   : > { %9053 = vmatpush1.bf16.msra.mxu0 %v13937_v58  ;;  %v14026_v58 = vld [vmem:[#allocation9 + $0x9ec] ss:$16 sps:$4 sm:$0xff]  }
 0x6f6   : > { %9096 = vmatpush1.bf16.msra.mxu1 %v13940_v63  ;;  %9054 = vmatprep.subr.bf16.mxu0 %v13945_v34  ;;  %v14021_v63 = vld [vmem:[#allocation9 + $0x9e0] ss:$16 sps:$4 sm:$0xff]   ;;  %v14024_v34 = vld [vmem:[#allocation9 + $0x9e8] ss:$16 sps:$4 sm:$0xff]  }
 0x6f7   : > { %9097 = vmatprep.subr.bf16.mxu1 %v13948_v25  ;;  %v14029_v25 = vld [vmem:[#allocation9 + $0xa04] ss:$16 sps:$4 sm:$0xff]  }
 0x6f9   : > { %9055 = vmatpush1.bf16.msra.mxu0 %v13943_v48  ;;  %v14032_v48 = vld [vmem:[#allocation9 + $0xa0c] ss:$16 sps:$4 sm:$0xff]  }
 0x6fa   : > { %9098 = vmatpush1.bf16.msra.mxu1 %v13946_v31  ;;  %9056 = vmatprep.subr.bf16.mxu0 %v13951_v33  ;;  %v14027_v31 = vld [vmem:[#allocation9 + $0xa00] ss:$16 sps:$4 sm:$0xff]   ;;  %v14030_v33 = vld [vmem:[#allocation9 + $0xa08] ss:$16 sps:$4 sm:$0xff]  }
 0x6fb   : > { %9099 = vmatprep.subr.bf16.mxu1 %v13954_v55  ;;  %v14035_v55 = vld [vmem:[#allocation9 + $0xa24] ss:$16 sps:$4 sm:$0xff]  }
 0x6fd   : > { %9057 = vmatpush1.bf16.msra.mxu0 %v13949_v62  ;;  %v14038_v62 = vld [vmem:[#allocation9 + $0xa2c] ss:$16 sps:$4 sm:$0xff]  }
 0x6fe   : > { %9100 = vmatpush1.bf16.msra.mxu1 %v13952_v23  ;;  %9058 = vmatprep.subr.bf16.mxu0 %v13957_v20  ;;  %v14033_v23 = vld [vmem:[#allocation9 + $0xa20] ss:$16 sps:$4 sm:$0xff]   ;;  %v14036_v20 = vld [vmem:[#allocation9 + $0xa28] ss:$16 sps:$4 sm:$0xff]  }
 0x6ff   : > { %9101 = vmatprep.subr.bf16.mxu1 %v13960_v56  ;;  %v14041_v56 = vld [vmem:[#allocation9 + $0xa44] ss:$16 sps:$4 sm:$0xff]  }
 0x701   : > { %9059 = vmatpush1.bf16.msra.mxu0 %v13955_v46  ;;  %v14044_v46 = vld [vmem:[#allocation9 + $0xa4c] ss:$16 sps:$4 sm:$0xff]  }
 0x702   : > { %9102 = vmatpush1.bf16.msra.mxu1 %v13958_v0  ;;  %9060 = vmatprep.subr.bf16.mxu0 %v13963_v15  ;;  %v14039_v0 = vld [vmem:[#allocation9 + $0xa40] ss:$16 sps:$4 sm:$0xff]   ;;  %v14042_v15 = vld [vmem:[#allocation9 + $0xa48] ss:$16 sps:$4 sm:$0xff]  }
 0x703   : > { %9103 = vmatprep.subr.bf16.mxu1 %v13966_v32  ;;  %v14047_v32 = vld [vmem:[#allocation9 + $0xa64] ss:$16 sps:$4 sm:$0xff]  }
 0x705   : > { %9061 = vmatpush1.bf16.msra.mxu0 %v13961_v9  ;;  %v14045_v9 = vld [vmem:[#allocation9 + $0xa60] ss:$16 sps:$4 sm:$0xff]  }
 0x706   : > { %9104 = vmatpush1.bf16.msra.mxu1 %v13964_v29  ;;  %9062 = vmatprep.subr.bf16.mxu0 %v13969_v57  ;;  %v14048_v29 = vld [vmem:[#allocation9 + $0xa68] ss:$16 sps:$4 sm:$0xff]   ;;  %v14053_v57 = vld [vmem:[#allocation9 + $0xa84] ss:$16 sps:$4 sm:$0xff]  }
 0x707   : > { %9105 = vmatprep.subr.bf16.mxu1 %v13972_v4  ;;  %v14056_v4 = vld [vmem:[#allocation9 + $0xa8c] ss:$16 sps:$4 sm:$0xff]  }
 0x709   : > { %9063 = vmatpush1.bf16.msra.mxu0 %v13967_v6  ;;  %v14054_v6 = vld [vmem:[#allocation9 + $0xa88] ss:$16 sps:$4 sm:$0xff]  }
 0x70a   : > { %9106 = vmatpush1.bf16.msra.mxu1 %v13970_v52  ;;  %9064 = vmatprep.subr.bf16.mxu0 %v13975_v38  ;;  %v14059_v52 = vld [vmem:[#allocation9 + $0xaa4] ss:$16 sps:$4 sm:$0xff]   ;;  %v14062_v38 = vld [vmem:[#allocation9 + $0xaac] ss:$16 sps:$4 sm:$0xff]  }
 0x70b   : > { %9107 = vmatprep.subr.bf16.mxu1 %v13978_v30  ;;  %v14057_v30 = vld [vmem:[#allocation9 + $0xaa0] ss:$16 sps:$4 sm:$0xff]  }
 0x70d   : > { %9065 = vmatpush1.bf16.msra.mxu0 %v13973_v45  ;;  %v14060_v45 = vld [vmem:[#allocation9 + $0xaa8] ss:$16 sps:$4 sm:$0xff]  }
 0x70e   : > { %9108 = vmatpush1.bf16.msra.mxu1 %v13976_v51  ;;  %9066 = vmatprep.subr.bf16.mxu0 %v13981_v24  ;;  %v14065_v51 = vld [vmem:[#allocation9 + $0xac4] ss:$16 sps:$4 sm:$0xff]   ;;  %v14068_v24 = vld [vmem:[#allocation9 + $0xacc] ss:$16 sps:$4 sm:$0xff]  }
 0x70f   : > { %9109 = vmatprep.subr.bf16.mxu1 %v13984_v47  ;;  %v14063_v47 = vld [vmem:[#allocation9 + $0xac0] ss:$16 sps:$4 sm:$0xff]  }
 0x711   : > { %9067 = vmatpush1.bf16.msra.mxu0 %v13979_v60  ;;  %v14066_v60 = vld [vmem:[#allocation9 + $0xac8] ss:$16 sps:$4 sm:$0xff]  }
 0x712   : > { %9110 = vmatpush1.bf16.msra.mxu1 %v13982_v17  ;;  %9068 = vmatprep.subr.bf16.mxu0 %v13987_v26  ;;  %v14071_v17 = vld [vmem:[#allocation9 + $0xae4] ss:$16 sps:$4 sm:$0xff]   ;;  %v14074_v26 = vld [vmem:[#allocation9 + $0xaec] ss:$16 sps:$4 sm:$0xff]  }
 0x713   : > { %9111 = vmatprep.subr.bf16.mxu1 %v13990_v27  ;;  %v14069_v27 = vld [vmem:[#allocation9 + $0xae0] ss:$16 sps:$4 sm:$0xff]  }
 0x715   : > { %9069 = vmatpush1.bf16.msra.mxu0 %v13985_v44  ;;  %v14072_v44 = vld [vmem:[#allocation9 + $0xae8] ss:$16 sps:$4 sm:$0xff]  }
 0x716   : > { %9112 = vmatpush1.bf16.msra.mxu1 %v13988_v36  ;;  %9070 = vmatprep.subr.bf16.mxu0 %v13993_v10  ;;  %v14077_v36 = vld [vmem:[#allocation9 + $0xb04] ss:$16 sps:$4 sm:$0xff]   ;;  %v14080_v10 = vld [vmem:[#allocation9 + $0xb0c] ss:$16 sps:$4 sm:$0xff]  }
 0x717   : > { %9113 = vmatprep.subr.bf16.mxu1 %v13996_v53  ;;  %v14075_v53 = vld [vmem:[#allocation9 + $0xb00] ss:$16 sps:$4 sm:$0xff]  }
 0x719   : > { %9071 = vmatpush1.bf16.msra.mxu0 %v13991_v19  ;;  %v14078_v19 = vld [vmem:[#allocation9 + $0xb08] ss:$16 sps:$4 sm:$0xff]  }
 0x71a   : > { %9114 = vmatpush1.bf16.msra.mxu1 %v13994_v28  ;;  %9072 = vmatprep.subr.bf16.mxu0 %v13999_v35  ;;  %v14083_v28 = vld [vmem:[#allocation9 + $0xb24] ss:$16 sps:$4 sm:$0xff]   ;;  %v14086_v35 = vld [vmem:[#allocation9 + $0xb2c] ss:$16 sps:$4 sm:$0xff]  }
 0x71b   : > { %9115 = vmatprep.subr.bf16.mxu1 %v14002_v49  ;;  %v14081_v49 = vld [vmem:[#allocation9 + $0xb20] ss:$16 sps:$4 sm:$0xff]  }
 0x71d   : > { %9073 = vmatpush1.bf16.msra.mxu0 %v13997_v14  ;;  %v14084_v14 = vld [vmem:[#allocation9 + $0xb28] ss:$16 sps:$4 sm:$0xff]  }
 0x71e   : > { %9116 = vmatpush1.bf16.msra.mxu1 %v14000_v39  ;;  %9074 = vmatprep.subr.bf16.mxu0 %v14005_v16  ;;  %v14089_v39 = vld [vmem:[#allocation9 + $0xb44] ss:$16 sps:$4 sm:$0xff]   ;;  %v14092_v16 = vld [vmem:[#allocation9 + $0xb4c] ss:$16 sps:$4 sm:$0xff]  }
 0x71f   : > { %9117 = vmatprep.subr.bf16.mxu1 %v14008_v42  ;;  %v14087_v42 = vld [vmem:[#allocation9 + $0xb40] ss:$16 sps:$4 sm:$0xff]  }
 0x721   : > { %9075 = vmatpush1.bf16.msra.mxu0 %v14003_v61  ;;  %v14090_v61 = vld [vmem:[#allocation9 + $0xb48] ss:$16 sps:$4 sm:$0xff]  }
 0x722   : > { %9118 = vmatpush1.bf16.msra.mxu1 %v14006_v5  ;;  %9076 = vmatprep.subr.bf16.mxu0 %v14011_v13  ;;  %v14095_v5 = vld [vmem:[#allocation9 + $0xb64] ss:$16 sps:$4 sm:$0xff]   ;;  %v14098_v13 = vld [vmem:[#allocation9 + $0xb6c] ss:$16 sps:$4 sm:$0xff]  }
 0x723   : > { %9119 = vmatprep.subr.bf16.mxu1 %v14014_v7  ;;  %v14093_v7 = vld [vmem:[#allocation9 + $0xb60] ss:$16 sps:$4 sm:$0xff]  }
 0x725   : > { %9077 = vmatpush1.bf16.msra.mxu0 %v14009_v3  ;;  %v14096_v3 = vld [vmem:[#allocation9 + $0xb68] ss:$16 sps:$4 sm:$0xff]  }
 0x726   : > { %9120 = vmatpush1.bf16.msra.mxu1 %v14012_v40  ;;  %9078 = vmatprep.subr.bf16.mxu0 %v14017_v1  ;;  %v14101_v40 = vld [vmem:[#allocation9 + $0xb84] ss:$16 sps:$4 sm:$0xff]   ;;  %v14104_v1 = vld [vmem:[#allocation9 + $0xb8c] ss:$16 sps:$4 sm:$0xff]  }
 0x727   : > { %9121 = vmatprep.subr.bf16.mxu1 %v14020_v41  ;;  %v14099_v41 = vld [vmem:[#allocation9 + $0xb80] ss:$16 sps:$4 sm:$0xff]  }
 0x729   : > { %9079 = vmatpush1.bf16.msra.mxu0 %v14015_v43  ;;  %v14102_v43 = vld [vmem:[#allocation9 + $0xb88] ss:$16 sps:$4 sm:$0xff]  }
 0x72a   : > { %9122 = vmatpush1.bf16.msra.mxu1 %v14018_v18  ;;  %9080 = vmatprep.subr.bf16.mxu0 %v14023_v11  ;;  %v14107_v18 = vld [vmem:[#allocation9 + $0xba4] ss:$16 sps:$4 sm:$0xff]   ;;  %v14110_v11 = vld [vmem:[#allocation9 + $0xbac] ss:$16 sps:$4 sm:$0xff]  }
 0x72b   : > { %9123 = vmatprep.subr.bf16.mxu1 %v14026_v58  ;;  %v14105_v58 = vld [vmem:[#allocation9 + $0xba0] ss:$16 sps:$4 sm:$0xff]  }
 0x72d   : > { %9081 = vmatpush1.bf16.msra.mxu0 %v14021_v63  ;;  %v14108_v63 = vld [vmem:[#allocation9 + $0xba8] ss:$16 sps:$4 sm:$0xff]  }
 0x72e   : > { %9124 = vmatpush1.bf16.msra.mxu1 %v14024_v34  ;;  %9529 = vmatprep.subr.bf16.mxu0 %v14029_v25  ;;  %v14113_v34 = vld [vmem:[#allocation9 + $0xbc4] ss:$16 sps:$4 sm:$0xff]   ;;  %v14116_v25 = vld [vmem:[#allocation9 + $0xbcc] ss:$16 sps:$4 sm:$0xff]  }
 0x72f   : > { %9572 = vmatprep.subr.bf16.mxu1 %v14032_v48  ;;  %v14111_v48 = vld [vmem:[#allocation9 + $0xbc0] ss:$16 sps:$4 sm:$0xff]  }
 0x730   : > { %9083 = vmatmul.mubr.bf16.vlgmr.msra.gmra.mrb[168].mxu0 %v17382_v8 }
 0x731   : > { %9126 = vmatmul.mubr.bf16.vlgmr.msra.gmra.mrb[192].mxu1 %v17382_v8  ;;  %9530 = vmatpush1.bf16.msra.mxu0 %v14027_v31  ;;  %v14050_v8 = vld [vmem:[#allocation9 + $0xa6c] ss:$16 sps:$4 sm:$0xff]   ;;  %v14114_v31 = vld [vmem:[#allocation9 + $0xbc8] ss:$16 sps:$4 sm:$0xff]  }
 0x732   : > { %9561 = vmatprep.mubr.bf16.mxu0 %v17418_v37  ;;  %9573 = vmatpush1.bf16.msra.mxu1 %v14030_v33  ;;  %v14119_v33 = vld [vmem:[#allocation9 + $0xbe4] ss:$16 sps:$4 sm:$0xff]  }
 0x733   : > { %9604 = vmatprep.mubr.bf16.mxu1 %v17418_v37  ;;  %9531 = vmatprep.subr.bf16.mxu0 %v14035_v55  ;;  %v14051_v37 = vld [vmem:[#allocation9 + $0xa80] ss:$16 sps:$4 sm:$0xff]   ;;  %v14122_v55 = vld [vmem:[#allocation9 + $0xbec] ss:$16 sps:$4 sm:$0xff]  }
 0x734   : > { %9574 = vmatprep.subr.bf16.mxu1 %v14038_v62  ;;  %v14117_v62 = vld [vmem:[#allocation9 + $0xbe0] ss:$16 sps:$4 sm:$0xff]  }
 0x735   : > { %9532 = vmatpush1.bf16.msra.mxu0 %v14033_v23  ;;  %v14120_v23 = vld [vmem:[#allocation9 + $0xbe8] ss:$16 sps:$4 sm:$0xff]  }
 0x736   : > { %9575 = vmatpush1.bf16.msra.mxu1 %v14036_v20  ;;  %9533 = vmatprep.subr.bf16.mxu0 %v14041_v56  ;;  %v14125_v20 = vld [vmem:[#allocation9 + $0xc04] ss:$16 sps:$4 sm:$0xff]   ;;  %v14128_v56 = vld [vmem:[#allocation9 + $0xc0c] ss:$16 sps:$4 sm:$0xff]  }
 0x737   : > { %9576 = vmatprep.subr.bf16.mxu1 %v14044_v46  ;;  %v14123_v46 = vld [vmem:[#allocation9 + $0xc00] ss:$16 sps:$4 sm:$0xff]  }
 0x739   : > { %9534 = vmatpush1.bf16.msra.mxu0 %v14039_v0  ;;  %v14126_v0 = vld [vmem:[#allocation9 + $0xc08] ss:$16 sps:$4 sm:$0xff]  }
 0x73a   : > { %9577 = vmatpush1.bf16.msra.mxu1 %v14042_v15  ;;  %9535 = vmatprep.subr.bf16.mxu0 %v14047_v32  ;;  %v14131_v15 = vld [vmem:[#allocation9 + $0xc24] ss:$16 sps:$4 sm:$0xff]   ;;  %v14134_v32 = vld [vmem:[#allocation9 + $0xc2c] ss:$16 sps:$4 sm:$0xff]  }
 0x73b   : > { %9578 = vmatprep.subr.bf16.mxu1 %v14050_v8  ;;  %v14129_v8 = vld [vmem:[#allocation9 + $0xc20] ss:$16 sps:$4 sm:$0xff]  }
 0x73d   : > { %9536 = vmatpush1.bf16.msra.mxu0 %v14045_v9  ;;  %v14132_v9 = vld [vmem:[#allocation9 + $0xc28] ss:$16 sps:$4 sm:$0xff]  }
 0x73e   : > { %9579 = vmatpush1.bf16.msra.mxu1 %v14048_v29  ;;  %9537 = vmatprep.subr.bf16.mxu0 %v14053_v57  ;;  %v14137_v29 = vld [vmem:[#allocation9 + $0xc44] ss:$16 sps:$4 sm:$0xff]   ;;  %v14140_v57 = vld [vmem:[#allocation9 + $0xc4c] ss:$16 sps:$4 sm:$0xff]  }
 0x73f   : > { %9580 = vmatprep.subr.bf16.mxu1 %v14056_v4  ;;  %v14135_v4 = vld [vmem:[#allocation9 + $0xc40] ss:$16 sps:$4 sm:$0xff]  }
 0x741   : > { %9538 = vmatpush1.bf16.msra.mxu0 %v14051_v37  ;;  %v14138_v37 = vld [vmem:[#allocation9 + $0xc48] ss:$16 sps:$4 sm:$0xff]  }
 0x742   : > { %9581 = vmatpush1.bf16.msra.mxu1 %v14054_v6  ;;  %9539 = vmatprep.subr.bf16.mxu0 %v14059_v52  ;;  %v14143_v6 = vld [vmem:[#allocation9 + $0xc64] ss:$16 sps:$4 sm:$0xff]   ;;  %v14141_v52 = vld [vmem:[#allocation9 + $0xc60] ss:$16 sps:$4 sm:$0xff]  }
 0x743   : > { %9582 = vmatprep.subr.bf16.mxu1 %v14062_v38  ;;  %v14144_v38 = vld [vmem:[#allocation9 + $0xc68] ss:$16 sps:$4 sm:$0xff]  }
 0x745   : > { %9540 = vmatpush1.bf16.msra.mxu0 %v14057_v30  ;;  %v14149_v30 = vld [vmem:[#allocation9 + $0xc84] ss:$16 sps:$4 sm:$0xff]  }
 0x746   : > { %9583 = vmatpush1.bf16.msra.mxu1 %v14060_v45  ;;  %9541 = vmatprep.subr.bf16.mxu0 %v14065_v51  ;;  %v14152_v45 = vld [vmem:[#allocation9 + $0xc8c] ss:$16 sps:$4 sm:$0xff]   ;;  %v14150_v51 = vld [vmem:[#allocation9 + $0xc88] ss:$16 sps:$4 sm:$0xff]  }
 0x747   : > { %9584 = vmatprep.subr.bf16.mxu1 %v14068_v24  ;;  %v14155_v24 = vld [vmem:[#allocation9 + $0xca4] ss:$16 sps:$4 sm:$0xff]  }
 0x749   : > { %9542 = vmatpush1.bf16.msra.mxu0 %v14063_v47  ;;  %v14158_v47 = vld [vmem:[#allocation9 + $0xcac] ss:$16 sps:$4 sm:$0xff]  }
 0x74a   : > { %9585 = vmatpush1.bf16.msra.mxu1 %v14066_v60  ;;  %9543 = vmatprep.subr.bf16.mxu0 %v14071_v17  ;;  %v14153_v60 = vld [vmem:[#allocation9 + $0xca0] ss:$16 sps:$4 sm:$0xff]   ;;  %v14156_v17 = vld [vmem:[#allocation9 + $0xca8] ss:$16 sps:$4 sm:$0xff]  }
 0x74b   : > { %9586 = vmatprep.subr.bf16.mxu1 %v14074_v26  ;;  %v14161_v26 = vld [vmem:[#allocation9 + $0xcc4] ss:$16 sps:$4 sm:$0xff]  }
 0x74d   : > { %9544 = vmatpush1.bf16.msra.mxu0 %v14069_v27  ;;  %v14164_v27 = vld [vmem:[#allocation9 + $0xccc] ss:$16 sps:$4 sm:$0xff]  }
 0x74e   : > { %9587 = vmatpush1.bf16.msra.mxu1 %v14072_v44  ;;  %9545 = vmatprep.subr.bf16.mxu0 %v14077_v36  ;;  %v14159_v44 = vld [vmem:[#allocation9 + $0xcc0] ss:$16 sps:$4 sm:$0xff]   ;;  %v14162_v36 = vld [vmem:[#allocation9 + $0xcc8] ss:$16 sps:$4 sm:$0xff]  }
 0x74f   : > { %9588 = vmatprep.subr.bf16.mxu1 %v14080_v10  ;;  %v14167_v10 = vld [vmem:[#allocation9 + $0xce4] ss:$16 sps:$4 sm:$0xff]  }
 0x751   : > { %9546 = vmatpush1.bf16.msra.mxu0 %v14075_v53  ;;  %v14170_v53 = vld [vmem:[#allocation9 + $0xcec] ss:$16 sps:$4 sm:$0xff]  }
 0x752   : > { %9589 = vmatpush1.bf16.msra.mxu1 %v14078_v19  ;;  %9547 = vmatprep.subr.bf16.mxu0 %v14083_v28  ;;  %v14165_v19 = vld [vmem:[#allocation9 + $0xce0] ss:$16 sps:$4 sm:$0xff]   ;;  %v14168_v28 = vld [vmem:[#allocation9 + $0xce8] ss:$16 sps:$4 sm:$0xff]  }
 0x753   : > { %9590 = vmatprep.subr.bf16.mxu1 %v14086_v35  ;;  %v14173_v35 = vld [vmem:[#allocation9 + $0xd04] ss:$16 sps:$4 sm:$0xff]  }
 0x755   : > { %9548 = vmatpush1.bf16.msra.mxu0 %v14081_v49  ;;  %v14176_v49 = vld [vmem:[#allocation9 + $0xd0c] ss:$16 sps:$4 sm:$0xff]  }
 0x756   : > { %9591 = vmatpush1.bf16.msra.mxu1 %v14084_v14  ;;  %9549 = vmatprep.subr.bf16.mxu0 %v14089_v39  ;;  %v14171_v14 = vld [vmem:[#allocation9 + $0xd00] ss:$16 sps:$4 sm:$0xff]   ;;  %v14174_v39 = vld [vmem:[#allocation9 + $0xd08] ss:$16 sps:$4 sm:$0xff]  }
 0x757   : > { %9592 = vmatprep.subr.bf16.mxu1 %v14092_v16  ;;  %v14179_v16 = vld [vmem:[#allocation9 + $0xd24] ss:$16 sps:$4 sm:$0xff]  }
 0x759   : > { %9550 = vmatpush1.bf16.msra.mxu0 %v14087_v42  ;;  %v14182_v42 = vld [vmem:[#allocation9 + $0xd2c] ss:$16 sps:$4 sm:$0xff]  }
 0x75a   : > { %9593 = vmatpush1.bf16.msra.mxu1 %v14090_v61  ;;  %9551 = vmatprep.subr.bf16.mxu0 %v14095_v5  ;;  %v14177_v61 = vld [vmem:[#allocation9 + $0xd20] ss:$16 sps:$4 sm:$0xff]   ;;  %v14180_v5 = vld [vmem:[#allocation9 + $0xd28] ss:$16 sps:$4 sm:$0xff]  }
 0x75b   : > { %9594 = vmatprep.subr.bf16.mxu1 %v14098_v13  ;;  %v14185_v13 = vld [vmem:[#allocation9 + $0xd44] ss:$16 sps:$4 sm:$0xff]  }
 0x75d   : > { %9552 = vmatpush1.bf16.msra.mxu0 %v14093_v7  ;;  %v14188_v7 = vld [vmem:[#allocation9 + $0xd4c] ss:$16 sps:$4 sm:$0xff]  }
 0x75e   : > { %9595 = vmatpush1.bf16.msra.mxu1 %v14096_v3  ;;  %9553 = vmatprep.subr.bf16.mxu0 %v14101_v40  ;;  %v14183_v3 = vld [vmem:[#allocation9 + $0xd40] ss:$16 sps:$4 sm:$0xff]   ;;  %v14186_v40 = vld [vmem:[#allocation9 + $0xd48] ss:$16 sps:$4 sm:$0xff]  }
 0x75f   : > { %9596 = vmatprep.subr.bf16.mxu1 %v14104_v1  ;;  %v14191_v1 = vld [vmem:[#allocation9 + $0xd64] ss:$16 sps:$4 sm:$0xff]  }
 0x761   : > { %9554 = vmatpush1.bf16.msra.mxu0 %v14099_v41  ;;  %v14194_v41 = vld [vmem:[#allocation9 + $0xd6c] ss:$16 sps:$4 sm:$0xff]  }
 0x762   : > { %9597 = vmatpush1.bf16.msra.mxu1 %v14102_v43  ;;  %9555 = vmatprep.subr.bf16.mxu0 %v14107_v18  ;;  %v14189_v43 = vld [vmem:[#allocation9 + $0xd60] ss:$16 sps:$4 sm:$0xff]   ;;  %v14192_v18 = vld [vmem:[#allocation9 + $0xd68] ss:$16 sps:$4 sm:$0xff]  }
 0x763   : > { %9598 = vmatprep.subr.bf16.mxu1 %v14110_v11  ;;  %v14197_v11 = vld [vmem:[#allocation9 + $0xd84] ss:$16 sps:$4 sm:$0xff]  }
 0x765   : > { %9556 = vmatpush1.bf16.msra.mxu0 %v14105_v58  ;;  %v14200_v58 = vld [vmem:[#allocation9 + $0xd8c] ss:$16 sps:$4 sm:$0xff]  }
 0x766   : > { %9599 = vmatpush1.bf16.msra.mxu1 %v14108_v63  ;;  %9557 = vmatprep.subr.bf16.mxu0 %v14113_v34  ;;  %v14195_v63 = vld [vmem:[#allocation9 + $0xd80] ss:$16 sps:$4 sm:$0xff]   ;;  %v14198_v34 = vld [vmem:[#allocation9 + $0xd88] ss:$16 sps:$4 sm:$0xff]  }
 0x767   : > { %9600 = vmatprep.subr.bf16.mxu1 %v14116_v25  ;;  %v14203_v25 = vld [vmem:[#allocation9 + $0xda4] ss:$16 sps:$4 sm:$0xff]  }
 0x769   : > { %9558 = vmatpush1.bf16.msra.mxu0 %v14111_v48  ;;  %v14206_v48 = vld [vmem:[#allocation9 + $0xdac] ss:$16 sps:$4 sm:$0xff]  }
 0x76a   : > { %9601 = vmatpush1.bf16.msra.mxu1 %v14114_v31  ;;  %9559 = vmatprep.subr.bf16.mxu0 %v14119_v33  ;;  %v14201_v31 = vld [vmem:[#allocation9 + $0xda0] ss:$16 sps:$4 sm:$0xff]   ;;  %v14204_v33 = vld [vmem:[#allocation9 + $0xda8] ss:$16 sps:$4 sm:$0xff]  }
 0x76b   : > { %9602 = vmatprep.subr.bf16.mxu1 %v14122_v55  ;;  %v14209_v55 = vld [vmem:[#allocation9 + $0xdc4] ss:$16 sps:$4 sm:$0xff]  }
 0x76d   : > { %9560 = vmatpush1.bf16.msra.mxu0 %v14117_v62  ;;  %v14212_v62 = vld [vmem:[#allocation9 + $0xdcc] ss:$16 sps:$4 sm:$0xff]  }
 0x76e   : > { %9603 = vmatpush1.bf16.msra.mxu1 %v14120_v23  ;;  %10008 = vmatprep.subr.bf16.mxu0 %v14125_v20  ;;  %v14207_v23 = vld [vmem:[#allocation9 + $0xdc0] ss:$16 sps:$4 sm:$0xff]   ;;  %v14210_v20 = vld [vmem:[#allocation9 + $0xdc8] ss:$16 sps:$4 sm:$0xff]  }
 0x76f   : > { %10051 = vmatprep.subr.bf16.mxu1 %v14128_v56  ;;  %v14215_v56 = vld [vmem:[#allocation9 + $0xde4] ss:$16 sps:$4 sm:$0xff]  }
 0x770   : > { %9562 = vmatmul.mubr.bf16.vlgmr.msra.gmra.mrb[168].mxu0 %v17411_v59 }
 0x771   : > { %9605 = vmatmul.mubr.bf16.vlgmr.msra.gmra.mrb[192].mxu1 %v17411_v59  ;;  %10009 = vmatpush1.bf16.msra.mxu0 %v14123_v46  ;;  %v14146_v59 = vld [vmem:[#allocation9 + $0xc6c] ss:$16 sps:$4 sm:$0xff]  }
 0x772   : > { %10040 = vmatprep.mubr.bf16.mxu0 %v17430_v21  ;;  %10052 = vmatpush1.bf16.msra.mxu1 %v14126_v0  ;;  %v14218_v46 = vld [vmem:[#allocation9 + $0xdec] ss:$16 sps:$4 sm:$0xff]   ;;  %v14213_v0 = vld [vmem:[#allocation9 + $0xde0] ss:$16 sps:$4 sm:$0xff]  }
 0x773   : > { %10083 = vmatprep.mubr.bf16.mxu1 %v17430_v21  ;;  %10010 = vmatprep.subr.bf16.mxu0 %v14131_v15  ;;  %v14147_v21 = vld [vmem:[#allocation9 + $0xc80] ss:$16 sps:$4 sm:$0xff]   ;;  %v14216_v15 = vld [vmem:[#allocation9 + $0xde8] ss:$16 sps:$4 sm:$0xff]  }
 0x774   : > { %10053 = vmatprep.subr.bf16.mxu1 %v14134_v32  ;;  %v14221_v32 = vld [vmem:[#allocation12 + $0x4] ss:$8 sps:$4 sm:$0xff]  }
 0x775   : > { %10011 = vmatpush1.bf16.msra.mxu0 %v14129_v8  ;;  %v14219_v8 = vld [vmem:[#allocation12] ss:$8 sps:$4 sm:$0xff]  }
 0x776   : > { %10054 = vmatpush1.bf16.msra.mxu1 %v14132_v9  ;;  %10012 = vmatprep.subr.bf16.mxu0 %v14137_v29  ;;  %v14224_v9 = vld [vmem:[#allocation12 + $0x14] ss:$8 sps:$4 sm:$0xff]   ;;  %v14222_v29 = vld [vmem:[#allocation12 + $0x10] ss:$8 sps:$4 sm:$0xff]  }
 0x777   : > { %10055 = vmatprep.subr.bf16.mxu1 %v14140_v57  ;;  %v14227_v57 = vld [vmem:[#allocation12 + $0x24] ss:$8 sps:$4 sm:$0xff]  }
 0x779   : > { %10013 = vmatpush1.bf16.msra.mxu0 %v14135_v4  ;;  %v14225_v4 = vld [vmem:[#allocation12 + $0x20] ss:$8 sps:$4 sm:$0xff]  }
 0x77a   : > { %10056 = vmatpush1.bf16.msra.mxu1 %v14138_v37  ;;  %10014 = vmatprep.subr.bf16.mxu0 %v14143_v6  ;;  %v14230_v37 = vld [vmem:[#allocation12 + $0x34] ss:$8 sps:$4 sm:$0xff]   ;;  %v14228_v6 = vld [vmem:[#allocation12 + $0x30] ss:$8 sps:$4 sm:$0xff]  }
 0x77b   : > { %10057 = vmatprep.subr.bf16.mxu1 %v14146_v59  ;;  %v14233_v59 = vld [vmem:[#allocation12 + $0x44] ss:$8 sps:$4 sm:$0xff]  }
 0x77d   : > { %10015 = vmatpush1.bf16.msra.mxu0 %v14141_v52  ;;  %v14231_v52 = vld [vmem:[#allocation12 + $0x40] ss:$8 sps:$4 sm:$0xff]  }
 0x77e   : > { %10058 = vmatpush1.bf16.msra.mxu1 %v14144_v38  ;;  %10016 = vmatprep.subr.bf16.mxu0 %v14149_v30  ;;  %v14236_v38 = vld [vmem:[#allocation12 + $0x54] ss:$8 sps:$4 sm:$0xff]   ;;  %v14234_v30 = vld [vmem:[#allocation12 + $0x50] ss:$8 sps:$4 sm:$0xff]  }
 0x77f   : > { %10059 = vmatprep.subr.bf16.mxu1 %v14152_v45  ;;  %v14237_v45 = vld [vmem:[#allocation12 + $0x60] ss:$8 sps:$4 sm:$0xff]  }
 0x781   : > { %10017 = vmatpush1.bf16.msra.mxu0 %v14147_v21  ;;  %v14242_v21 = vld [vmem:[#allocation12 + $0x74] ss:$8 sps:$4 sm:$0xff]  }
 0x782   : > { %10060 = vmatpush1.bf16.msra.mxu1 %v14150_v51  ;;  %10018 = vmatprep.subr.bf16.mxu0 %v14155_v24  ;;  %v14240_v51 = vld [vmem:[#allocation12 + $0x70] ss:$8 sps:$4 sm:$0xff]   ;;  %v14245_v24 = vld [vmem:[#allocation12 + $0x84] ss:$8 sps:$4 sm:$0xff]  }
 0x783   : > { %10061 = vmatprep.subr.bf16.mxu1 %v14158_v47  ;;  %v14243_v47 = vld [vmem:[#allocation12 + $0x80] ss:$8 sps:$4 sm:$0xff]  }
 0x785   : > { %10019 = vmatpush1.bf16.msra.mxu0 %v14153_v60  ;;  %v14248_v60 = vld [vmem:[#allocation12 + $0x94] ss:$8 sps:$4 sm:$0xff]  }
 0x786   : > { %10062 = vmatpush1.bf16.msra.mxu1 %v14156_v17  ;;  %10020 = vmatprep.subr.bf16.mxu0 %v14161_v26  ;;  %v14246_v17 = vld [vmem:[#allocation12 + $0x90] ss:$8 sps:$4 sm:$0xff]   ;;  %v14251_v26 = vld [vmem:[#allocation12 + $0xa4] ss:$8 sps:$4 sm:$0xff]  }
 0x787   : > { %10063 = vmatprep.subr.bf16.mxu1 %v14164_v27  ;;  %v14249_v27 = vld [vmem:[#allocation12 + $0xa0] ss:$8 sps:$4 sm:$0xff]  }
 0x789   : > { %10021 = vmatpush1.bf16.msra.mxu0 %v14159_v44  ;;  %v14254_v44 = vld [vmem:[#allocation12 + $0xb4] ss:$8 sps:$4 sm:$0xff]  }
 0x78a   : > { %10064 = vmatpush1.bf16.msra.mxu1 %v14162_v36  ;;  %10022 = vmatprep.subr.bf16.mxu0 %v14167_v10  ;;  %v14252_v36 = vld [vmem:[#allocation12 + $0xb0] ss:$8 sps:$4 sm:$0xff]   ;;  %v14257_v10 = vld [vmem:[#allocation12 + $0xc4] ss:$8 sps:$4 sm:$0xff]  }
 0x78b   : > { %10065 = vmatprep.subr.bf16.mxu1 %v14170_v53  ;;  %v14255_v53 = vld [vmem:[#allocation12 + $0xc0] ss:$8 sps:$4 sm:$0xff]  }
 0x78d   : > { %10023 = vmatpush1.bf16.msra.mxu0 %v14165_v19  ;;  %v14260_v19 = vld [vmem:[#allocation12 + $0xd4] ss:$8 sps:$4 sm:$0xff]  }
 0x78e   : > { %10066 = vmatpush1.bf16.msra.mxu1 %v14168_v28  ;;  %10024 = vmatprep.subr.bf16.mxu0 %v14173_v35  ;;  %v14258_v28 = vld [vmem:[#allocation12 + $0xd0] ss:$8 sps:$4 sm:$0xff]   ;;  %v14263_v35 = vld [vmem:[#allocation12 + $0xe4] ss:$8 sps:$4 sm:$0xff]  }
 0x78f   : > { %10067 = vmatprep.subr.bf16.mxu1 %v14176_v49  ;;  %v14261_v49 = vld [vmem:[#allocation12 + $0xe0] ss:$8 sps:$4 sm:$0xff]  }
 0x791   : > { %10025 = vmatpush1.bf16.msra.mxu0 %v14171_v14  ;;  %v14266_v14 = vld [vmem:[#allocation12 + $0xf4] ss:$8 sps:$4 sm:$0xff]  }
 0x792   : > { %10068 = vmatpush1.bf16.msra.mxu1 %v14174_v39  ;;  %10026 = vmatprep.subr.bf16.mxu0 %v14179_v16  ;;  %v14264_v39 = vld [vmem:[#allocation12 + $0xf0] ss:$8 sps:$4 sm:$0xff]   ;;  %v14269_v16 = vld [vmem:[#allocation12 + $0x104] ss:$8 sps:$4 sm:$0xff]  }
 0x793   : > { %10069 = vmatprep.subr.bf16.mxu1 %v14182_v42  ;;  %v14315_v42 = vld [vmem:[#allocation15 + $0x40] sm:$0xff]  }
 0x795   : > { %10027 = vmatpush1.bf16.msra.mxu0 %v14177_v61  ;;  %v14316_v61 = vld [vmem:[#allocation15] sm:$0xff]  }
 0x796   : > { %10070 = vmatpush1.bf16.msra.mxu1 %v14180_v5  ;;  %10028 = vmatprep.subr.bf16.mxu0 %v14185_v13  ;;  %v14317_v5 = vld [vmem:[#allocation15 + $0x48] sm:$0xff]  }
 0x797   : > { %10071 = vmatprep.subr.bf16.mxu1 %v14188_v7  ;;  %v14318_v13 = vld [vmem:[#allocation15 + $0x8] sm:$0xff]   ;;  %v14319_v7 = vld [vmem:[#allocation15 + $0x50] sm:$0xff]  }
 0x799   : > { %10029 = vmatpush1.bf16.msra.mxu0 %v14183_v3  ;;  %v14320_v3 = vld [vmem:[#allocation15 + $0x10] sm:$0xff]  }
 0x79a   : > { %10072 = vmatpush1.bf16.msra.mxu1 %v14186_v40  ;;  %10030 = vmatprep.subr.bf16.mxu0 %v14191_v1  ;;  %v14321_v40 = vld [vmem:[#allocation15 + $0x58] sm:$0xff]  }
 0x79b   : > { %10073 = vmatprep.subr.bf16.mxu1 %v14194_v41  ;;  %v14322_v1 = vld [vmem:[#allocation15 + $0x18] sm:$0xff]   ;;  %v14323_v41 = vld [vmem:[#allocation15 + $0x60] sm:$0xff]  }
 0x79d   : > { %10031 = vmatpush1.bf16.msra.mxu0 %v14189_v43  ;;  %v14324_v43 = vld [vmem:[#allocation15 + $0x20] sm:$0xff]  }
 0x79e   : > { %10074 = vmatpush1.bf16.msra.mxu1 %v14192_v18  ;;  %10032 = vmatprep.subr.bf16.mxu0 %v14197_v11  ;;  %v14325_v18 = vld [vmem:[#allocation15 + $0x68] sm:$0xff]   ;;  %v6728_v11 = vld [vmem:[#allocation11] sm:$0xf] }
 0x79f   : > { %10075 = vmatprep.subr.bf16.mxu1 %v14200_v58  ;;  %v7203_v58 = vrot.slane %v6728_v11, %v17686_v50 }
 0x7a1   : > { %10033 = vmatpush1.bf16.msra.mxu0 %v14195_v63  ;;  %v7211_v63 = vrot.slane %v6728_v11, %v17687_v2 }
 0x7a2   : > { %10076 = vmatpush1.bf16.msra.mxu1 %v14198_v34  ;;  %10034 = vmatprep.subr.bf16.mxu0 %v14203_v25  ;;  %v7207_v34 = vrot.slane %v6728_v11, %v17688_v22  ;;  %v7215_v25 = vrot.slane %v6728_v11, %v17689_v12  ;;  %v14314_v11 = vld [vmem:[#allocation12 + $0x1f4] ss:$8 sps:$4 sm:$0xff]  }
 0x7a3   : > { %10077 = vmatprep.subr.bf16.mxu1 %v14206_v48 }
 0x7a5   : > { %10035 = vmatpush1.bf16.msra.mxu0 %v14201_v31 }
 0x7a6   : > { %10078 = vmatpush1.bf16.msra.mxu1 %v14204_v33  ;;  %10036 = vmatprep.subr.bf16.mxu0 %v14209_v55 }
 0x7a7   : > { %10079 = vmatprep.subr.bf16.mxu1 %v14212_v62 }
 0x7a9   : > { %10037 = vmatpush1.bf16.msra.mxu0 %v14207_v23 }
 0x7aa   : > { %10080 = vmatpush1.bf16.msra.mxu1 %v14210_v20  ;;  %10038 = vmatprep.subr.bf16.mxu0 %v14215_v56 }
 0x7ab   : > { %10081 = vmatprep.subr.bf16.mxu1 %v14218_v46 }
 0x7ad   : > { %10039 = vmatpush1.bf16.msra.mxu0 %v14213_v0 }
 0x7ae   : > { %10082 = vmatpush1.bf16.msra.mxu1 %v14216_v15  ;;  %10510 = vmatprep.subr.bf16.mxu0 %v14221_v32 }
 0x7af   : > { %12001 = vmatprep.subr.bf16.mxu1 %v14315_v42  ;;  %v14294_v42 = vld [vmem:[#allocation12 + $0x190] ss:$8 sps:$4 sm:$0xff]  }
 0x7b0   : > { %10041 = vmatmul.mubr.bf16.vlgmr.msra.gmra.mrb[168].mxu0 %v17428_v54 }
 0x7b1   : > { %10084 = vmatmul.mubr.bf16.vlgmr.msra.gmra.mrb[192].mxu1 %v17428_v54  ;;  %10511 = vmatpush1.bf16.msra.mxu0 %v14219_v8  ;;  %v14239_v54 = vld [vmem:[#allocation12 + $0x64] ss:$8 sps:$4 sm:$0xff]  }
 0x7b2   : > { %10512 = vmatprep.subr.bf16.mxu0 %v14224_v9  ;;  %12002 = vmatpush3.bf16.msra.mxu1 %v14316_v61  ;;  %v14299_v61 = vld [vmem:[#allocation12 + $0x1a4] ss:$8 sps:$4 sm:$0xff]  }
 0x7b3   : > { %12003 = vmatprep.subr.bf16.mxu1 %v14317_v5  ;;  %v14297_v5 = vld [vmem:[#allocation12 + $0x1a0] ss:$8 sps:$4 sm:$0xff]  }
 0x7b5   : > { %10513 = vmatpush1.bf16.msra.mxu0 %v14222_v29 }
 0x7b6   : > { %10514 = vmatprep.subr.bf16.mxu0 %v14227_v57  ;;  %12004 = vmatpush3.bf16.msra.mxu1 %v14318_v13  ;;  %v14302_v13 = vld [vmem:[#allocation12 + $0x1b4] ss:$8 sps:$4 sm:$0xff]  }
 0x7b7   : > { %12005 = vmatprep.subr.bf16.mxu1 %v14319_v7  ;;  %v14300_v7 = vld [vmem:[#allocation12 + $0x1b0] ss:$8 sps:$4 sm:$0xff]  }
 0x7b9   : > { %10515 = vmatpush1.bf16.msra.mxu0 %v14225_v4 }
 0x7ba   : > { %10516 = vmatprep.subr.bf16.mxu0 %v14230_v37  ;;  %12006 = vmatpush3.bf16.msra.mxu1 %v14320_v3  ;;  %v14305_v3 = vld [vmem:[#allocation12 + $0x1c4] ss:$8 sps:$4 sm:$0xff]  }
 0x7bb   : > { %12007 = vmatprep.subr.bf16.mxu1 %v14321_v40  ;;  %v14303_v40 = vld [vmem:[#allocation12 + $0x1c0] ss:$8 sps:$4 sm:$0xff]  }
 0x7bd   : > { %10517 = vmatpush1.bf16.msra.mxu0 %v14228_v6 }
 0x7be   : > { %10518 = vmatprep.subr.bf16.mxu0 %v14233_v59  ;;  %12008 = vmatpush3.bf16.msra.mxu1 %v14322_v1  ;;  %v14308_v1 = vld [vmem:[#allocation12 + $0x1d4] ss:$8 sps:$4 sm:$0xff]  }
 0x7bf   : > { %12009 = vmatprep.subr.bf16.mxu1 %v14323_v41  ;;  %v14306_v41 = vld [vmem:[#allocation12 + $0x1d0] ss:$8 sps:$4 sm:$0xff]  }
 0x7c1   : > { %10519 = vmatpush1.bf16.msra.mxu0 %v14231_v52 }
 0x7c2   : > { %10520 = vmatprep.subr.bf16.mxu0 %v14236_v38  ;;  %12010 = vmatpush3.bf16.msra.mxu1 %v14324_v43  ;;  %v14311_v43 = vld [vmem:[#allocation12 + $0x1e4] ss:$8 sps:$4 sm:$0xff]  }
 0x7c3   : > { %12011 = vmatprep.subr.bf16.mxu1 %v14325_v18  ;;  %v14309_v18 = vld [vmem:[#allocation12 + $0x1e0] ss:$8 sps:$4 sm:$0xff]  }
 0x7c5   : > { %10521 = vmatpush1.bf16.msra.mxu0 %v14234_v30 }
 0x7c6   : > { %10522 = vmatprep.subr.bf16.mxu0 %v14239_v54 }
 0x7c9   : > { %10523 = vmatpush1.bf16.msra.mxu0 %v14237_v45 }
 0x7ca   : > { %10524 = vmatprep.subr.bf16.mxu0 %v14242_v21  ;;  %v14267_v21 = vld [vmem:[#allocation12 + $0x100] ss:$8 sps:$4 sm:$0xff]  }
 0x7cd   : > { %10525 = vmatpush1.bf16.msra.mxu0 %v14240_v51 }
 0x7ce   : > { %10526 = vmatprep.subr.bf16.mxu0 %v14245_v24  ;;  %v14272_v24 = vld [vmem:[#allocation12 + $0x114] ss:$8 sps:$4 sm:$0xff]  }
 0x7d1   : > { %10527 = vmatpush1.bf16.msra.mxu0 %v14243_v47  ;;  %v14270_v47 = vld [vmem:[#allocation12 + $0x110] ss:$8 sps:$4 sm:$0xff]  }
 0x7d2   : > { %10528 = vmatprep.subr.bf16.mxu0 %v14248_v60  ;;  %v14275_v60 = vld [vmem:[#allocation12 + $0x124] ss:$8 sps:$4 sm:$0xff]  }
 0x7d5   : > { %10529 = vmatpush1.bf16.msra.mxu0 %v14246_v17  ;;  %v14273_v17 = vld [vmem:[#allocation12 + $0x120] ss:$8 sps:$4 sm:$0xff]  }
 0x7d6   : > { %10530 = vmatprep.subr.bf16.mxu0 %v14251_v26  ;;  %v14278_v26 = vld [vmem:[#allocation12 + $0x134] ss:$8 sps:$4 sm:$0xff]  }
 0x7d9   : > { %10531 = vmatpush1.bf16.msra.mxu0 %v14249_v27  ;;  %v14276_v27 = vld [vmem:[#allocation12 + $0x130] ss:$8 sps:$4 sm:$0xff]  }
 0x7da   : > { %10532 = vmatprep.subr.bf16.mxu0 %v14254_v44  ;;  %v14281_v44 = vld [vmem:[#allocation12 + $0x144] ss:$8 sps:$4 sm:$0xff]  }
 0x7dd   : > { %10533 = vmatpush1.bf16.msra.mxu0 %v14252_v36  ;;  %v14279_v36 = vld [vmem:[#allocation12 + $0x140] ss:$8 sps:$4 sm:$0xff]  }
 0x7de   : > { %10534 = vmatprep.subr.bf16.mxu0 %v14257_v10  ;;  %v14284_v10 = vld [vmem:[#allocation12 + $0x154] ss:$8 sps:$4 sm:$0xff]  }
 0x7e1   : > { %10535 = vmatpush1.bf16.msra.mxu0 %v14255_v53  ;;  %v14282_v53 = vld [vmem:[#allocation12 + $0x150] ss:$8 sps:$4 sm:$0xff]  }
 0x7e2   : > { %10536 = vmatprep.subr.bf16.mxu0 %v14260_v19  ;;  %v14287_v19 = vld [vmem:[#allocation12 + $0x164] ss:$8 sps:$4 sm:$0xff]  }
 0x7e5   : > { %10537 = vmatpush1.bf16.msra.mxu0 %v14258_v28  ;;  %v14285_v28 = vld [vmem:[#allocation12 + $0x160] ss:$8 sps:$4 sm:$0xff]  }
 0x7e6   : > { %10538 = vmatprep.subr.bf16.mxu0 %v14263_v35  ;;  %v14290_v35 = vld [vmem:[#allocation12 + $0x174] ss:$8 sps:$4 sm:$0xff]  }
 0x7e9   : > { %10539 = vmatpush1.bf16.msra.mxu0 %v14261_v49  ;;  %v14288_v49 = vld [vmem:[#allocation12 + $0x170] ss:$8 sps:$4 sm:$0xff]  }
 0x7ea   : > { %10540 = vmatprep.subr.bf16.mxu0 %v14266_v14  ;;  %v14293_v14 = vld [vmem:[#allocation12 + $0x184] ss:$8 sps:$4 sm:$0xff]  }
 0x7ed   : > { %10541 = vmatpush1.bf16.msra.mxu0 %v14264_v39  ;;  %v14291_v39 = vld [vmem:[#allocation12 + $0x180] ss:$8 sps:$4 sm:$0xff]  }
 0x7ee   : > { %10553 = vmatprep.subr.bf16.mxu0 %v14269_v16  ;;  %v14296_v16 = vld [vmem:[#allocation12 + $0x194] ss:$8 sps:$4 sm:$0xff]  }
 0x883   : > { %v10042_v48 = vpop.f32.mrb[168].mxu0 }
 0x884   : > { %v12387_v31 = vadd.f32 %v10042_v48, %v7203_v58  ;;  %v10085_v33 = vpop.f32.mrb[192].mxu1  ;;  %v10044_v55 = vpop.f32.mrb[169].mxu0  ;;  %v14329_v48 = vld [vmem:[#allocation15 + $0x78] sm:$0xff]  }
 0x885   : > { %v12391_v62 = vadd.f32 %v10085_v33, %v7211_v63  ;;  %v12388_v23 = vadd.f32 %v10044_v55, %v7207_v34  ;;  %v10087_v20 = vpop.f32.mrb[193].mxu1  ;;  %v10046_v56 = vpop.f32.mrb[170].mxu0  ;;  %v10178_v33 = vld [vmem:[#allocation14] sm:$0x3] }
 0x886   : > { %v12392_v46 = vadd.f32 %v10087_v20, %v7215_v25  ;;  %v12389_v0 = vadd.f32 %v10046_v56, %v7203_v58  ;;  %v10089_v15 = vpop.f32.mrb[194].mxu1  ;;  %v10048_v32 = vpop.f32.mrb[171].mxu0  ;;  %v10102_v2 = vmax.f32 %v12387_v31, 0.0  ;;  %v14312_v58 = vld [vmem:[#allocation12 + $0x1f0] ss:$8 sps:$4 sm:$0xff]   ;;  %v10183_v55 = vrot.slane %v10178_v33, %v17686_v50 }
 0x887   : > { %v12393_v8 = vadd.f32 %v10089_v15, %v7211_v63  ;;  %v12390_v9 = vadd.f32 %v10048_v32, %v7207_v34  ;;  %v10091_v29 = vpop.f32.mrb[195].mxu1  ;;  %v10104_v37 = vmax.f32 %v12391_v62, 0.0  ;;  %v10103_v12 = vmax.f32 %v12388_v23, 0.0  ;;  %v14326_v63 = vld [vmem:[#allocation15 + $0x28] sm:$0xff]   ;;  %v14327_v34 = vld [vmem:[#allocation15 + $0x70] sm:$0xff]   ;;  %v14330_v31 = vld [vmem:[#allocation15 + $0x38] sm:$0xff]  }
 0x888   : > { %v10106_v57 = vmax.f32 %v12389_v0, 0.0  ;;  %v12394_v4 = vadd.f32 %v10091_v29, %v7215_v25  ;;  %v10105_v52 = vmax.f32 %v12392_v46, 0.0  ;;  %12012 = vmatpush3.bf16.msra.mxu1 %v14326_v63  ;;  %v14328_v25 = vld [vmem:[#allocation15 + $0x30] sm:$0xff]   ;;  %v10187_v62 = vrot.slane %v10178_v33, %v17688_v22  ;;  %v11981_v22 = vld [vmem:[#allocation17] ss:$0 sm:$0xff] }
 0x889   : > { %v10108_v6 = vmax.f32 %v12393_v8, 0.0  ;;  %v10107_v59 = vmax.f32 %v12390_v9, 0.0  ;;  %12013 = vmatprep.subr.bf16.mxu1 %v14327_v34 }
 0x88a   : > { %v10110_v38 = vpack.c.bf16 %v10106_v57, %v10102_v2  ;;  %v10109_v30 = vmax.f32 %v12394_v4, 0.0 }
 0x88b   : > { %v17454_v54 = vpack.c.bf16 %v10108_v6, %v10104_v37  ;;  %v10111_v45 = vpack.c.bf16 %v10107_v59, %v10103_v12 }
 0x88c   : > { %v10113_v51 = vpack.c.bf16 %v10109_v30, %v10105_v52  ;;  %12014 = vmatpush3.bf16.msra.mxu1 %v14328_v25 }
 0x88d   : > { %10542 = vmatprep.mubr.bf16.mxu0 %v10111_v45  ;;  %12015 = vmatprep.subr.bf16.mxu1 %v14329_v48 }
 0x88e   : > { %10543 = vmatmul.mubr.bf16.vlgmr.msra.gmra.mrb[172].mxu0 %v10110_v38 }
 0x88f   : > { %10554 = vmatpush1.bf16.msra.mxu0 %v14267_v21  ;;  %10585 = vmatprep.mubr.bf16.mxu0 %v10113_v51 }
 0x890   : > { %10555 = vmatprep.subr.bf16.mxu0 %v14272_v24  ;;  %12016 = vmatpush3.bf16.msra.mxu1 %v14330_v31 }
 0x893   : > { %10556 = vmatpush1.bf16.msra.mxu0 %v14270_v47 }
 0x894   : > { %10557 = vmatprep.subr.bf16.mxu0 %v14275_v60 }
 0x897   : > { %10558 = vmatpush1.bf16.msra.mxu0 %v14273_v17 }
 0x898   : > { %10559 = vmatprep.subr.bf16.mxu0 %v14278_v26 }
 0x89b   : > { %10560 = vmatpush1.bf16.msra.mxu0 %v14276_v27 }
 0x89c   : > { %10561 = vmatprep.subr.bf16.mxu0 %v14281_v44 }
 0x89f   : > { %10562 = vmatpush1.bf16.msra.mxu0 %v14279_v36 }
 0x8a0   : > { %10563 = vmatprep.subr.bf16.mxu0 %v14284_v10 }
 0x8a3   : > { %10564 = vmatpush1.bf16.msra.mxu0 %v14282_v53 }
 0x8a4   : > { %10565 = vmatprep.subr.bf16.mxu0 %v14287_v19 }
 0x8a7   : > { %10566 = vmatpush1.bf16.msra.mxu0 %v14285_v28 }
 0x8a8   : > { %10567 = vmatprep.subr.bf16.mxu0 %v14290_v35 }
 0x8ab   : > { %10568 = vmatpush1.bf16.msra.mxu0 %v14288_v49 }
 0x8ac   : > { %10569 = vmatprep.subr.bf16.mxu0 %v14293_v14 }
 0x8af   : > { %10570 = vmatpush1.bf16.msra.mxu0 %v14291_v39 }
 0x8b0   : > { %10571 = vmatprep.subr.bf16.mxu0 %v14296_v16 }
 0x8b3   : > { %10572 = vmatpush1.bf16.msra.mxu0 %v14294_v42 }
 0x8b4   : > { %10573 = vmatprep.subr.bf16.mxu0 %v14299_v61 }
 0x8b7   : > { %10574 = vmatpush1.bf16.msra.mxu0 %v14297_v5 }
 0x8b8   : > { %10575 = vmatprep.subr.bf16.mxu0 %v14302_v13 }
 0x8bb   : > { %10576 = vmatpush1.bf16.msra.mxu0 %v14300_v7 }
 0x8bc   : > { %10577 = vmatprep.subr.bf16.mxu0 %v14305_v3 }
 0x8bf   : > { %10578 = vmatpush1.bf16.msra.mxu0 %v14303_v40 }
 0x8c0   : > { %10579 = vmatprep.subr.bf16.mxu0 %v14308_v1 }
 0x8c3   : > { %10580 = vmatpush1.bf16.msra.mxu0 %v14306_v41 }
 0x8c4   : > { %10581 = vmatprep.subr.bf16.mxu0 %v14311_v43 }
 0x8c7   : > { %10582 = vmatpush1.bf16.msra.mxu0 %v14309_v18 }
 0x8c8   : > { %10583 = vmatprep.subr.bf16.mxu0 %v14314_v11 }
 0x8cb   : > { %10584 = vmatpush1.bf16.msra.mxu0 %v14312_v58 }
 0x8ce   : > { %10586 = vmatmul.mubr.bf16.vlgmr.msra.gmra.mrb[172].mxu0 %v17454_v54 }
 0x9a1   : > { %v10587_v23 = vpop.f32.mrb[172].mxu0 }
 0x9a2   : > { %v12395_v20 = vadd.f32 %v10587_v23, %v10183_v55  ;;  %v10589_v56 = vpop.f32.mrb[173].mxu0 }
 0x9a3   : > { %v12396_v46 = vadd.f32 %v10589_v56, %v10187_v62  ;;  %v10591_v0 = vpop.f32.mrb[174].mxu0 }
 0x9a4   : > { %v12397_v15 = vadd.f32 %v10591_v0, %v10183_v55  ;;  %v10593_v32 = vpop.f32.mrb[175].mxu0  ;;  %v10596_v9 = vmax.f32 %v12395_v20, 0.0 }
 0x9a5   : > { %v12398_v8 = vadd.f32 %v10593_v32, %v10187_v62  ;;  %v10597_v2 = vmax.f32 %v12396_v46, 0.0 }
 0x9a6   : > { %v10598_v29 = vmax.f32 %v12397_v15, 0.0 }
 0x9a7   : > { %v10599_v57 = vmax.f32 %v12398_v8, 0.0 }
 0x9a8   : > { %v10600_v4 = vpack.c.bf16 %v10598_v29, %v10596_v9 }
 0x9a9   : > { %v10601_v37 = vpack.c.bf16 %v10599_v57, %v10597_v2 }
 0x9ab   : > { %10769 = vmatprep.mubr.bf16.mxu1 %v10601_v37 }
 0x9ac   : > { %10770 = vmatmul.mubr.bf16.vlgmr.msra.gmra.mrb[196].mxu1 %v10600_v4 }
 0xa7f   : > { %v12017_v50 = vpop.f32.mrb[196].mxu1 }
 0xa80   : > { %v12018_v12 = vpop.f32.mrb[197].mxu1 }
 0xa81   : > { %v12019_v6 = vadd.f32 %v12018_v12, %v12017_v50  ;;  %v12020_v59 = vpop.f32.mrb[198].mxu1 }
 0xa82   : > { %v12021_v52 = vpop.f32.mrb[199].mxu1 }
 0xa83   : > { %v10772_v38 = vadd.f32 %v12019_v6, %v11981_v22  ;;  %v12022_v30 = vadd.f32 %v12021_v52, %v12020_v59 }
 0xa85   : > { %10778 = vst [vmem:[%s779_s23] sm:$0xff] %v10772_v38  ;;  %v10775_v54 = vadd.f32 %v12022_v30, %v11981_v22 }
 0xa87   : > { %10779 = vst [vmem:[%s779_s23 + $0x8] sm:$0xff] %v10775_v54 }
 0xa88 PF: > { %s17692_s19 = sld [smem:[#allocation23_spill]]  ;;  %s17693_s25 = sld [smem:[#allocation24_spill]] }
 0xa89   : > { %s17694_s17 = smov %s14621_s18 }
 0xa8e   : > { %p23_p4 = scmp.ge.s32.totalorder %s17692_s19, 4   ;;  %s17695_s18 = smov %s17693_s25 }
 0xa90   :  { %25 = sbr.rel (!%p23_p4) target bundleno = 10 (0xa), region = 187 }
 0xa97   :  { %10802 = vsyncpa [#allocation5], 1 }
 0xa98   :  { %10804 = vsyncpa [#allocation5 + $0x1], 1 }
 0xa99   :  { %10805 = vsyncpa [#allocation7], 1 }
 0xa9a   :  { %10806 = vsyncpa [#allocation10], 1 }
 0xa9b   :  { %10807 = vsyncpa [#allocation13], 1 }
 0xa9c   :  { %10808 = vsyncpa [#allocation16], 1 }

</bundles_post_ra>
